<compile_context>
chip_gen: v5e
topology: v5e:2x2
jax: 0.10.0
libtpu: 0.0.40
codegen_flags: <defaults>
</compile_context>

<pallas_src>
import functools

import jax
import jax.numpy as jnp
from jax.experimental import pallas as pl
from jax.experimental.pallas import tpu as pltpu

# Above the 16/32 MiB scoped defaults, below v7x's 64 MiB physical VMEM.
_VMEM_LIMIT = 40 * 1024 * 1024


def _pick_tile_m(m, target):
    """Largest tile <= target that divides m and keeps blocks (8,128)-legal."""
    t = min(target, m)
    while t > 0:
        if m % t == 0 and (t % 8 == 0 or t == m):
            return t
        t -= 1
    return m


# ----------------------------------------------------------------------------
# Kernel 1: tiled matmul (+bias) with fused ReLU / BN-statistics epilogue
# ----------------------------------------------------------------------------

def _mm_kernel_single_k(*refs, has_bias, relu_in, relu_out, want_stats):
    i = 0
    a_ref = refs[i]; i += 1
    b_ref = refs[i]; i += 1
    bias_ref = None
    if has_bias:
        bias_ref = refs[i]; i += 1
    out_ref = refs[i]; i += 1
    psum_ref = psq_ref = None
    if want_stats:
        psum_ref, psq_ref = refs[i], refs[i + 1]

    a = a_ref[...]
    if relu_in:
        a = jnp.maximum(a, jnp.zeros_like(a))
    y = jnp.dot(a, b_ref[...], preferred_element_type=jnp.float32)
    if has_bias:
        y = y + bias_ref[...]
    if relu_out:
        y = jnp.maximum(y, 0.0)
    out_ref[...] = y.astype(out_ref.dtype)
    if want_stats:
        psum_ref[...] = jnp.sum(y, axis=0, keepdims=True)[None]
        psq_ref[...] = jnp.sum(y * y, axis=0, keepdims=True)[None]


def _mm_kernel_multi_k(*refs, has_bias, relu_in, relu_out, want_stats):
    i = 0
    a_ref = refs[i]; i += 1
    b_ref = refs[i]; i += 1
    bias_ref = None
    if has_bias:
        bias_ref = refs[i]; i += 1
    out_ref = refs[i]; i += 1
    psum_ref = psq_ref = None
    if want_stats:
        psum_ref, psq_ref = refs[i], refs[i + 1]
    acc_ref = refs[-1]

    k = pl.program_id(1)

    @pl.when(k == 0)
    def _():
        acc_ref[...] = jnp.zeros_like(acc_ref)

    a = a_ref[...]
    if relu_in:
        a = jnp.maximum(a, jnp.zeros_like(a))
    acc_ref[...] += jnp.dot(a, b_ref[...], preferred_element_type=jnp.float32)

    @pl.when(k == pl.num_programs(1) - 1)
    def _():
        y = acc_ref[...]
        if has_bias:
            y = y + bias_ref[...]
        if relu_out:
            y = jnp.maximum(y, 0.0)
        out_ref[...] = y.astype(out_ref.dtype)
        if want_stats:
            psum_ref[...] = jnp.sum(y, axis=0, keepdims=True)[None]
            psq_ref[...] = jnp.sum(y * y, axis=0, keepdims=True)[None]


def pallas_matmul_bias(a, b, bias=None, *, relu_in=False, relu_out=False,
                       want_stats=False, tm_target=1024,
                       out_dtype=jnp.bfloat16):
    """a:[M,K] @ b:[K,C] (+bias) with fused ReLU / BN partial statistics.

    bf16 MXU inputs, f32 accumulation, bf16 activation output by default.
    Returns (out [M,C], (psum, psq) per-M-tile column stats or None).
    """
    M, K = a.shape
    _, C = b.shape

    a = a.astype(jnp.bfloat16)
    b = b.astype(jnp.bfloat16)
    has_bias = bias is not None

    tm = _pick_tile_m(M, tm_target)        # divides M -> never a ragged tile
    nmi = M // tm

    # Single full-depth K block for every layer of this model (K <= 3456 for
    # the 512x512 config); only huge K falls back to 512-wide accumulation.
    single_k = K <= 4096

    if single_k:
        in_arrays = [a, b]
        in_specs = [pl.BlockSpec((tm, K), lambda i: (i, 0)),
                    pl.BlockSpec((K, C), lambda i: (0, 0))]
        if has_bias:
            in_arrays.append(bias.reshape(1, C).astype(jnp.float32))
            in_specs.append(pl.BlockSpec((1, C), lambda i: (0, 0)))
        out_shapes = [jax.ShapeDtypeStruct((M, C), out_dtype)]
        out_specs = [pl.BlockSpec((tm, C), lambda i: (i, 0))]
        if want_stats:
            out_shapes += [jax.ShapeDtypeStruct((nmi, 1, C), jnp.float32)] * 2
            out_specs += [pl.BlockSpec((1, 1, C), lambda i: (i, 0, 0))] * 2
        kernel = functools.partial(_mm_kernel_single_k, has_bias=has_bias,
                                   relu_in=relu_in, relu_out=relu_out,
                                   want_stats=want_stats)
        res = pl.pallas_call(
            kernel,
            out_shape=out_shapes,
            grid=(nmi,),
            in_specs=in_specs,
            out_specs=out_specs,
            compiler_params=pltpu.CompilerParams(
                dimension_semantics=("parallel",),
                vmem_limit_bytes=_VMEM_LIMIT),
        )(*in_arrays)
    else:
        tk = 512
        pad = (-K) % tk
        if pad:
            a = jnp.pad(a, ((0, 0), (0, pad)))
            b = jnp.pad(b, ((0, pad), (0, 0)))
        K += pad
        nki = K // tk
        in_arrays = [a, b]
        in_specs = [pl.BlockSpec((tm, tk), lambda i, k: (i, k)),
                    pl.BlockSpec((tk, C), lambda i, k: (k, 0))]
        if has_bias:
            in_arrays.append(bias.reshape(1, C).astype(jnp.float32))
            in_specs.append(pl.BlockSpec((1, C), lambda i, k: (0, 0)))
        out_shapes = [jax.ShapeDtypeStruct((M, C), out_dtype)]
        out_specs = [pl.BlockSpec((tm, C), lambda i, k: (i, 0))]
        if want_stats:
            out_shapes += [jax.ShapeDtypeStruct((nmi, 1, C), jnp.float32)] * 2
            out_specs += [pl.BlockSpec((1, 1, C), lambda i, k: (i, 0, 0))] * 2
        kernel = functools.partial(_mm_kernel_multi_k, has_bias=has_bias,
                                   relu_in=relu_in, relu_out=relu_out,
                                   want_stats=want_stats)
        res = pl.pallas_call(
            kernel,
            out_shape=out_shapes,
            grid=(nmi, nki),
            in_specs=in_specs,
            out_specs=out_specs,
            scratch_shapes=[pltpu.VMEM((tm, C), jnp.float32)],
            compiler_params=pltpu.CompilerParams(
                dimension_semantics=("parallel", "arbitrary"),
                vmem_limit_bytes=_VMEM_LIMIT),
        )(*in_arrays)

    out = res[0]
    stats = (res[1], res[2]) if want_stats else None
    return out, stats


# ----------------------------------------------------------------------------
# Kernel 2: fused BN-affine (+ReLU) (+ residual adds), lane-dense tiles
# ----------------------------------------------------------------------------

def _affine_kernel(x_ref, scale_ref, shift_ref, *rest, relu, n_res):
    res_refs = rest[:n_res]
    out_ref = rest[n_res]
    y = x_ref[...].astype(jnp.float32) * scale_ref[...] + shift_ref[...]
    if relu:
        y = jnp.maximum(y, 0.0)
    for r in res_refs:
        y = y + r[...].astype(jnp.float32)      # residual adds stay in f32
    out_ref[...] = y.astype(out_ref.dtype)


def pallas_affine(x2d, scale, shift, *, relu, residuals=(),
                  out_dtype=jnp.bfloat16):
    """y = relu?(x*scale + shift) + sum(residuals); per-column scale/shift.

    x2d / residuals: [M, C], scale/shift: [C].  Rows are folded into lanes
    (free, contiguous host reshape) so loads and stores are lane-dense even
    for tiny C; arithmetic in f32, bf16 output by default.
    """
    M, C = x2d.shape
    f = 1
    while C * f < 512 and (M % (f * 2) == 0) and f < 128:
        f *= 2
    Mf, Cf = M // f, C * f

    x2 = x2d.reshape(Mf, Cf).astype(jnp.bfloat16)
    sc = jnp.tile(scale.astype(jnp.float32), f).reshape(1, Cf)
    sh = jnp.tile(shift.astype(jnp.float32), f).reshape(1, Cf)
    res = [r.reshape(Mf, Cf).astype(jnp.bfloat16) for r in residuals]

    # ~1 MiB of bf16 rows per input stream per tile.
    row_target = max(8, (1 << 20) // max(Cf * 2, 1))
    tme = _pick_tile_m(Mf, row_target)

    kernel = functools.partial(_affine_kernel, relu=relu, n_res=len(res))
    out = pl.pallas_call(
        kernel,
        out_shape=jax.ShapeDtypeStruct((Mf, Cf), out_dtype),
        grid=(Mf // tme,),
        in_specs=[pl.BlockSpec((tme, Cf), lambda i: (i, 0)),
                  pl.BlockSpec((1, Cf), lambda i: (0, 0)),
                  pl.BlockSpec((1, Cf), lambda i: (0, 0))]
                 + [pl.BlockSpec((tme, Cf), lambda i: (i, 0)) for _ in res],
        out_specs=pl.BlockSpec((tme, Cf), lambda i: (i, 0)),
        compiler_params=pltpu.CompilerParams(
            dimension_semantics=("parallel",),
            vmem_limit_bytes=_VMEM_LIMIT),
    )(x2, sc, sh, *res)
    return out.reshape(M, C)


# ----------------------------------------------------------------------------
# conv / deconv / batchnorm built on the two kernels (NHWC internally)
# ----------------------------------------------------------------------------

def _im2col_nhwc(x, kh, kw, stride, padding):
    # TODO(synk): for the overlapping 3x3 convs this still materializes the
    #   kh*kw-times activation copy in HBM; intended follow-up is a halo
    #   kernel (pl.ANY input + make_async_copy of tile_rows+kh-1 NHWC rows)
    #   accumulating kh*kw [tm,Cin]x[Cin,Cout] taps in the f32 accumulator.
    #   Kernel==stride convs have no duplication (pure relayout).
    N, H, W, C = x.shape
    xp = jnp.pad(x, ((0, 0), (padding, padding), (padding, padding), (0, 0)))
    Hout = (H + 2 * padding - kh) // stride + 1
    Wout = (W + 2 * padding - kw) // stride + 1
    taps = []
    for dy in range(kh):
        for dx in range(kw):
            taps.append(xp[:, dy:dy + stride * Hout:stride,
                           dx:dx + stride * Wout:stride, :])
    cols = jnp.stack(taps, axis=3)                      # [N,Hout,Wout,kh*kw,C]
    return cols.reshape(N * Hout * Wout, kh * kw * C), Hout, Wout


def conv2d(x, w, b=None, stride=1, padding=0, *, relu_in=False,
           relu_out=False, want_stats=False):
    """NHWC Conv2d.  x:[N,H,W,Cin], w:[Cout,Cin,kh,kw] (PyTorch layout)."""
    N, H, W, Cin = x.shape
    Cout, _, kh, kw = w.shape
    cols, Hout, Wout = _im2col_nhwc(x.astype(jnp.bfloat16), kh, kw, stride,
                                    padding)
    wm = jnp.transpose(w, (2, 3, 1, 0)).reshape(kh * kw * Cin, Cout)
    out2d, stats = pallas_matmul_bias(cols, wm, b, relu_in=relu_in,
                                      relu_out=relu_out, want_stats=want_stats)
    return out2d.reshape(N, Hout, Wout, Cout), stats


def conv_transpose2d_matmul(x, w, *, want_stats=False):
    """Matmul part of ConvTranspose2d with kernel_size == stride.
    x:[N,H,W,Cin], w:[Cin,Cout,k,k].  Returns pre-interleave
    [N*H*W, Cout*k*k] slab (bias dropped: the following BatchNorm cancels it).
    """
    N, H, W, Cin = x.shape
    _, Cout, kh, kw = w.shape
    a = x.astype(jnp.bfloat16).reshape(N * H * W, Cin)
    wm = w.reshape(Cin, Cout * kh * kw)
    out2d, stats = pallas_matmul_bias(a, wm, None, want_stats=want_stats)
    return out2d, stats, (N, H, W, Cout, kh, kw)


def _bn_scale_shift(psum, psq, count, gamma, beta, group=1, eps=1e-5):
    """Per-channel BN (batch statistics) scale/shift from fused partial sums."""
    # TODO(synk): E[x^2]-E[x]^2 in f32 can cancel catastrophically for huge,
    #   low-variance activations; a two-pass / Welford reduction is safer.
    s = jnp.sum(psum, axis=(0, 1))
    ss = jnp.sum(psq, axis=(0, 1))
    if group > 1:                        # deconv slab columns are (Cout, k*k)
        s = s.reshape(-1, group).sum(-1)
        ss = ss.reshape(-1, group).sum(-1)
    mean = s / count
    var = jnp.maximum(ss / count - mean * mean, 0.0)
    inv = gamma * jax.lax.rsqrt(var + eps)
    return inv, beta - mean * inv


def conv_bn_relu(x, p, stride, padding, residuals=()):
    # Conv bias omitted: a per-channel constant is exactly cancelled by the
    # batch-statistics mean subtraction of the following BatchNorm.
    y, (psum, psq) = conv2d(x, p["conv"]["w"], None, stride, padding,
                            want_stats=True)
    N, H, W, C = y.shape
    scale, shift = _bn_scale_shift(psum, psq, N * H * W,
                                   p["bn"]["gamma"], p["bn"]["beta"])
    y2 = pallas_affine(y.reshape(-1, C), scale, shift, relu=True,
                       residuals=[r.reshape(-1, C) for r in residuals])
    return y2.reshape(N, H, W, C)


def deconv_bn_relu(x, p):
    """relu(bn(conv_transpose(x))) with kernel_size == stride.

    BN+ReLU run on the pre-interleave [N*H*W, Cout*k*k] slab (k*k times the
    lane width) and the unavoidable spatial interleave then moves bf16."""
    w = p["conv"]["w"]
    y2d, (psum, psq), (N, H, W, Cout, kh, kw) = conv_transpose2d_matmul(
        x, w, want_stats=True)
    scale, shift = _bn_scale_shift(psum, psq, N * H * W * kh * kw,
                                   p["bn"]["gamma"], p["bn"]["beta"],
                                   group=kh * kw)
    y2 = pallas_affine(y2d, jnp.repeat(scale, kh * kw),
                       jnp.repeat(shift, kh * kw), relu=True)
    # TODO(synk): the (Cout,kh,kw)->spatial interleave is a 6-D XLA transpose;
    #   an in-kernel strided store would avoid this extra pass.
    out = (y2.reshape(N, H, W, Cout, kh, kw)
           .transpose(0, 1, 4, 2, 5, 3)
           .reshape(N, H * kh, W * kw, Cout))
    return out


def resblock(x, p, extra_residuals=()):
    # h = relu(conv1(relu(x)))      (both ReLUs fused into the matmul kernel)
    h, _ = conv2d(x, p["conv1"]["w"], p["conv1"]["b"], 1, 1,
                  relu_in=True, relu_out=True)
    # out = x + bn(conv2(h)) [+ extra residuals fused into the same affine]
    # conv2 bias omitted (cancelled by the BatchNorm mean subtraction).
    h, (psum, psq) = conv2d(h, p["conv2"]["w"], None, 1, 1, want_stats=True)
    N, H, W, C = h.shape
    scale, shift = _bn_scale_shift(psum, psq, N * H * W,
                                   p["bn"]["gamma"], p["bn"]["beta"])
    res = [x.reshape(-1, C)] + [r.reshape(-1, C) for r in extra_residuals]
    y = pallas_affine(h.reshape(-1, C), scale, shift, relu=False,
                      residuals=res)
    return y.reshape(N, H, W, C)


# ----------------------------------------------------------------------------
# Encoder / Decoder / ResNetAE forward
# ----------------------------------------------------------------------------

def encoder_forward(p, x, use_skips=True):
    """x: NHWC."""
    n_levels = len(p["levels"])
    x = conv_bn_relu(x, p["input"], stride=1, padding=1)
    skips = []
    for i, lvl in enumerate(p["levels"]):
        for rb in lvl["res"]:
            x = resblock(x, rb)
        if use_skips:
            ks = 2 ** (n_levels - i)
            skips.append(conv_bn_relu(x, lvl["skip"], stride=ks, padding=0))
        # multi-res skip sum fused into the last level's down-conv BN epilogue
        res = tuple(skips) if (use_skips and i == n_levels - 1) else ()
        x = conv_bn_relu(x, lvl["down"], stride=2, padding=0, residuals=res)
    y, _ = conv2d(x, p["out"]["w"], p["out"]["b"], 1, 1)
    return y


def decoder_forward(p, z, use_skips=True):
    """z: NHWC."""
    z = conv_bn_relu(z, p["input"], stride=1, padding=1)
    z_top = z
    for i, lvl in enumerate(p["levels"]):
        skip = deconv_bn_relu(z_top, lvl["skip"]) if use_skips else None
        z = deconv_bn_relu(z, lvl["up"])
        n_rb = len(lvl["res"])
        for j, rb in enumerate(lvl["res"]):
            # decoder multi-res skip add fused into the last ResBlock's affine
            extra = (skip,) if (use_skips and j == n_rb - 1) else ()
            z = resblock(z, rb, extra_residuals=extra)
        if use_skips and n_rb == 0:        # no resblock epilogue to fuse into
            C = z.shape[-1]
            z = pallas_affine(z.reshape(-1, C), jnp.ones((C,), jnp.float32),
                              jnp.zeros((C,), jnp.float32), relu=False,
                              residuals=[skip.reshape(-1, C)]).reshape(z.shape)
    y, _ = conv2d(z, p["out"]["w"], p["out"]["b"], 1, 1)
    return y


def resnet_ae_forward(params, x_nchw):
    x = jnp.transpose(x_nchw, (0, 2, 3, 1)).astype(jnp.bfloat16)  # NCHW->NHWC
    z1 = encoder_forward(params["enc_rgb_curr"], x[..., 0:3])
    z2 = encoder_forward(params["enc_rgb_next"], x[..., 3:6])
    z3 = encoder_forward(params["enc_scf"], x[..., 6:])
    z = jnp.concatenate([z1, z2, z3], axis=-1)
    y = decoder_forward(params["dec"], z)
    return jnp.transpose(y, (0, 3, 1, 2)).astype(jnp.float32)      # -> NCHW


# ----------------------------------------------------------------------------
# deterministic parameter init (synthetic; no checkpoint loading)
# ----------------------------------------------------------------------------

class KeyGen:
    def __init__(self, seed):
        self._key = jax.random.PRNGKey(seed)

    def __call__(self):
        self._key, sub = jax.random.split(self._key)
        return sub


def init_conv(kg, cin, cout, k):
    return {
        "w": 0.1 * jax.random.normal(kg(), (cout, cin, k, k), jnp.float32),
        "b": 0.01 * jax.random.normal(kg(), (cout,), jnp.float32),
    }


def init_deconv(kg, cin, cout, k):
    return {
        "w": 0.1 * jax.random.normal(kg(), (cin, cout, k, k), jnp.float32),
        "b": 0.01 * jax.random.normal(kg(), (cout,), jnp.float32),
    }


def init_bn(c):
    return {"gamma": jnp.ones((c,), jnp.float32),
            "beta": jnp.zeros((c,), jnp.float32)}


def init_resblock(kg, cin, cout):
    return {
        "conv1": init_conv(kg, cin, cout, 3),
        "conv2": init_conv(kg, cout, cout, 3),
        "bn": init_bn(cout),
    }


def init_encoder(kg, input_ch, n_blocks, n_levels, z_dim):
    max_f = 2 ** (n_levels + 3)
    p = {
        "input": {"conv": init_conv(kg, input_ch, 8, 3), "bn": init_bn(8)},
        "levels": [],
        "out": init_conv(kg, max_f, z_dim, 3),
    }
    for i in range(n_levels):
        nf1, nf2 = 2 ** (i + 3), 2 ** (i + 4)
        ks = 2 ** (n_levels - i)
        p["levels"].append(
            {
                "res": [init_resblock(kg, nf1, nf1) for _ in range(n_blocks)],
                "skip": {"conv": init_conv(kg, nf1, max_f, ks),
                         "bn": init_bn(max_f)},
                "down": {"conv": init_conv(kg, nf1, nf2, 2),
                         "bn": init_bn(nf2)},
            }
        )
    return p


def init_decoder(kg, in_ch, output_channels, n_blocks, n_levels):
    max_f = 2 ** (n_levels + 3)
    p = {
        "input": {"conv": init_conv(kg, in_ch, max_f, 3), "bn": init_bn(max_f)},
        "levels": [],
    }
    nf1 = max_f
    for i in range(n_levels):
        nf0 = 2 ** (n_levels - i + 3)
        nf1 = 2 ** (n_levels - i + 2)
        ks = 2 ** (i + 1)
        p["levels"].append(
            {
                "up": {"conv": init_deconv(kg, nf0, nf1, 2), "bn": init_bn(nf1)},
                "res": [init_resblock(kg, nf1, nf1) for _ in range(n_blocks)],
                "skip": {"conv": init_deconv(kg, max_f, nf1, ks),
                         "bn": init_bn(nf1)},
            }
        )
    p["out"] = init_conv(kg, nf1, output_channels, 3)
    return p


def init_resnet_ae(seed, n_blocks, n_levels, z_dim, output_channels):
    kg = KeyGen(seed)
    return {
        "enc_rgb_curr": init_encoder(kg, 3, n_blocks, n_levels, z_dim),
        "enc_rgb_next": init_encoder(kg, 3, n_blocks, n_levels, z_dim),
        "enc_scf": init_encoder(kg, 12, n_blocks, n_levels, z_dim),
        # decoder input = concat of 3 encodings -> 3 * z_dim channels
        "dec": init_decoder(kg, 3 * z_dim, output_channels, n_blocks, n_levels),
    }


# ----------------------------------------------------------------------------
# main
# ----------------------------------------------------------------------------

if __name__ == "__main__":
    # Small config consistent with the module (defaults 512x512x18 / 4 levels /
    # z_dim=128 scaled down; code is shape-generic).
    N_BLOCKS, N_LEVELS, Z_DIM, OUT_CH = 1, 2, 16, 12
    BATCH, SPATIAL, IN_CH = 2, 16, 18  # 18 = 3 (rgb curr) + 3 (rgb next) + 12

    x = jax.random.normal(jax.random.PRNGKey(0),
                          (BATCH, IN_CH, SPATIAL, SPATIAL), jnp.float32)
    params = init_resnet_ae(seed=1, n_blocks=N_BLOCKS, n_levels=N_LEVELS,
                            z_dim=Z_DIM, output_channels=OUT_CH)

    out = jax.jit(resnet_ae_forward)(params, x)
    out = jax.block_until_ready(out)

    assert out.shape == (BATCH, OUT_CH, SPATIAL, SPATIAL), out.shape
    assert bool(jnp.all(jnp.isfinite(out)))
    print("KERNEL_OK")
</pallas_src>

<mosaic_0001>
module attributes {stable_mosaic.version = 11 : i64} {
  func.func @_mm_kernel_single_k(%arg0: i32, %arg1: memref<512x27xbf16, #tpu.memory_space<vmem>>, %arg2: memref<27x8xbf16, #tpu.memory_space<vmem>>, %arg3: memref<512x8xbf16, #tpu.memory_space<vmem>>, %arg4: memref<1x1x8xf32, #tpu.memory_space<vmem>>, %arg5: memref<1x1x8xf32, #tpu.memory_space<vmem>>) attributes {dimension_semantics = [#tpu.dimension_semantics<parallel>], iteration_bounds = array<i64: 1>, scalar_prefetch = 0 : i64, scratch_operands = 0 : i64, tpu.core_type = #tpu.core_type<tc>, window_params = [{transform_indices = @transform_0, window_bounds = array<i64: 512, 27>}, {pipeline_mode = #tpu.pipeline_mode<synchronous>, transform_indices = @transform_1, window_bounds = array<i64: 27, 8>}, {transform_indices = @transform_2, window_bounds = array<i64: 512, 8>}, {transform_indices = @transform_3, window_bounds = array<i64: 1, 1, 8>}, {transform_indices = @transform_4, window_bounds = array<i64: 1, 1, 8>}]} {
    %c0 = arith.constant 0 : index
    %c0_0 = arith.constant 0 : index
    %0 = vector.load %arg1[%c0, %c0_0] : memref<512x27xbf16, #tpu.memory_space<vmem>>, vector<512x27xbf16>
    %c0_1 = arith.constant 0 : index
    %c0_2 = arith.constant 0 : index
    %1 = vector.load %arg2[%c0_1, %c0_2] : memref<27x8xbf16, #tpu.memory_space<vmem>>, vector<27x8xbf16>
    %cst = arith.constant dense<0.000000e+00> : vector<512x8xf32>
    %2 = tpu.matmul %0, %1, %cst {dimension_numbers = #tpu.dot_dimension_numbers<[1], [0], [0], [1], [0, 0, 1, 1], [], []>} : vector<512x27xbf16>, vector<27x8xbf16>, vector<512x8xf32> -> vector<512x8xf32>
    %3 = arith.truncf %2 : vector<512x8xf32> to vector<512x8xbf16>
    %c0_3 = arith.constant 0 : index
    %c0_4 = arith.constant 0 : index
    %4 = vector.load %arg3[%c0_3, %c0_4] : memref<512x8xbf16, #tpu.memory_space<vmem>>, vector<512x8xbf16>
    tpu.vector_store %arg3[%c0_3, %c0_4], %3 {strides = array<i32>} : memref<512x8xbf16, #tpu.memory_space<vmem>>, vector<512x8xbf16>,
    %cst_5 = arith.constant dense<0.000000e+00> : vector<8xf32>
    %5 = vector.multi_reduction <add>, %2, %cst_5 [0] : vector<512x8xf32> to vector<8xf32>
    %6 = vector.shape_cast %5 : vector<8xf32> to vector<1x8xf32>
    %7 = vector.shape_cast %6 : vector<1x8xf32> to vector<1x1x8xf32>
    %c0_6 = arith.constant 0 : index
    %c0_7 = arith.constant 0 : index
    %c0_8 = arith.constant 0 : index
    %8 = vector.load %arg4[%c0_6, %c0_7, %c0_8] : memref<1x1x8xf32, #tpu.memory_space<vmem>>, vector<1x1x8xf32>
    tpu.vector_store %arg4[%c0_6, %c0_7, %c0_8], %7 {strides = array<i32>} : memref<1x1x8xf32, #tpu.memory_space<vmem>>, vector<1x1x8xf32>,
    %9 = arith.mulf %2, %2 : vector<512x8xf32>
    %cst_9 = arith.constant dense<0.000000e+00> : vector<8xf32>
    %10 = vector.multi_reduction <add>, %9, %cst_9 [0] : vector<512x8xf32> to vector<8xf32>
    %11 = vector.shape_cast %10 : vector<8xf32> to vector<1x8xf32>
    %12 = vector.shape_cast %11 : vector<1x8xf32> to vector<1x1x8xf32>
    %c0_10 = arith.constant 0 : index
    %c0_11 = arith.constant 0 : index
    %c0_12 = arith.constant 0 : index
    %13 = vector.load %arg5[%c0_10, %c0_11, %c0_12] : memref<1x1x8xf32, #tpu.memory_space<vmem>>, vector<1x1x8xf32>
    tpu.vector_store %arg5[%c0_10, %c0_11, %c0_12], %12 {strides = array<i32>} : memref<1x1x8xf32, #tpu.memory_space<vmem>>, vector<1x1x8xf32>,
    return
  }
  func.func @transform_0(%arg0: i32) -> (i32, i32) {
    %c0_i32 = arith.constant 0 : i32
    %c0_i32_0 = arith.constant 0 : i32
    return %arg0, %c0_i32 : i32, i32
  }
  func.func @transform_1(%arg0: i32) -> (i32, i32) {
    %c0_i32 = arith.constant 0 : i32
    %c0_i32_0 = arith.constant 0 : i32
    %c0_i32_1 = arith.constant 0 : i32
    return %c0_i32, %c0_i32_0 : i32, i32
  }
  func.func @transform_2(%arg0: i32) -> (i32, i32) {
    %c0_i32 = arith.constant 0 : i32
    %c0_i32_0 = arith.constant 0 : i32
    return %arg0, %c0_i32 : i32, i32
  }
  func.func @transform_3(%arg0: i32) -> (i32, i32, i32) {
    %c0_i32 = arith.constant 0 : i32
    %c0_i32_0 = arith.constant 0 : i32
    %c0_i32_1 = arith.constant 0 : i32
    return %arg0, %c0_i32, %c0_i32_0 : i32, i32, i32
  }
  func.func @transform_4(%arg0: i32) -> (i32, i32, i32) {
    %c0_i32 = arith.constant 0 : i32
    %c0_i32_0 = arith.constant 0 : i32
    %c0_i32_1 = arith.constant 0 : i32
    return %arg0, %c0_i32, %c0_i32_0 : i32, i32, i32
  }
}

module attributes {stable_mosaic.version = 11 : i64} {
  func.func @_affine_kernel(%arg0: i32, %arg1: memref<8x512xbf16, #tpu.memory_space<vmem>>, %arg2: memref<1x512xf32, #tpu.memory_space<vmem>>, %arg3: memref<1x512xf32, #tpu.memory_space<vmem>>, %arg4: memref<8x512xbf16, #tpu.memory_space<vmem>>) attributes {dimension_semantics = [#tpu.dimension_semantics<parallel>], iteration_bounds = array<i64: 1>, scalar_prefetch = 0 : i64, scratch_operands = 0 : i64, tpu.core_type = #tpu.core_type<tc>, window_params = [{transform_indices = @transform_0, window_bounds = array<i64: 8, 512>}, {pipeline_mode = #tpu.pipeline_mode<synchronous>, transform_indices = @transform_1, window_bounds = array<i64: 1, 512>}, {pipeline_mode = #tpu.pipeline_mode<synchronous>, transform_indices = @transform_2, window_bounds = array<i64: 1, 512>}, {transform_indices = @transform_3, window_bounds = array<i64: 8, 512>}]} {
    %c0 = arith.constant 0 : index
    %c0_0 = arith.constant 0 : index
    %0 = vector.load %arg1[%c0, %c0_0] : memref<8x512xbf16, #tpu.memory_space<vmem>>, vector<8x512xbf16>
    %1 = arith.extf %0 : vector<8x512xbf16> to vector<8x512xf32>
    %c0_1 = arith.constant 0 : index
    %c0_2 = arith.constant 0 : index
    %2 = vector.load %arg2[%c0_1, %c0_2] : memref<1x512xf32, #tpu.memory_space<vmem>>, vector<1x512xf32>
    %3 = vector.broadcast %2 : vector<1x512xf32> to vector<8x512xf32>
    %4 = arith.mulf %1, %3 : vector<8x512xf32>
    %c0_3 = arith.constant 0 : index
    %c0_4 = arith.constant 0 : index
    %5 = vector.load %arg3[%c0_3, %c0_4] : memref<1x512xf32, #tpu.memory_space<vmem>>, vector<1x512xf32>
    %6 = vector.broadcast %5 : vector<1x512xf32> to vector<8x512xf32>
    %7 = arith.addf %4, %6 : vector<8x512xf32>
    %cst = arith.constant 0.000000e+00 : f32
    %8 = vector.broadcast %cst : f32 to vector<8x512xf32>
    %9 = arith.maximumf %7, %8 : vector<8x512xf32>
    %10 = arith.truncf %9 : vector<8x512xf32> to vector<8x512xbf16>
    %c0_5 = arith.constant 0 : index
    %c0_6 = arith.constant 0 : index
    %11 = vector.load %arg4[%c0_5, %c0_6] : memref<8x512xbf16, #tpu.memory_space<vmem>>, vector<8x512xbf16>
    tpu.vector_store %arg4[%c0_5, %c0_6], %10 {strides = array<i32>} : memref<8x512xbf16, #tpu.memory_space<vmem>>, vector<8x512xbf16>,
    return
  }
  func.func @transform_0(%arg0: i32) -> (i32, i32) {
    %c0_i32 = arith.constant 0 : i32
    %c0_i32_0 = arith.constant 0 : i32
    return %arg0, %c0_i32 : i32, i32
  }
  func.func @transform_1(%arg0: i32) -> (i32, i32) {
    %c0_i32 = arith.constant 0 : i32
    %c0_i32_0 = arith.constant 0 : i32
    %c0_i32_1 = arith.constant 0 : i32
    return %c0_i32, %c0_i32_0 : i32, i32
  }
  func.func @transform_2(%arg0: i32) -> (i32, i32) {
    %c0_i32 = arith.constant 0 : i32
    %c0_i32_0 = arith.constant 0 : i32
    %c0_i32_1 = arith.constant 0 : i32
    return %c0_i32, %c0_i32_0 : i32, i32
  }
  func.func @transform_3(%arg0: i32) -> (i32, i32) {
    %c0_i32 = arith.constant 0 : i32
    %c0_i32_0 = arith.constant 0 : i32
    return %arg0, %c0_i32 : i32, i32
  }
}

module attributes {stable_mosaic.version = 11 : i64} {
  func.func @_mm_kernel_single_k(%arg0: i32, %arg1: memref<512x72xbf16, #tpu.memory_space<vmem>>, %arg2: memref<72x8xbf16, #tpu.memory_space<vmem>>, %arg3: memref<1x8xf32, #tpu.memory_space<vmem>>, %arg4: memref<512x8xbf16, #tpu.memory_space<vmem>>) attributes {dimension_semantics = [#tpu.dimension_semantics<parallel>], iteration_bounds = array<i64: 1>, scalar_prefetch = 0 : i64, scratch_operands = 0 : i64, tpu.core_type = #tpu.core_type<tc>, window_params = [{transform_indices = @transform_0, window_bounds = array<i64: 512, 72>}, {pipeline_mode = #tpu.pipeline_mode<synchronous>, transform_indices = @transform_1, window_bounds = array<i64: 72, 8>}, {pipeline_mode = #tpu.pipeline_mode<synchronous>, transform_indices = @transform_2, window_bounds = array<i64: 1, 8>}, {transform_indices = @transform_3, window_bounds = array<i64: 512, 8>}]} {
    %c0 = arith.constant 0 : index
    %c0_0 = arith.constant 0 : index
    %0 = vector.load %arg1[%c0, %c0_0] : memref<512x72xbf16, #tpu.memory_space<vmem>>, vector<512x72xbf16>
    %cst = arith.constant 0.000000e+00 : bf16
    %1 = vector.broadcast %cst : bf16 to vector<512x72xbf16>
    %2 = arith.maximumf %0, %1 : vector<512x72xbf16>
    %c0_1 = arith.constant 0 : index
    %c0_2 = arith.constant 0 : index
    %3 = vector.load %arg2[%c0_1, %c0_2] : memref<72x8xbf16, #tpu.memory_space<vmem>>, vector<72x8xbf16>
    %cst_3 = arith.constant dense<0.000000e+00> : vector<512x8xf32>
    %4 = tpu.matmul %2, %3, %cst_3 {dimension_numbers = #tpu.dot_dimension_numbers<[1], [0], [0], [1], [0, 0, 1, 1], [], []>} : vector<512x72xbf16>, vector<72x8xbf16>, vector<512x8xf32> -> vector<512x8xf32>
    %c0_4 = arith.constant 0 : index
    %c0_5 = arith.constant 0 : index
    %5 = vector.load %arg3[%c0_4, %c0_5] : memref<1x8xf32, #tpu.memory_space<vmem>>, vector<1x8xf32>
    %6 = vector.broadcast %5 : vector<1x8xf32> to vector<512x8xf32>
    %7 = arith.addf %4, %6 : vector<512x8xf32>
    %cst_6 = arith.constant 0.000000e+00 : f32
    %8 = vector.broadcast %cst_6 : f32 to vector<512x8xf32>
    %9 = arith.maximumf %7, %8 : vector<512x8xf32>
    %10 = arith.truncf %9 : vector<512x8xf32> to vector<512x8xbf16>
    %c0_7 = arith.constant 0 : index
    %c0_8 = arith.constant 0 : index
    %11 = vector.load %arg4[%c0_7, %c0_8] : memref<512x8xbf16, #tpu.memory_space<vmem>>, vector<512x8xbf16>
    tpu.vector_store %arg4[%c0_7, %c0_8], %10 {strides = array<i32>} : memref<512x8xbf16, #tpu.memory_space<vmem>>, vector<512x8xbf16>,
    return
  }
  func.func @transform_0(%arg0: i32) -> (i32, i32) {
    %c0_i32 = arith.constant 0 : i32
    %c0_i32_0 = arith.constant 0 : i32
    return %arg0, %c0_i32 : i32, i32
  }
  func.func @transform_1(%arg0: i32) -> (i32, i32) {
    %c0_i32 = arith.constant 0 : i32
    %c0_i32_0 = arith.constant 0 : i32
    %c0_i32_1 = arith.constant 0 : i32
    return %c0_i32, %c0_i32_0 : i32, i32
  }
  func.func @transform_2(%arg0: i32) -> (i32, i32) {
    %c0_i32 = arith.constant 0 : i32
    %c0_i32_0 = arith.constant 0 : i32
    %c0_i32_1 = arith.constant 0 : i32
    return %c0_i32, %c0_i32_0 : i32, i32
  }
  func.func @transform_3(%arg0: i32) -> (i32, i32) {
    %c0_i32 = arith.constant 0 : i32
    %c0_i32_0 = arith.constant 0 : i32
    return %arg0, %c0_i32 : i32, i32
  }
}

module attributes {stable_mosaic.version = 11 : i64} {
  func.func @_mm_kernel_single_k(%arg0: i32, %arg1: memref<512x72xbf16, #tpu.memory_space<vmem>>, %arg2: memref<72x8xbf16, #tpu.memory_space<vmem>>, %arg3: memref<512x8xbf16, #tpu.memory_space<vmem>>, %arg4: memref<1x1x8xf32, #tpu.memory_space<vmem>>, %arg5: memref<1x1x8xf32, #tpu.memory_space<vmem>>) attributes {dimension_semantics = [#tpu.dimension_semantics<parallel>], iteration_bounds = array<i64: 1>, scalar_prefetch = 0 : i64, scratch_operands = 0 : i64, tpu.core_type = #tpu.core_type<tc>, window_params = [{transform_indices = @transform_0, window_bounds = array<i64: 512, 72>}, {pipeline_mode = #tpu.pipeline_mode<synchronous>, transform_indices = @transform_1, window_bounds = array<i64: 72, 8>}, {transform_indices = @transform_2, window_bounds = array<i64: 512, 8>}, {transform_indices = @transform_3, window_bounds = array<i64: 1, 1, 8>}, {transform_indices = @transform_4, window_bounds = array<i64: 1, 1, 8>}]} {
    %c0 = arith.constant 0 : index
    %c0_0 = arith.constant 0 : index
    %0 = vector.load %arg1[%c0, %c0_0] : memref<512x72xbf16, #tpu.memory_space<vmem>>, vector<512x72xbf16>
    %c0_1 = arith.constant 0 : index
    %c0_2 = arith.constant 0 : index
    %1 = vector.load %arg2[%c0_1, %c0_2] : memref<72x8xbf16, #tpu.memory_space<vmem>>, vector<72x8xbf16>
    %cst = arith.constant dense<0.000000e+00> : vector<512x8xf32>
    %2 = tpu.matmul %0, %1, %cst {dimension_numbers = #tpu.dot_dimension_numbers<[1], [0], [0], [1], [0, 0, 1, 1], [], []>} : vector<512x72xbf16>, vector<72x8xbf16>, vector<512x8xf32> -> vector<512x8xf32>
    %3 = arith.truncf %2 : vector<512x8xf32> to vector<512x8xbf16>
    %c0_3 = arith.constant 0 : index
    %c0_4 = arith.constant 0 : index
    %4 = vector.load %arg3[%c0_3, %c0_4] : memref<512x8xbf16, #tpu.memory_space<vmem>>, vector<512x8xbf16>
    tpu.vector_store %arg3[%c0_3, %c0_4], %3 {strides = array<i32>} : memref<512x8xbf16, #tpu.memory_space<vmem>>, vector<512x8xbf16>,
    %cst_5 = arith.constant dense<0.000000e+00> : vector<8xf32>
    %5 = vector.multi_reduction <add>, %2, %cst_5 [0] : vector<512x8xf32> to vector<8xf32>
    %6 = vector.shape_cast %5 : vector<8xf32> to vector<1x8xf32>
    %7 = vector.shape_cast %6 : vector<1x8xf32> to vector<1x1x8xf32>
    %c0_6 = arith.constant 0 : index
    %c0_7 = arith.constant 0 : index
    %c0_8 = arith.constant 0 : index
    %8 = vector.load %arg4[%c0_6, %c0_7, %c0_8] : memref<1x1x8xf32, #tpu.memory_space<vmem>>, vector<1x1x8xf32>
    tpu.vector_store %arg4[%c0_6, %c0_7, %c0_8], %7 {strides = array<i32>} : memref<1x1x8xf32, #tpu.memory_space<vmem>>, vector<1x1x8xf32>,
    %9 = arith.mulf %2, %2 : vector<512x8xf32>
    %cst_9 = arith.constant dense<0.000000e+00> : vector<8xf32>
    %10 = vector.multi_reduction <add>, %9, %cst_9 [0] : vector<512x8xf32> to vector<8xf32>
    %11 = vector.shape_cast %10 : vector<8xf32> to vector<1x8xf32>
    %12 = vector.shape_cast %11 : vector<1x8xf32> to vector<1x1x8xf32>
    %c0_10 = arith.constant 0 : index
    %c0_11 = arith.constant 0 : index
    %c0_12 = arith.constant 0 : index
    %13 = vector.load %arg5[%c0_10, %c0_11, %c0_12] : memref<1x1x8xf32, #tpu.memory_space<vmem>>, vector<1x1x8xf32>
    tpu.vector_store %arg5[%c0_10, %c0_11, %c0_12], %12 {strides = array<i32>} : memref<1x1x8xf32, #tpu.memory_space<vmem>>, vector<1x1x8xf32>,
    return
  }
  func.func @transform_0(%arg0: i32) -> (i32, i32) {
    %c0_i32 = arith.constant 0 : i32
    %c0_i32_0 = arith.constant 0 : i32
    return %arg0, %c0_i32 : i32, i32
  }
  func.func @transform_1(%arg0: i32) -> (i32, i32) {
    %c0_i32 = arith.constant 0 : i32
    %c0_i32_0 = arith.constant 0 : i32
    %c0_i32_1 = arith.constant 0 : i32
    return %c0_i32, %c0_i32_0 : i32, i32
  }
  func.func @transform_2(%arg0: i32) -> (i32, i32) {
    %c0_i32 = arith.constant 0 : i32
    %c0_i32_0 = arith.constant 0 : i32
    return %arg0, %c0_i32 : i32, i32
  }
  func.func @transform_3(%arg0: i32) -> (i32, i32, i32) {
    %c0_i32 = arith.constant 0 : i32
    %c0_i32_0 = arith.constant 0 : i32
    %c0_i32_1 = arith.constant 0 : i32
    return %arg0, %c0_i32, %c0_i32_0 : i32, i32, i32
  }
  func.func @transform_4(%arg0: i32) -> (i32, i32, i32) {
    %c0_i32 = arith.constant 0 : i32
    %c0_i32_0 = arith.constant 0 : i32
    %c0_i32_1 = arith.constant 0 : i32
    return %arg0, %c0_i32, %c0_i32_0 : i32, i32, i32
  }
}

module attributes {stable_mosaic.version = 11 : i64} {
  func.func @_affine_kernel(%arg0: i32, %arg1: memref<8x512xbf16, #tpu.memory_space<vmem>>, %arg2: memref<1x512xf32, #tpu.memory_space<vmem>>, %arg3: memref<1x512xf32, #tpu.memory_space<vmem>>, %arg4: memref<8x512xbf16, #tpu.memory_space<vmem>>, %arg5: memref<8x512xbf16, #tpu.memory_space<vmem>>) attributes {dimension_semantics = [#tpu.dimension_semantics<parallel>], iteration_bounds = array<i64: 1>, scalar_prefetch = 0 : i64, scratch_operands = 0 : i64, tpu.core_type = #tpu.core_type<tc>, window_params = [{transform_indices = @transform_0, window_bounds = array<i64: 8, 512>}, {pipeline_mode = #tpu.pipeline_mode<synchronous>, transform_indices = @transform_1, window_bounds = array<i64: 1, 512>}, {pipeline_mode = #tpu.pipeline_mode<synchronous>, transform_indices = @transform_2, window_bounds = array<i64: 1, 512>}, {transform_indices = @transform_3, window_bounds = array<i64: 8, 512>}, {transform_indices = @transform_4, window_bounds = array<i64: 8, 512>}]} {
    %c0 = arith.constant 0 : index
    %c0_0 = arith.constant 0 : index
    %0 = vector.load %arg1[%c0, %c0_0] : memref<8x512xbf16, #tpu.memory_space<vmem>>, vector<8x512xbf16>
    %1 = arith.extf %0 : vector<8x512xbf16> to vector<8x512xf32>
    %c0_1 = arith.constant 0 : index
    %c0_2 = arith.constant 0 : index
    %2 = vector.load %arg2[%c0_1, %c0_2] : memref<1x512xf32, #tpu.memory_space<vmem>>, vector<1x512xf32>
    %3 = vector.broadcast %2 : vector<1x512xf32> to vector<8x512xf32>
    %4 = arith.mulf %1, %3 : vector<8x512xf32>
    %c0_3 = arith.constant 0 : index
    %c0_4 = arith.constant 0 : index
    %5 = vector.load %arg3[%c0_3, %c0_4] : memref<1x512xf32, #tpu.memory_space<vmem>>, vector<1x512xf32>
    %6 = vector.broadcast %5 : vector<1x512xf32> to vector<8x512xf32>
    %7 = arith.addf %4, %6 : vector<8x512xf32>
    %c0_5 = arith.constant 0 : index
    %c0_6 = arith.constant 0 : index
    %8 = vector.load %arg4[%c0_5, %c0_6] : memref<8x512xbf16, #tpu.memory_space<vmem>>, vector<8x512xbf16>
    %9 = arith.extf %8 : vector<8x512xbf16> to vector<8x512xf32>
    %10 = arith.addf %7, %9 : vector<8x512xf32>
    %11 = arith.truncf %10 : vector<8x512xf32> to vector<8x512xbf16>
    %c0_7 = arith.constant 0 : index
    %c0_8 = arith.constant 0 : index
    %12 = vector.load %arg5[%c0_7, %c0_8] : memref<8x512xbf16, #tpu.memory_space<vmem>>, vector<8x512xbf16>
    tpu.vector_store %arg5[%c0_7, %c0_8], %11 {strides = array<i32>} : memref<8x512xbf16, #tpu.memory_space<vmem>>, vector<8x512xbf16>,
    return
  }
  func.func @transform_0(%arg0: i32) -> (i32, i32) {
    %c0_i32 = arith.constant 0 : i32
    %c0_i32_0 = arith.constant 0 : i32
    return %arg0, %c0_i32 : i32, i32
  }
  func.func @transform_1(%arg0: i32) -> (i32, i32) {
    %c0_i32 = arith.constant 0 : i32
    %c0_i32_0 = arith.constant 0 : i32
    %c0_i32_1 = arith.constant 0 : i32
    return %c0_i32, %c0_i32_0 : i32, i32
  }
  func.func @transform_2(%arg0: i32) -> (i32, i32) {
    %c0_i32 = arith.constant 0 : i32
    %c0_i32_0 = arith.constant 0 : i32
    %c0_i32_1 = arith.constant 0 : i32
    return %c0_i32, %c0_i32_0 : i32, i32
  }
  func.func @transform_3(%arg0: i32) -> (i32, i32) {
    %c0_i32 = arith.constant 0 : i32
    %c0_i32_0 = arith.constant 0 : i32
    return %arg0, %c0_i32 : i32, i32
  }
  func.func @transform_4(%arg0: i32) -> (i32, i32) {
    %c0_i32 = arith.constant 0 : i32
    %c0_i32_0 = arith.constant 0 : i32
    return %arg0, %c0_i32 : i32, i32
  }
}

module attributes {stable_mosaic.version = 11 : i64} {
  func.func @_mm_kernel_single_k(%arg0: i32, %arg1: memref<128x32xbf16, #tpu.memory_space<vmem>>, %arg2: memref<32x16xbf16, #tpu.memory_space<vmem>>, %arg3: memref<128x16xbf16, #tpu.memory_space<vmem>>, %arg4: memref<1x1x16xf32, #tpu.memory_space<vmem>>, %arg5: memref<1x1x16xf32, #tpu.memory_space<vmem>>) attributes {dimension_semantics = [#tpu.dimension_semantics<parallel>], iteration_bounds = array<i64: 1>, scalar_prefetch = 0 : i64, scratch_operands = 0 : i64, tpu.core_type = #tpu.core_type<tc>, window_params = [{transform_indices = @transform_0, window_bounds = array<i64: 128, 32>}, {pipeline_mode = #tpu.pipeline_mode<synchronous>, transform_indices = @transform_1, window_bounds = array<i64: 32, 16>}, {transform_indices = @transform_2, window_bounds = array<i64: 128, 16>}, {transform_indices = @transform_3, window_bounds = array<i64: 1, 1, 16>}, {transform_indices = @transform_4, window_bounds = array<i64: 1, 1, 16>}]} {
    %c0 = arith.constant 0 : index
    %c0_0 = arith.constant 0 : index
    %0 = vector.load %arg1[%c0, %c0_0] : memref<128x32xbf16, #tpu.memory_space<vmem>>, vector<128x32xbf16>
    %c0_1 = arith.constant 0 : index
    %c0_2 = arith.constant 0 : index
    %1 = vector.load %arg2[%c0_1, %c0_2] : memref<32x16xbf16, #tpu.memory_space<vmem>>, vector<32x16xbf16>
    %cst = arith.constant dense<0.000000e+00> : vector<128x16xf32>
    %2 = tpu.matmul %0, %1, %cst {dimension_numbers = #tpu.dot_dimension_numbers<[1], [0], [0], [1], [0, 0, 1, 1], [], []>} : vector<128x32xbf16>, vector<32x16xbf16>, vector<128x16xf32> -> vector<128x16xf32>
    %3 = arith.truncf %2 : vector<128x16xf32> to vector<128x16xbf16>
    %c0_3 = arith.constant 0 : index
    %c0_4 = arith.constant 0 : index
    %4 = vector.load %arg3[%c0_3, %c0_4] : memref<128x16xbf16, #tpu.memory_space<vmem>>, vector<128x16xbf16>
    tpu.vector_store %arg3[%c0_3, %c0_4], %3 {strides = array<i32>} : memref<128x16xbf16, #tpu.memory_space<vmem>>, vector<128x16xbf16>,
    %cst_5 = arith.constant dense<0.000000e+00> : vector<16xf32>
    %5 = vector.multi_reduction <add>, %2, %cst_5 [0] : vector<128x16xf32> to vector<16xf32>
    %6 = vector.shape_cast %5 : vector<16xf32> to vector<1x16xf32>
    %7 = vector.shape_cast %6 : vector<1x16xf32> to vector<1x1x16xf32>
    %c0_6 = arith.constant 0 : index
    %c0_7 = arith.constant 0 : index
    %c0_8 = arith.constant 0 : index
    %8 = vector.load %arg4[%c0_6, %c0_7, %c0_8] : memref<1x1x16xf32, #tpu.memory_space<vmem>>, vector<1x1x16xf32>
    tpu.vector_store %arg4[%c0_6, %c0_7, %c0_8], %7 {strides = array<i32>} : memref<1x1x16xf32, #tpu.memory_space<vmem>>, vector<1x1x16xf32>,
    %9 = arith.mulf %2, %2 : vector<128x16xf32>
    %cst_9 = arith.constant dense<0.000000e+00> : vector<16xf32>
    %10 = vector.multi_reduction <add>, %9, %cst_9 [0] : vector<128x16xf32> to vector<16xf32>
    %11 = vector.shape_cast %10 : vector<16xf32> to vector<1x16xf32>
    %12 = vector.shape_cast %11 : vector<1x16xf32> to vector<1x1x16xf32>
    %c0_10 = arith.constant 0 : index
    %c0_11 = arith.constant 0 : index
    %c0_12 = arith.constant 0 : index
    %13 = vector.load %arg5[%c0_10, %c0_11, %c0_12] : memref<1x1x16xf32, #tpu.memory_space<vmem>>, vector<1x1x16xf32>
    tpu.vector_store %arg5[%c0_10, %c0_11, %c0_12], %12 {strides = array<i32>} : memref<1x1x16xf32, #tpu.memory_space<vmem>>, vector<1x1x16xf32>,
    return
  }
  func.func @transform_0(%arg0: i32) -> (i32, i32) {
    %c0_i32 = arith.constant 0 : i32
    %c0_i32_0 = arith.constant 0 : i32
    return %arg0, %c0_i32 : i32, i32
  }
  func.func @transform_1(%arg0: i32) -> (i32, i32) {
    %c0_i32 = arith.constant 0 : i32
    %c0_i32_0 = arith.constant 0 : i32
    %c0_i32_1 = arith.constant 0 : i32
    return %c0_i32, %c0_i32_0 : i32, i32
  }
  func.func @transform_2(%arg0: i32) -> (i32, i32) {
    %c0_i32 = arith.constant 0 : i32
    %c0_i32_0 = arith.constant 0 : i32
    return %arg0, %c0_i32 : i32, i32
  }
  func.func @transform_3(%arg0: i32) -> (i32, i32, i32) {
    %c0_i32 = arith.constant 0 : i32
    %c0_i32_0 = arith.constant 0 : i32
    %c0_i32_1 = arith.constant 0 : i32
    return %arg0, %c0_i32, %c0_i32_0 : i32, i32, i32
  }
  func.func @transform_4(%arg0: i32) -> (i32, i32, i32) {
    %c0_i32 = arith.constant 0 : i32
    %c0_i32_0 = arith.constant 0 : i32
    %c0_i32_1 = arith.constant 0 : i32
    return %arg0, %c0_i32, %c0_i32_0 : i32, i32, i32
  }
}

module attributes {stable_mosaic.version = 11 : i64} {
  func.func @_affine_kernel(%arg0: i32, %arg1: memref<4x512xbf16, #tpu.memory_space<vmem>>, %arg2: memref<1x512xf32, #tpu.memory_space<vmem>>, %arg3: memref<1x512xf32, #tpu.memory_space<vmem>>, %arg4: memref<4x512xbf16, #tpu.memory_space<vmem>>) attributes {dimension_semantics = [#tpu.dimension_semantics<parallel>], iteration_bounds = array<i64: 1>, scalar_prefetch = 0 : i64, scratch_operands = 0 : i64, tpu.core_type = #tpu.core_type<tc>, window_params = [{transform_indices = @transform_0, window_bounds = array<i64: 4, 512>}, {pipeline_mode = #tpu.pipeline_mode<synchronous>, transform_indices = @transform_1, window_bounds = array<i64: 1, 512>}, {pipeline_mode = #tpu.pipeline_mode<synchronous>, transform_indices = @transform_2, window_bounds = array<i64: 1, 512>}, {transform_indices = @transform_3, window_bounds = array<i64: 4, 512>}]} {
    %c0 = arith.constant 0 : index
    %c0_0 = arith.constant 0 : index
    %0 = vector.load %arg1[%c0, %c0_0] : memref<4x512xbf16, #tpu.memory_space<vmem>>, vector<4x512xbf16>
    %1 = arith.extf %0 : vector<4x512xbf16> to vector<4x512xf32>
    %c0_1 = arith.constant 0 : index
    %c0_2 = arith.constant 0 : index
    %2 = vector.load %arg2[%c0_1, %c0_2] : memref<1x512xf32, #tpu.memory_space<vmem>>, vector<1x512xf32>
    %3 = vector.broadcast %2 : vector<1x512xf32> to vector<4x512xf32>
    %4 = arith.mulf %1, %3 : vector<4x512xf32>
    %c0_3 = arith.constant 0 : index
    %c0_4 = arith.constant 0 : index
    %5 = vector.load %arg3[%c0_3, %c0_4] : memref<1x512xf32, #tpu.memory_space<vmem>>, vector<1x512xf32>
    %6 = vector.broadcast %5 : vector<1x512xf32> to vector<4x512xf32>
    %7 = arith.addf %4, %6 : vector<4x512xf32>
    %cst = arith.constant 0.000000e+00 : f32
    %8 = vector.broadcast %cst : f32 to vector<4x512xf32>
    %9 = arith.maximumf %7, %8 : vector<4x512xf32>
    %10 = arith.truncf %9 : vector<4x512xf32> to vector<4x512xbf16>
    %c0_5 = arith.constant 0 : index
    %c0_6 = arith.constant 0 : index
    %11 = vector.load %arg4[%c0_5, %c0_6] : memref<4x512xbf16, #tpu.memory_space<vmem>>, vector<4x512xbf16>
    tpu.vector_store %arg4[%c0_5, %c0_6], %10 {strides = array<i32>} : memref<4x512xbf16, #tpu.memory_space<vmem>>, vector<4x512xbf16>,
    return
  }
  func.func @transform_0(%arg0: i32) -> (i32, i32) {
    %c0_i32 = arith.constant 0 : i32
    %c0_i32_0 = arith.constant 0 : i32
    return %arg0, %c0_i32 : i32, i32
  }
  func.func @transform_1(%arg0: i32) -> (i32, i32) {
    %c0_i32 = arith.constant 0 : i32
    %c0_i32_0 = arith.constant 0 : i32
    %c0_i32_1 = arith.constant 0 : i32
    return %c0_i32, %c0_i32_0 : i32, i32
  }
  func.func @transform_2(%arg0: i32) -> (i32, i32) {
    %c0_i32 = arith.constant 0 : i32
    %c0_i32_0 = arith.constant 0 : i32
    %c0_i32_1 = arith.constant 0 : i32
    return %c0_i32, %c0_i32_0 : i32, i32
  }
  func.func @transform_3(%arg0: i32) -> (i32, i32) {
    %c0_i32 = arith.constant 0 : i32
    %c0_i32_0 = arith.constant 0 : i32
    return %arg0, %c0_i32 : i32, i32
  }
}

module attributes {stable_mosaic.version = 11 : i64} {
  func.func @_mm_kernel_single_k(%arg0: i32, %arg1: memref<128x144xbf16, #tpu.memory_space<vmem>>, %arg2: memref<144x16xbf16, #tpu.memory_space<vmem>>, %arg3: memref<1x16xf32, #tpu.memory_space<vmem>>, %arg4: memref<128x16xbf16, #tpu.memory_space<vmem>>) attributes {dimension_semantics = [#tpu.dimension_semantics<parallel>], iteration_bounds = array<i64: 1>, scalar_prefetch = 0 : i64, scratch_operands = 0 : i64, tpu.core_type = #tpu.core_type<tc>, window_params = [{transform_indices = @transform_0, window_bounds = array<i64: 128, 144>}, {pipeline_mode = #tpu.pipeline_mode<synchronous>, transform_indices = @transform_1, window_bounds = array<i64: 144, 16>}, {pipeline_mode = #tpu.pipeline_mode<synchronous>, transform_indices = @transform_2, window_bounds = array<i64: 1, 16>}, {transform_indices = @transform_3, window_bounds = array<i64: 128, 16>}]} {
    %c0 = arith.constant 0 : index
    %c0_0 = arith.constant 0 : index
    %0 = vector.load %arg1[%c0, %c0_0] : memref<128x144xbf16, #tpu.memory_space<vmem>>, vector<128x144xbf16>
    %cst = arith.constant 0.000000e+00 : bf16
    %1 = vector.broadcast %cst : bf16 to vector<128x144xbf16>
    %2 = arith.maximumf %0, %1 : vector<128x144xbf16>
    %c0_1 = arith.constant 0 : index
    %c0_2 = arith.constant 0 : index
    %3 = vector.load %arg2[%c0_1, %c0_2] : memref<144x16xbf16, #tpu.memory_space<vmem>>, vector<144x16xbf16>
    %cst_3 = arith.constant dense<0.000000e+00> : vector<128x16xf32>
    %4 = tpu.matmul %2, %3, %cst_3 {dimension_numbers = #tpu.dot_dimension_numbers<[1], [0], [0], [1], [0, 0, 1, 1], [], []>} : vector<128x144xbf16>, vector<144x16xbf16>, vector<128x16xf32> -> vector<128x16xf32>
    %c0_4 = arith.constant 0 : index
    %c0_5 = arith.constant 0 : index
    %5 = vector.load %arg3[%c0_4, %c0_5] : memref<1x16xf32, #tpu.memory_space<vmem>>, vector<1x16xf32>
    %6 = vector.broadcast %5 : vector<1x16xf32> to vector<128x16xf32>
    %7 = arith.addf %4, %6 : vector<128x16xf32>
    %cst_6 = arith.constant 0.000000e+00 : f32
    %8 = vector.broadcast %cst_6 : f32 to vector<128x16xf32>
    %9 = arith.maximumf %7, %8 : vector<128x16xf32>
    %10 = arith.truncf %9 : vector<128x16xf32> to vector<128x16xbf16>
    %c0_7 = arith.constant 0 : index
    %c0_8 = arith.constant 0 : index
    %11 = vector.load %arg4[%c0_7, %c0_8] : memref<128x16xbf16, #tpu.memory_space<vmem>>, vector<128x16xbf16>
    tpu.vector_store %arg4[%c0_7, %c0_8], %10 {strides = array<i32>} : memref<128x16xbf16, #tpu.memory_space<vmem>>, vector<128x16xbf16>,
    return
  }
  func.func @transform_0(%arg0: i32) -> (i32, i32) {
    %c0_i32 = arith.constant 0 : i32
    %c0_i32_0 = arith.constant 0 : i32
    return %arg0, %c0_i32 : i32, i32
  }
  func.func @transform_1(%arg0: i32) -> (i32, i32) {
    %c0_i32 = arith.constant 0 : i32
    %c0_i32_0 = arith.constant 0 : i32
    %c0_i32_1 = arith.constant 0 : i32
    return %c0_i32, %c0_i32_0 : i32, i32
  }
  func.func @transform_2(%arg0: i32) -> (i32, i32) {
    %c0_i32 = arith.constant 0 : i32
    %c0_i32_0 = arith.constant 0 : i32
    %c0_i32_1 = arith.constant 0 : i32
    return %c0_i32, %c0_i32_0 : i32, i32
  }
  func.func @transform_3(%arg0: i32) -> (i32, i32) {
    %c0_i32 = arith.constant 0 : i32
    %c0_i32_0 = arith.constant 0 : i32
    return %arg0, %c0_i32 : i32, i32
  }
}

module attributes {stable_mosaic.version = 11 : i64} {
  func.func @_mm_kernel_single_k(%arg0: i32, %arg1: memref<128x144xbf16, #tpu.memory_space<vmem>>, %arg2: memref<144x16xbf16, #tpu.memory_space<vmem>>, %arg3: memref<128x16xbf16, #tpu.memory_space<vmem>>, %arg4: memref<1x1x16xf32, #tpu.memory_space<vmem>>, %arg5: memref<1x1x16xf32, #tpu.memory_space<vmem>>) attributes {dimension_semantics = [#tpu.dimension_semantics<parallel>], iteration_bounds = array<i64: 1>, scalar_prefetch = 0 : i64, scratch_operands = 0 : i64, tpu.core_type = #tpu.core_type<tc>, window_params = [{transform_indices = @transform_0, window_bounds = array<i64: 128, 144>}, {pipeline_mode = #tpu.pipeline_mode<synchronous>, transform_indices = @transform_1, window_bounds = array<i64: 144, 16>}, {transform_indices = @transform_2, window_bounds = array<i64: 128, 16>}, {transform_indices = @transform_3, window_bounds = array<i64: 1, 1, 16>}, {transform_indices = @transform_4, window_bounds = array<i64: 1, 1, 16>}]} {
    %c0 = arith.constant 0 : index
    %c0_0 = arith.constant 0 : index
    %0 = vector.load %arg1[%c0, %c0_0] : memref<128x144xbf16, #tpu.memory_space<vmem>>, vector<128x144xbf16>
    %c0_1 = arith.constant 0 : index
    %c0_2 = arith.constant 0 : index
    %1 = vector.load %arg2[%c0_1, %c0_2] : memref<144x16xbf16, #tpu.memory_space<vmem>>, vector<144x16xbf16>
    %cst = arith.constant dense<0.000000e+00> : vector<128x16xf32>
    %2 = tpu.matmul %0, %1, %cst {dimension_numbers = #tpu.dot_dimension_numbers<[1], [0], [0], [1], [0, 0, 1, 1], [], []>} : vector<128x144xbf16>, vector<144x16xbf16>, vector<128x16xf32> -> vector<128x16xf32>
    %3 = arith.truncf %2 : vector<128x16xf32> to vector<128x16xbf16>
    %c0_3 = arith.constant 0 : index
    %c0_4 = arith.constant 0 : index
    %4 = vector.load %arg3[%c0_3, %c0_4] : memref<128x16xbf16, #tpu.memory_space<vmem>>, vector<128x16xbf16>
    tpu.vector_store %arg3[%c0_3, %c0_4], %3 {strides = array<i32>} : memref<128x16xbf16, #tpu.memory_space<vmem>>, vector<128x16xbf16>,
    %cst_5 = arith.constant dense<0.000000e+00> : vector<16xf32>
    %5 = vector.multi_reduction <add>, %2, %cst_5 [0] : vector<128x16xf32> to vector<16xf32>
    %6 = vector.shape_cast %5 : vector<16xf32> to vector<1x16xf32>
    %7 = vector.shape_cast %6 : vector<1x16xf32> to vector<1x1x16xf32>
    %c0_6 = arith.constant 0 : index
    %c0_7 = arith.constant 0 : index
    %c0_8 = arith.constant 0 : index
    %8 = vector.load %arg4[%c0_6, %c0_7, %c0_8] : memref<1x1x16xf32, #tpu.memory_space<vmem>>, vector<1x1x16xf32>
    tpu.vector_store %arg4[%c0_6, %c0_7, %c0_8], %7 {strides = array<i32>} : memref<1x1x16xf32, #tpu.memory_space<vmem>>, vector<1x1x16xf32>,
    %9 = arith.mulf %2, %2 : vector<128x16xf32>
    %cst_9 = arith.constant dense<0.000000e+00> : vector<16xf32>
    %10 = vector.multi_reduction <add>, %9, %cst_9 [0] : vector<128x16xf32> to vector<16xf32>
    %11 = vector.shape_cast %10 : vector<16xf32> to vector<1x16xf32>
    %12 = vector.shape_cast %11 : vector<1x16xf32> to vector<1x1x16xf32>
    %c0_10 = arith.constant 0 : index
    %c0_11 = arith.constant 0 : index
    %c0_12 = arith.constant 0 : index
    %13 = vector.load %arg5[%c0_10, %c0_11, %c0_12] : memref<1x1x16xf32, #tpu.memory_space<vmem>>, vector<1x1x16xf32>
    tpu.vector_store %arg5[%c0_10, %c0_11, %c0_12], %12 {strides = array<i32>} : memref<1x1x16xf32, #tpu.memory_space<vmem>>, vector<1x1x16xf32>,
    return
  }
  func.func @transform_0(%arg0: i32) -> (i32, i32) {
    %c0_i32 = arith.constant 0 : i32
    %c0_i32_0 = arith.constant 0 : i32
    return %arg0, %c0_i32 : i32, i32
  }
  func.func @transform_1(%arg0: i32) -> (i32, i32) {
    %c0_i32 = arith.constant 0 : i32
    %c0_i32_0 = arith.constant 0 : i32
    %c0_i32_1 = arith.constant 0 : i32
    return %c0_i32, %c0_i32_0 : i32, i32
  }
  func.func @transform_2(%arg0: i32) -> (i32, i32) {
    %c0_i32 = arith.constant 0 : i32
    %c0_i32_0 = arith.constant 0 : i32
    return %arg0, %c0_i32 : i32, i32
  }
  func.func @transform_3(%arg0: i32) -> (i32, i32, i32) {
    %c0_i32 = arith.constant 0 : i32
    %c0_i32_0 = arith.constant 0 : i32
    %c0_i32_1 = arith.constant 0 : i32
    return %arg0, %c0_i32, %c0_i32_0 : i32, i32, i32
  }
  func.func @transform_4(%arg0: i32) -> (i32, i32, i32) {
    %c0_i32 = arith.constant 0 : i32
    %c0_i32_0 = arith.constant 0 : i32
    %c0_i32_1 = arith.constant 0 : i32
    return %arg0, %c0_i32, %c0_i32_0 : i32, i32, i32
  }
}

module attributes {stable_mosaic.version = 11 : i64} {
  func.func @_affine_kernel(%arg0: i32, %arg1: memref<4x512xbf16, #tpu.memory_space<vmem>>, %arg2: memref<1x512xf32, #tpu.memory_space<vmem>>, %arg3: memref<1x512xf32, #tpu.memory_space<vmem>>, %arg4: memref<4x512xbf16, #tpu.memory_space<vmem>>, %arg5: memref<4x512xbf16, #tpu.memory_space<vmem>>) attributes {dimension_semantics = [#tpu.dimension_semantics<parallel>], iteration_bounds = array<i64: 1>, scalar_prefetch = 0 : i64, scratch_operands = 0 : i64, tpu.core_type = #tpu.core_type<tc>, window_params = [{transform_indices = @transform_0, window_bounds = array<i64: 4, 512>}, {pipeline_mode = #tpu.pipeline_mode<synchronous>, transform_indices = @transform_1, window_bounds = array<i64: 1, 512>}, {pipeline_mode = #tpu.pipeline_mode<synchronous>, transform_indices = @transform_2, window_bounds = array<i64: 1, 512>}, {transform_indices = @transform_3, window_bounds = array<i64: 4, 512>}, {transform_indices = @transform_4, window_bounds = array<i64: 4, 512>}]} {
    %c0 = arith.constant 0 : index
    %c0_0 = arith.constant 0 : index
    %0 = vector.load %arg1[%c0, %c0_0] : memref<4x512xbf16, #tpu.memory_space<vmem>>, vector<4x512xbf16>
    %1 = arith.extf %0 : vector<4x512xbf16> to vector<4x512xf32>
    %c0_1 = arith.constant 0 : index
    %c0_2 = arith.constant 0 : index
    %2 = vector.load %arg2[%c0_1, %c0_2] : memref<1x512xf32, #tpu.memory_space<vmem>>, vector<1x512xf32>
    %3 = vector.broadcast %2 : vector<1x512xf32> to vector<4x512xf32>
    %4 = arith.mulf %1, %3 : vector<4x512xf32>
    %c0_3 = arith.constant 0 : index
    %c0_4 = arith.constant 0 : index
    %5 = vector.load %arg3[%c0_3, %c0_4] : memref<1x512xf32, #tpu.memory_space<vmem>>, vector<1x512xf32>
    %6 = vector.broadcast %5 : vector<1x512xf32> to vector<4x512xf32>
    %7 = arith.addf %4, %6 : vector<4x512xf32>
    %c0_5 = arith.constant 0 : index
    %c0_6 = arith.constant 0 : index
    %8 = vector.load %arg4[%c0_5, %c0_6] : memref<4x512xbf16, #tpu.memory_space<vmem>>, vector<4x512xbf16>
    %9 = arith.extf %8 : vector<4x512xbf16> to vector<4x512xf32>
    %10 = arith.addf %7, %9 : vector<4x512xf32>
    %11 = arith.truncf %10 : vector<4x512xf32> to vector<4x512xbf16>
    %c0_7 = arith.constant 0 : index
    %c0_8 = arith.constant 0 : index
    %12 = vector.load %arg5[%c0_7, %c0_8] : memref<4x512xbf16, #tpu.memory_space<vmem>>, vector<4x512xbf16>
    tpu.vector_store %arg5[%c0_7, %c0_8], %11 {strides = array<i32>} : memref<4x512xbf16, #tpu.memory_space<vmem>>, vector<4x512xbf16>,
    return
  }
  func.func @transform_0(%arg0: i32) -> (i32, i32) {
    %c0_i32 = arith.constant 0 : i32
    %c0_i32_0 = arith.constant 0 : i32
    return %arg0, %c0_i32 : i32, i32
  }
  func.func @transform_1(%arg0: i32) -> (i32, i32) {
    %c0_i32 = arith.constant 0 : i32
    %c0_i32_0 = arith.constant 0 : i32
    %c0_i32_1 = arith.constant 0 : i32
    return %c0_i32, %c0_i32_0 : i32, i32
  }
  func.func @transform_2(%arg0: i32) -> (i32, i32) {
    %c0_i32 = arith.constant 0 : i32
    %c0_i32_0 = arith.constant 0 : i32
    %c0_i32_1 = arith.constant 0 : i32
    return %c0_i32, %c0_i32_0 : i32, i32
  }
  func.func @transform_3(%arg0: i32) -> (i32, i32) {
    %c0_i32 = arith.constant 0 : i32
    %c0_i32_0 = arith.constant 0 : i32
    return %arg0, %c0_i32 : i32, i32
  }
  func.func @transform_4(%arg0: i32) -> (i32, i32) {
    %c0_i32 = arith.constant 0 : i32
    %c0_i32_0 = arith.constant 0 : i32
    return %arg0, %c0_i32 : i32, i32
  }
}

module attributes {stable_mosaic.version = 11 : i64} {
  func.func @_affine_kernel(%arg0: i32, %arg1: memref<2x512xbf16, #tpu.memory_space<vmem>>, %arg2: memref<1x512xf32, #tpu.memory_space<vmem>>, %arg3: memref<1x512xf32, #tpu.memory_space<vmem>>, %arg4: memref<2x512xbf16, #tpu.memory_space<vmem>>) attributes {dimension_semantics = [#tpu.dimension_semantics<parallel>], iteration_bounds = array<i64: 1>, scalar_prefetch = 0 : i64, scratch_operands = 0 : i64, tpu.core_type = #tpu.core_type<tc>, window_params = [{transform_indices = @transform_0, window_bounds = array<i64: 2, 512>}, {pipeline_mode = #tpu.pipeline_mode<synchronous>, transform_indices = @transform_1, window_bounds = array<i64: 1, 512>}, {pipeline_mode = #tpu.pipeline_mode<synchronous>, transform_indices = @transform_2, window_bounds = array<i64: 1, 512>}, {transform_indices = @transform_3, window_bounds = array<i64: 2, 512>}]} {
    %c0 = arith.constant 0 : index
    %c0_0 = arith.constant 0 : index
    %0 = vector.load %arg1[%c0, %c0_0] : memref<2x512xbf16, #tpu.memory_space<vmem>>, vector<2x512xbf16>
    %1 = arith.extf %0 : vector<2x512xbf16> to vector<2x512xf32>
    %c0_1 = arith.constant 0 : index
    %c0_2 = arith.constant 0 : index
    %2 = vector.load %arg2[%c0_1, %c0_2] : memref<1x512xf32, #tpu.memory_space<vmem>>, vector<1x512xf32>
    %3 = vector.broadcast %2 : vector<1x512xf32> to vector<2x512xf32>
    %4 = arith.mulf %1, %3 : vector<2x512xf32>
    %c0_3 = arith.constant 0 : index
    %c0_4 = arith.constant 0 : index
    %5 = vector.load %arg3[%c0_3, %c0_4] : memref<1x512xf32, #tpu.memory_space<vmem>>, vector<1x512xf32>
    %6 = vector.broadcast %5 : vector<1x512xf32> to vector<2x512xf32>
    %7 = arith.addf %4, %6 : vector<2x512xf32>
    %cst = arith.constant 0.000000e+00 : f32
    %8 = vector.broadcast %cst : f32 to vector<2x512xf32>
    %9 = arith.maximumf %7, %8 : vector<2x512xf32>
    %10 = arith.truncf %9 : vector<2x512xf32> to vector<2x512xbf16>
    %c0_5 = arith.constant 0 : index
    %c0_6 = arith.constant 0 : index
    %11 = vector.load %arg4[%c0_5, %c0_6] : memref<2x512xbf16, #tpu.memory_space<vmem>>, vector<2x512xbf16>
    tpu.vector_store %arg4[%c0_5, %c0_6], %10 {strides = array<i32>} : memref<2x512xbf16, #tpu.memory_space<vmem>>, vector<2x512xbf16>,
    return
  }
  func.func @transform_0(%arg0: i32) -> (i32, i32) {
    %c0_i32 = arith.constant 0 : i32
    %c0_i32_0 = arith.constant 0 : i32
    return %arg0, %c0_i32 : i32, i32
  }
  func.func @transform_1(%arg0: i32) -> (i32, i32) {
    %c0_i32 = arith.constant 0 : i32
    %c0_i32_0 = arith.constant 0 : i32
    %c0_i32_1 = arith.constant 0 : i32
    return %c0_i32, %c0_i32_0 : i32, i32
  }
  func.func @transform_2(%arg0: i32) -> (i32, i32) {
    %c0_i32 = arith.constant 0 : i32
    %c0_i32_0 = arith.constant 0 : i32
    %c0_i32_1 = arith.constant 0 : i32
    return %c0_i32, %c0_i32_0 : i32, i32
  }
  func.func @transform_3(%arg0: i32) -> (i32, i32) {
    %c0_i32 = arith.constant 0 : i32
    %c0_i32_0 = arith.constant 0 : i32
    return %arg0, %c0_i32 : i32, i32
  }
}

module attributes {stable_mosaic.version = 11 : i64} {
  func.func @_mm_kernel_single_k(%arg0: i32, %arg1: memref<32x64xbf16, #tpu.memory_space<vmem>>, %arg2: memref<64x32xbf16, #tpu.memory_space<vmem>>, %arg3: memref<32x32xbf16, #tpu.memory_space<vmem>>, %arg4: memref<1x1x32xf32, #tpu.memory_space<vmem>>, %arg5: memref<1x1x32xf32, #tpu.memory_space<vmem>>) attributes {dimension_semantics = [#tpu.dimension_semantics<parallel>], iteration_bounds = array<i64: 1>, scalar_prefetch = 0 : i64, scratch_operands = 0 : i64, tpu.core_type = #tpu.core_type<tc>, window_params = [{transform_indices = @transform_0, window_bounds = array<i64: 32, 64>}, {pipeline_mode = #tpu.pipeline_mode<synchronous>, transform_indices = @transform_1, window_bounds = array<i64: 64, 32>}, {transform_indices = @transform_2, window_bounds = array<i64: 32, 32>}, {transform_indices = @transform_3, window_bounds = array<i64: 1, 1, 32>}, {transform_indices = @transform_4, window_bounds = array<i64: 1, 1, 32>}]} {
    %c0 = arith.constant 0 : index
    %c0_0 = arith.constant 0 : index
    %0 = vector.load %arg1[%c0, %c0_0] : memref<32x64xbf16, #tpu.memory_space<vmem>>, vector<32x64xbf16>
    %c0_1 = arith.constant 0 : index
    %c0_2 = arith.constant 0 : index
    %1 = vector.load %arg2[%c0_1, %c0_2] : memref<64x32xbf16, #tpu.memory_space<vmem>>, vector<64x32xbf16>
    %cst = arith.constant dense<0.000000e+00> : vector<32x32xf32>
    %2 = tpu.matmul %0, %1, %cst {dimension_numbers = #tpu.dot_dimension_numbers<[1], [0], [0], [1], [0, 0, 1, 1], [], []>} : vector<32x64xbf16>, vector<64x32xbf16>, vector<32x32xf32> -> vector<32x32xf32>
    %3 = arith.truncf %2 : vector<32x32xf32> to vector<32x32xbf16>
    %c0_3 = arith.constant 0 : index
    %c0_4 = arith.constant 0 : index
    %4 = vector.load %arg3[%c0_3, %c0_4] : memref<32x32xbf16, #tpu.memory_space<vmem>>, vector<32x32xbf16>
    tpu.vector_store %arg3[%c0_3, %c0_4], %3 {strides = array<i32>} : memref<32x32xbf16, #tpu.memory_space<vmem>>, vector<32x32xbf16>,
    %cst_5 = arith.constant dense<0.000000e+00> : vector<32xf32>
    %5 = vector.multi_reduction <add>, %2, %cst_5 [0] : vector<32x32xf32> to vector<32xf32>
    %6 = vector.shape_cast %5 : vector<32xf32> to vector<1x32xf32>
    %7 = vector.shape_cast %6 : vector<1x32xf32> to vector<1x1x32xf32>
    %c0_6 = arith.constant 0 : index
    %c0_7 = arith.constant 0 : index
    %c0_8 = arith.constant 0 : index
    %8 = vector.load %arg4[%c0_6, %c0_7, %c0_8] : memref<1x1x32xf32, #tpu.memory_space<vmem>>, vector<1x1x32xf32>
    tpu.vector_store %arg4[%c0_6, %c0_7, %c0_8], %7 {strides = array<i32>} : memref<1x1x32xf32, #tpu.memory_space<vmem>>, vector<1x1x32xf32>,
    %9 = arith.mulf %2, %2 : vector<32x32xf32>
    %cst_9 = arith.constant dense<0.000000e+00> : vector<32xf32>
    %10 = vector.multi_reduction <add>, %9, %cst_9 [0] : vector<32x32xf32> to vector<32xf32>
    %11 = vector.shape_cast %10 : vector<32xf32> to vector<1x32xf32>
    %12 = vector.shape_cast %11 : vector<1x32xf32> to vector<1x1x32xf32>
    %c0_10 = arith.constant 0 : index
    %c0_11 = arith.constant 0 : index
    %c0_12 = arith.constant 0 : index
    %13 = vector.load %arg5[%c0_10, %c0_11, %c0_12] : memref<1x1x32xf32, #tpu.memory_space<vmem>>, vector<1x1x32xf32>
    tpu.vector_store %arg5[%c0_10, %c0_11, %c0_12], %12 {strides = array<i32>} : memref<1x1x32xf32, #tpu.memory_space<vmem>>, vector<1x1x32xf32>,
    return
  }
  func.func @transform_0(%arg0: i32) -> (i32, i32) {
    %c0_i32 = arith.constant 0 : i32
    %c0_i32_0 = arith.constant 0 : i32
    return %arg0, %c0_i32 : i32, i32
  }
  func.func @transform_1(%arg0: i32) -> (i32, i32) {
    %c0_i32 = arith.constant 0 : i32
    %c0_i32_0 = arith.constant 0 : i32
    %c0_i32_1 = arith.constant 0 : i32
    return %c0_i32, %c0_i32_0 : i32, i32
  }
  func.func @transform_2(%arg0: i32) -> (i32, i32) {
    %c0_i32 = arith.constant 0 : i32
    %c0_i32_0 = arith.constant 0 : i32
    return %arg0, %c0_i32 : i32, i32
  }
  func.func @transform_3(%arg0: i32) -> (i32, i32, i32) {
    %c0_i32 = arith.constant 0 : i32
    %c0_i32_0 = arith.constant 0 : i32
    %c0_i32_1 = arith.constant 0 : i32
    return %arg0, %c0_i32, %c0_i32_0 : i32, i32, i32
  }
  func.func @transform_4(%arg0: i32) -> (i32, i32, i32) {
    %c0_i32 = arith.constant 0 : i32
    %c0_i32_0 = arith.constant 0 : i32
    %c0_i32_1 = arith.constant 0 : i32
    return %arg0, %c0_i32, %c0_i32_0 : i32, i32, i32
  }
}

module attributes {stable_mosaic.version = 11 : i64} {
  func.func @_affine_kernel(%arg0: i32, %arg1: memref<2x512xbf16, #tpu.memory_space<vmem>>, %arg2: memref<1x512xf32, #tpu.memory_space<vmem>>, %arg3: memref<1x512xf32, #tpu.memory_space<vmem>>, %arg4: memref<2x512xbf16, #tpu.memory_space<vmem>>, %arg5: memref<2x512xbf16, #tpu.memory_space<vmem>>, %arg6: memref<2x512xbf16, #tpu.memory_space<vmem>>) attributes {dimension_semantics = [#tpu.dimension_semantics<parallel>], iteration_bounds = array<i64: 1>, scalar_prefetch = 0 : i64, scratch_operands = 0 : i64, tpu.core_type = #tpu.core_type<tc>, window_params = [{transform_indices = @transform_0, window_bounds = array<i64: 2, 512>}, {pipeline_mode = #tpu.pipeline_mode<synchronous>, transform_indices = @transform_1, window_bounds = array<i64: 1, 512>}, {pipeline_mode = #tpu.pipeline_mode<synchronous>, transform_indices = @transform_2, window_bounds = array<i64: 1, 512>}, {transform_indices = @transform_3, window_bounds = array<i64: 2, 512>}, {transform_indices = @transform_4, window_bounds = array<i64: 2, 512>}, {transform_indices = @transform_5, window_bounds = array<i64: 2, 512>}]} {
    %c0 = arith.constant 0 : index
    %c0_0 = arith.constant 0 : index
    %0 = vector.load %arg1[%c0, %c0_0] : memref<2x512xbf16, #tpu.memory_space<vmem>>, vector<2x512xbf16>
    %1 = arith.extf %0 : vector<2x512xbf16> to vector<2x512xf32>
    %c0_1 = arith.constant 0 : index
    %c0_2 = arith.constant 0 : index
    %2 = vector.load %arg2[%c0_1, %c0_2] : memref<1x512xf32, #tpu.memory_space<vmem>>, vector<1x512xf32>
    %3 = vector.broadcast %2 : vector<1x512xf32> to vector<2x512xf32>
    %4 = arith.mulf %1, %3 : vector<2x512xf32>
    %c0_3 = arith.constant 0 : index
    %c0_4 = arith.constant 0 : index
    %5 = vector.load %arg3[%c0_3, %c0_4] : memref<1x512xf32, #tpu.memory_space<vmem>>, vector<1x512xf32>
    %6 = vector.broadcast %5 : vector<1x512xf32> to vector<2x512xf32>
    %7 = arith.addf %4, %6 : vector<2x512xf32>
    %cst = arith.constant 0.000000e+00 : f32
    %8 = vector.broadcast %cst : f32 to vector<2x512xf32>
    %9 = arith.maximumf %7, %8 : vector<2x512xf32>
    %c0_5 = arith.constant 0 : index
    %c0_6 = arith.constant 0 : index
    %10 = vector.load %arg4[%c0_5, %c0_6] : memref<2x512xbf16, #tpu.memory_space<vmem>>, vector<2x512xbf16>
    %11 = arith.extf %10 : vector<2x512xbf16> to vector<2x512xf32>
    %12 = arith.addf %9, %11 : vector<2x512xf32>
    %c0_7 = arith.constant 0 : index
    %c0_8 = arith.constant 0 : index
    %13 = vector.load %arg5[%c0_7, %c0_8] : memref<2x512xbf16, #tpu.memory_space<vmem>>, vector<2x512xbf16>
    %14 = arith.extf %13 : vector<2x512xbf16> to vector<2x512xf32>
    %15 = arith.addf %12, %14 : vector<2x512xf32>
    %16 = arith.truncf %15 : vector<2x512xf32> to vector<2x512xbf16>
    %c0_9 = arith.constant 0 : index
    %c0_10 = arith.constant 0 : index
    %17 = vector.load %arg6[%c0_9, %c0_10] : memref<2x512xbf16, #tpu.memory_space<vmem>>, vector<2x512xbf16>
    tpu.vector_store %arg6[%c0_9, %c0_10], %16 {strides = array<i32>} : memref<2x512xbf16, #tpu.memory_space<vmem>>, vector<2x512xbf16>,
    return
  }
  func.func @transform_0(%arg0: i32) -> (i32, i32) {
    %c0_i32 = arith.constant 0 : i32
    %c0_i32_0 = arith.constant 0 : i32
    return %arg0, %c0_i32 : i32, i32
  }
  func.func @transform_1(%arg0: i32) -> (i32, i32) {
    %c0_i32 = arith.constant 0 : i32
    %c0_i32_0 = arith.constant 0 : i32
    %c0_i32_1 = arith.constant 0 : i32
    return %c0_i32, %c0_i32_0 : i32, i32
  }
  func.func @transform_2(%arg0: i32) -> (i32, i32) {
    %c0_i32 = arith.constant 0 : i32
    %c0_i32_0 = arith.constant 0 : i32
    %c0_i32_1 = arith.constant 0 : i32
    return %c0_i32, %c0_i32_0 : i32, i32
  }
  func.func @transform_3(%arg0: i32) -> (i32, i32) {
    %c0_i32 = arith.constant 0 : i32
    %c0_i32_0 = arith.constant 0 : i32
    return %arg0, %c0_i32 : i32, i32
  }
  func.func @transform_4(%arg0: i32) -> (i32, i32) {
    %c0_i32 = arith.constant 0 : i32
    %c0_i32_0 = arith.constant 0 : i32
    return %arg0, %c0_i32 : i32, i32
  }
  func.func @transform_5(%arg0: i32) -> (i32, i32) {
    %c0_i32 = arith.constant 0 : i32
    %c0_i32_0 = arith.constant 0 : i32
    return %arg0, %c0_i32 : i32, i32
  }
}

module attributes {stable_mosaic.version = 11 : i64} {
  func.func @_mm_kernel_single_k(%arg0: i32, %arg1: memref<32x128xbf16, #tpu.memory_space<vmem>>, %arg2: memref<128x32xbf16, #tpu.memory_space<vmem>>, %arg3: memref<32x32xbf16, #tpu.memory_space<vmem>>, %arg4: memref<1x1x32xf32, #tpu.memory_space<vmem>>, %arg5: memref<1x1x32xf32, #tpu.memory_space<vmem>>) attributes {dimension_semantics = [#tpu.dimension_semantics<parallel>], iteration_bounds = array<i64: 1>, scalar_prefetch = 0 : i64, scratch_operands = 0 : i64, tpu.core_type = #tpu.core_type<tc>, window_params = [{transform_indices = @transform_0, window_bounds = array<i64: 32, 128>}, {pipeline_mode = #tpu.pipeline_mode<synchronous>, transform_indices = @transform_1, window_bounds = array<i64: 128, 32>}, {transform_indices = @transform_2, window_bounds = array<i64: 32, 32>}, {transform_indices = @transform_3, window_bounds = array<i64: 1, 1, 32>}, {transform_indices = @transform_4, window_bounds = array<i64: 1, 1, 32>}]} {
    %c0 = arith.constant 0 : index
    %c0_0 = arith.constant 0 : index
    %0 = vector.load %arg1[%c0, %c0_0] : memref<32x128xbf16, #tpu.memory_space<vmem>>, vector<32x128xbf16>
    %c0_1 = arith.constant 0 : index
    %c0_2 = arith.constant 0 : index
    %1 = vector.load %arg2[%c0_1, %c0_2] : memref<128x32xbf16, #tpu.memory_space<vmem>>, vector<128x32xbf16>
    %cst = arith.constant dense<0.000000e+00> : vector<32x32xf32>
    %2 = tpu.matmul %0, %1, %cst {dimension_numbers = #tpu.dot_dimension_numbers<[1], [0], [0], [1], [0, 0, 1, 1], [], []>} : vector<32x128xbf16>, vector<128x32xbf16>, vector<32x32xf32> -> vector<32x32xf32>
    %3 = arith.truncf %2 : vector<32x32xf32> to vector<32x32xbf16>
    %c0_3 = arith.constant 0 : index
    %c0_4 = arith.constant 0 : index
    %4 = vector.load %arg3[%c0_3, %c0_4] : memref<32x32xbf16, #tpu.memory_space<vmem>>, vector<32x32xbf16>
    tpu.vector_store %arg3[%c0_3, %c0_4], %3 {strides = array<i32>} : memref<32x32xbf16, #tpu.memory_space<vmem>>, vector<32x32xbf16>,
    %cst_5 = arith.constant dense<0.000000e+00> : vector<32xf32>
    %5 = vector.multi_reduction <add>, %2, %cst_5 [0] : vector<32x32xf32> to vector<32xf32>
    %6 = vector.shape_cast %5 : vector<32xf32> to vector<1x32xf32>
    %7 = vector.shape_cast %6 : vector<1x32xf32> to vector<1x1x32xf32>
    %c0_6 = arith.constant 0 : index
    %c0_7 = arith.constant 0 : index
    %c0_8 = arith.constant 0 : index
    %8 = vector.load %arg4[%c0_6, %c0_7, %c0_8] : memref<1x1x32xf32, #tpu.memory_space<vmem>>, vector<1x1x32xf32>
    tpu.vector_store %arg4[%c0_6, %c0_7, %c0_8], %7 {strides = array<i32>} : memref<1x1x32xf32, #tpu.memory_space<vmem>>, vector<1x1x32xf32>,
    %9 = arith.mulf %2, %2 : vector<32x32xf32>
    %cst_9 = arith.constant dense<0.000000e+00> : vector<32xf32>
    %10 = vector.multi_reduction <add>, %9, %cst_9 [0] : vector<32x32xf32> to vector<32xf32>
    %11 = vector.shape_cast %10 : vector<32xf32> to vector<1x32xf32>
    %12 = vector.shape_cast %11 : vector<1x32xf32> to vector<1x1x32xf32>
    %c0_10 = arith.constant 0 : index
    %c0_11 = arith.constant 0 : index
    %c0_12 = arith.constant 0 : index
    %13 = vector.load %arg5[%c0_10, %c0_11, %c0_12] : memref<1x1x32xf32, #tpu.memory_space<vmem>>, vector<1x1x32xf32>
    tpu.vector_store %arg5[%c0_10, %c0_11, %c0_12], %12 {strides = array<i32>} : memref<1x1x32xf32, #tpu.memory_space<vmem>>, vector<1x1x32xf32>,
    return
  }
  func.func @transform_0(%arg0: i32) -> (i32, i32) {
    %c0_i32 = arith.constant 0 : i32
    %c0_i32_0 = arith.constant 0 : i32
    return %arg0, %c0_i32 : i32, i32
  }
  func.func @transform_1(%arg0: i32) -> (i32, i32) {
    %c0_i32 = arith.constant 0 : i32
    %c0_i32_0 = arith.constant 0 : i32
    %c0_i32_1 = arith.constant 0 : i32
    return %c0_i32, %c0_i32_0 : i32, i32
  }
  func.func @transform_2(%arg0: i32) -> (i32, i32) {
    %c0_i32 = arith.constant 0 : i32
    %c0_i32_0 = arith.constant 0 : i32
    return %arg0, %c0_i32 : i32, i32
  }
  func.func @transform_3(%arg0: i32) -> (i32, i32, i32) {
    %c0_i32 = arith.constant 0 : i32
    %c0_i32_0 = arith.constant 0 : i32
    %c0_i32_1 = arith.constant 0 : i32
    return %arg0, %c0_i32, %c0_i32_0 : i32, i32, i32
  }
  func.func @transform_4(%arg0: i32) -> (i32, i32, i32) {
    %c0_i32 = arith.constant 0 : i32
    %c0_i32_0 = arith.constant 0 : i32
    %c0_i32_1 = arith.constant 0 : i32
    return %arg0, %c0_i32, %c0_i32_0 : i32, i32, i32
  }
}

module attributes {stable_mosaic.version = 11 : i64} {
  func.func @_mm_kernel_single_k(%arg0: i32, %arg1: memref<32x288xbf16, #tpu.memory_space<vmem>>, %arg2: memref<288x16xbf16, #tpu.memory_space<vmem>>, %arg3: memref<1x16xf32, #tpu.memory_space<vmem>>, %arg4: memref<32x16xbf16, #tpu.memory_space<vmem>>) attributes {dimension_semantics = [#tpu.dimension_semantics<parallel>], iteration_bounds = array<i64: 1>, scalar_prefetch = 0 : i64, scratch_operands = 0 : i64, tpu.core_type = #tpu.core_type<tc>, window_params = [{transform_indices = @transform_0, window_bounds = array<i64: 32, 288>}, {pipeline_mode = #tpu.pipeline_mode<synchronous>, transform_indices = @transform_1, window_bounds = array<i64: 288, 16>}, {pipeline_mode = #tpu.pipeline_mode<synchronous>, transform_indices = @transform_2, window_bounds = array<i64: 1, 16>}, {transform_indices = @transform_3, window_bounds = array<i64: 32, 16>}]} {
    %c0 = arith.constant 0 : index
    %c0_0 = arith.constant 0 : index
    %0 = vector.load %arg1[%c0, %c0_0] : memref<32x288xbf16, #tpu.memory_space<vmem>>, vector<32x288xbf16>
    %c0_1 = arith.constant 0 : index
    %c0_2 = arith.constant 0 : index
    %1 = vector.load %arg2[%c0_1, %c0_2] : memref<288x16xbf16, #tpu.memory_space<vmem>>, vector<288x16xbf16>
    %cst = arith.constant dense<0.000000e+00> : vector<32x16xf32>
    %2 = tpu.matmul %0, %1, %cst {dimension_numbers = #tpu.dot_dimension_numbers<[1], [0], [0], [1], [0, 0, 1, 1], [], []>} : vector<32x288xbf16>, vector<288x16xbf16>, vector<32x16xf32> -> vector<32x16xf32>
    %c0_3 = arith.constant 0 : index
    %c0_4 = arith.constant 0 : index
    %3 = vector.load %arg3[%c0_3, %c0_4] : memref<1x16xf32, #tpu.memory_space<vmem>>, vector<1x16xf32>
    %4 = vector.broadcast %3 : vector<1x16xf32> to vector<32x16xf32>
    %5 = arith.addf %2, %4 : vector<32x16xf32>
    %6 = arith.truncf %5 : vector<32x16xf32> to vector<32x16xbf16>
    %c0_5 = arith.constant 0 : index
    %c0_6 = arith.constant 0 : index
    %7 = vector.load %arg4[%c0_5, %c0_6] : memref<32x16xbf16, #tpu.memory_space<vmem>>, vector<32x16xbf16>
    tpu.vector_store %arg4[%c0_5, %c0_6], %6 {strides = array<i32>} : memref<32x16xbf16, #tpu.memory_space<vmem>>, vector<32x16xbf16>,
    return
  }
  func.func @transform_0(%arg0: i32) -> (i32, i32) {
    %c0_i32 = arith.constant 0 : i32
    %c0_i32_0 = arith.constant 0 : i32
    return %arg0, %c0_i32 : i32, i32
  }
  func.func @transform_1(%arg0: i32) -> (i32, i32) {
    %c0_i32 = arith.constant 0 : i32
    %c0_i32_0 = arith.constant 0 : i32
    %c0_i32_1 = arith.constant 0 : i32
    return %c0_i32, %c0_i32_0 : i32, i32
  }
  func.func @transform_2(%arg0: i32) -> (i32, i32) {
    %c0_i32 = arith.constant 0 : i32
    %c0_i32_0 = arith.constant 0 : i32
    %c0_i32_1 = arith.constant 0 : i32
    return %c0_i32, %c0_i32_0 : i32, i32
  }
  func.func @transform_3(%arg0: i32) -> (i32, i32) {
    %c0_i32 = arith.constant 0 : i32
    %c0_i32_0 = arith.constant 0 : i32
    return %arg0, %c0_i32 : i32, i32
  }
}

module attributes {stable_mosaic.version = 11 : i64} {
  func.func @_mm_kernel_single_k(%arg0: i32, %arg1: memref<512x108xbf16, #tpu.memory_space<vmem>>, %arg2: memref<108x8xbf16, #tpu.memory_space<vmem>>, %arg3: memref<512x8xbf16, #tpu.memory_space<vmem>>, %arg4: memref<1x1x8xf32, #tpu.memory_space<vmem>>, %arg5: memref<1x1x8xf32, #tpu.memory_space<vmem>>) attributes {dimension_semantics = [#tpu.dimension_semantics<parallel>], iteration_bounds = array<i64: 1>, scalar_prefetch = 0 : i64, scratch_operands = 0 : i64, tpu.core_type = #tpu.core_type<tc>, window_params = [{transform_indices = @transform_0, window_bounds = array<i64: 512, 108>}, {pipeline_mode = #tpu.pipeline_mode<synchronous>, transform_indices = @transform_1, window_bounds = array<i64: 108, 8>}, {transform_indices = @transform_2, window_bounds = array<i64: 512, 8>}, {transform_indices = @transform_3, window_bounds = array<i64: 1, 1, 8>}, {transform_indices = @transform_4, window_bounds = array<i64: 1, 1, 8>}]} {
    %c0 = arith.constant 0 : index
    %c0_0 = arith.constant 0 : index
    %0 = vector.load %arg1[%c0, %c0_0] : memref<512x108xbf16, #tpu.memory_space<vmem>>, vector<512x108xbf16>
    %c0_1 = arith.constant 0 : index
    %c0_2 = arith.constant 0 : index
    %1 = vector.load %arg2[%c0_1, %c0_2] : memref<108x8xbf16, #tpu.memory_space<vmem>>, vector<108x8xbf16>
    %cst = arith.constant dense<0.000000e+00> : vector<512x8xf32>
    %2 = tpu.matmul %0, %1, %cst {dimension_numbers = #tpu.dot_dimension_numbers<[1], [0], [0], [1], [0, 0, 1, 1], [], []>} : vector<512x108xbf16>, vector<108x8xbf16>, vector<512x8xf32> -> vector<512x8xf32>
    %3 = arith.truncf %2 : vector<512x8xf32> to vector<512x8xbf16>
    %c0_3 = arith.constant 0 : index
    %c0_4 = arith.constant 0 : index
    %4 = vector.load %arg3[%c0_3, %c0_4] : memref<512x8xbf16, #tpu.memory_space<vmem>>, vector<512x8xbf16>
    tpu.vector_store %arg3[%c0_3, %c0_4], %3 {strides = array<i32>} : memref<512x8xbf16, #tpu.memory_space<vmem>>, vector<512x8xbf16>,
    %cst_5 = arith.constant dense<0.000000e+00> : vector<8xf32>
    %5 = vector.multi_reduction <add>, %2, %cst_5 [0] : vector<512x8xf32> to vector<8xf32>
    %6 = vector.shape_cast %5 : vector<8xf32> to vector<1x8xf32>
    %7 = vector.shape_cast %6 : vector<1x8xf32> to vector<1x1x8xf32>
    %c0_6 = arith.constant 0 : index
    %c0_7 = arith.constant 0 : index
    %c0_8 = arith.constant 0 : index
    %8 = vector.load %arg4[%c0_6, %c0_7, %c0_8] : memref<1x1x8xf32, #tpu.memory_space<vmem>>, vector<1x1x8xf32>
    tpu.vector_store %arg4[%c0_6, %c0_7, %c0_8], %7 {strides = array<i32>} : memref<1x1x8xf32, #tpu.memory_space<vmem>>, vector<1x1x8xf32>,
    %9 = arith.mulf %2, %2 : vector<512x8xf32>
    %cst_9 = arith.constant dense<0.000000e+00> : vector<8xf32>
    %10 = vector.multi_reduction <add>, %9, %cst_9 [0] : vector<512x8xf32> to vector<8xf32>
    %11 = vector.shape_cast %10 : vector<8xf32> to vector<1x8xf32>
    %12 = vector.shape_cast %11 : vector<1x8xf32> to vector<1x1x8xf32>
    %c0_10 = arith.constant 0 : index
    %c0_11 = arith.constant 0 : index
    %c0_12 = arith.constant 0 : index
    %13 = vector.load %arg5[%c0_10, %c0_11, %c0_12] : memref<1x1x8xf32, #tpu.memory_space<vmem>>, vector<1x1x8xf32>
    tpu.vector_store %arg5[%c0_10, %c0_11, %c0_12], %12 {strides = array<i32>} : memref<1x1x8xf32, #tpu.memory_space<vmem>>, vector<1x1x8xf32>,
    return
  }
  func.func @transform_0(%arg0: i32) -> (i32, i32) {
    %c0_i32 = arith.constant 0 : i32
    %c0_i32_0 = arith.constant 0 : i32
    return %arg0, %c0_i32 : i32, i32
  }
  func.func @transform_1(%arg0: i32) -> (i32, i32) {
    %c0_i32 = arith.constant 0 : i32
    %c0_i32_0 = arith.constant 0 : i32
    %c0_i32_1 = arith.constant 0 : i32
    return %c0_i32, %c0_i32_0 : i32, i32
  }
  func.func @transform_2(%arg0: i32) -> (i32, i32) {
    %c0_i32 = arith.constant 0 : i32
    %c0_i32_0 = arith.constant 0 : i32
    return %arg0, %c0_i32 : i32, i32
  }
  func.func @transform_3(%arg0: i32) -> (i32, i32, i32) {
    %c0_i32 = arith.constant 0 : i32
    %c0_i32_0 = arith.constant 0 : i32
    %c0_i32_1 = arith.constant 0 : i32
    return %arg0, %c0_i32, %c0_i32_0 : i32, i32, i32
  }
  func.func @transform_4(%arg0: i32) -> (i32, i32, i32) {
    %c0_i32 = arith.constant 0 : i32
    %c0_i32_0 = arith.constant 0 : i32
    %c0_i32_1 = arith.constant 0 : i32
    return %arg0, %c0_i32, %c0_i32_0 : i32, i32, i32
  }
}

module attributes {stable_mosaic.version = 11 : i64} {
  func.func @_mm_kernel_single_k(%arg0: i32, %arg1: memref<32x432xbf16, #tpu.memory_space<vmem>>, %arg2: memref<432x32xbf16, #tpu.memory_space<vmem>>, %arg3: memref<32x32xbf16, #tpu.memory_space<vmem>>, %arg4: memref<1x1x32xf32, #tpu.memory_space<vmem>>, %arg5: memref<1x1x32xf32, #tpu.memory_space<vmem>>) attributes {dimension_semantics = [#tpu.dimension_semantics<parallel>], iteration_bounds = array<i64: 1>, scalar_prefetch = 0 : i64, scratch_operands = 0 : i64, tpu.core_type = #tpu.core_type<tc>, window_params = [{transform_indices = @transform_0, window_bounds = array<i64: 32, 432>}, {pipeline_mode = #tpu.pipeline_mode<synchronous>, transform_indices = @transform_1, window_bounds = array<i64: 432, 32>}, {transform_indices = @transform_2, window_bounds = array<i64: 32, 32>}, {transform_indices = @transform_3, window_bounds = array<i64: 1, 1, 32>}, {transform_indices = @transform_4, window_bounds = array<i64: 1, 1, 32>}]} {
    %c0 = arith.constant 0 : index
    %c0_0 = arith.constant 0 : index
    %0 = vector.load %arg1[%c0, %c0_0] : memref<32x432xbf16, #tpu.memory_space<vmem>>, vector<32x432xbf16>
    %c0_1 = arith.constant 0 : index
    %c0_2 = arith.constant 0 : index
    %1 = vector.load %arg2[%c0_1, %c0_2] : memref<432x32xbf16, #tpu.memory_space<vmem>>, vector<432x32xbf16>
    %cst = arith.constant dense<0.000000e+00> : vector<32x32xf32>
    %2 = tpu.matmul %0, %1, %cst {dimension_numbers = #tpu.dot_dimension_numbers<[1], [0], [0], [1], [0, 0, 1, 1], [], []>} : vector<32x432xbf16>, vector<432x32xbf16>, vector<32x32xf32> -> vector<32x32xf32>
    %3 = arith.truncf %2 : vector<32x32xf32> to vector<32x32xbf16>
    %c0_3 = arith.constant 0 : index
    %c0_4 = arith.constant 0 : index
    %4 = vector.load %arg3[%c0_3, %c0_4] : memref<32x32xbf16, #tpu.memory_space<vmem>>, vector<32x32xbf16>
    tpu.vector_store %arg3[%c0_3, %c0_4], %3 {strides = array<i32>} : memref<32x32xbf16, #tpu.memory_space<vmem>>, vector<32x32xbf16>,
    %cst_5 = arith.constant dense<0.000000e+00> : vector<32xf32>
    %5 = vector.multi_reduction <add>, %2, %cst_5 [0] : vector<32x32xf32> to vector<32xf32>
    %6 = vector.shape_cast %5 : vector<32xf32> to vector<1x32xf32>
    %7 = vector.shape_cast %6 : vector<1x32xf32> to vector<1x1x32xf32>
    %c0_6 = arith.constant 0 : index
    %c0_7 = arith.constant 0 : index
    %c0_8 = arith.constant 0 : index
    %8 = vector.load %arg4[%c0_6, %c0_7, %c0_8] : memref<1x1x32xf32, #tpu.memory_space<vmem>>, vector<1x1x32xf32>
    tpu.vector_store %arg4[%c0_6, %c0_7, %c0_8], %7 {strides = array<i32>} : memref<1x1x32xf32, #tpu.memory_space<vmem>>, vector<1x1x32xf32>,
    %9 = arith.mulf %2, %2 : vector<32x32xf32>
    %cst_9 = arith.constant dense<0.000000e+00> : vector<32xf32>
    %10 = vector.multi_reduction <add>, %9, %cst_9 [0] : vector<32x32xf32> to vector<32xf32>
    %11 = vector.shape_cast %10 : vector<32xf32> to vector<1x32xf32>
    %12 = vector.shape_cast %11 : vector<1x32xf32> to vector<1x1x32xf32>
    %c0_10 = arith.constant 0 : index
    %c0_11 = arith.constant 0 : index
    %c0_12 = arith.constant 0 : index
    %13 = vector.load %arg5[%c0_10, %c0_11, %c0_12] : memref<1x1x32xf32, #tpu.memory_space<vmem>>, vector<1x1x32xf32>
    tpu.vector_store %arg5[%c0_10, %c0_11, %c0_12], %12 {strides = array<i32>} : memref<1x1x32xf32, #tpu.memory_space<vmem>>, vector<1x1x32xf32>,
    return
  }
  func.func @transform_0(%arg0: i32) -> (i32, i32) {
    %c0_i32 = arith.constant 0 : i32
    %c0_i32_0 = arith.constant 0 : i32
    return %arg0, %c0_i32 : i32, i32
  }
  func.func @transform_1(%arg0: i32) -> (i32, i32) {
    %c0_i32 = arith.constant 0 : i32
    %c0_i32_0 = arith.constant 0 : i32
    %c0_i32_1 = arith.constant 0 : i32
    return %c0_i32, %c0_i32_0 : i32, i32
  }
  func.func @transform_2(%arg0: i32) -> (i32, i32) {
    %c0_i32 = arith.constant 0 : i32
    %c0_i32_0 = arith.constant 0 : i32
    return %arg0, %c0_i32 : i32, i32
  }
  func.func @transform_3(%arg0: i32) -> (i32, i32, i32) {
    %c0_i32 = arith.constant 0 : i32
    %c0_i32_0 = arith.constant 0 : i32
    %c0_i32_1 = arith.constant 0 : i32
    return %arg0, %c0_i32, %c0_i32_0 : i32, i32, i32
  }
  func.func @transform_4(%arg0: i32) -> (i32, i32, i32) {
    %c0_i32 = arith.constant 0 : i32
    %c0_i32_0 = arith.constant 0 : i32
    %c0_i32_1 = arith.constant 0 : i32
    return %arg0, %c0_i32, %c0_i32_0 : i32, i32, i32
  }
}

module attributes {stable_mosaic.version = 11 : i64} {
  func.func @_mm_kernel_single_k(%arg0: i32, %arg1: memref<32x32xbf16, #tpu.memory_space<vmem>>, %arg2: memref<32x128xbf16, #tpu.memory_space<vmem>>, %arg3: memref<32x128xbf16, #tpu.memory_space<vmem>>, %arg4: memref<1x1x128xf32, #tpu.memory_space<vmem>>, %arg5: memref<1x1x128xf32, #tpu.memory_space<vmem>>) attributes {dimension_semantics = [#tpu.dimension_semantics<parallel>], iteration_bounds = array<i64: 1>, scalar_prefetch = 0 : i64, scratch_operands = 0 : i64, tpu.core_type = #tpu.core_type<tc>, window_params = [{transform_indices = @transform_0, window_bounds = array<i64: 32, 32>}, {pipeline_mode = #tpu.pipeline_mode<synchronous>, transform_indices = @transform_1, window_bounds = array<i64: 32, 128>}, {transform_indices = @transform_2, window_bounds = array<i64: 32, 128>}, {transform_indices = @transform_3, window_bounds = array<i64: 1, 1, 128>}, {transform_indices = @transform_4, window_bounds = array<i64: 1, 1, 128>}]} {
    %c0 = arith.constant 0 : index
    %c0_0 = arith.constant 0 : index
    %0 = vector.load %arg1[%c0, %c0_0] : memref<32x32xbf16, #tpu.memory_space<vmem>>, vector<32x32xbf16>
    %c0_1 = arith.constant 0 : index
    %c0_2 = arith.constant 0 : index
    %1 = vector.load %arg2[%c0_1, %c0_2] : memref<32x128xbf16, #tpu.memory_space<vmem>>, vector<32x128xbf16>
    %cst = arith.constant dense<0.000000e+00> : vector<32x128xf32>
    %2 = tpu.matmul %0, %1, %cst {dimension_numbers = #tpu.dot_dimension_numbers<[1], [0], [0], [1], [0, 0, 1, 1], [], []>} : vector<32x32xbf16>, vector<32x128xbf16>, vector<32x128xf32> -> vector<32x128xf32>
    %3 = arith.truncf %2 : vector<32x128xf32> to vector<32x128xbf16>
    %c0_3 = arith.constant 0 : index
    %c0_4 = arith.constant 0 : index
    %4 = vector.load %arg3[%c0_3, %c0_4] : memref<32x128xbf16, #tpu.memory_space<vmem>>, vector<32x128xbf16>
    tpu.vector_store %arg3[%c0_3, %c0_4], %3 {strides = array<i32>} : memref<32x128xbf16, #tpu.memory_space<vmem>>, vector<32x128xbf16>,
    %cst_5 = arith.constant dense<0.000000e+00> : vector<128xf32>
    %5 = vector.multi_reduction <add>, %2, %cst_5 [0] : vector<32x128xf32> to vector<128xf32>
    %6 = vector.shape_cast %5 : vector<128xf32> to vector<1x128xf32>
    %7 = vector.shape_cast %6 : vector<1x128xf32> to vector<1x1x128xf32>
    %c0_6 = arith.constant 0 : index
    %c0_7 = arith.constant 0 : index
    %c0_8 = arith.constant 0 : index
    %8 = vector.load %arg4[%c0_6, %c0_7, %c0_8] : memref<1x1x128xf32, #tpu.memory_space<vmem>>, vector<1x1x128xf32>
    tpu.vector_store %arg4[%c0_6, %c0_7, %c0_8], %7 {strides = array<i32>} : memref<1x1x128xf32, #tpu.memory_space<vmem>>, vector<1x1x128xf32>,
    %9 = arith.mulf %2, %2 : vector<32x128xf32>
    %cst_9 = arith.constant dense<0.000000e+00> : vector<128xf32>
    %10 = vector.multi_reduction <add>, %9, %cst_9 [0] : vector<32x128xf32> to vector<128xf32>
    %11 = vector.shape_cast %10 : vector<128xf32> to vector<1x128xf32>
    %12 = vector.shape_cast %11 : vector<1x128xf32> to vector<1x1x128xf32>
    %c0_10 = arith.constant 0 : index
    %c0_11 = arith.constant 0 : index
    %c0_12 = arith.constant 0 : index
    %13 = vector.load %arg5[%c0_10, %c0_11, %c0_12] : memref<1x1x128xf32, #tpu.memory_space<vmem>>, vector<1x1x128xf32>
    tpu.vector_store %arg5[%c0_10, %c0_11, %c0_12], %12 {strides = array<i32>} : memref<1x1x128xf32, #tpu.memory_space<vmem>>, vector<1x1x128xf32>,
    return
  }
  func.func @transform_0(%arg0: i32) -> (i32, i32) {
    %c0_i32 = arith.constant 0 : i32
    %c0_i32_0 = arith.constant 0 : i32
    return %arg0, %c0_i32 : i32, i32
  }
  func.func @transform_1(%arg0: i32) -> (i32, i32) {
    %c0_i32 = arith.constant 0 : i32
    %c0_i32_0 = arith.constant 0 : i32
    %c0_i32_1 = arith.constant 0 : i32
    return %c0_i32, %c0_i32_0 : i32, i32
  }
  func.func @transform_2(%arg0: i32) -> (i32, i32) {
    %c0_i32 = arith.constant 0 : i32
    %c0_i32_0 = arith.constant 0 : i32
    return %arg0, %c0_i32 : i32, i32
  }
  func.func @transform_3(%arg0: i32) -> (i32, i32, i32) {
    %c0_i32 = arith.constant 0 : i32
    %c0_i32_0 = arith.constant 0 : i32
    %c0_i32_1 = arith.constant 0 : i32
    return %arg0, %c0_i32, %c0_i32_0 : i32, i32, i32
  }
  func.func @transform_4(%arg0: i32) -> (i32, i32, i32) {
    %c0_i32 = arith.constant 0 : i32
    %c0_i32_0 = arith.constant 0 : i32
    %c0_i32_1 = arith.constant 0 : i32
    return %arg0, %c0_i32, %c0_i32_0 : i32, i32, i32
  }
}

module attributes {stable_mosaic.version = 11 : i64} {
  func.func @_mm_kernel_single_k(%arg0: i32, %arg1: memref<32x32xbf16, #tpu.memory_space<vmem>>, %arg2: memref<32x64xbf16, #tpu.memory_space<vmem>>, %arg3: memref<32x64xbf16, #tpu.memory_space<vmem>>, %arg4: memref<1x1x64xf32, #tpu.memory_space<vmem>>, %arg5: memref<1x1x64xf32, #tpu.memory_space<vmem>>) attributes {dimension_semantics = [#tpu.dimension_semantics<parallel>], iteration_bounds = array<i64: 1>, scalar_prefetch = 0 : i64, scratch_operands = 0 : i64, tpu.core_type = #tpu.core_type<tc>, window_params = [{transform_indices = @transform_0, window_bounds = array<i64: 32, 32>}, {pipeline_mode = #tpu.pipeline_mode<synchronous>, transform_indices = @transform_1, window_bounds = array<i64: 32, 64>}, {transform_indices = @transform_2, window_bounds = array<i64: 32, 64>}, {transform_indices = @transform_3, window_bounds = array<i64: 1, 1, 64>}, {transform_indices = @transform_4, window_bounds = array<i64: 1, 1, 64>}]} {
    %c0 = arith.constant 0 : index
    %c0_0 = arith.constant 0 : index
    %0 = vector.load %arg1[%c0, %c0_0] : memref<32x32xbf16, #tpu.memory_space<vmem>>, vector<32x32xbf16>
    %c0_1 = arith.constant 0 : index
    %c0_2 = arith.constant 0 : index
    %1 = vector.load %arg2[%c0_1, %c0_2] : memref<32x64xbf16, #tpu.memory_space<vmem>>, vector<32x64xbf16>
    %cst = arith.constant dense<0.000000e+00> : vector<32x64xf32>
    %2 = tpu.matmul %0, %1, %cst {dimension_numbers = #tpu.dot_dimension_numbers<[1], [0], [0], [1], [0, 0, 1, 1], [], []>} : vector<32x32xbf16>, vector<32x64xbf16>, vector<32x64xf32> -> vector<32x64xf32>
    %3 = arith.truncf %2 : vector<32x64xf32> to vector<32x64xbf16>
    %c0_3 = arith.constant 0 : index
    %c0_4 = arith.constant 0 : index
    %4 = vector.load %arg3[%c0_3, %c0_4] : memref<32x64xbf16, #tpu.memory_space<vmem>>, vector<32x64xbf16>
    tpu.vector_store %arg3[%c0_3, %c0_4], %3 {strides = array<i32>} : memref<32x64xbf16, #tpu.memory_space<vmem>>, vector<32x64xbf16>,
    %cst_5 = arith.constant dense<0.000000e+00> : vector<64xf32>
    %5 = vector.multi_reduction <add>, %2, %cst_5 [0] : vector<32x64xf32> to vector<64xf32>
    %6 = vector.shape_cast %5 : vector<64xf32> to vector<1x64xf32>
    %7 = vector.shape_cast %6 : vector<1x64xf32> to vector<1x1x64xf32>
    %c0_6 = arith.constant 0 : index
    %c0_7 = arith.constant 0 : index
    %c0_8 = arith.constant 0 : index
    %8 = vector.load %arg4[%c0_6, %c0_7, %c0_8] : memref<1x1x64xf32, #tpu.memory_space<vmem>>, vector<1x1x64xf32>
    tpu.vector_store %arg4[%c0_6, %c0_7, %c0_8], %7 {strides = array<i32>} : memref<1x1x64xf32, #tpu.memory_space<vmem>>, vector<1x1x64xf32>,
    %9 = arith.mulf %2, %2 : vector<32x64xf32>
    %cst_9 = arith.constant dense<0.000000e+00> : vector<64xf32>
    %10 = vector.multi_reduction <add>, %9, %cst_9 [0] : vector<32x64xf32> to vector<64xf32>
    %11 = vector.shape_cast %10 : vector<64xf32> to vector<1x64xf32>
    %12 = vector.shape_cast %11 : vector<1x64xf32> to vector<1x1x64xf32>
    %c0_10 = arith.constant 0 : index
    %c0_11 = arith.constant 0 : index
    %c0_12 = arith.constant 0 : index
    %13 = vector.load %arg5[%c0_10, %c0_11, %c0_12] : memref<1x1x64xf32, #tpu.memory_space<vmem>>, vector<1x1x64xf32>
    tpu.vector_store %arg5[%c0_10, %c0_11, %c0_12], %12 {strides = array<i32>} : memref<1x1x64xf32, #tpu.memory_space<vmem>>, vector<1x1x64xf32>,
    return
  }
  func.func @transform_0(%arg0: i32) -> (i32, i32) {
    %c0_i32 = arith.constant 0 : i32
    %c0_i32_0 = arith.constant 0 : i32
    return %arg0, %c0_i32 : i32, i32
  }
  func.func @transform_1(%arg0: i32) -> (i32, i32) {
    %c0_i32 = arith.constant 0 : i32
    %c0_i32_0 = arith.constant 0 : i32
    %c0_i32_1 = arith.constant 0 : i32
    return %c0_i32, %c0_i32_0 : i32, i32
  }
  func.func @transform_2(%arg0: i32) -> (i32, i32) {
    %c0_i32 = arith.constant 0 : i32
    %c0_i32_0 = arith.constant 0 : i32
    return %arg0, %c0_i32 : i32, i32
  }
  func.func @transform_3(%arg0: i32) -> (i32, i32, i32) {
    %c0_i32 = arith.constant 0 : i32
    %c0_i32_0 = arith.constant 0 : i32
    %c0_i32_1 = arith.constant 0 : i32
    return %arg0, %c0_i32, %c0_i32_0 : i32, i32, i32
  }
  func.func @transform_4(%arg0: i32) -> (i32, i32, i32) {
    %c0_i32 = arith.constant 0 : i32
    %c0_i32_0 = arith.constant 0 : i32
    %c0_i32_1 = arith.constant 0 : i32
    return %arg0, %c0_i32, %c0_i32_0 : i32, i32, i32
  }
}

module attributes {stable_mosaic.version = 11 : i64} {
  func.func @_affine_kernel(%arg0: i32, %arg1: memref<4x512xbf16, #tpu.memory_space<vmem>>, %arg2: memref<1x512xf32, #tpu.memory_space<vmem>>, %arg3: memref<1x512xf32, #tpu.memory_space<vmem>>, %arg4: memref<4x512xbf16, #tpu.memory_space<vmem>>, %arg5: memref<4x512xbf16, #tpu.memory_space<vmem>>, %arg6: memref<4x512xbf16, #tpu.memory_space<vmem>>) attributes {dimension_semantics = [#tpu.dimension_semantics<parallel>], iteration_bounds = array<i64: 1>, scalar_prefetch = 0 : i64, scratch_operands = 0 : i64, tpu.core_type = #tpu.core_type<tc>, window_params = [{transform_indices = @transform_0, window_bounds = array<i64: 4, 512>}, {pipeline_mode = #tpu.pipeline_mode<synchronous>, transform_indices = @transform_1, window_bounds = array<i64: 1, 512>}, {pipeline_mode = #tpu.pipeline_mode<synchronous>, transform_indices = @transform_2, window_bounds = array<i64: 1, 512>}, {transform_indices = @transform_3, window_bounds = array<i64: 4, 512>}, {transform_indices = @transform_4, window_bounds = array<i64: 4, 512>}, {transform_indices = @transform_5, window_bounds = array<i64: 4, 512>}]} {
    %c0 = arith.constant 0 : index
    %c0_0 = arith.constant 0 : index
    %0 = vector.load %arg1[%c0, %c0_0] : memref<4x512xbf16, #tpu.memory_space<vmem>>, vector<4x512xbf16>
    %1 = arith.extf %0 : vector<4x512xbf16> to vector<4x512xf32>
    %c0_1 = arith.constant 0 : index
    %c0_2 = arith.constant 0 : index
    %2 = vector.load %arg2[%c0_1, %c0_2] : memref<1x512xf32, #tpu.memory_space<vmem>>, vector<1x512xf32>
    %3 = vector.broadcast %2 : vector<1x512xf32> to vector<4x512xf32>
    %4 = arith.mulf %1, %3 : vector<4x512xf32>
    %c0_3 = arith.constant 0 : index
    %c0_4 = arith.constant 0 : index
    %5 = vector.load %arg3[%c0_3, %c0_4] : memref<1x512xf32, #tpu.memory_space<vmem>>, vector<1x512xf32>
    %6 = vector.broadcast %5 : vector<1x512xf32> to vector<4x512xf32>
    %7 = arith.addf %4, %6 : vector<4x512xf32>
    %c0_5 = arith.constant 0 : index
    %c0_6 = arith.constant 0 : index
    %8 = vector.load %arg4[%c0_5, %c0_6] : memref<4x512xbf16, #tpu.memory_space<vmem>>, vector<4x512xbf16>
    %9 = arith.extf %8 : vector<4x512xbf16> to vector<4x512xf32>
    %10 = arith.addf %7, %9 : vector<4x512xf32>
    %c0_7 = arith.constant 0 : index
    %c0_8 = arith.constant 0 : index
    %11 = vector.load %arg5[%c0_7, %c0_8] : memref<4x512xbf16, #tpu.memory_space<vmem>>, vector<4x512xbf16>
    %12 = arith.extf %11 : vector<4x512xbf16> to vector<4x512xf32>
    %13 = arith.addf %10, %12 : vector<4x512xf32>
    %14 = arith.truncf %13 : vector<4x512xf32> to vector<4x512xbf16>
    %c0_9 = arith.constant 0 : index
    %c0_10 = arith.constant 0 : index
    %15 = vector.load %arg6[%c0_9, %c0_10] : memref<4x512xbf16, #tpu.memory_space<vmem>>, vector<4x512xbf16>
    tpu.vector_store %arg6[%c0_9, %c0_10], %14 {strides = array<i32>} : memref<4x512xbf16, #tpu.memory_space<vmem>>, vector<4x512xbf16>,
    return
  }
  func.func @transform_0(%arg0: i32) -> (i32, i32) {
    %c0_i32 = arith.constant 0 : i32
    %c0_i32_0 = arith.constant 0 : i32
    return %arg0, %c0_i32 : i32, i32
  }
  func.func @transform_1(%arg0: i32) -> (i32, i32) {
    %c0_i32 = arith.constant 0 : i32
    %c0_i32_0 = arith.constant 0 : i32
    %c0_i32_1 = arith.constant 0 : i32
    return %c0_i32, %c0_i32_0 : i32, i32
  }
  func.func @transform_2(%arg0: i32) -> (i32, i32) {
    %c0_i32 = arith.constant 0 : i32
    %c0_i32_0 = arith.constant 0 : i32
    %c0_i32_1 = arith.constant 0 : i32
    return %c0_i32, %c0_i32_0 : i32, i32
  }
  func.func @transform_3(%arg0: i32) -> (i32, i32) {
    %c0_i32 = arith.constant 0 : i32
    %c0_i32_0 = arith.constant 0 : i32
    return %arg0, %c0_i32 : i32, i32
  }
  func.func @transform_4(%arg0: i32) -> (i32, i32) {
    %c0_i32 = arith.constant 0 : i32
    %c0_i32_0 = arith.constant 0 : i32
    return %arg0, %c0_i32 : i32, i32
  }
  func.func @transform_5(%arg0: i32) -> (i32, i32) {
    %c0_i32 = arith.constant 0 : i32
    %c0_i32_0 = arith.constant 0 : i32
    return %arg0, %c0_i32 : i32, i32
  }
}

module attributes {stable_mosaic.version = 11 : i64} {
  func.func @_mm_kernel_single_k(%arg0: i32, %arg1: memref<128x16xbf16, #tpu.memory_space<vmem>>, %arg2: memref<16x32xbf16, #tpu.memory_space<vmem>>, %arg3: memref<128x32xbf16, #tpu.memory_space<vmem>>, %arg4: memref<1x1x32xf32, #tpu.memory_space<vmem>>, %arg5: memref<1x1x32xf32, #tpu.memory_space<vmem>>) attributes {dimension_semantics = [#tpu.dimension_semantics<parallel>], iteration_bounds = array<i64: 1>, scalar_prefetch = 0 : i64, scratch_operands = 0 : i64, tpu.core_type = #tpu.core_type<tc>, window_params = [{transform_indices = @transform_0, window_bounds = array<i64: 128, 16>}, {pipeline_mode = #tpu.pipeline_mode<synchronous>, transform_indices = @transform_1, window_bounds = array<i64: 16, 32>}, {transform_indices = @transform_2, window_bounds = array<i64: 128, 32>}, {transform_indices = @transform_3, window_bounds = array<i64: 1, 1, 32>}, {transform_indices = @transform_4, window_bounds = array<i64: 1, 1, 32>}]} {
    %c0 = arith.constant 0 : index
    %c0_0 = arith.constant 0 : index
    %0 = vector.load %arg1[%c0, %c0_0] : memref<128x16xbf16, #tpu.memory_space<vmem>>, vector<128x16xbf16>
    %c0_1 = arith.constant 0 : index
    %c0_2 = arith.constant 0 : index
    %1 = vector.load %arg2[%c0_1, %c0_2] : memref<16x32xbf16, #tpu.memory_space<vmem>>, vector<16x32xbf16>
    %cst = arith.constant dense<0.000000e+00> : vector<128x32xf32>
    %2 = tpu.matmul %0, %1, %cst {dimension_numbers = #tpu.dot_dimension_numbers<[1], [0], [0], [1], [0, 0, 1, 1], [], []>} : vector<128x16xbf16>, vector<16x32xbf16>, vector<128x32xf32> -> vector<128x32xf32>
    %3 = arith.truncf %2 : vector<128x32xf32> to vector<128x32xbf16>
    %c0_3 = arith.constant 0 : index
    %c0_4 = arith.constant 0 : index
    %4 = vector.load %arg3[%c0_3, %c0_4] : memref<128x32xbf16, #tpu.memory_space<vmem>>, vector<128x32xbf16>
    tpu.vector_store %arg3[%c0_3, %c0_4], %3 {strides = array<i32>} : memref<128x32xbf16, #tpu.memory_space<vmem>>, vector<128x32xbf16>,
    %cst_5 = arith.constant dense<0.000000e+00> : vector<32xf32>
    %5 = vector.multi_reduction <add>, %2, %cst_5 [0] : vector<128x32xf32> to vector<32xf32>
    %6 = vector.shape_cast %5 : vector<32xf32> to vector<1x32xf32>
    %7 = vector.shape_cast %6 : vector<1x32xf32> to vector<1x1x32xf32>
    %c0_6 = arith.constant 0 : index
    %c0_7 = arith.constant 0 : index
    %c0_8 = arith.constant 0 : index
    %8 = vector.load %arg4[%c0_6, %c0_7, %c0_8] : memref<1x1x32xf32, #tpu.memory_space<vmem>>, vector<1x1x32xf32>
    tpu.vector_store %arg4[%c0_6, %c0_7, %c0_8], %7 {strides = array<i32>} : memref<1x1x32xf32, #tpu.memory_space<vmem>>, vector<1x1x32xf32>,
    %9 = arith.mulf %2, %2 : vector<128x32xf32>
    %cst_9 = arith.constant dense<0.000000e+00> : vector<32xf32>
    %10 = vector.multi_reduction <add>, %9, %cst_9 [0] : vector<128x32xf32> to vector<32xf32>
    %11 = vector.shape_cast %10 : vector<32xf32> to vector<1x32xf32>
    %12 = vector.shape_cast %11 : vector<1x32xf32> to vector<1x1x32xf32>
    %c0_10 = arith.constant 0 : index
    %c0_11 = arith.constant 0 : index
    %c0_12 = arith.constant 0 : index
    %13 = vector.load %arg5[%c0_10, %c0_11, %c0_12] : memref<1x1x32xf32, #tpu.memory_space<vmem>>, vector<1x1x32xf32>
    tpu.vector_store %arg5[%c0_10, %c0_11, %c0_12], %12 {strides = array<i32>} : memref<1x1x32xf32, #tpu.memory_space<vmem>>, vector<1x1x32xf32>,
    return
  }
  func.func @transform_0(%arg0: i32) -> (i32, i32) {
    %c0_i32 = arith.constant 0 : i32
    %c0_i32_0 = arith.constant 0 : i32
    return %arg0, %c0_i32 : i32, i32
  }
  func.func @transform_1(%arg0: i32) -> (i32, i32) {
    %c0_i32 = arith.constant 0 : i32
    %c0_i32_0 = arith.constant 0 : i32
    %c0_i32_1 = arith.constant 0 : i32
    return %c0_i32, %c0_i32_0 : i32, i32
  }
  func.func @transform_2(%arg0: i32) -> (i32, i32) {
    %c0_i32 = arith.constant 0 : i32
    %c0_i32_0 = arith.constant 0 : i32
    return %arg0, %c0_i32 : i32, i32
  }
  func.func @transform_3(%arg0: i32) -> (i32, i32, i32) {
    %c0_i32 = arith.constant 0 : i32
    %c0_i32_0 = arith.constant 0 : i32
    %c0_i32_1 = arith.constant 0 : i32
    return %arg0, %c0_i32, %c0_i32_0 : i32, i32, i32
  }
  func.func @transform_4(%arg0: i32) -> (i32, i32, i32) {
    %c0_i32 = arith.constant 0 : i32
    %c0_i32_0 = arith.constant 0 : i32
    %c0_i32_1 = arith.constant 0 : i32
    return %arg0, %c0_i32, %c0_i32_0 : i32, i32, i32
  }
}

module attributes {stable_mosaic.version = 11 : i64} {
  func.func @_affine_kernel(%arg0: i32, %arg1: memref<8x512xbf16, #tpu.memory_space<vmem>>, %arg2: memref<1x512xf32, #tpu.memory_space<vmem>>, %arg3: memref<1x512xf32, #tpu.memory_space<vmem>>, %arg4: memref<8x512xbf16, #tpu.memory_space<vmem>>, %arg5: memref<8x512xbf16, #tpu.memory_space<vmem>>, %arg6: memref<8x512xbf16, #tpu.memory_space<vmem>>) attributes {dimension_semantics = [#tpu.dimension_semantics<parallel>], iteration_bounds = array<i64: 1>, scalar_prefetch = 0 : i64, scratch_operands = 0 : i64, tpu.core_type = #tpu.core_type<tc>, window_params = [{transform_indices = @transform_0, window_bounds = array<i64: 8, 512>}, {pipeline_mode = #tpu.pipeline_mode<synchronous>, transform_indices = @transform_1, window_bounds = array<i64: 1, 512>}, {pipeline_mode = #tpu.pipeline_mode<synchronous>, transform_indices = @transform_2, window_bounds = array<i64: 1, 512>}, {transform_indices = @transform_3, window_bounds = array<i64: 8, 512>}, {transform_indices = @transform_4, window_bounds = array<i64: 8, 512>}, {transform_indices = @transform_5, window_bounds = array<i64: 8, 512>}]} {
    %c0 = arith.constant 0 : index
    %c0_0 = arith.constant 0 : index
    %0 = vector.load %arg1[%c0, %c0_0] : memref<8x512xbf16, #tpu.memory_space<vmem>>, vector<8x512xbf16>
    %1 = arith.extf %0 : vector<8x512xbf16> to vector<8x512xf32>
    %c0_1 = arith.constant 0 : index
    %c0_2 = arith.constant 0 : index
    %2 = vector.load %arg2[%c0_1, %c0_2] : memref<1x512xf32, #tpu.memory_space<vmem>>, vector<1x512xf32>
    %3 = vector.broadcast %2 : vector<1x512xf32> to vector<8x512xf32>
    %4 = arith.mulf %1, %3 : vector<8x512xf32>
    %c0_3 = arith.constant 0 : index
    %c0_4 = arith.constant 0 : index
    %5 = vector.load %arg3[%c0_3, %c0_4] : memref<1x512xf32, #tpu.memory_space<vmem>>, vector<1x512xf32>
    %6 = vector.broadcast %5 : vector<1x512xf32> to vector<8x512xf32>
    %7 = arith.addf %4, %6 : vector<8x512xf32>
    %c0_5 = arith.constant 0 : index
    %c0_6 = arith.constant 0 : index
    %8 = vector.load %arg4[%c0_5, %c0_6] : memref<8x512xbf16, #tpu.memory_space<vmem>>, vector<8x512xbf16>
    %9 = arith.extf %8 : vector<8x512xbf16> to vector<8x512xf32>
    %10 = arith.addf %7, %9 : vector<8x512xf32>
    %c0_7 = arith.constant 0 : index
    %c0_8 = arith.constant 0 : index
    %11 = vector.load %arg5[%c0_7, %c0_8] : memref<8x512xbf16, #tpu.memory_space<vmem>>, vector<8x512xbf16>
    %12 = arith.extf %11 : vector<8x512xbf16> to vector<8x512xf32>
    %13 = arith.addf %10, %12 : vector<8x512xf32>
    %14 = arith.truncf %13 : vector<8x512xf32> to vector<8x512xbf16>
    %c0_9 = arith.constant 0 : index
    %c0_10 = arith.constant 0 : index
    %15 = vector.load %arg6[%c0_9, %c0_10] : memref<8x512xbf16, #tpu.memory_space<vmem>>, vector<8x512xbf16>
    tpu.vector_store %arg6[%c0_9, %c0_10], %14 {strides = array<i32>} : memref<8x512xbf16, #tpu.memory_space<vmem>>, vector<8x512xbf16>,
    return
  }
  func.func @transform_0(%arg0: i32) -> (i32, i32) {
    %c0_i32 = arith.constant 0 : i32
    %c0_i32_0 = arith.constant 0 : i32
    return %arg0, %c0_i32 : i32, i32
  }
  func.func @transform_1(%arg0: i32) -> (i32, i32) {
    %c0_i32 = arith.constant 0 : i32
    %c0_i32_0 = arith.constant 0 : i32
    %c0_i32_1 = arith.constant 0 : i32
    return %c0_i32, %c0_i32_0 : i32, i32
  }
  func.func @transform_2(%arg0: i32) -> (i32, i32) {
    %c0_i32 = arith.constant 0 : i32
    %c0_i32_0 = arith.constant 0 : i32
    %c0_i32_1 = arith.constant 0 : i32
    return %c0_i32, %c0_i32_0 : i32, i32
  }
  func.func @transform_3(%arg0: i32) -> (i32, i32) {
    %c0_i32 = arith.constant 0 : i32
    %c0_i32_0 = arith.constant 0 : i32
    return %arg0, %c0_i32 : i32, i32
  }
  func.func @transform_4(%arg0: i32) -> (i32, i32) {
    %c0_i32 = arith.constant 0 : i32
    %c0_i32_0 = arith.constant 0 : i32
    return %arg0, %c0_i32 : i32, i32
  }
  func.func @transform_5(%arg0: i32) -> (i32, i32) {
    %c0_i32 = arith.constant 0 : i32
    %c0_i32_0 = arith.constant 0 : i32
    return %arg0, %c0_i32 : i32, i32
  }
}

module attributes {stable_mosaic.version = 11 : i64} {
  func.func @_mm_kernel_single_k(%arg0: i32, %arg1: memref<512x72xbf16, #tpu.memory_space<vmem>>, %arg2: memref<72x12xbf16, #tpu.memory_space<vmem>>, %arg3: memref<1x12xf32, #tpu.memory_space<vmem>>, %arg4: memref<512x12xbf16, #tpu.memory_space<vmem>>) attributes {dimension_semantics = [#tpu.dimension_semantics<parallel>], iteration_bounds = array<i64: 1>, scalar_prefetch = 0 : i64, scratch_operands = 0 : i64, tpu.core_type = #tpu.core_type<tc>, window_params = [{transform_indices = @transform_0, window_bounds = array<i64: 512, 72>}, {pipeline_mode = #tpu.pipeline_mode<synchronous>, transform_indices = @transform_1, window_bounds = array<i64: 72, 12>}, {pipeline_mode = #tpu.pipeline_mode<synchronous>, transform_indices = @transform_2, window_bounds = array<i64: 1, 12>}, {transform_indices = @transform_3, window_bounds = array<i64: 512, 12>}]} {
    %c0 = arith.constant 0 : index
    %c0_0 = arith.constant 0 : index
    %0 = vector.load %arg1[%c0, %c0_0] : memref<512x72xbf16, #tpu.memory_space<vmem>>, vector<512x72xbf16>
    %c0_1 = arith.constant 0 : index
    %c0_2 = arith.constant 0 : index
    %1 = vector.load %arg2[%c0_1, %c0_2] : memref<72x12xbf16, #tpu.memory_space<vmem>>, vector<72x12xbf16>
    %cst = arith.constant dense<0.000000e+00> : vector<512x12xf32>
    %2 = tpu.matmul %0, %1, %cst {dimension_numbers = #tpu.dot_dimension_numbers<[1], [0], [0], [1], [0, 0, 1, 1], [], []>} : vector<512x72xbf16>, vector<72x12xbf16>, vector<512x12xf32> -> vector<512x12xf32>
    %c0_3 = arith.constant 0 : index
    %c0_4 = arith.constant 0 : index
    %3 = vector.load %arg3[%c0_3, %c0_4] : memref<1x12xf32, #tpu.memory_space<vmem>>, vector<1x12xf32>
    %4 = vector.broadcast %3 : vector<1x12xf32> to vector<512x12xf32>
    %5 = arith.addf %2, %4 : vector<512x12xf32>
    %6 = arith.truncf %5 : vector<512x12xf32> to vector<512x12xbf16>
    %c0_5 = arith.constant 0 : index
    %c0_6 = arith.constant 0 : index
    %7 = vector.load %arg4[%c0_5, %c0_6] : memref<512x12xbf16, #tpu.memory_space<vmem>>, vector<512x12xbf16>
    tpu.vector_store %arg4[%c0_5, %c0_6], %6 {strides = array<i32>} : memref<512x12xbf16, #tpu.memory_space<vmem>>, vector<512x12xbf16>,
    return
  }
  func.func @transform_0(%arg0: i32) -> (i32, i32) {
    %c0_i32 = arith.constant 0 : i32
    %c0_i32_0 = arith.constant 0 : i32
    return %arg0, %c0_i32 : i32, i32
  }
  func.func @transform_1(%arg0: i32) -> (i32, i32) {
    %c0_i32 = arith.constant 0 : i32
    %c0_i32_0 = arith.constant 0 : i32
    %c0_i32_1 = arith.constant 0 : i32
    return %c0_i32, %c0_i32_0 : i32, i32
  }
  func.func @transform_2(%arg0: i32) -> (i32, i32) {
    %c0_i32 = arith.constant 0 : i32
    %c0_i32_0 = arith.constant 0 : i32
    %c0_i32_1 = arith.constant 0 : i32
    return %c0_i32, %c0_i32_0 : i32, i32
  }
  func.func @transform_3(%arg0: i32) -> (i32, i32) {
    %c0_i32 = arith.constant 0 : i32
    %c0_i32_0 = arith.constant 0 : i32
    return %arg0, %c0_i32 : i32, i32
  }
}

</mosaic_0001>

<bundles_post_ra>
// kernel: tile.275
= control target key start
LH: loop header
LB: loop body
LE: loop exit
PB: predicated region body
PF: predicated region fallthrough
CT: control target
= control target key end

     0   :  { %s64_s0 = inlined_call_operand.vmem [shape: f32[8], index: 0, kind: input, shape index: {}]   ;;  %s65_s1 = inlined_call_operand.vmem [shape: f32[64,8], index: 1, kind: output, shape index: {}]  }
   0x1   :  { %v4_v0 = vld [vmem:[%s64_s0] ss:$0 sm:$0xff] }
   0x2   :  { %5 = vst [vmem:[%s65_s1] sm:$0xff] %v4_v0 }
   0x3   :  { %20 = vst [vmem:[%s65_s1 + $0x8] sm:$0xff] %v4_v0 }
   0x4   :  { %21 = vst [vmem:[%s65_s1 + $0x10] sm:$0xff] %v4_v0 }
   0x5   :  { %22 = vst [vmem:[%s65_s1 + $0x18] sm:$0xff] %v4_v0 }
   0x6   :  { %23 = vst [vmem:[%s65_s1 + $0x20] sm:$0xff] %v4_v0 }
   0x7   :  { %24 = vst [vmem:[%s65_s1 + $0x28] sm:$0xff] %v4_v0 }
   0x8   :  { %25 = vst [vmem:[%s65_s1 + $0x30] sm:$0xff] %v4_v0 }
   0x9   :  { %26 = vst [vmem:[%s65_s1 + $0x38] sm:$0xff] %v4_v0 }

// kernel: tile.276
= control target key start
LH: loop header
LB: loop body
LE: loop exit
PB: predicated region body
PF: predicated region fallthrough
CT: control target
= control target key end

     0   :  { %vm6_vm0 = vcmask 1043458   ;;  %s11_s6 = smov 3  ;;  %s14_s7 = smov 12  ;;  %vm8_vm1 = vcmask 64512   ;;  %vm20_vm2 = vcmask 1048512   ;;  %vm32_vm3 = vcmask 982912   ;;  %s411_s0 = inlined_call_operand.vmem [shape: f32[64,8], index: 0, kind: input, shape index: {}]   ;;  %s412_s1 = inlined_call_operand.vmem [shape: f32[1,512], index: 1, kind: output, shape index: {}]  }
   0x1   :  { %v214_v0 = vld [vmem:[%s411_s0 + $0xf] ss:$16 sm:%s11_s6]   ;;  %s35_s12 = smov 3  ;;  %s38_s15 = smov 12  ;;  %vm44_vm4 = vcmask 917312   ;;  %vm56_vm5 = vcmask 851712  }
   0x2   :  { %v215_v1 = vld [vmem:[%s411_s0 + $0xf] ss:$16 sm:%s14_s7]   ;;  %v218_v3 = vld [vmem:[%s411_s0 + $0xd] ss:$16 sm:%s35_s12]   ;;  %s262_s16 = smov 120   ;;  %s23_s19 = smov 3 }
   0x3   :  { %v17_v2 = vsel %vm6_vm0, %v215_v1, %v214_v0  ;;  %v219_v4 = vld [vmem:[%s411_s0 + $0xd] ss:$16 sm:%s38_s15]   ;;  %s26_s20 = smov 12  ;;  %v216_v6 = vld [vmem:[%s411_s0 + $0xe] ss:$16 sm:%s23_s19]   ;;  %s47_s23 = smov 3 }
   0x4   :  { %18 = vrot.lane.b32.xlu0 %v17_v2, %s262_s16  ;;  %v41_v5 = vsel %vm6_vm0, %v219_v4, %v218_v3  ;;  %s263_s24 = smov 104   ;;  %v217_v7 = vld [vmem:[%s411_s0 + $0xe] ss:$16 sm:%s26_s20]   ;;  %s50_s27 = smov 12  ;;  %vm68_vm6 = vcmask 786112   ;;  %vm80_vm7 = vcmask 720512  }
   0x5   :  { %42 = vrot.lane.b32.xlu1 %v41_v5, %s263_s24  ;;  %v220_v8 = vld [vmem:[%s411_s0 + $0xc] ss:$16 sm:%s47_s23]   ;;  %v29_v10 = vsel %vm6_vm0, %v217_v7, %v216_v6  ;;  %s83_s3 = smov 3  ;;  %s86_s4 = smov 12  ;;  %vm92_vm8 = vcmask 654912   ;;  %vm104_vm9 = vcmask 589312  }
   0x6   :  { %v221_v9 = vld [vmem:[%s411_s0 + $0xc] ss:$16 sm:%s50_s27]   ;;  %s264_s5 = smov 112   ;;  %s95_s6 = smov 3  ;;  %v226_v12 = vld [vmem:[%s411_s0 + $0x9] ss:$16 sm:%s83_s3]  }
   0x7   :  { %v53_v11 = vsel %vm6_vm0, %v221_v9, %v220_v8  ;;  %s98_s7 = smov 12  ;;  %v227_v13 = vld [vmem:[%s411_s0 + $0x9] ss:$16 sm:%s86_s4]   ;;  %s59_s12 = smov 3  ;;  %v228_v16 = vld [vmem:[%s411_s0 + $0x8] ss:$16 sm:%s95_s6]  }
   0x8   :  { %s62_s13 = smov 12  ;;  %s265_s14 = smov 96   ;;  %v222_v14 = vld [vmem:[%s411_s0 + $0xb] ss:$16 sm:%s59_s12]   ;;  %v229_v17 = vld [vmem:[%s411_s0 + $0x8] ss:$16 sm:%s98_s7]   ;;  %v89_v19 = vsel %vm6_vm0, %v227_v13, %v226_v12 }
   0x9   :  { %v223_v15 = vld [vmem:[%s411_s0 + $0xb] ss:$16 sm:%s62_s13]   ;;  %s266_s23 = smov 88   ;;  %s71_s24 = smov 3  ;;  %v101_v20 = vsel %vm6_vm0, %v229_v17, %v228_v16  ;;  %vm116_vm10 = vcmask 523712   ;;  %vm128_vm11 = vcmask 458112  }
   0xa   :  { %v65_v18 = vsel %vm6_vm0, %v223_v15, %v222_v14  ;;  %s119_s25 = smov 3  ;;  %s74_s26 = smov 12  ;;  %v224_v21 = vld [vmem:[%s411_s0 + $0xa] ss:$16 sm:%s71_s24]   ;;  %vm140_vm12 = vcmask 392512   ;;  %vm152_vm13 = vcmask 326912  }
   0xb   :  { %66 = vrot.lane.b32.xlu2 %v65_v18, %s266_s23  ;;  %s122_s27 = smov 12  ;;  %v225_v22 = vld [vmem:[%s411_s0 + $0xa] ss:$16 sm:%s74_s26]   ;;  %s267_s3 = smov 72   ;;  %vm164_vm14 = vcmask 261312   ;;  %vm176_vm15 = vcmask 195712  }
   0xc   :  { %30 = vrot.lane.b32.xlu0 %v29_v10, %s264_s5  ;;  %v232_v23 = vld [vmem:[%s411_s0 + $0x6] ss:$16 sm:%s119_s25]   ;;  %s131_s6 = smov 3  ;;  %s134_s7 = smov 12  ;;  %v77_v25 = vsel %vm6_vm0, %v225_v22, %v224_v21 }
   0xd   :  { %54 = vrot.lane.b32.xlu1 %v53_v11, %s265_s14  ;;  %s268_s8 = smov 64   ;;  %v233_v24 = vld [vmem:[%s411_s0 + $0x6] ss:$16 sm:%s122_s27]   ;;  %s107_s15 = smov 3 }
   0xe   :  { %v234_v26 = vld [vmem:[%s411_s0 + $0x5] ss:$16 sm:%s131_s6]   ;;  %s110_s16 = smov 12  ;;  %v125_v28 = vsel %vm6_vm0, %v233_v24, %v232_v23  ;;  %s269_s17 = smov 80   ;;  %v230_v30 = vld [vmem:[%s411_s0 + $0x7] ss:$16 sm:%s107_s15]  }
   0xf   :  { %v235_v27 = vld [vmem:[%s411_s0 + $0x5] ss:$16 sm:%s134_s7]   ;;  %s155_s18 = smov 3  ;;  %s158_s19 = smov 12  ;;  %v231_v31 = vld [vmem:[%s411_s0 + $0x7] ss:$16 sm:%s110_s16]  }
  0x10   :  { %v137_v29 = vsel %vm6_vm0, %v235_v27, %v234_v26  ;;  %s270_s24 = smov 48   ;;  %v238_v32 = vld [vmem:[%s411_s0 + $0x3] ss:$16 sm:%s155_s18]   ;;  %s167_s27 = smov 3  ;;  %v113_v34 = vsel %vm6_vm0, %v231_v31, %v230_v30 }
  0x11   :  { %s170_s28 = smov 12  ;;  %s271_s29 = smov 40   ;;  %v239_v33 = vld [vmem:[%s411_s0 + $0x3] ss:$16 sm:%s158_s19]   ;;  %v240_v35 = vld [vmem:[%s411_s0 + $0x2] ss:$16 sm:%s167_s27]  }
  0x12   :  { %v241_v36 = vld [vmem:[%s411_s0 + $0x2] ss:$16 sm:%s170_s28]   ;;  %s143_s7 = smov 3  ;;  %v161_v37 = vsel %vm6_vm0, %v239_v33, %v238_v32  ;;  %s272_s9 = smov 56  }
  0x13   :  { %78 = vrot.lane.b32.xlu2 %v77_v25, %s269_s17  ;;  %v173_v38 = vsel %vm6_vm0, %v241_v36, %v240_v35  ;;  %v236_v39 = vld [vmem:[%s411_s0 + $0x4] ss:$16 sm:%s143_s7]   ;;  %s273_s14 = smov 24   ;;  %s274_s15 = smov 16  }
  0x14   :  { %90 = vrot.lane.b32.xlu0 %v89_v19, %s267_s3  ;;  %s179_s16 = smov 3  ;;  %s182_s17 = smov 12 }
  0x15   :  { %102 = vrot.lane.b32.xlu1 %v101_v20, %s268_s8  ;;  %s146_s8 = smov 12  ;;  %s275_s18 = smov 32   ;;  %v242_v42 = vld [vmem:[%s411_s0 + $0x1] ss:$16 sm:%s179_s16]  }
  0x16   :  { %v237_v40 = vld [vmem:[%s411_s0 + $0x4] ss:$16 sm:%s146_s8]   ;;  %v243_v43 = vld [vmem:[%s411_s0 + $0x1] ss:$16 sm:%s182_s17]   ;;  %s276_s23 = smov 8   ;;  %s4_s25 = smov 12 }
  0x17   :  { %v149_v41 = vsel %vm6_vm0, %v237_v40, %v236_v39  ;;  %v185_v44 = vsel %vm6_vm0, %v243_v43, %v242_v42  ;;  %v5_v46 = vld [vmem:[%s411_s0] ss:$16 sm:%s4_s25]  }
  0x1b   :  { %114 = vrot.lane.b32.xlu2 %v113_v34, %s272_s9 }
  0x1c   :  { %126 = vrot.lane.b32.xlu0 %v125_v28, %s270_s24  ;;  %s2_s24 = smov 3 }
  0x1d   :  { %138 = vrot.lane.b32.xlu1 %v137_v29, %s271_s29  ;;  %v3_v45 = vld [vmem:[%s411_s0] ss:$16 sm:%s2_s24]  }
  0x1e   :  { %v7_v47 = vsel %vm6_vm0, %v5_v46, %v3_v45  ;;  %vm188_vm0 = vcmask 130112  }
  0x1f   :  { %9 = vst.msk [vmem:[#allocation0] ss:$8 sm:$0xf] %vm8_vm1, %v7_v47  }
  0x23   :  { %150 = vrot.lane.b32.xlu2 %v149_v41, %s275_s18 }
  0x24   :  { %162 = vrot.lane.b32.xlu0 %v161_v37, %s273_s14 }
  0x25   :  { %174 = vrot.lane.b32.xlu1 %v173_v38, %s274_s15 }
  0x2b   :  { %186 = vrot.lane.b32.xlu2 %v185_v44, %s276_s23 }
  0x65   :  { %v67_v48 = vpop.permute.xlu2 %66  }
  0x6d   :  { %v79_v49 = vpop.permute.xlu2 %78  }
  0x75   :  { %v115_v52 = vpop.permute.xlu2 %114  }
  0x76   :  { %v19_v50 = vpop.permute.xlu0 %18  }
  0x77   :  { %21 = vst.msk [vmem:[#allocation0] ss:$8 sm:$0xf] %vm20_vm2, %v19_v50   ;;  %v43_v51 = vpop.permute.xlu1 %42  }
  0x7d   :  { %v151_v55 = vpop.permute.xlu2 %150  }
  0x7e   :  { %v31_v53 = vpop.permute.xlu0 %30  }
  0x7f   :  { %33 = vst.msk [vmem:[#allocation0] ss:$8 sm:$0xf] %vm32_vm3, %v31_v53   ;;  %v55_v54 = vpop.permute.xlu1 %54  }
  0x80   :  { %45 = vst.msk [vmem:[#allocation0] ss:$8 sm:$0xf] %vm44_vm4, %v43_v51  }
  0x81   :  { %57 = vst.msk [vmem:[#allocation0] ss:$8 sm:$0xf] %vm56_vm5, %v55_v54  }
  0x82   :  { %69 = vst.msk [vmem:[#allocation0] ss:$8 sm:$0xf] %vm68_vm6, %v67_v48  }
  0x83   :  { %81 = vst.msk [vmem:[#allocation0] ss:$8 sm:$0xf] %vm80_vm7, %v79_v49  }
  0x85   :  { %v187_v58 = vpop.permute.xlu2 %186  }
  0x86   :  { %v91_v56 = vpop.permute.xlu0 %90  }
  0x87   :  { %93 = vst.msk [vmem:[#allocation0] ss:$8 sm:$0xf] %vm92_vm8, %v91_v56   ;;  %v103_v57 = vpop.permute.xlu1 %102  }
  0x88   :  { %105 = vst.msk [vmem:[#allocation0] ss:$8 sm:$0xf] %vm104_vm9, %v103_v57  }
  0x89   :  { %117 = vst.msk [vmem:[#allocation0] ss:$8 sm:$0xf] %vm116_vm10, %v115_v52  }
  0x8e   :  { %v127_v59 = vpop.permute.xlu0 %126  }
  0x8f   :  { %129 = vst.msk [vmem:[#allocation0] ss:$8 sm:$0xf] %vm128_vm11, %v127_v59   ;;  %v139_v60 = vpop.permute.xlu1 %138  }
  0x90   :  { %141 = vst.msk [vmem:[#allocation0] ss:$8 sm:$0xf] %vm140_vm12, %v139_v60  }
  0x91   :  { %153 = vst.msk [vmem:[#allocation0] ss:$8 sm:$0xf] %vm152_vm13, %v151_v55  }
  0x96   :  { %v163_v61 = vpop.permute.xlu0 %162  }
  0x97   :  { %165 = vst.msk [vmem:[#allocation0] ss:$8 sm:$0xf] %vm164_vm14, %v163_v61   ;;  %v175_v62 = vpop.permute.xlu1 %174  }
  0x98   :  { %177 = vst.msk [vmem:[#allocation0] ss:$8 sm:$0xf] %vm176_vm15, %v175_v62  }
  0x99   :  { %189 = vst.msk [vmem:[#allocation0] ss:$8 sm:$0xf] %vm188_vm0, %v187_v58  }
  0xa0   :  { %v192_v63 = vld [vmem:[#allocation0] sm:$0x1]  ;;  %v197_v0 = vld [vmem:[#allocation0 + $0x8] sm:$0x1]  ;;  %v203_v1 = vld [vmem:[#allocation0 + $0x10] sm:$0x1] }
  0xa1   :  { %195 = vst [vmem:[%s412_s1] sm:$0x1] %v192_v63  ;;  %v209_v2 = vld [vmem:[#allocation0 + $0x18] sm:$0x1] }
  0xa2   :  { %244 = vst [vmem:[%s412_s1 + $0x1] sm:$0x1] %v197_v0 }
  0xa3   :  { %245 = vst [vmem:[%s412_s1 + $0x2] sm:$0x1] %v203_v1 }
  0xa4   :  { %246 = vst [vmem:[%s412_s1 + $0x3] sm:$0x1] %v209_v2 }

// kernel: resnet_ae_forward.68
= control target key start
LH: loop header
LB: loop body
LE: loop exit
PB: predicated region body
PF: predicated region fallthrough
CT: control target
= control target key end

     0   :  { %vm351_vm0 = vcmask 1044480   ;;  %vm352_vm1 = vcmask 1045504   ;;  %v1211_v2 = vmov 65535   ;;  %vm254_vm2 = vcmask 220160   ;;  %s2148_s1 = inlined_call_operand.vmem [shape: bf16[27,8], index: 1, kind: input, shape index: {}]   ;;  %s2149_s0 = inlined_call_operand.vmem [shape: bf16[512,27], index: 0, kind: input, shape index: {}]   ;;  %s2150_s2 = inlined_call_operand.vmem [shape: bf16[512,8], index: 2, kind: output, shape index: {0}]   ;;  %s2151_s3 = inlined_call_operand.vmem [shape: f32[1,1,8], index: 3, kind: output, shape index: {1}]   ;;  %s2152_s4 = inlined_call_operand.vmem [shape: f32[1,1,8], index: 4, kind: output, shape index: {2}]  }
   0x1   :  { %v1136_v0 = vld [vmem:[%s2148_s1 + $0x8] sm:$0xf]  ;;  %v1203_v1 = vld [vmem:[%s2148_s1 + $0x8] sm:$0x30]  ;;  %v353_v3 = vsel %vm351_vm0, 4294967295, %v1211_v2  ;;  %v1202_v7 = vld [vmem:[%s2148_s1] sm:$0xff] }
   0x2   :  { %v1137_v4 = vor.u32 %v1203_v1, %v1136_v0  ;;  %v354_v5 = vsel %vm352_vm1, %v353_v3, 0  ;;  %v1170_v8 = vld [vmem:[%s2149_s0] sm:$0xff]  ;;  %v1171_v10 = vld [vmem:[%s2149_s0 + $0x8] sm:$0xff]  ;;  %v1172_v13 = vld [vmem:[%s2149_s0 + $0x10] sm:$0xff]  ;;  %vm591_vm3 = vcmask 60416   ;;  %vm656_vm4 = vcmask 64512  }
   0x3   :  { %v1178_v9 = vld [vmem:[%s2149_s0 + $0x40] sm:$0xff]  ;;  %v1179_v11 = vld [vmem:[%s2149_s0 + $0x48] sm:$0xff]  ;;  %v1180_v14 = vld [vmem:[%s2149_s0 + $0x50] sm:$0xff]  ;;  %vm790_vm5 = vcmask 57344  }
   0x4   :  { %v356_v6 = vand.u32 %v1137_v4, %v354_v5  ;;  %v1186_v12 = vld [vmem:[%s2149_s0 + $0x80] sm:$0xff]  ;;  %v1187_v15 = vld [vmem:[%s2149_s0 + $0x88] sm:$0xff]  ;;  %v1173_v16 = vld [vmem:[%s2149_s0 + $0x18] sm:$0xff] }
   0x5   :  { %v1181_v17 = vld [vmem:[%s2149_s0 + $0x58] sm:$0xff]  ;;  %v1188_v18 = vld [vmem:[%s2149_s0 + $0x90] sm:$0xff]  ;;  %v1194_v19 = vld [vmem:[%s2149_s0 + $0xc0] sm:$0xff] }
   0x6   :  { %364 = vmatpush.bf16.msra.mxu0 %v356_v6  ;;  %1204 = vmatpush.bf16.msra.mxu1 %v356_v6  ;;  %v1174_v20 = vld [vmem:[%s2149_s0 + $0x20] sm:$0xff]  ;;  %v1189_v22 = vld [vmem:[%s2149_s0 + $0x98] sm:$0xff]  ;;  %v1195_v23 = vld [vmem:[%s2149_s0 + $0xc8] sm:$0xff] }
   0x7   :  { %1205 = vmatpush.bf16.msra.mxu2 %v356_v6  ;;  %1206 = vmatpush.bf16.msra.mxu3 %v356_v6  ;;  %v1182_v21 = vld [vmem:[%s2149_s0 + $0x60] sm:$0xff]  ;;  %v1175_v24 = vld [vmem:[%s2149_s0 + $0x28] sm:$0xff]  ;;  %v1196_v27 = vld [vmem:[%s2149_s0 + $0xd0] sm:$0xff] }
   0x8   :  { %v1183_v25 = vld [vmem:[%s2149_s0 + $0x68] sm:$0xff]  ;;  %v1190_v26 = vld [vmem:[%s2149_s0 + $0xa0] sm:$0xff]  ;;  %v1176_v28 = vld [vmem:[%s2149_s0 + $0x30] sm:$0xff] }
   0x9   :  { %v1184_v29 = vld [vmem:[%s2149_s0 + $0x70] sm:$0xff]  ;;  %v1191_v30 = vld [vmem:[%s2149_s0 + $0xa8] sm:$0xff]  ;;  %v1197_v31 = vld [vmem:[%s2149_s0 + $0xd8] sm:$0xff] }
   0xa   :  { %365 = vmatpush.bf16.msra.mxu0 %v1202_v7  ;;  %1207 = vmatpush.bf16.msra.mxu1 %v1202_v7  ;;  %v1177_v32 = vld [vmem:[%s2149_s0 + $0x38] sm:$0xff]  ;;  %v1192_v34 = vld [vmem:[%s2149_s0 + $0xb0] sm:$0xff]  ;;  %v1198_v35 = vld [vmem:[%s2149_s0 + $0xe0] sm:$0xff] }
   0xb   :  { %1208 = vmatpush.bf16.msra.mxu2 %v1202_v7  ;;  %1209 = vmatpush.bf16.msra.mxu3 %v1202_v7  ;;  %v1185_v33 = vld [vmem:[%s2149_s0 + $0x78] sm:$0xff]  ;;  %v1199_v41 = vld [vmem:[%s2149_s0 + $0xe8] sm:$0xff]  ;;  %v1200_v62 = vld [vmem:[%s2149_s0 + $0xf0] sm:$0xff] }
   0xc   :  { %v1193_v40 = vld [vmem:[%s2149_s0 + $0xb8] sm:$0xff] }
   0xd   :  { %1138 = vmatmul.msk.bf16.vlgmr.msra.gmra.mxu0 %vm254_vm2, %v1170_v8  ;;  %1146 = vmatmul.msk.bf16.vlgmr.msra.gmra.mxu1 %vm254_vm2, %v1178_v9 }
   0xe   :  { %1154 = vmatmul.msk.bf16.vlgmr.msra.gmra.mxu2 %vm254_vm2, %v1186_v12  ;;  %1162 = vmatmul.msk.bf16.vlgmr.msra.gmra.mxu3 %vm254_vm2, %v1194_v19 }
  0x1d   :  { %1139 = vmatmul.msk.bf16.gmra.mxu0 %vm254_vm2, %v1171_v10  ;;  %1147 = vmatmul.msk.bf16.gmra.mxu1 %vm254_vm2, %v1179_v11 }
  0x1e   :  { %1155 = vmatmul.msk.bf16.gmra.mxu2 %vm254_vm2, %v1187_v15  ;;  %1163 = vmatmul.msk.bf16.gmra.mxu3 %vm254_vm2, %v1195_v23 }
  0x2d   :  { %1140 = vmatmul.msk.bf16.gmra.mxu0 %vm254_vm2, %v1172_v13  ;;  %1148 = vmatmul.msk.bf16.gmra.mxu1 %vm254_vm2, %v1180_v14 }
  0x2e   :  { %1156 = vmatmul.msk.bf16.gmra.mxu2 %vm254_vm2, %v1188_v18  ;;  %1164 = vmatmul.msk.bf16.gmra.mxu3 %vm254_vm2, %v1196_v27 }
  0x3d   :  { %1141 = vmatmul.msk.bf16.gmra.mxu0 %vm254_vm2, %v1173_v16  ;;  %1149 = vmatmul.msk.bf16.gmra.mxu1 %vm254_vm2, %v1181_v17 }
  0x3e   :  { %1157 = vmatmul.msk.bf16.gmra.mxu2 %vm254_vm2, %v1189_v22  ;;  %1165 = vmatmul.msk.bf16.gmra.mxu3 %vm254_vm2, %v1197_v31 }
  0x4d   :  { %1142 = vmatmul.msk.bf16.gmra.mxu0 %vm254_vm2, %v1174_v20  ;;  %1150 = vmatmul.msk.bf16.gmra.mxu1 %vm254_vm2, %v1182_v21  ;;  %v1201_v21 = vld [vmem:[%s2149_s0 + $0xf8] sm:$0xff] }
  0x4e   :  { %1158 = vmatmul.msk.bf16.gmra.mxu2 %vm254_vm2, %v1190_v26  ;;  %1166 = vmatmul.msk.bf16.gmra.mxu3 %vm254_vm2, %v1198_v35 }
  0x5d   :  { %1143 = vmatmul.msk.bf16.gmra.mxu0 %vm254_vm2, %v1175_v24  ;;  %1151 = vmatmul.msk.bf16.gmra.mxu1 %vm254_vm2, %v1183_v25 }
  0x5e   :  { %1159 = vmatmul.msk.bf16.gmra.mxu2 %vm254_vm2, %v1191_v30  ;;  %1167 = vmatmul.msk.bf16.gmra.mxu3 %vm254_vm2, %v1199_v41 }
  0x6d   :  { %1144 = vmatmul.msk.bf16.gmra.mxu0 %vm254_vm2, %v1176_v28  ;;  %1152 = vmatmul.msk.bf16.gmra.mxu1 %vm254_vm2, %v1184_v29 }
  0x6e   :  { %1160 = vmatmul.msk.bf16.gmra.mxu2 %vm254_vm2, %v1192_v34  ;;  %1168 = vmatmul.msk.bf16.gmra.mxu3 %vm254_vm2, %v1200_v62 }
  0x7d   :  { %1145 = vmatmul.msk.bf16.gmra.mxu0 %vm254_vm2, %v1177_v32  ;;  %1153 = vmatmul.msk.bf16.gmra.mxu1 %vm254_vm2, %v1185_v33 }
  0x7e   :  { %1161 = vmatmul.msk.bf16.gmra.mxu2 %vm254_vm2, %v1193_v40  ;;  %1169 = vmatmul.msk.bf16.gmra.mxu3 %vm254_vm2, %v1201_v21 }
  0x8a   :  { %v367_v36 = vpop.f32.mrf.mxu0  ;;  %v1358_v37 = vpop.f32.mrf.mxu1 }
  0x8b   :  { %v527_v38 = vpack.c.bf16 %v367_v36, %v367_v36  ;;  %v543_v39 = vpack.c.bf16 %v1358_v37, %v1358_v37  ;;  %v792_v42 = vmul.f32 %v367_v36, %v367_v36  ;;  %v657_v43 = vsel %vm656_vm4, %v367_v36, 0.0 }
  0x8d   :  { %592 = vst.msk [vmem:[%s2150_s2] sm:$0xf] %vm591_vm3, %v527_v38  ;;  %v856_v51 = vsel %vm656_vm4, %v792_v42, 0.0 }
  0x8e   :  { %608 = vst.msk [vmem:[%s2150_s2 + $0x40] sm:$0xf] %vm591_vm3, %v543_v39 }
  0x91   :  { %v1417_v6 = vpop.f32.mrf.mxu2  ;;  %v1522_v41 = vpop.f32.mrf.mxu3 }
  0x92   :  { %v369_v44 = vpop.f32.mrf.mxu0  ;;  %v1379_v45 = vpop.f32.mrf.mxu1  ;;  %v559_v10 = vpack.c.bf16 %v1417_v6, %v1417_v6 }
  0x93   :  { %v528_v46 = vpack.c.bf16 %v369_v44, %v369_v44  ;;  %v658_v47 = vsel %vm656_vm4, %v369_v44, 0.0  ;;  %v793_v48 = vmul.f32 %v369_v44, %v369_v44  ;;  %v544_v49 = vpack.c.bf16 %v1379_v45, %v1379_v45 }
  0x94   :  { %v659_v50 = vadd.f32 %v658_v47, %v657_v43  ;;  %624 = vst.msk [vmem:[%s2150_s2 + $0x80] sm:$0xf] %vm591_vm3, %v559_v10  ;;  %v575_v43 = vpack.c.bf16 %v1522_v41, %v1522_v41 }
  0x95   :  { %593 = vst.msk [vmem:[%s2150_s2 + $0x4] sm:$0xf] %vm591_vm3, %v528_v46  ;;  %v857_v52 = vsel %vm656_vm4, %v793_v48, 0.0 }
  0x96   :  { %v858_v53 = vadd.f32 %v857_v52, %v856_v51  ;;  %609 = vst.msk [vmem:[%s2150_s2 + $0x44] sm:$0xf] %vm591_vm3, %v544_v49 }
  0x97   :  { %640 = vst.msk [vmem:[%s2150_s2 + $0xc0] sm:$0xf] %vm591_vm3, %v575_v43 }
  0x99   :  { %v1439_v17 = vpop.f32.mrf.mxu2 }
  0x9a   :  { %v372_v54 = vpop.f32.mrf.mxu0  ;;  %v1394_v55 = vpop.f32.mrf.mxu1  ;;  %v560_v19 = vpack.c.bf16 %v1439_v17, %v1439_v17 }
  0x9b   :  { %v529_v56 = vpack.c.bf16 %v372_v54, %v372_v54  ;;  %v660_v57 = vsel %vm656_vm4, %v372_v54, 0.0  ;;  %v794_v58 = vmul.f32 %v372_v54, %v372_v54  ;;  %v545_v59 = vpack.c.bf16 %v1394_v55, %v1394_v55 }
  0x9c   :  { %v661_v60 = vadd.f32 %v660_v57, %v659_v50  ;;  %625 = vst.msk [vmem:[%s2150_s2 + $0x84] sm:$0xf] %vm591_vm3, %v560_v19  ;;  %v1554_v50 = vpop.f32.mrf.mxu3 }
  0x9d   :  { %594 = vst.msk [vmem:[%s2150_s2 + $0x8] sm:$0xf] %vm591_vm3, %v529_v56  ;;  %v859_v61 = vsel %vm656_vm4, %v794_v58, 0.0  ;;  %v576_v52 = vpack.c.bf16 %v1554_v50, %v1554_v50 }
  0x9e   :  { %v860_v63 = vadd.f32 %v859_v61, %v858_v53  ;;  %610 = vst.msk [vmem:[%s2150_s2 + $0x48] sm:$0xf] %vm591_vm3, %v545_v59 }
  0x9f   :  { %641 = vst.msk [vmem:[%s2150_s2 + $0xc4] sm:$0xf] %vm591_vm3, %v576_v52 }
  0xa1   :  { %v1472_v27 = vpop.f32.mrf.mxu2 }
  0xa2   :  { %v374_v0 = vpop.f32.mrf.mxu0  ;;  %v1412_v1 = vpop.f32.mrf.mxu1  ;;  %v561_v28 = vpack.c.bf16 %v1472_v27, %v1472_v27 }
  0xa3   :  { %v530_v2 = vpack.c.bf16 %v374_v0, %v374_v0  ;;  %v662_v3 = vsel %vm656_vm4, %v374_v0, 0.0  ;;  %v795_v4 = vmul.f32 %v374_v0, %v374_v0  ;;  %v546_v5 = vpack.c.bf16 %v1412_v1, %v1412_v1 }
  0xa4   :  { %v663_v7 = vadd.f32 %v662_v3, %v661_v60  ;;  %626 = vst.msk [vmem:[%s2150_s2 + $0x88] sm:$0xf] %vm591_vm3, %v561_v28  ;;  %v1586_v59 = vpop.f32.mrf.mxu3 }
  0xa5   :  { %595 = vst.msk [vmem:[%s2150_s2 + $0xc] sm:$0xf] %vm591_vm3, %v530_v2  ;;  %v861_v8 = vsel %vm656_vm4, %v795_v4, 0.0  ;;  %v577_v61 = vpack.c.bf16 %v1586_v59, %v1586_v59 }
  0xa6   :  { %v862_v9 = vadd.f32 %v861_v8, %v860_v63  ;;  %611 = vst.msk [vmem:[%s2150_s2 + $0x4c] sm:$0xf] %vm591_vm3, %v546_v5 }
  0xa7   :  { %642 = vst.msk [vmem:[%s2150_s2 + $0xc8] sm:$0xf] %vm591_vm3, %v577_v61 }
  0xa9   :  { %v1496_v33 = vpop.f32.mrf.mxu2 }
  0xaa   :  { %v377_v11 = vpop.f32.mrf.mxu0  ;;  %v1434_v12 = vpop.f32.mrf.mxu1  ;;  %v562_v34 = vpack.c.bf16 %v1496_v33, %v1496_v33 }
  0xab   :  { %v531_v13 = vpack.c.bf16 %v377_v11, %v377_v11  ;;  %v664_v14 = vsel %vm656_vm4, %v377_v11, 0.0  ;;  %v796_v15 = vmul.f32 %v377_v11, %v377_v11  ;;  %v547_v16 = vpack.c.bf16 %v1434_v12, %v1434_v12 }
  0xac   :  { %v1441_v18 = vadd.f32 %v664_v14, %v663_v7  ;;  %627 = vst.msk [vmem:[%s2150_s2 + $0x8c] sm:$0xf] %vm591_vm3, %v562_v34  ;;  %v1618_v4 = vpop.f32.mrf.mxu3 }
  0xad   :  { %596 = vst.msk [vmem:[%s2150_s2 + $0x10] sm:$0xf] %vm591_vm3, %v531_v13  ;;  %v863_v20 = vsel %vm656_vm4, %v796_v15, 0.0  ;;  %v578_v7 = vpack.c.bf16 %v1618_v4, %v1618_v4 }
  0xae   :  { %v1453_v22 = vadd.f32 %v863_v20, %v862_v9  ;;  %612 = vst.msk [vmem:[%s2150_s2 + $0x50] sm:$0xf] %vm591_vm3, %v547_v16 }
  0xaf   :  { %643 = vst.msk [vmem:[%s2150_s2 + $0xcc] sm:$0xf] %vm591_vm3, %v578_v7 }
  0xb1   :  { %v1520_v40 = vpop.f32.mrf.mxu2 }
  0xb2   :  { %v1464_v23 = vpop.f32.mrf.mxu0  ;;  %v1466_v24 = vpop.f32.mrf.mxu1  ;;  %v563_v42 = vpack.c.bf16 %v1520_v40, %v1520_v40 }
  0xb3   :  { %v532_v25 = vpack.c.bf16 %v1464_v23, %v1464_v23  ;;  %v548_v26 = vpack.c.bf16 %v1466_v24, %v1466_v24  ;;  %v797_v19 = vmul.f32 %v1464_v23, %v1464_v23 }
  0xb4   :  { %628 = vst.msk [vmem:[%s2150_s2 + $0x90] sm:$0xf] %vm591_vm3, %v563_v42  ;;  %v1646_v14 = vpop.f32.mrf.mxu3 }
  0xb5   :  { %597 = vst.msk [vmem:[%s2150_s2 + $0x14] sm:$0xf] %vm591_vm3, %v532_v25  ;;  %v579_v34 = vpack.c.bf16 %v1646_v14, %v1646_v14 }
  0xb6   :  { %613 = vst.msk [vmem:[%s2150_s2 + $0x54] sm:$0xf] %vm591_vm3, %v548_v26 }
  0xb7   :  { %644 = vst.msk [vmem:[%s2150_s2 + $0xd0] sm:$0xf] %vm591_vm3, %v579_v34 }
  0xb9   :  { %v1552_v49 = vpop.f32.mrf.mxu2 }
  0xba   :  { %v1488_v29 = vpop.f32.mrf.mxu0  ;;  %v1490_v30 = vpop.f32.mrf.mxu1  ;;  %v564_v51 = vpack.c.bf16 %v1552_v49, %v1552_v49 }
  0xbb   :  { %v533_v31 = vpack.c.bf16 %v1488_v29, %v1488_v29  ;;  %v549_v32 = vpack.c.bf16 %v1490_v30, %v1490_v30 }
  0xbc   :  { %629 = vst.msk [vmem:[%s2150_s2 + $0x94] sm:$0xf] %vm591_vm3, %v564_v51  ;;  %v1664_v26 = vpop.f32.mrf.mxu3 }
  0xbd   :  { %598 = vst.msk [vmem:[%s2150_s2 + $0x18] sm:$0xf] %vm591_vm3, %v533_v31  ;;  %v666_v31 = vsel %vm656_vm4, %v1464_v23, 0.0  ;;  %v865_v23 = vsel %vm656_vm4, %v797_v19, 0.0 }
  0xbe   :  { %614 = vst.msk [vmem:[%s2150_s2 + $0x58] sm:$0xf] %vm591_vm3, %v549_v32  ;;  %v798_v32 = vmul.f32 %v1488_v29, %v1488_v29  ;;  %v667_v43 = vadd.f32 %v666_v31, %v1441_v18  ;;  %v866_v18 = vadd.f32 %v865_v23, %v1453_v22 }
  0xc1   :  { %v1584_v58 = vpop.f32.mrf.mxu2 }
  0xc2   :  { %v1512_v35 = vpop.f32.mrf.mxu0  ;;  %v1514_v36 = vpop.f32.mrf.mxu1  ;;  %v565_v60 = vpack.c.bf16 %v1584_v58, %v1584_v58 }
  0xc3   :  { %v534_v38 = vpack.c.bf16 %v1512_v35, %v1512_v35  ;;  %v550_v39 = vpack.c.bf16 %v1514_v36, %v1514_v36 }
  0xc4   :  { %630 = vst.msk [vmem:[%s2150_s2 + $0x98] sm:$0xf] %vm591_vm3, %v565_v60 }
  0xc5   :  { %599 = vst.msk [vmem:[%s2150_s2 + $0x1c] sm:$0xf] %vm591_vm3, %v534_v38  ;;  %v799_v38 = vmul.f32 %v1512_v35, %v1512_v35 }
  0xc6   :  { %615 = vst.msk [vmem:[%s2150_s2 + $0x5c] sm:$0xf] %vm591_vm3, %v550_v39  ;;  %v668_v39 = vsel %vm656_vm4, %v1488_v29, 0.0  ;;  %v867_v29 = vsel %vm656_vm4, %v798_v32, 0.0 }
  0xc7   :  { %v669_v52 = vadd.f32 %v668_v39, %v667_v43  ;;  %v868_v7 = vadd.f32 %v867_v29, %v866_v18 }
  0xc9   :  { %v1616_v3 = vpop.f32.mrf.mxu2 }
  0xca   :  { %v1544_v44 = vpop.f32.mrf.mxu0  ;;  %v1546_v46 = vpop.f32.mrf.mxu1  ;;  %v566_v5 = vpack.c.bf16 %v1616_v3, %v1616_v3 }
  0xcb   :  { %v535_v47 = vpack.c.bf16 %v1544_v44, %v1544_v44  ;;  %v551_v48 = vpack.c.bf16 %v1546_v46, %v1546_v46  ;;  %v800_v51 = vmul.f32 %v1544_v44, %v1544_v44 }
  0xcc   :  { %631 = vst.msk [vmem:[%s2150_s2 + $0x9c] sm:$0xf] %vm591_vm3, %v566_v5  ;;  %v1725_v5 = vpop.f32.mrf.mxu3 }
  0xcd   :  { %600 = vst.msk [vmem:[%s2150_s2 + $0x20] sm:$0xf] %vm591_vm3, %v535_v47  ;;  %v580_v47 = vpack.c.bf16 %v1664_v26, %v1664_v26 }
  0xce   :  { %616 = vst.msk [vmem:[%s2150_s2 + $0x60] sm:$0xf] %vm591_vm3, %v551_v48  ;;  %v670_v48 = vsel %vm656_vm4, %v1512_v35, 0.0  ;;  %v672_v35 = vsel %vm656_vm4, %v1544_v44, 0.0 }
  0xcf   :  { %645 = vst.msk [vmem:[%s2150_s2 + $0xd4] sm:$0xf] %vm591_vm3, %v580_v47 }
  0xd1   :  { %v1644_v13 = vpop.f32.mrf.mxu2 }
  0xd2   :  { %v1576_v53 = vpop.f32.mrf.mxu0  ;;  %v1578_v54 = vpop.f32.mrf.mxu1  ;;  %v567_v28 = vpack.c.bf16 %v1644_v13, %v1644_v13 }
  0xd3   :  { %v536_v56 = vpack.c.bf16 %v1576_v53, %v1576_v53  ;;  %v552_v57 = vpack.c.bf16 %v1578_v54, %v1578_v54  ;;  %v801_v61 = vmul.f32 %v1576_v53, %v1576_v53  ;;  %v674_v19 = vsel %vm656_vm4, %v1576_v53, 0.0 }
  0xd4   :  { %632 = vst.msk [vmem:[%s2150_s2 + $0xa0] sm:$0xf] %vm591_vm3, %v567_v28 }
  0xd5   :  { %601 = vst.msk [vmem:[%s2150_s2 + $0x24] sm:$0xf] %vm591_vm3, %v536_v56  ;;  %v869_v56 = vsel %vm656_vm4, %v799_v38, 0.0  ;;  %v873_v31 = vsel %vm656_vm4, %v801_v61, 0.0 }
  0xd6   :  { %617 = vst.msk [vmem:[%s2150_s2 + $0x64] sm:$0xf] %vm591_vm3, %v552_v57 }
  0xd9   :  { %v1662_v25 = vpop.f32.mrf.mxu2 }
  0xda   :  { %v1608_v62 = vpop.f32.mrf.mxu0  ;;  %v1610_v63 = vpop.f32.mrf.mxu1  ;;  %v568_v42 = vpack.c.bf16 %v1662_v25, %v1662_v25 }
  0xdb   :  { %v537_v0 = vpack.c.bf16 %v1608_v62, %v1608_v62  ;;  %v553_v2 = vpack.c.bf16 %v1610_v63, %v1610_v63  ;;  %v802_v44 = vmul.f32 %v1608_v62, %v1608_v62  ;;  %v676_v53 = vsel %vm656_vm4, %v1608_v62, 0.0 }
  0xdc   :  { %633 = vst.msk [vmem:[%s2150_s2 + $0xa4] sm:$0xf] %vm591_vm3, %v568_v42 }
  0xdd   :  { %602 = vst.msk [vmem:[%s2150_s2 + $0x28] sm:$0xf] %vm591_vm3, %v537_v0  ;;  %v875_v38 = vsel %vm656_vm4, %v802_v44, 0.0 }
  0xde   :  { %618 = vst.msk [vmem:[%s2150_s2 + $0x68] sm:$0xf] %vm591_vm3, %v553_v2 }
  0xe1   :  { %v1723_v2 = vpop.f32.mrf.mxu2 }
  0xe2   :  { %v394_v8 = vpop.f32.mrf.mxu0  ;;  %v1640_v9 = vpop.f32.mrf.mxu1 }
  0xe3   :  { %v538_v10 = vpack.c.bf16 %v394_v8, %v394_v8  ;;  %v554_v11 = vpack.c.bf16 %v1640_v9, %v1640_v9  ;;  %v803_v28 = vmul.f32 %v394_v8, %v394_v8  ;;  %v678_v23 = vsel %vm656_vm4, %v394_v8, 0.0 }
  0xe5   :  { %603 = vst.msk [vmem:[%s2150_s2 + $0x2c] sm:$0xf] %vm591_vm3, %v538_v10  ;;  %v671_v10 = vadd.f32 %v670_v48, %v669_v52  ;;  %v877_v47 = vsel %vm656_vm4, %v803_v28, 0.0 }
  0xe6   :  { %619 = vst.msk [vmem:[%s2150_s2 + $0x6c] sm:$0xf] %vm591_vm3, %v554_v11  ;;  %v871_v11 = vsel %vm656_vm4, %v800_v51, 0.0 }
  0xea   :  { %v397_v15 = vpop.f32.mrf.mxu0  ;;  %v1656_v16 = vpop.f32.mrf.mxu1 }
  0xeb   :  { %v539_v20 = vpack.c.bf16 %v397_v15, %v397_v15  ;;  %v555_v21 = vpack.c.bf16 %v1656_v16, %v1656_v16  ;;  %v804_v39 = vmul.f32 %v397_v15, %v397_v15  ;;  %v680_v51 = vsel %vm656_vm4, %v397_v15, 0.0 }
  0xed   :  { %604 = vst.msk [vmem:[%s2150_s2 + $0x30] sm:$0xf] %vm591_vm3, %v539_v20  ;;  %v870_v20 = vadd.f32 %v869_v56, %v868_v7  ;;  %v1751_v56 = vpop.f32.mrf.mxu2 }
  0xee   :  { %620 = vst.msk [vmem:[%s2150_s2 + $0x70] sm:$0xf] %vm591_vm3, %v555_v21  ;;  %v673_v21 = vadd.f32 %v672_v35, %v671_v10  ;;  %v1753_v35 = vpop.f32.mrf.mxu3  ;;  %v581_v10 = vpack.c.bf16 %v1725_v5, %v1725_v5 }
  0xef   :  { %v872_v32 = vadd.f32 %v871_v11, %v870_v20  ;;  %v570_v20 = vpack.c.bf16 %v1751_v56, %v1751_v56 }
  0xf0   :  { %v675_v34 = vadd.f32 %v674_v19, %v673_v21  ;;  %646 = vst.msk [vmem:[%s2150_s2 + $0xd8] sm:$0xf] %vm591_vm3, %v581_v10  ;;  %v690_v10 = vsel %vm656_vm4, %v1379_v45, 0.0 }
  0xf1   :  { %v874_v42 = vadd.f32 %v873_v31, %v872_v32  ;;  %v582_v31 = vpack.c.bf16 %v1753_v35, %v1753_v35  ;;  %635 = vst.msk [vmem:[%s2150_s2 + $0xac] sm:$0xf] %vm591_vm3, %v570_v20  ;;  %v808_v32 = vmul.f32 %v1358_v37, %v1358_v37  ;;  %v811_v20 = vmul.f32 %v1412_v1, %v1412_v1 }
  0xf2   :  { %v399_v57 = vpop.f32.mrf.mxu0  ;;  %v1711_v60 = vpop.f32.mrf.mxu1  ;;  %v677_v43 = vadd.f32 %v676_v53, %v675_v34 }
  0xf3   :  { %v540_v0 = vpack.c.bf16 %v399_v57, %v399_v57  ;;  %v556_v22 = vpack.c.bf16 %v1711_v60, %v1711_v60  ;;  %v805_v18 = vmul.f32 %v399_v57, %v399_v57  ;;  %v876_v8 = vadd.f32 %v875_v38, %v874_v42  ;;  %647 = vst.msk [vmem:[%s2150_s2 + $0xdc] sm:$0xf] %vm591_vm3, %v582_v31 }
  0xf4   :  { %v679_v61 = vadd.f32 %v678_v23, %v677_v43  ;;  %v682_v7 = vsel %vm656_vm4, %v399_v57, 0.0 }
  0xf5   :  { %605 = vst.msk [vmem:[%s2150_s2 + $0x34] sm:$0xf] %vm591_vm3, %v540_v0  ;;  %v569_v0 = vpack.c.bf16 %v1723_v2, %v1723_v2  ;;  %v878_v11 = vadd.f32 %v877_v47, %v876_v8  ;;  %v881_v44 = vsel %vm656_vm4, %v805_v18, 0.0  ;;  %v688_v8 = vsel %vm656_vm4, %v1358_v37, 0.0 }
  0xf6   :  { %621 = vst.msk [vmem:[%s2150_s2 + $0x74] sm:$0xf] %vm591_vm3, %v556_v22  ;;  %v879_v22 = vsel %vm656_vm4, %v804_v39, 0.0  ;;  %v681_v19 = vadd.f32 %v680_v51, %v679_v61  ;;  %v1799_v51 = vpop.f32.mrf.mxu2  ;;  %v1801_v18 = vpop.f32.mrf.mxu3  ;;  %v809_v61 = vmul.f32 %v1379_v45, %v1379_v45  ;;  %v887_v37 = vsel %vm656_vm4, %v808_v32, 0.0 }
  0xf7   :  { %634 = vst.msk [vmem:[%s2150_s2 + $0xa8] sm:$0xf] %vm591_vm3, %v569_v0  ;;  %v880_v21 = vadd.f32 %v879_v22, %v878_v11  ;;  %v810_v22 = vmul.f32 %v1394_v55, %v1394_v55  ;;  %v812_v45 = vmul.f32 %v1434_v12, %v1434_v12  ;;  %v571_v32 = vpack.c.bf16 %v1799_v51, %v1799_v51 }
  0xf8   :  { %v683_v28 = vadd.f32 %v682_v7, %v681_v19 }
  0xf9   :  { %v882_v34 = vadd.f32 %v881_v44, %v880_v21  ;;  %v889_v44 = vsel %vm656_vm4, %v809_v61, 0.0  ;;  %v891_v21 = vsel %vm656_vm4, %v810_v22, 0.0  ;;  %636 = vst.msk [vmem:[%s2150_s2 + $0xb0] sm:$0xf] %vm591_vm3, %v571_v32  ;;  %v698_v61 = vsel %vm656_vm4, %v1466_v24, 0.0 }
  0xfa   :  { %v402_v29 = vpop.f32.mrf.mxu0  ;;  %v1746_v48 = vpop.f32.mrf.mxu1 }
  0xfb   :  { %v541_v52 = vpack.c.bf16 %v402_v29, %v402_v29  ;;  %v557_v62 = vpack.c.bf16 %v1746_v48, %v1746_v48  ;;  %v806_v15 = vmul.f32 %v402_v29, %v402_v29  ;;  %v684_v57 = vsel %vm656_vm4, %v402_v29, 0.0 }
  0xfc   :  { %v685_v38 = vadd.f32 %v684_v57, %v683_v28  ;;  %v692_v57 = vsel %vm656_vm4, %v1394_v55, 0.0 }
  0xfd   :  { %606 = vst.msk [vmem:[%s2150_s2 + $0x38] sm:$0xf] %vm591_vm3, %v541_v52  ;;  %v883_v53 = vsel %vm656_vm4, %v806_v15, 0.0 }
  0xfe   :  { %622 = vst.msk [vmem:[%s2150_s2 + $0x78] sm:$0xf] %vm591_vm3, %v557_v62  ;;  %v884_v52 = vadd.f32 %v883_v53, %v882_v34  ;;  %v694_v53 = vsel %vm656_vm4, %v1412_v1, 0.0  ;;  %v583_v34 = vpack.c.bf16 %v1801_v18, %v1801_v18  ;;  %v1835_v55 = vpop.f32.mrf.mxu2  ;;  %v696_v1 = vsel %vm656_vm4, %v1434_v12, 0.0 }
 0x100   :  { %648 = vst.msk [vmem:[%s2150_s2 + $0xe0] sm:$0xf] %vm591_vm3, %v583_v34 }
 0x102   :  { %v404_v23 = vpop.f32.mrf.mxu0  ;;  %v1790_v39 = vpop.f32.mrf.mxu1 }
 0x103   :  { %v542_v42 = vpack.c.bf16 %v404_v23, %v404_v23  ;;  %v686_v43 = vsel %vm656_vm4, %v404_v23, 0.0  ;;  %v807_v47 = vmul.f32 %v404_v23, %v404_v23  ;;  %v558_v29 = vpack.c.bf16 %v1790_v39, %v1790_v39 }
 0x104   :  { %v687_v62 = vadd.f32 %v686_v43, %v685_v38  ;;  %v1837_v38 = vpop.f32.mrf.mxu3  ;;  %v893_v43 = vsel %vm656_vm4, %v811_v20, 0.0 }
 0x105   :  { %607 = vst.msk [vmem:[%s2150_s2 + $0x3c] sm:$0xf] %vm591_vm3, %v542_v42  ;;  %v885_v0 = vsel %vm656_vm4, %v807_v47, 0.0  ;;  %v813_v47 = vmul.f32 %v1466_v24, %v1466_v24  ;;  %v584_v12 = vpack.c.bf16 %v1837_v38, %v1837_v38  ;;  %v700_v24 = vsel %vm656_vm4, %v1490_v30, 0.0 }
 0x106   :  { %v689_v7 = vadd.f32 %v688_v8, %v687_v62  ;;  %v886_v15 = vadd.f32 %v885_v0, %v884_v52  ;;  %623 = vst.msk [vmem:[%s2150_s2 + $0x7c] sm:$0xf] %vm591_vm3, %v558_v29  ;;  %v572_v29 = vpack.c.bf16 %v1835_v55, %v1835_v55  ;;  %v895_v8 = vsel %vm656_vm4, %v812_v45, 0.0  ;;  %v1879_v20 = vpop.f32.mrf.mxu2 }
 0x107   :  { %v814_v0 = vmul.f32 %v1490_v30, %v1490_v30  ;;  %649 = vst.msk [vmem:[%s2150_s2 + $0xe4] sm:$0xf] %vm591_vm3, %v584_v12  ;;  %v817_v45 = vmul.f32 %v1578_v54, %v1578_v54 }
 0x108   :  { %v691_v11 = vadd.f32 %v690_v10, %v689_v7  ;;  %v888_v19 = vadd.f32 %v887_v37, %v886_v15  ;;  %637 = vst.msk [vmem:[%s2150_s2 + $0xb4] sm:$0xf] %vm591_vm3, %v572_v29  ;;  %v897_v15 = vsel %vm656_vm4, %v813_v47, 0.0  ;;  %v815_v37 = vmul.f32 %v1514_v36, %v1514_v36 }
 0x109   :  { %v905_v47 = vsel %vm656_vm4, %v817_v45, 0.0  ;;  %v819_v29 = vmul.f32 %v1640_v9, %v1640_v9  ;;  %v823_v45 = vmul.f32 %v1790_v39, %v1790_v39 }
 0x10a   :  { %v693_v28 = vadd.f32 %v692_v57, %v691_v11  ;;  %v890_v31 = vadd.f32 %v889_v44, %v888_v19  ;;  %v899_v19 = vsel %vm656_vm4, %v814_v0, 0.0  ;;  %v702_v44 = vsel %vm656_vm4, %v1514_v36, 0.0 }
 0x10b   :  { %v816_v57 = vmul.f32 %v1546_v46, %v1546_v46  ;;  %v901_v30 = vsel %vm656_vm4, %v815_v37, 0.0  ;;  %v818_v36 = vmul.f32 %v1610_v63, %v1610_v63  ;;  %v821_v37 = vmul.f32 %v1711_v60, %v1711_v60 }
 0x10c   :  { %v695_v23 = vadd.f32 %v694_v53, %v693_v28  ;;  %v892_v42 = vadd.f32 %v891_v21, %v890_v31  ;;  %v1881_v21 = vpop.f32.mrf.mxu3  ;;  %v704_v53 = vsel %vm656_vm4, %v1546_v46, 0.0  ;;  %v708_v46 = vsel %vm656_vm4, %v1610_v63, 0.0 }
 0x10d   :  { %v585_v0 = vpack.c.bf16 %v1881_v21, %v1881_v21 }
 0x10e   :  { %v697_v52 = vadd.f32 %v696_v1, %v695_v23  ;;  %v894_v62 = vadd.f32 %v893_v43, %v892_v42  ;;  %v903_v23 = vsel %vm656_vm4, %v816_v57, 0.0  ;;  %v706_v42 = vsel %vm656_vm4, %v1578_v54, 0.0  ;;  %v1907_v63 = vpop.f32.mrf.mxu2 }
 0x10f   :  { %v820_v54 = vmul.f32 %v1656_v16, %v1656_v16  ;;  %650 = vst.msk [vmem:[%s2150_s2 + $0xe8] sm:$0xf] %vm591_vm3, %v585_v0  ;;  %v714_v57 = vsel %vm656_vm4, %v1711_v60, 0.0  ;;  %v716_v60 = vsel %vm656_vm4, %v1746_v48, 0.0 }
 0x110   :  { %v699_v22 = vadd.f32 %v698_v61, %v697_v52  ;;  %v896_v7 = vadd.f32 %v895_v8, %v894_v62  ;;  %v907_v52 = vsel %vm656_vm4, %v818_v36, 0.0  ;;  %v710_v8 = vsel %vm656_vm4, %v1640_v9, 0.0 }
 0x111   :  { %v573_v61 = vpack.c.bf16 %v1879_v20, %v1879_v20  ;;  %v712_v9 = vsel %vm656_vm4, %v1656_v16, 0.0 }
 0x112   :  { %v898_v10 = vadd.f32 %v897_v15, %v896_v7  ;;  %v701_v11 = vadd.f32 %v700_v24, %v699_v22  ;;  %v909_v24 = vsel %vm656_vm4, %v819_v29, 0.0  ;;  %v917_v29 = vsel %vm656_vm4, %v823_v45, 0.0 }
 0x113   :  { %638 = vst.msk [vmem:[%s2150_s2 + $0xb8] sm:$0xf] %vm591_vm3, %v573_v61 }
 0x114   :  { %v703_v28 = vadd.f32 %v702_v44, %v701_v11  ;;  %v900_v31 = vadd.f32 %v899_v19, %v898_v10  ;;  %v1909_v22 = vpop.f32.mrf.mxu3  ;;  %v574_v10 = vpack.c.bf16 %v1907_v63, %v1907_v63  ;;  %v911_v44 = vsel %vm656_vm4, %v820_v54, 0.0 }
 0x115   :  { %v586_v16 = vpack.c.bf16 %v1909_v22, %v1909_v22 }
 0x116   :  { %v705_v32 = vadd.f32 %v704_v53, %v703_v28  ;;  %v902_v34 = vadd.f32 %v901_v30, %v900_v31  ;;  %v822_v28 = vmul.f32 %v1746_v48, %v1746_v48  ;;  %639 = vst.msk [vmem:[%s2150_s2 + $0xbc] sm:$0xf] %vm591_vm3, %v574_v10  ;;  %v913_v53 = vsel %vm656_vm4, %v821_v37, 0.0 }
 0x117   :  { %651 = vst.msk [vmem:[%s2150_s2 + $0xec] sm:$0xf] %vm591_vm3, %v586_v16  ;;  %v720_v48 = vsel %vm656_vm4, %v1417_v6, 0.0  ;;  %v828_v37 = vmul.f32 %v1520_v40, %v1520_v40 }
 0x118   :  { %v707_v43 = vadd.f32 %v706_v42, %v705_v32  ;;  %v904_v1 = vadd.f32 %v903_v23, %v902_v34  ;;  %v824_v34 = vmul.f32 %v1417_v6, %v1417_v6  ;;  %v915_v23 = vsel %vm656_vm4, %v822_v28, 0.0 }
 0x119   :  { %v718_v42 = vsel %vm656_vm4, %v1790_v39, 0.0  ;;  %v826_v39 = vmul.f32 %v1472_v27, %v1472_v27  ;;  %v724_v6 = vsel %vm656_vm4, %v1472_v27, 0.0 }
 0x11a   :  { %v709_v62 = vadd.f32 %v708_v46, %v707_v43  ;;  %v906_v12 = vadd.f32 %v905_v47, %v904_v1  ;;  %v825_v46 = vmul.f32 %v1439_v17, %v1439_v17 }
 0x11c   :  { %v711_v7 = vadd.f32 %v710_v8, %v709_v62  ;;  %v908_v15 = vadd.f32 %v907_v52, %v906_v12  ;;  %v1951_v43 = vpop.f32.mrf.mxu3  ;;  %v919_v12 = vsel %vm656_vm4, %v824_v34, 0.0  ;;  %v722_v8 = vsel %vm656_vm4, %v1439_v17, 0.0 }
 0x11d   :  { %v921_v0 = vsel %vm656_vm4, %v825_v46, 0.0  ;;  %v726_v17 = vsel %vm656_vm4, %v1496_v33, 0.0  ;;  %v587_v10 = vpack.c.bf16 %v1951_v43, %v1951_v43  ;;  %v831_v34 = vmul.f32 %v1616_v3, %v1616_v3 }
 0x11e   :  { %v713_v11 = vadd.f32 %v712_v9, %v711_v7  ;;  %v910_v19 = vadd.f32 %v909_v24, %v908_v15  ;;  %v827_v7 = vmul.f32 %v1496_v33, %v1496_v33  ;;  %v923_v9 = vsel %vm656_vm4, %v826_v39, 0.0 }
 0x11f   :  { %v829_v33 = vmul.f32 %v1552_v49, %v1552_v49  ;;  %652 = vst.msk [vmem:[%s2150_s2 + $0xf0] sm:$0xf] %vm591_vm3, %v587_v10 }
 0x120   :  { %v912_v31 = vadd.f32 %v911_v44, %v910_v19  ;;  %v715_v30 = vadd.f32 %v714_v57, %v713_v11  ;;  %v925_v44 = vsel %vm656_vm4, %v827_v7, 0.0  ;;  %v728_v57 = vsel %vm656_vm4, %v1520_v40, 0.0 }
 0x121   :  { %v730_v40 = vsel %vm656_vm4, %v1552_v49, 0.0  ;;  %v734_v49 = vsel %vm656_vm4, %v1616_v3, 0.0  ;;  %v738_v3 = vsel %vm656_vm4, %v1662_v25, 0.0  ;;  %v835_v7 = vmul.f32 %v1751_v56, %v1751_v56 }
 0x122   :  { %v914_v36 = vadd.f32 %v913_v53, %v912_v31  ;;  %v717_v32 = vadd.f32 %v716_v60, %v715_v30  ;;  %v927_v30 = vsel %vm656_vm4, %v828_v37, 0.0  ;;  %v830_v53 = vmul.f32 %v1584_v58, %v1584_v58 }
 0x124   :  { %v916_v1 = vadd.f32 %v915_v23, %v914_v36  ;;  %v719_v47 = vadd.f32 %v718_v42, %v717_v32  ;;  %v1975_v11 = vpop.f32.mrf.mxu3  ;;  %v929_v36 = vsel %vm656_vm4, %v829_v33, 0.0  ;;  %v732_v32 = vsel %vm656_vm4, %v1584_v58, 0.0 }
 0x125   :  { %v588_v16 = vpack.c.bf16 %v1975_v11, %v1975_v11  ;;  %v736_v58 = vsel %vm656_vm4, %v1644_v13, 0.0 }
 0x126   :  { %v721_v52 = vadd.f32 %v720_v48, %v719_v47  ;;  %v918_v62 = vadd.f32 %v917_v29, %v916_v1  ;;  %v931_v1 = vsel %vm656_vm4, %v830_v53, 0.0  ;;  %v832_v47 = vmul.f32 %v1644_v13, %v1644_v13 }
 0x127   :  { %653 = vst.msk [vmem:[%s2150_s2 + $0xf4] sm:$0xf] %vm591_vm3, %v588_v16  ;;  %v740_v13 = vsel %vm656_vm4, %v1723_v2, 0.0  ;;  %v941_v16 = vsel %vm656_vm4, %v835_v7, 0.0 }
 0x128   :  { %v723_v54 = vadd.f32 %v722_v8, %v721_v52  ;;  %v920_v61 = vadd.f32 %v919_v12, %v918_v62  ;;  %v933_v52 = vsel %vm656_vm4, %v831_v34, 0.0  ;;  %v833_v62 = vmul.f32 %v1662_v25, %v1662_v25 }
 0x129   :  { %v935_v39 = vsel %vm656_vm4, %v832_v47, 0.0  ;;  %v742_v25 = vsel %vm656_vm4, %v1751_v56, 0.0  ;;  %v837_v56 = vmul.f32 %v1835_v55, %v1835_v55  ;;  %v840_v34 = vmul.f32 %v1522_v41, %v1522_v41 }
 0x12a   :  { %v725_v15 = vadd.f32 %v724_v6, %v723_v54  ;;  %v922_v24 = vadd.f32 %v921_v0, %v920_v61  ;;  %v834_v54 = vmul.f32 %v1723_v2, %v1723_v2  ;;  %v937_v6 = vsel %vm656_vm4, %v833_v62, 0.0 }
 0x12b   :  { %v945_v53 = vsel %vm656_vm4, %v837_v56, 0.0 }
 0x12c   :  { %v727_v19 = vadd.f32 %v726_v17, %v725_v15  ;;  %v924_v27 = vadd.f32 %v923_v9, %v922_v24  ;;  %v2007_v48 = vpop.f32.mrf.mxu3  ;;  %v939_v9 = vsel %vm656_vm4, %v834_v54, 0.0  ;;  %v836_v17 = vmul.f32 %v1799_v51, %v1799_v51 }
 0x12d   :  { %v589_v37 = vpack.c.bf16 %v2007_v48, %v2007_v48 }
 0x12e   :  { %v729_v28 = vadd.f32 %v728_v57, %v727_v19  ;;  %v926_v31 = vadd.f32 %v925_v44, %v924_v27  ;;  %v744_v44 = vsel %vm656_vm4, %v1799_v51, 0.0  ;;  %v746_v51 = vsel %vm656_vm4, %v1835_v55, 0.0 }
 0x12f   :  { %654 = vst.msk [vmem:[%s2150_s2 + $0xf8] sm:$0xf] %vm591_vm3, %v589_v37 }
 0x130   :  { %v731_v60 = vadd.f32 %v730_v40, %v729_v28  ;;  %v928_v45 = vadd.f32 %v927_v30, %v926_v31  ;;  %v943_v28 = vsel %vm656_vm4, %v836_v17, 0.0  ;;  %v838_v31 = vmul.f32 %v1879_v20, %v1879_v20 }
 0x131   :  { %v846_v17 = vmul.f32 %v1725_v5, %v1725_v5 }
 0x132   :  { %v930_v23 = vadd.f32 %v929_v36, %v928_v45  ;;  %v733_v42 = vadd.f32 %v732_v32, %v731_v60  ;;  %v748_v60 = vsel %vm656_vm4, %v1879_v20, 0.0  ;;  %v839_v45 = vmul.f32 %v1907_v63, %v1907_v63 }
 0x133   :  { %v947_v55 = vsel %vm656_vm4, %v838_v31, 0.0  ;;  %v841_v20 = vmul.f32 %v1554_v50, %v1554_v50  ;;  %v963_v56 = vsel %vm656_vm4, %v846_v17, 0.0  ;;  %v849_v31 = vmul.f32 %v1837_v38, %v1837_v38 }
 0x134   :  { %v735_v46 = vadd.f32 %v734_v49, %v733_v42  ;;  %v932_v29 = vadd.f32 %v931_v1, %v930_v23  ;;  %v2031_v10 = vpop.f32.mrf.mxu3  ;;  %v750_v23 = vsel %vm656_vm4, %v1907_v63, 0.0  ;;  %v752_v49 = vsel %vm656_vm4, %v1522_v41, 0.0 }
 0x135   :  { %v590_v27 = vpack.c.bf16 %v2031_v10, %v2031_v10  ;;  %v949_v47 = vsel %vm656_vm4, %v839_v45, 0.0  ;;  %v842_v63 = vmul.f32 %v1586_v59, %v1586_v59  ;;  %v756_v41 = vsel %vm656_vm4, %v1586_v59, 0.0 }
 0x136   :  { %v737_v12 = vadd.f32 %v736_v58, %v735_v46  ;;  %v934_v8 = vadd.f32 %v933_v52, %v932_v29  ;;  %v951_v52 = vsel %vm656_vm4, %v840_v34, 0.0  ;;  %v754_v58 = vsel %vm656_vm4, %v1554_v50, 0.0 }
 0x137   :  { %655 = vst.msk [vmem:[%s2150_s2 + $0xfc] sm:$0xf] %vm591_vm3, %v590_v27  ;;  %v758_v50 = vsel %vm656_vm4, %v1618_v4, 0.0  ;;  %v760_v59 = vsel %vm656_vm4, %v1646_v14, 0.0  ;;  %v847_v27 = vmul.f32 %v1753_v35, %v1753_v35  ;;  %v851_v34 = vmul.f32 %v1909_v22, %v1909_v22 }
 0x138   :  { %v739_v61 = vadd.f32 %v738_v3, %v737_v12  ;;  %v936_v0 = vadd.f32 %v935_v39, %v934_v8  ;;  %v953_v8 = vsel %vm656_vm4, %v841_v20, 0.0  ;;  %v843_v39 = vmul.f32 %v1618_v4, %v1618_v4 }
 0x139   :  { %v762_v4 = vsel %vm656_vm4, %v1664_v26, 0.0 }
 0x13a   :  { %v741_v15 = vadd.f32 %v740_v13, %v739_v61  ;;  %v938_v24 = vadd.f32 %v937_v6, %v936_v0  ;;  %v955_v61 = vsel %vm656_vm4, %v842_v63, 0.0  ;;  %v844_v0 = vmul.f32 %v1646_v14, %v1646_v14 }
 0x13b   :  { %v957_v7 = vsel %vm656_vm4, %v843_v39, 0.0  ;;  %v764_v14 = vsel %vm656_vm4, %v1725_v5, 0.0  ;;  %v768_v5 = vsel %vm656_vm4, %v1801_v18, 0.0  ;;  %v854_v63 = vmul.f32 %v2007_v48, %v2007_v48 }
 0x13c   :  { %v743_v19 = vadd.f32 %v742_v25, %v741_v15  ;;  %v940_v2 = vadd.f32 %v939_v9, %v938_v24  ;;  %v845_v15 = vmul.f32 %v1664_v26, %v1664_v26  ;;  %v959_v25 = vsel %vm656_vm4, %v844_v0, 0.0 }
 0x13d   :  { %v766_v26 = vsel %vm656_vm4, %v1753_v35, 0.0  ;;  %v770_v35 = vsel %vm656_vm4, %v1837_v38, 0.0  ;;  %v774_v38 = vsel %vm656_vm4, %v1909_v22, 0.0  ;;  %v778_v22 = vsel %vm656_vm4, %v1975_v11, 0.0 }
 0x13e   :  { %v942_v57 = vadd.f32 %v941_v16, %v940_v2  ;;  %v745_v33 = vadd.f32 %v744_v44, %v743_v19  ;;  %v961_v2 = vsel %vm656_vm4, %v845_v15, 0.0 }
 0x140   :  { %v944_v30 = vadd.f32 %v943_v28, %v942_v57  ;;  %v747_v40 = vadd.f32 %v746_v51, %v745_v33  ;;  %v848_v57 = vmul.f32 %v1801_v18, %v1801_v18  ;;  %v965_v51 = vsel %vm656_vm4, %v847_v27, 0.0 }
 0x141   :  { %v772_v18 = vsel %vm656_vm4, %v1881_v21, 0.0 }
 0x142   :  { %v946_v36 = vadd.f32 %v945_v53, %v944_v30  ;;  %v749_v32 = vadd.f32 %v748_v60, %v747_v40  ;;  %v967_v53 = vsel %vm656_vm4, %v848_v57, 0.0  ;;  %v850_v60 = vmul.f32 %v1881_v21, %v1881_v21 }
 0x143   :  { %v776_v21 = vsel %vm656_vm4, %v1951_v43, 0.0 }
 0x144   :  { %v948_v42 = vadd.f32 %v947_v55, %v946_v36  ;;  %v751_v1 = vadd.f32 %v750_v23, %v749_v32  ;;  %v969_v32 = vsel %vm656_vm4, %v849_v31, 0.0 }
 0x146   :  { %v753_v46 = vadd.f32 %v752_v49, %v751_v1  ;;  %v950_v29 = vadd.f32 %v949_v47, %v948_v42  ;;  %v971_v42 = vsel %vm656_vm4, %v850_v60, 0.0  ;;  %v852_v1 = vmul.f32 %v1951_v43, %v1951_v43 }
 0x147   :  { %v973_v47 = vsel %vm656_vm4, %v851_v34, 0.0  ;;  %v780_v43 = vsel %vm656_vm4, %v2007_v48, 0.0 }
 0x148   :  { %v755_v62 = vadd.f32 %v754_v58, %v753_v46  ;;  %v952_v12 = vadd.f32 %v951_v52, %v950_v29  ;;  %v853_v46 = vmul.f32 %v1975_v11, %v1975_v11  ;;  %v975_v58 = vsel %vm656_vm4, %v852_v1, 0.0 }
 0x149   :  { %v782_v11 = vsel %vm656_vm4, %v2031_v10, 0.0 }
 0x14a   :  { %v757_v3 = vadd.f32 %v756_v41, %v755_v62  ;;  %v954_v54 = vadd.f32 %v953_v8, %v952_v12  ;;  %v977_v8 = vsel %vm656_vm4, %v853_v46, 0.0  ;;  %v855_v41 = vmul.f32 %v2031_v10, %v2031_v10 }
 0x14c   :  { %v759_v6 = vadd.f32 %v758_v50, %v757_v3  ;;  %v956_v13 = vadd.f32 %v955_v61, %v954_v54  ;;  %v979_v54 = vsel %vm656_vm4, %v854_v63, 0.0  ;;  %v981_v0 = vsel %vm656_vm4, %v855_v41, 0.0 }
 0x14e   :  { %v761_v24 = vadd.f32 %v760_v59, %v759_v6  ;;  %v958_v9 = vadd.f32 %v957_v7, %v956_v13 }
 0x150   :  { %v763_v37 = vadd.f32 %v762_v4, %v761_v24  ;;  %v960_v19 = vadd.f32 %v959_v25, %v958_v9 }
 0x152   :  { %v962_v16 = vadd.f32 %v961_v2, %v960_v19  ;;  %v765_v44 = vadd.f32 %v764_v14, %v763_v37 }
 0x154   :  { %v767_v33 = vadd.f32 %v766_v26, %v765_v44  ;;  %v964_v28 = vadd.f32 %v963_v56, %v962_v16 }
 0x156   :  { %v769_v30 = vadd.f32 %v768_v5, %v767_v33  ;;  %v966_v40 = vadd.f32 %v965_v51, %v964_v28 }
 0x158   :  { %v771_v45 = vadd.f32 %v770_v35, %v769_v30  ;;  %v968_v36 = vadd.f32 %v967_v53, %v966_v40 }
 0x15a   :  { %v773_v55 = vadd.f32 %v772_v18, %v771_v45  ;;  %v970_v23 = vadd.f32 %v969_v32, %v968_v36 }
 0x15c   :  { %v775_v49 = vadd.f32 %v774_v38, %v773_v55  ;;  %v972_v20 = vadd.f32 %v971_v42, %v970_v23 }
 0x15e   :  { %v974_v29 = vadd.f32 %v973_v47, %v972_v20  ;;  %v777_v52 = vadd.f32 %v776_v21, %v775_v49 }
 0x160   :  { %v976_v62 = vadd.f32 %v975_v58, %v974_v29  ;;  %v779_v12 = vadd.f32 %v778_v22, %v777_v52 }
 0x162   :  { %v978_v39 = vadd.f32 %v977_v8, %v976_v62  ;;  %v781_v3 = vadd.f32 %v780_v43, %v779_v12 }
 0x164   :  { %v980_v61 = vadd.f32 %v979_v54, %v978_v39  ;;  %v783_v50 = vadd.f32 %v782_v11, %v781_v3 }
 0x166   :  { %v784_v6 = vrot.slane %v783_v50, 4  ;;  %v982_v13 = vadd.f32 %v981_v0, %v980_v61 }
 0x168   :  { %v785_v7 = vadd.f32 %v784_v6, %v783_v50  ;;  %v983_v59 = vrot.slane %v982_v13, 4 }
 0x16a   :  { %v786_v15 = vrot.slane %v785_v7, 2  ;;  %v984_v48 = vadd.f32 %v983_v59, %v982_v13 }
 0x16c   :  { %v787_v24 = vadd.f32 %v786_v15, %v785_v7  ;;  %v985_v9 = vrot.slane %v984_v48, 2 }
 0x16e   :  { %v788_v25 = vrot.slane %v787_v24, 1  ;;  %v986_v4 = vadd.f32 %v985_v9, %v984_v48 }
 0x170   :  { %v789_v17 = vadd.f32 %v788_v25, %v787_v24  ;;  %v987_v37 = vrot.slane %v986_v4, 1 }
 0x172   :  { %791 = vst.msk [vmem:[%s2151_s3] sm:$0x1] %vm790_vm5, %v789_v17  ;;  %v988_v10 = vadd.f32 %v987_v37, %v986_v4 }
 0x174   :  { %989 = vst.msk [vmem:[%s2152_s4] sm:$0x1] %vm790_vm5, %v988_v10 }

// kernel: resnet_ae_forward.69
= control target key start
LH: loop header
LB: loop body
LE: loop exit
PB: predicated region body
PF: predicated region fallthrough
CT: control target
= control target key end

     0   :  { %s98_s0 = inlined_call_operand.vmem [shape: bf16[8,512], index: 0, kind: input, shape index: {}]   ;;  %s99_s1 = inlined_call_operand.vmem [shape: f32[1,512], index: 1, kind: input, shape index: {}]   ;;  %s100_s2 = inlined_call_operand.vmem [shape: f32[1,512], index: 2, kind: input, shape index: {}]   ;;  %s101_s3 = inlined_call_operand.vmem [shape: bf16[8,512], index: 3, kind: output, shape index: {}]  }
   0x1   :  { %v14_v0 = vld [vmem:[%s98_s0] sm:$0xff]  ;;  %v15_v7 = vld [vmem:[%s98_s0 + $0x8] sm:$0xff] }
   0x2   :  { %v20_v1 = vld [vmem:[%s99_s1] sm:$0xf]  ;;  %v16_v3 = vunpack.c.l.bf16 %v14_v0  ;;  %v17_v4 = vunpack.c.h.bf16 %v14_v0  ;;  %v18_v10 = vunpack.c.l.bf16 %v15_v7  ;;  %v19_v11 = vunpack.c.h.bf16 %v15_v7 }
   0x3   :  { %v34_v2 = vld [vmem:[%s100_s2] sm:$0xf]  ;;  %v22_v5 = vperm.slane %v20_v1, 0  ;;  %v23_v6 = vperm.slane %v20_v1, 1  ;;  %v24_v14 = vperm.slane %v20_v1, 2  ;;  %v25_v15 = vperm.slane %v20_v1, 3 }
   0x4   :  { %v36_v8 = vperm.slane %v34_v2, 0  ;;  %v37_v9 = vperm.slane %v34_v2, 1  ;;  %v38_v16 = vperm.slane %v34_v2, 2  ;;  %v39_v17 = vperm.slane %v34_v2, 3 }
   0x5   :  { %v30_v12 = vmul.f32 %v22_v5, %v16_v3  ;;  %v31_v13 = vmul.f32 %v23_v6, %v17_v4  ;;  %v32_v20 = vmul.f32 %v24_v14, %v18_v10  ;;  %v33_v21 = vmul.f32 %v25_v15, %v19_v11 }
   0x7   :  { %v44_v18 = vadd.f32 %v36_v8, %v30_v12  ;;  %v45_v19 = vadd.f32 %v37_v9, %v31_v13  ;;  %v46_v24 = vadd.f32 %v38_v16, %v32_v20  ;;  %v47_v25 = vadd.f32 %v39_v17, %v33_v21 }
   0x9   :  { %v48_v22 = vmax.f32 %v44_v18, 0.0  ;;  %v49_v23 = vmax.f32 %v45_v19, 0.0  ;;  %v50_v27 = vmax.f32 %v46_v24, 0.0  ;;  %v51_v28 = vmax.f32 %v47_v25, 0.0 }
   0xb   :  { %v52_v26 = vpack.c.bf16 %v49_v23, %v48_v22  ;;  %v53_v29 = vpack.c.bf16 %v51_v28, %v50_v27 }
   0xd   :  { %54 = vst [vmem:[%s101_s3] sm:$0xff] %v52_v26 }
   0xe   :  { %55 = vst [vmem:[%s101_s3 + $0x8] sm:$0xff] %v53_v29 }

// kernel: resnet_ae_forward.70
= control target key start
LH: loop header
LB: loop body
LE: loop exit
PB: predicated region body
PF: predicated region fallthrough
CT: control target
= control target key end

     0   :  { %vm376_vm0 = vcmask 1043456   ;;  %vm279_vm1 = vcmask 588800   ;;  %vm677_vm2 = vcmask 60416   ;;  %s1461_s1 = inlined_call_operand.vmem [shape: bf16[72,8], index: 1, kind: input, shape index: {}]   ;;  %s1462_s0 = inlined_call_operand.vmem [shape: bf16[512,72], index: 0, kind: input, shape index: {}]   ;;  %s1463_s2 = inlined_call_operand.vmem [shape: f32[1,8], index: 2, kind: input, shape index: {}]   ;;  %s1464_s3 = inlined_call_operand.vmem [shape: bf16[512,8], index: 3, kind: output, shape index: {}]  }
   0x1   :  { %v247_v0 = vld [vmem:[%s1461_s1 + $0x20] sm:$0xf]  ;;  %v797_v4 = vld [vmem:[%s1461_s1 + $0x18] sm:$0xff]  ;;  %v796_v5 = vld [vmem:[%s1461_s1 + $0x10] sm:$0xff] }
   0x2   :  { %v269_v1 = vunpack.c.l.b16 %v247_v0  ;;  %v799_v6 = vld [vmem:[%s1462_s0] sm:$0xff]   ;;  %v795_v14 = vld [vmem:[%s1461_s1 + $0x8] sm:$0xff]  ;;  %v927_v56 = vld [vmem:[%s1462_s0 + $0x10] sm:$0xff]  }
   0x3   :  { %v933_v7 = vld [vmem:[%s1462_s0 + $0x40] sm:$0xff]   ;;  %v800_v10 = vunpack.c.l.bf16 %v799_v6  ;;  %v801_v11 = vunpack.c.h.bf16 %v799_v6  ;;  %v926_v32 = vld [vmem:[%s1462_s0 + $0x8] sm:$0xff]   ;;  %v935_v57 = vld [vmem:[%s1462_s0 + $0x50] sm:$0xff]   ;;  %v808_v60 = vunpack.c.l.bf16 %v927_v56  ;;  %v809_v61 = vunpack.c.h.bf16 %v927_v56 }
   0x4   :  { %v274_v2 = vpack.c.b16 %v269_v1, %v269_v1  ;;  %v941_v8 = vld [vmem:[%s1462_s0 + $0x80] sm:$0xff]   ;;  %v832_v12 = vunpack.c.l.bf16 %v933_v7  ;;  %v833_v13 = vunpack.c.h.bf16 %v933_v7  ;;  %v934_v33 = vld [vmem:[%s1462_s0 + $0x48] sm:$0xff]   ;;  %v804_v36 = vunpack.c.l.bf16 %v926_v32  ;;  %v943_v58 = vld [vmem:[%s1462_s0 + $0x90] sm:$0xff]  }
   0x5   :  { %v949_v9 = vld [vmem:[%s1462_s0 + $0xc0] sm:$0xff]   ;;  %v864_v15 = vunpack.c.l.bf16 %v941_v8  ;;  %v865_v16 = vunpack.c.h.bf16 %v941_v8  ;;  %v143_v19 = vmax.f32 %v800_v10, 0.0  ;;  %v144_v20 = vmax.f32 %v801_v11, 0.0  ;;  %v942_v34 = vld [vmem:[%s1462_s0 + $0x88] sm:$0xff]   ;;  %v951_v59 = vld [vmem:[%s1462_s0 + $0xd0] sm:$0xff]  }
   0x6   :  { %v378_v3 = vsel %vm376_vm0, %v274_v2, 0  ;;  %v896_v17 = vunpack.c.l.bf16 %v949_v9  ;;  %v897_v18 = vunpack.c.h.bf16 %v949_v9  ;;  %v159_v21 = vmax.f32 %v832_v12, 0.0  ;;  %v794_v23 = vld [vmem:[%s1461_s1] sm:$0xff]  ;;  %v950_v35 = vld [vmem:[%s1462_s0 + $0xc8] sm:$0xff]  }
   0x7   :  { %383 = vmatpush.bf16.msra.mxu0 %v378_v3  ;;  %957 = vmatpush.bf16.msra.mxu1 %v378_v3  ;;  %v160_v22 = vmax.f32 %v833_v13, 0.0  ;;  %v175_v24 = vmax.f32 %v864_v15, 0.0  ;;  %v176_v25 = vmax.f32 %v865_v16, 0.0  ;;  %v207_v28 = vpack.c.bf16 %v144_v20, %v143_v19  ;;  %v928_v16 = vld [vmem:[%s1462_s0 + $0x18] sm:$0xff]  }
   0x8   :  { %958 = vmatpush.bf16.msra.mxu2 %v378_v3  ;;  %959 = vmatpush.bf16.msra.mxu3 %v378_v3  ;;  %v191_v26 = vmax.f32 %v896_v17, 0.0  ;;  %v192_v27 = vmax.f32 %v897_v18, 0.0  ;;  %v805_v37 = vunpack.c.h.bf16 %v926_v32  ;;  %v836_v38 = vunpack.c.l.bf16 %v934_v33  ;;  %v936_v17 = vld [vmem:[%s1462_s0 + $0x58] sm:$0xff]  }
   0x9   :  { %v215_v29 = vpack.c.bf16 %v160_v22, %v159_v21  ;;  %v223_v30 = vpack.c.bf16 %v176_v25, %v175_v24  ;;  %v837_v39 = vunpack.c.h.bf16 %v934_v33  ;;  %v868_v40 = vunpack.c.l.bf16 %v942_v34  ;;  %v944_v18 = vld [vmem:[%s1462_s0 + $0x98] sm:$0xff]  }
   0xa   :  { %v231_v31 = vpack.c.bf16 %v192_v27, %v191_v26  ;;  %v869_v41 = vunpack.c.h.bf16 %v942_v34  ;;  %v900_v42 = vunpack.c.l.bf16 %v950_v35  ;;  %v901_v43 = vunpack.c.h.bf16 %v950_v35  ;;  %v952_v19 = vld [vmem:[%s1462_s0 + $0xd8] sm:$0xff]  }
   0xb   :  { %384 = vmatpush.bf16.msra.mxu0 %v797_v4  ;;  %960 = vmatpush.bf16.msra.mxu1 %v797_v4  ;;  %v145_v44 = vmax.f32 %v804_v36, 0.0  ;;  %v146_v45 = vmax.f32 %v805_v37, 0.0  ;;  %v161_v46 = vmax.f32 %v836_v38, 0.0  ;;  %v162_v47 = vmax.f32 %v837_v39, 0.0 }
   0xc   :  { %961 = vmatpush.bf16.msra.mxu2 %v797_v4  ;;  %962 = vmatpush.bf16.msra.mxu3 %v797_v4  ;;  %v177_v48 = vmax.f32 %v868_v40, 0.0  ;;  %v178_v49 = vmax.f32 %v869_v41, 0.0  ;;  %v193_v50 = vmax.f32 %v900_v42, 0.0  ;;  %v194_v51 = vmax.f32 %v901_v43, 0.0  ;;  %v929_v40 = vld [vmem:[%s1462_s0 + $0x20] sm:$0xff]  }
   0xd   :  { %v208_v52 = vpack.c.bf16 %v146_v45, %v145_v44  ;;  %v216_v53 = vpack.c.bf16 %v162_v47, %v161_v46  ;;  %v840_v62 = vunpack.c.l.bf16 %v935_v57  ;;  %v841_v63 = vunpack.c.h.bf16 %v935_v57  ;;  %v937_v41 = vld [vmem:[%s1462_s0 + $0x60] sm:$0xff]  }
   0xe   :  { %v224_v54 = vpack.c.bf16 %v178_v49, %v177_v48  ;;  %v232_v55 = vpack.c.bf16 %v194_v51, %v193_v50  ;;  %v872_v0 = vunpack.c.l.bf16 %v943_v58  ;;  %v873_v1 = vunpack.c.h.bf16 %v943_v58  ;;  %v945_v42 = vld [vmem:[%s1462_s0 + $0xa0] sm:$0xff]  }
   0xf   :  { %385 = vmatpush.bf16.msra.mxu0 %v796_v5  ;;  %963 = vmatpush.bf16.msra.mxu1 %v796_v5  ;;  %v904_v2 = vunpack.c.l.bf16 %v951_v59  ;;  %v905_v3 = vunpack.c.h.bf16 %v951_v59  ;;  %v147_v4 = vmax.f32 %v808_v60, 0.0  ;;  %v163_v6 = vmax.f32 %v840_v62, 0.0  ;;  %v953_v43 = vld [vmem:[%s1462_s0 + $0xe0] sm:$0xff]  }
  0x10   :  { %964 = vmatpush.bf16.msra.mxu2 %v796_v5  ;;  %965 = vmatpush.bf16.msra.mxu3 %v796_v5  ;;  %v148_v5 = vmax.f32 %v809_v61, 0.0  ;;  %v164_v7 = vmax.f32 %v841_v63, 0.0  ;;  %v179_v8 = vmax.f32 %v872_v0, 0.0  ;;  %v180_v9 = vmax.f32 %v873_v1, 0.0  ;;  %v930_v0 = vld [vmem:[%s1462_s0 + $0x28] sm:$0xff]  }
  0x11   :  { %v195_v10 = vmax.f32 %v904_v2, 0.0  ;;  %v196_v11 = vmax.f32 %v905_v3, 0.0  ;;  %v812_v20 = vunpack.c.l.bf16 %v928_v16  ;;  %v813_v21 = vunpack.c.h.bf16 %v928_v16  ;;  %v938_v1 = vld [vmem:[%s1462_s0 + $0x68] sm:$0xff]  }
  0x12   :  { %v209_v12 = vpack.c.bf16 %v148_v5, %v147_v4  ;;  %v217_v13 = vpack.c.bf16 %v164_v7, %v163_v6  ;;  %v844_v22 = vunpack.c.l.bf16 %v936_v17  ;;  %v876_v24 = vunpack.c.l.bf16 %v944_v18  ;;  %v946_v2 = vld [vmem:[%s1462_s0 + $0xa8] sm:$0xff]  }
  0x13   :  { %386 = vmatpush.bf16.msra.mxu0 %v795_v14  ;;  %966 = vmatpush.bf16.msra.mxu1 %v795_v14  ;;  %v233_v15 = vpack.c.bf16 %v196_v11, %v195_v10  ;;  %v877_v25 = vunpack.c.h.bf16 %v944_v18  ;;  %v908_v26 = vunpack.c.l.bf16 %v952_v19  ;;  %v909_v27 = vunpack.c.h.bf16 %v952_v19  ;;  %v954_v3 = vld [vmem:[%s1462_s0 + $0xe8] sm:$0xff]  }
  0x14   :  { %967 = vmatpush.bf16.msra.mxu2 %v795_v14  ;;  %968 = vmatpush.bf16.msra.mxu3 %v795_v14  ;;  %v225_v14 = vpack.c.bf16 %v180_v9, %v179_v8  ;;  %v181_v32 = vmax.f32 %v876_v24, 0.0  ;;  %v816_v44 = vunpack.c.l.bf16 %v929_v40  ;;  %v817_v45 = vunpack.c.h.bf16 %v929_v40  ;;  %v931_v24 = vld [vmem:[%s1462_s0 + $0x30] sm:$0xff]  }
  0x15   :  { %v182_v33 = vmax.f32 %v877_v25, 0.0  ;;  %v197_v34 = vmax.f32 %v908_v26, 0.0  ;;  %v198_v35 = vmax.f32 %v909_v27, 0.0  ;;  %v848_v46 = vunpack.c.l.bf16 %v937_v41  ;;  %v939_v25 = vld [vmem:[%s1462_s0 + $0x70] sm:$0xff]  }
  0x16   :  { %v849_v47 = vunpack.c.h.bf16 %v937_v41  ;;  %v880_v48 = vunpack.c.l.bf16 %v945_v42  ;;  %v881_v49 = vunpack.c.h.bf16 %v945_v42  ;;  %v912_v50 = vunpack.c.l.bf16 %v953_v43  ;;  %v947_v26 = vld [vmem:[%s1462_s0 + $0xb0] sm:$0xff]  }
  0x17   :  { %387 = vmatpush.bf16.msra.mxu0 %v794_v23  ;;  %969 = vmatpush.bf16.msra.mxu1 %v794_v23  ;;  %v226_v38 = vpack.c.bf16 %v182_v33, %v181_v32  ;;  %v234_v39 = vpack.c.bf16 %v198_v35, %v197_v34  ;;  %v913_v51 = vunpack.c.h.bf16 %v953_v43  ;;  %v820_v4 = vunpack.c.l.bf16 %v930_v0  ;;  %v955_v27 = vld [vmem:[%s1462_s0 + $0xf0] sm:$0xff]  }
  0x18   :  { %970 = vmatpush.bf16.msra.mxu2 %v794_v23  ;;  %971 = vmatpush.bf16.msra.mxu3 %v794_v23  ;;  %v845_v23 = vunpack.c.h.bf16 %v936_v17  ;;  %v183_v56 = vmax.f32 %v880_v48, 0.0  ;;  %v184_v57 = vmax.f32 %v881_v49, 0.0  ;;  %v199_v58 = vmax.f32 %v912_v50, 0.0  ;;  %v932_v48 = vld [vmem:[%s1462_s0 + $0x38] sm:$0xff]  }
  0x19   :  { %v200_v59 = vmax.f32 %v913_v51, 0.0  ;;  %v821_v5 = vunpack.c.h.bf16 %v930_v0  ;;  %v852_v6 = vunpack.c.l.bf16 %v938_v1  ;;  %v853_v7 = vunpack.c.h.bf16 %v938_v1  ;;  %v940_v49 = vld [vmem:[%s1462_s0 + $0x78] sm:$0xff]  }
  0x1a   :  { %762 = vmatmul.msk.bf16.vlgmr.msra.gmra.mxu0 %vm279_vm1, %v207_v28  ;;  %770 = vmatmul.msk.bf16.vlgmr.msra.gmra.mxu1 %vm279_vm1, %v215_v29  ;;  %v149_v28 = vmax.f32 %v812_v20, 0.0  ;;  %v150_v29 = vmax.f32 %v813_v21, 0.0  ;;  %v227_v62 = vpack.c.bf16 %v184_v57, %v183_v56  ;;  %v884_v8 = vunpack.c.l.bf16 %v946_v2  ;;  %v948_v50 = vld [vmem:[%s1462_s0 + $0xb8] sm:$0xff]  }
  0x1b   :  { %778 = vmatmul.msk.bf16.vlgmr.msra.gmra.mxu2 %vm279_vm1, %v223_v30  ;;  %786 = vmatmul.msk.bf16.vlgmr.msra.gmra.mxu3 %vm279_vm1, %v231_v31  ;;  %v165_v30 = vmax.f32 %v844_v22, 0.0  ;;  %v166_v31 = vmax.f32 %v845_v23, 0.0  ;;  %v235_v63 = vpack.c.bf16 %v200_v59, %v199_v58  ;;  %v885_v9 = vunpack.c.h.bf16 %v946_v2  ;;  %v956_v51 = vld [vmem:[%s1462_s0 + $0xf8] sm:$0xff]  }
  0x1c   :  { %v210_v36 = vpack.c.bf16 %v150_v29, %v149_v28  ;;  %v916_v10 = vunpack.c.l.bf16 %v954_v3  ;;  %v917_v11 = vunpack.c.h.bf16 %v954_v3  ;;  %v185_v16 = vmax.f32 %v884_v8, 0.0  ;;  %v1139_v8 = vld [vmem:[%s1463_s2] ss:$0 sm:$0xff] }
  0x1d   :  { %v218_v37 = vpack.c.bf16 %v166_v31, %v165_v30  ;;  %v186_v17 = vmax.f32 %v885_v9, 0.0  ;;  %v824_v28 = vunpack.c.l.bf16 %v931_v24  ;;  %v825_v29 = vunpack.c.h.bf16 %v931_v24 }
  0x1e   :  { %v201_v18 = vmax.f32 %v916_v10, 0.0  ;;  %v202_v19 = vmax.f32 %v917_v11, 0.0  ;;  %v856_v30 = vunpack.c.l.bf16 %v939_v25  ;;  %v857_v31 = vunpack.c.h.bf16 %v939_v25 }
  0x1f   :  { %v228_v22 = vpack.c.bf16 %v186_v17, %v185_v16  ;;  %v888_v32 = vunpack.c.l.bf16 %v947_v26  ;;  %v889_v33 = vunpack.c.h.bf16 %v947_v26  ;;  %v920_v34 = vunpack.c.l.bf16 %v955_v27 }
  0x20   :  { %v236_v23 = vpack.c.bf16 %v202_v19, %v201_v18  ;;  %v921_v35 = vunpack.c.h.bf16 %v955_v27  ;;  %v892_v56 = vunpack.c.l.bf16 %v948_v50  ;;  %v893_v57 = vunpack.c.h.bf16 %v948_v50 }
  0x21   :  { %v187_v40 = vmax.f32 %v888_v32, 0.0  ;;  %v188_v41 = vmax.f32 %v889_v33, 0.0  ;;  %v203_v42 = vmax.f32 %v920_v34, 0.0  ;;  %v924_v58 = vunpack.c.l.bf16 %v956_v51 }
  0x22   :  { %v204_v43 = vmax.f32 %v921_v35, 0.0  ;;  %v925_v59 = vunpack.c.h.bf16 %v956_v51  ;;  %v189_v0 = vmax.f32 %v892_v56, 0.0  ;;  %v190_v1 = vmax.f32 %v893_v57, 0.0 }
  0x23   :  { %v205_v2 = vmax.f32 %v924_v58, 0.0 }
  0x24   :  { %v206_v3 = vmax.f32 %v925_v59, 0.0 }
  0x2a   :  { %763 = vmatmul.msk.bf16.gmra.mxu0 %vm279_vm1, %v208_v52  ;;  %771 = vmatmul.msk.bf16.gmra.mxu1 %vm279_vm1, %v216_v53  ;;  %v151_v52 = vmax.f32 %v816_v44, 0.0  ;;  %v152_v53 = vmax.f32 %v817_v45, 0.0 }
  0x2b   :  { %779 = vmatmul.msk.bf16.gmra.mxu2 %vm279_vm1, %v224_v54  ;;  %787 = vmatmul.msk.bf16.gmra.mxu3 %vm279_vm1, %v232_v55  ;;  %v167_v54 = vmax.f32 %v848_v46, 0.0  ;;  %v168_v55 = vmax.f32 %v849_v47, 0.0  ;;  %v229_v46 = vpack.c.bf16 %v188_v41, %v187_v40  ;;  %v237_v47 = vpack.c.bf16 %v204_v43, %v203_v42 }
  0x2c   :  { %v211_v60 = vpack.c.bf16 %v152_v53, %v151_v52  ;;  %v828_v52 = vunpack.c.l.bf16 %v932_v48  ;;  %v829_v53 = vunpack.c.h.bf16 %v932_v48 }
  0x2d   :  { %v219_v61 = vpack.c.bf16 %v168_v55, %v167_v54  ;;  %v860_v54 = vunpack.c.l.bf16 %v940_v49  ;;  %v861_v55 = vunpack.c.h.bf16 %v940_v49 }
  0x3a   :  { %764 = vmatmul.msk.bf16.gmra.mxu0 %vm279_vm1, %v209_v12  ;;  %772 = vmatmul.msk.bf16.gmra.mxu1 %vm279_vm1, %v217_v13  ;;  %v153_v12 = vmax.f32 %v820_v4, 0.0  ;;  %v154_v13 = vmax.f32 %v821_v5, 0.0 }
  0x3b   :  { %780 = vmatmul.msk.bf16.gmra.mxu2 %vm279_vm1, %v225_v14  ;;  %788 = vmatmul.msk.bf16.gmra.mxu3 %vm279_vm1, %v233_v15  ;;  %v169_v14 = vmax.f32 %v852_v6, 0.0  ;;  %v170_v15 = vmax.f32 %v853_v7, 0.0  ;;  %v230_v6 = vpack.c.bf16 %v190_v1, %v189_v0  ;;  %v238_v7 = vpack.c.bf16 %v206_v3, %v205_v2 }
  0x3c   :  { %v212_v20 = vpack.c.bf16 %v154_v13, %v153_v12 }
  0x3d   :  { %v220_v21 = vpack.c.bf16 %v170_v15, %v169_v14 }
  0x4a   :  { %765 = vmatmul.msk.bf16.gmra.mxu0 %vm279_vm1, %v210_v36  ;;  %773 = vmatmul.msk.bf16.gmra.mxu1 %vm279_vm1, %v218_v37  ;;  %v155_v36 = vmax.f32 %v824_v28, 0.0  ;;  %v156_v37 = vmax.f32 %v825_v29, 0.0 }
  0x4b   :  { %781 = vmatmul.msk.bf16.gmra.mxu2 %vm279_vm1, %v226_v38  ;;  %789 = vmatmul.msk.bf16.gmra.mxu3 %vm279_vm1, %v234_v39  ;;  %v171_v38 = vmax.f32 %v856_v30, 0.0  ;;  %v172_v39 = vmax.f32 %v857_v31, 0.0 }
  0x4c   :  { %v213_v44 = vpack.c.bf16 %v156_v37, %v155_v36 }
  0x4d   :  { %v221_v45 = vpack.c.bf16 %v172_v39, %v171_v38 }
  0x5a   :  { %766 = vmatmul.msk.bf16.gmra.mxu0 %vm279_vm1, %v211_v60  ;;  %774 = vmatmul.msk.bf16.gmra.mxu1 %vm279_vm1, %v219_v61  ;;  %v157_v60 = vmax.f32 %v828_v52, 0.0  ;;  %v158_v61 = vmax.f32 %v829_v53, 0.0 }
  0x5b   :  { %782 = vmatmul.msk.bf16.gmra.mxu2 %vm279_vm1, %v227_v62  ;;  %790 = vmatmul.msk.bf16.gmra.mxu3 %vm279_vm1, %v235_v63  ;;  %v173_v62 = vmax.f32 %v860_v54, 0.0  ;;  %v174_v63 = vmax.f32 %v861_v55, 0.0 }
  0x5c   :  { %v214_v4 = vpack.c.bf16 %v158_v61, %v157_v60 }
  0x5d   :  { %v222_v5 = vpack.c.bf16 %v174_v63, %v173_v62 }
  0x6a   :  { %767 = vmatmul.msk.bf16.gmra.mxu0 %vm279_vm1, %v212_v20  ;;  %775 = vmatmul.msk.bf16.gmra.mxu1 %vm279_vm1, %v220_v21 }
  0x6b   :  { %783 = vmatmul.msk.bf16.gmra.mxu2 %vm279_vm1, %v228_v22  ;;  %791 = vmatmul.msk.bf16.gmra.mxu3 %vm279_vm1, %v236_v23 }
  0x7a   :  { %768 = vmatmul.msk.bf16.gmra.mxu0 %vm279_vm1, %v213_v44  ;;  %776 = vmatmul.msk.bf16.gmra.mxu1 %vm279_vm1, %v221_v45 }
  0x7b   :  { %784 = vmatmul.msk.bf16.gmra.mxu2 %vm279_vm1, %v229_v46  ;;  %792 = vmatmul.msk.bf16.gmra.mxu3 %vm279_vm1, %v237_v47 }
  0x8a   :  { %769 = vmatmul.msk.bf16.gmra.mxu0 %vm279_vm1, %v214_v4  ;;  %777 = vmatmul.msk.bf16.gmra.mxu1 %vm279_vm1, %v222_v5 }
  0x8b   :  { %785 = vmatmul.msk.bf16.gmra.mxu2 %vm279_vm1, %v230_v6  ;;  %793 = vmatmul.msk.bf16.gmra.mxu3 %vm279_vm1, %v238_v7 }
  0x97   :  { %v389_v9 = vpop.f32.mrf.mxu0  ;;  %v429_v10 = vpop.f32.mrf.mxu1 }
  0x98   :  { %v390_v11 = vadd.f32 %v1139_v8, %v389_v9  ;;  %v430_v12 = vadd.f32 %v1139_v8, %v429_v10 }
  0x9a   :  { %v549_v13 = vmax.f32 %v390_v11, 0.0  ;;  %v565_v14 = vmax.f32 %v430_v12, 0.0 }
  0x9c   :  { %v613_v15 = vpack.c.bf16 %v549_v13, %v549_v13  ;;  %v629_v16 = vpack.c.bf16 %v565_v14, %v565_v14 }
  0x9e   :  { %678 = vst.msk [vmem:[%s1464_s3] sm:$0xf] %vm677_vm2, %v613_v15  ;;  %v469_v17 = vpop.f32.mrf.mxu2  ;;  %v509_v18 = vpop.f32.mrf.mxu3 }
  0x9f   :  { %694 = vst.msk [vmem:[%s1464_s3 + $0x40] sm:$0xf] %vm677_vm2, %v629_v16  ;;  %v470_v19 = vadd.f32 %v1139_v8, %v469_v17  ;;  %v510_v20 = vadd.f32 %v1139_v8, %v509_v18  ;;  %v391_v21 = vpop.f32.mrf.mxu0  ;;  %v431_v22 = vpop.f32.mrf.mxu1 }
  0xa0   :  { %v392_v23 = vadd.f32 %v1139_v8, %v391_v21  ;;  %v432_v24 = vadd.f32 %v1139_v8, %v431_v22 }
  0xa1   :  { %v581_v25 = vmax.f32 %v470_v19, 0.0  ;;  %v597_v26 = vmax.f32 %v510_v20, 0.0 }
  0xa2   :  { %v550_v27 = vmax.f32 %v392_v23, 0.0  ;;  %v566_v28 = vmax.f32 %v432_v24, 0.0 }
  0xa3   :  { %v645_v29 = vpack.c.bf16 %v581_v25, %v581_v25  ;;  %v661_v30 = vpack.c.bf16 %v597_v26, %v597_v26 }
  0xa4   :  { %v614_v31 = vpack.c.bf16 %v550_v27, %v550_v27  ;;  %v630_v32 = vpack.c.bf16 %v566_v28, %v566_v28 }
  0xa5   :  { %710 = vst.msk [vmem:[%s1464_s3 + $0x80] sm:$0xf] %vm677_vm2, %v645_v29 }
  0xa6   :  { %726 = vst.msk [vmem:[%s1464_s3 + $0xc0] sm:$0xf] %vm677_vm2, %v661_v30  ;;  %v471_v33 = vpop.f32.mrf.mxu2  ;;  %v511_v34 = vpop.f32.mrf.mxu3 }
  0xa7   :  { %679 = vst.msk [vmem:[%s1464_s3 + $0x4] sm:$0xf] %vm677_vm2, %v614_v31  ;;  %v472_v35 = vadd.f32 %v1139_v8, %v471_v33  ;;  %v512_v36 = vadd.f32 %v1139_v8, %v511_v34  ;;  %v394_v37 = vpop.f32.mrf.mxu0  ;;  %v434_v38 = vpop.f32.mrf.mxu1 }
  0xa8   :  { %695 = vst.msk [vmem:[%s1464_s3 + $0x44] sm:$0xf] %vm677_vm2, %v630_v32  ;;  %v395_v39 = vadd.f32 %v1139_v8, %v394_v37  ;;  %v435_v40 = vadd.f32 %v1139_v8, %v434_v38 }
  0xa9   :  { %v582_v41 = vmax.f32 %v472_v35, 0.0  ;;  %v598_v42 = vmax.f32 %v512_v36, 0.0 }
  0xaa   :  { %v551_v43 = vmax.f32 %v395_v39, 0.0  ;;  %v567_v44 = vmax.f32 %v435_v40, 0.0 }
  0xab   :  { %v646_v45 = vpack.c.bf16 %v582_v41, %v582_v41  ;;  %v662_v46 = vpack.c.bf16 %v598_v42, %v598_v42 }
  0xac   :  { %v615_v47 = vpack.c.bf16 %v551_v43, %v551_v43  ;;  %v631_v48 = vpack.c.bf16 %v567_v44, %v567_v44 }
  0xad   :  { %711 = vst.msk [vmem:[%s1464_s3 + $0x84] sm:$0xf] %vm677_vm2, %v646_v45 }
  0xae   :  { %727 = vst.msk [vmem:[%s1464_s3 + $0xc4] sm:$0xf] %vm677_vm2, %v662_v46  ;;  %v474_v49 = vpop.f32.mrf.mxu2  ;;  %v514_v50 = vpop.f32.mrf.mxu3 }
  0xaf   :  { %680 = vst.msk [vmem:[%s1464_s3 + $0x8] sm:$0xf] %vm677_vm2, %v615_v47  ;;  %v475_v51 = vadd.f32 %v1139_v8, %v474_v49  ;;  %v515_v52 = vadd.f32 %v1139_v8, %v514_v50  ;;  %v396_v53 = vpop.f32.mrf.mxu0  ;;  %v436_v54 = vpop.f32.mrf.mxu1 }
  0xb0   :  { %696 = vst.msk [vmem:[%s1464_s3 + $0x48] sm:$0xf] %vm677_vm2, %v631_v48  ;;  %v397_v55 = vadd.f32 %v1139_v8, %v396_v53  ;;  %v437_v56 = vadd.f32 %v1139_v8, %v436_v54 }
  0xb1   :  { %v583_v57 = vmax.f32 %v475_v51, 0.0  ;;  %v599_v58 = vmax.f32 %v515_v52, 0.0 }
  0xb2   :  { %v552_v59 = vmax.f32 %v397_v55, 0.0  ;;  %v568_v60 = vmax.f32 %v437_v56, 0.0 }
  0xb3   :  { %v647_v61 = vpack.c.bf16 %v583_v57, %v583_v57  ;;  %v663_v62 = vpack.c.bf16 %v599_v58, %v599_v58 }
  0xb4   :  { %v616_v63 = vpack.c.bf16 %v552_v59, %v552_v59  ;;  %v632_v0 = vpack.c.bf16 %v568_v60, %v568_v60 }
  0xb5   :  { %712 = vst.msk [vmem:[%s1464_s3 + $0x88] sm:$0xf] %vm677_vm2, %v647_v61 }
  0xb6   :  { %728 = vst.msk [vmem:[%s1464_s3 + $0xc8] sm:$0xf] %vm677_vm2, %v663_v62  ;;  %v476_v1 = vpop.f32.mrf.mxu2  ;;  %v516_v2 = vpop.f32.mrf.mxu3 }
  0xb7   :  { %681 = vst.msk [vmem:[%s1464_s3 + $0xc] sm:$0xf] %vm677_vm2, %v616_v63  ;;  %v477_v3 = vadd.f32 %v1139_v8, %v476_v1  ;;  %v517_v4 = vadd.f32 %v1139_v8, %v516_v2  ;;  %v399_v5 = vpop.f32.mrf.mxu0  ;;  %v439_v6 = vpop.f32.mrf.mxu1 }
  0xb8   :  { %697 = vst.msk [vmem:[%s1464_s3 + $0x4c] sm:$0xf] %vm677_vm2, %v632_v0  ;;  %v400_v7 = vadd.f32 %v1139_v8, %v399_v5  ;;  %v440_v9 = vadd.f32 %v1139_v8, %v439_v6 }
  0xb9   :  { %v584_v10 = vmax.f32 %v477_v3, 0.0  ;;  %v600_v11 = vmax.f32 %v517_v4, 0.0 }
  0xba   :  { %v553_v12 = vmax.f32 %v400_v7, 0.0  ;;  %v569_v13 = vmax.f32 %v440_v9, 0.0 }
  0xbb   :  { %v648_v14 = vpack.c.bf16 %v584_v10, %v584_v10  ;;  %v664_v15 = vpack.c.bf16 %v600_v11, %v600_v11 }
  0xbc   :  { %v617_v16 = vpack.c.bf16 %v553_v12, %v553_v12  ;;  %v633_v17 = vpack.c.bf16 %v569_v13, %v569_v13 }
  0xbd   :  { %713 = vst.msk [vmem:[%s1464_s3 + $0x8c] sm:$0xf] %vm677_vm2, %v648_v14 }
  0xbe   :  { %729 = vst.msk [vmem:[%s1464_s3 + $0xcc] sm:$0xf] %vm677_vm2, %v664_v15  ;;  %v479_v18 = vpop.f32.mrf.mxu2  ;;  %v519_v19 = vpop.f32.mrf.mxu3 }
  0xbf   :  { %682 = vst.msk [vmem:[%s1464_s3 + $0x10] sm:$0xf] %vm677_vm2, %v617_v16  ;;  %v480_v20 = vadd.f32 %v1139_v8, %v479_v18  ;;  %v520_v21 = vadd.f32 %v1139_v8, %v519_v19  ;;  %v401_v22 = vpop.f32.mrf.mxu0  ;;  %v441_v23 = vpop.f32.mrf.mxu1 }
  0xc0   :  { %698 = vst.msk [vmem:[%s1464_s3 + $0x50] sm:$0xf] %vm677_vm2, %v633_v17  ;;  %v402_v24 = vadd.f32 %v1139_v8, %v401_v22  ;;  %v442_v25 = vadd.f32 %v1139_v8, %v441_v23 }
  0xc1   :  { %v585_v26 = vmax.f32 %v480_v20, 0.0  ;;  %v601_v27 = vmax.f32 %v520_v21, 0.0 }
  0xc2   :  { %v554_v28 = vmax.f32 %v402_v24, 0.0  ;;  %v570_v29 = vmax.f32 %v442_v25, 0.0 }
  0xc3   :  { %v649_v30 = vpack.c.bf16 %v585_v26, %v585_v26  ;;  %v665_v31 = vpack.c.bf16 %v601_v27, %v601_v27 }
  0xc4   :  { %v618_v32 = vpack.c.bf16 %v554_v28, %v554_v28  ;;  %v634_v33 = vpack.c.bf16 %v570_v29, %v570_v29 }
  0xc5   :  { %714 = vst.msk [vmem:[%s1464_s3 + $0x90] sm:$0xf] %vm677_vm2, %v649_v30 }
  0xc6   :  { %730 = vst.msk [vmem:[%s1464_s3 + $0xd0] sm:$0xf] %vm677_vm2, %v665_v31  ;;  %v481_v34 = vpop.f32.mrf.mxu2  ;;  %v521_v35 = vpop.f32.mrf.mxu3 }
  0xc7   :  { %683 = vst.msk [vmem:[%s1464_s3 + $0x14] sm:$0xf] %vm677_vm2, %v618_v32  ;;  %v482_v36 = vadd.f32 %v1139_v8, %v481_v34  ;;  %v522_v37 = vadd.f32 %v1139_v8, %v521_v35  ;;  %v404_v38 = vpop.f32.mrf.mxu0  ;;  %v444_v39 = vpop.f32.mrf.mxu1 }
  0xc8   :  { %699 = vst.msk [vmem:[%s1464_s3 + $0x54] sm:$0xf] %vm677_vm2, %v634_v33  ;;  %v405_v40 = vadd.f32 %v1139_v8, %v404_v38  ;;  %v445_v41 = vadd.f32 %v1139_v8, %v444_v39 }
  0xc9   :  { %v586_v42 = vmax.f32 %v482_v36, 0.0  ;;  %v602_v43 = vmax.f32 %v522_v37, 0.0 }
  0xca   :  { %v555_v44 = vmax.f32 %v405_v40, 0.0  ;;  %v571_v45 = vmax.f32 %v445_v41, 0.0 }
  0xcb   :  { %v650_v46 = vpack.c.bf16 %v586_v42, %v586_v42  ;;  %v666_v47 = vpack.c.bf16 %v602_v43, %v602_v43 }
  0xcc   :  { %v619_v48 = vpack.c.bf16 %v555_v44, %v555_v44  ;;  %v635_v49 = vpack.c.bf16 %v571_v45, %v571_v45 }
  0xcd   :  { %715 = vst.msk [vmem:[%s1464_s3 + $0x94] sm:$0xf] %vm677_vm2, %v650_v46 }
  0xce   :  { %731 = vst.msk [vmem:[%s1464_s3 + $0xd4] sm:$0xf] %vm677_vm2, %v666_v47  ;;  %v484_v50 = vpop.f32.mrf.mxu2  ;;  %v524_v51 = vpop.f32.mrf.mxu3 }
  0xcf   :  { %684 = vst.msk [vmem:[%s1464_s3 + $0x18] sm:$0xf] %vm677_vm2, %v619_v48  ;;  %v485_v52 = vadd.f32 %v1139_v8, %v484_v50  ;;  %v525_v53 = vadd.f32 %v1139_v8, %v524_v51  ;;  %v406_v54 = vpop.f32.mrf.mxu0  ;;  %v446_v55 = vpop.f32.mrf.mxu1 }
  0xd0   :  { %700 = vst.msk [vmem:[%s1464_s3 + $0x58] sm:$0xf] %vm677_vm2, %v635_v49  ;;  %v407_v56 = vadd.f32 %v1139_v8, %v406_v54  ;;  %v447_v57 = vadd.f32 %v1139_v8, %v446_v55 }
  0xd1   :  { %v587_v58 = vmax.f32 %v485_v52, 0.0  ;;  %v603_v59 = vmax.f32 %v525_v53, 0.0 }
  0xd2   :  { %v556_v60 = vmax.f32 %v407_v56, 0.0  ;;  %v572_v61 = vmax.f32 %v447_v57, 0.0 }
  0xd3   :  { %v651_v62 = vpack.c.bf16 %v587_v58, %v587_v58  ;;  %v667_v63 = vpack.c.bf16 %v603_v59, %v603_v59 }
  0xd4   :  { %v620_v0 = vpack.c.bf16 %v556_v60, %v556_v60  ;;  %v636_v1 = vpack.c.bf16 %v572_v61, %v572_v61 }
  0xd5   :  { %716 = vst.msk [vmem:[%s1464_s3 + $0x98] sm:$0xf] %vm677_vm2, %v651_v62 }
  0xd6   :  { %732 = vst.msk [vmem:[%s1464_s3 + $0xd8] sm:$0xf] %vm677_vm2, %v667_v63  ;;  %v486_v2 = vpop.f32.mrf.mxu2  ;;  %v526_v3 = vpop.f32.mrf.mxu3 }
  0xd7   :  { %685 = vst.msk [vmem:[%s1464_s3 + $0x1c] sm:$0xf] %vm677_vm2, %v620_v0  ;;  %v487_v4 = vadd.f32 %v1139_v8, %v486_v2  ;;  %v527_v5 = vadd.f32 %v1139_v8, %v526_v3  ;;  %v409_v6 = vpop.f32.mrf.mxu0  ;;  %v449_v7 = vpop.f32.mrf.mxu1 }
  0xd8   :  { %701 = vst.msk [vmem:[%s1464_s3 + $0x5c] sm:$0xf] %vm677_vm2, %v636_v1  ;;  %v410_v9 = vadd.f32 %v1139_v8, %v409_v6  ;;  %v450_v10 = vadd.f32 %v1139_v8, %v449_v7 }
  0xd9   :  { %v588_v11 = vmax.f32 %v487_v4, 0.0  ;;  %v604_v12 = vmax.f32 %v527_v5, 0.0 }
  0xda   :  { %v557_v13 = vmax.f32 %v410_v9, 0.0  ;;  %v573_v14 = vmax.f32 %v450_v10, 0.0 }
  0xdb   :  { %v652_v15 = vpack.c.bf16 %v588_v11, %v588_v11  ;;  %v668_v16 = vpack.c.bf16 %v604_v12, %v604_v12 }
  0xdc   :  { %v621_v17 = vpack.c.bf16 %v557_v13, %v557_v13  ;;  %v637_v18 = vpack.c.bf16 %v573_v14, %v573_v14 }
  0xdd   :  { %717 = vst.msk [vmem:[%s1464_s3 + $0x9c] sm:$0xf] %vm677_vm2, %v652_v15 }
  0xde   :  { %733 = vst.msk [vmem:[%s1464_s3 + $0xdc] sm:$0xf] %vm677_vm2, %v668_v16  ;;  %v489_v19 = vpop.f32.mrf.mxu2  ;;  %v529_v20 = vpop.f32.mrf.mxu3 }
  0xdf   :  { %686 = vst.msk [vmem:[%s1464_s3 + $0x20] sm:$0xf] %vm677_vm2, %v621_v17  ;;  %v490_v21 = vadd.f32 %v1139_v8, %v489_v19  ;;  %v530_v22 = vadd.f32 %v1139_v8, %v529_v20  ;;  %v411_v23 = vpop.f32.mrf.mxu0  ;;  %v451_v24 = vpop.f32.mrf.mxu1 }
  0xe0   :  { %702 = vst.msk [vmem:[%s1464_s3 + $0x60] sm:$0xf] %vm677_vm2, %v637_v18  ;;  %v412_v25 = vadd.f32 %v1139_v8, %v411_v23  ;;  %v452_v26 = vadd.f32 %v1139_v8, %v451_v24 }
  0xe1   :  { %v589_v27 = vmax.f32 %v490_v21, 0.0  ;;  %v605_v28 = vmax.f32 %v530_v22, 0.0 }
  0xe2   :  { %v558_v29 = vmax.f32 %v412_v25, 0.0  ;;  %v574_v30 = vmax.f32 %v452_v26, 0.0 }
  0xe3   :  { %v653_v31 = vpack.c.bf16 %v589_v27, %v589_v27  ;;  %v669_v32 = vpack.c.bf16 %v605_v28, %v605_v28 }
  0xe4   :  { %v622_v33 = vpack.c.bf16 %v558_v29, %v558_v29  ;;  %v638_v34 = vpack.c.bf16 %v574_v30, %v574_v30 }
  0xe5   :  { %718 = vst.msk [vmem:[%s1464_s3 + $0xa0] sm:$0xf] %vm677_vm2, %v653_v31 }
  0xe6   :  { %734 = vst.msk [vmem:[%s1464_s3 + $0xe0] sm:$0xf] %vm677_vm2, %v669_v32  ;;  %v491_v35 = vpop.f32.mrf.mxu2  ;;  %v531_v36 = vpop.f32.mrf.mxu3 }
  0xe7   :  { %687 = vst.msk [vmem:[%s1464_s3 + $0x24] sm:$0xf] %vm677_vm2, %v622_v33  ;;  %v492_v37 = vadd.f32 %v1139_v8, %v491_v35  ;;  %v532_v38 = vadd.f32 %v1139_v8, %v531_v36  ;;  %v414_v39 = vpop.f32.mrf.mxu0  ;;  %v454_v40 = vpop.f32.mrf.mxu1 }
  0xe8   :  { %703 = vst.msk [vmem:[%s1464_s3 + $0x64] sm:$0xf] %vm677_vm2, %v638_v34  ;;  %v415_v41 = vadd.f32 %v1139_v8, %v414_v39  ;;  %v455_v42 = vadd.f32 %v1139_v8, %v454_v40 }
  0xe9   :  { %v590_v43 = vmax.f32 %v492_v37, 0.0  ;;  %v606_v44 = vmax.f32 %v532_v38, 0.0 }
  0xea   :  { %v559_v45 = vmax.f32 %v415_v41, 0.0  ;;  %v575_v46 = vmax.f32 %v455_v42, 0.0 }
  0xeb   :  { %v654_v47 = vpack.c.bf16 %v590_v43, %v590_v43  ;;  %v670_v48 = vpack.c.bf16 %v606_v44, %v606_v44 }
  0xec   :  { %v623_v49 = vpack.c.bf16 %v559_v45, %v559_v45  ;;  %v639_v50 = vpack.c.bf16 %v575_v46, %v575_v46 }
  0xed   :  { %719 = vst.msk [vmem:[%s1464_s3 + $0xa4] sm:$0xf] %vm677_vm2, %v654_v47 }
  0xee   :  { %735 = vst.msk [vmem:[%s1464_s3 + $0xe4] sm:$0xf] %vm677_vm2, %v670_v48  ;;  %v494_v51 = vpop.f32.mrf.mxu2  ;;  %v534_v52 = vpop.f32.mrf.mxu3 }
  0xef   :  { %688 = vst.msk [vmem:[%s1464_s3 + $0x28] sm:$0xf] %vm677_vm2, %v623_v49  ;;  %v495_v53 = vadd.f32 %v1139_v8, %v494_v51  ;;  %v535_v54 = vadd.f32 %v1139_v8, %v534_v52  ;;  %v416_v55 = vpop.f32.mrf.mxu0  ;;  %v456_v56 = vpop.f32.mrf.mxu1 }
  0xf0   :  { %704 = vst.msk [vmem:[%s1464_s3 + $0x68] sm:$0xf] %vm677_vm2, %v639_v50  ;;  %v417_v57 = vadd.f32 %v1139_v8, %v416_v55  ;;  %v457_v58 = vadd.f32 %v1139_v8, %v456_v56 }
  0xf1   :  { %v591_v59 = vmax.f32 %v495_v53, 0.0  ;;  %v607_v60 = vmax.f32 %v535_v54, 0.0 }
  0xf2   :  { %v560_v61 = vmax.f32 %v417_v57, 0.0  ;;  %v576_v62 = vmax.f32 %v457_v58, 0.0 }
  0xf3   :  { %v655_v63 = vpack.c.bf16 %v591_v59, %v591_v59  ;;  %v671_v0 = vpack.c.bf16 %v607_v60, %v607_v60 }
  0xf4   :  { %v624_v1 = vpack.c.bf16 %v560_v61, %v560_v61  ;;  %v640_v2 = vpack.c.bf16 %v576_v62, %v576_v62 }
  0xf5   :  { %720 = vst.msk [vmem:[%s1464_s3 + $0xa8] sm:$0xf] %vm677_vm2, %v655_v63 }
  0xf6   :  { %736 = vst.msk [vmem:[%s1464_s3 + $0xe8] sm:$0xf] %vm677_vm2, %v671_v0  ;;  %v496_v3 = vpop.f32.mrf.mxu2  ;;  %v536_v4 = vpop.f32.mrf.mxu3 }
  0xf7   :  { %689 = vst.msk [vmem:[%s1464_s3 + $0x2c] sm:$0xf] %vm677_vm2, %v624_v1  ;;  %v497_v5 = vadd.f32 %v1139_v8, %v496_v3  ;;  %v537_v6 = vadd.f32 %v1139_v8, %v536_v4  ;;  %v419_v7 = vpop.f32.mrf.mxu0  ;;  %v459_v9 = vpop.f32.mrf.mxu1 }
  0xf8   :  { %705 = vst.msk [vmem:[%s1464_s3 + $0x6c] sm:$0xf] %vm677_vm2, %v640_v2  ;;  %v420_v10 = vadd.f32 %v1139_v8, %v419_v7  ;;  %v460_v11 = vadd.f32 %v1139_v8, %v459_v9 }
  0xf9   :  { %v592_v12 = vmax.f32 %v497_v5, 0.0  ;;  %v608_v13 = vmax.f32 %v537_v6, 0.0 }
  0xfa   :  { %v561_v14 = vmax.f32 %v420_v10, 0.0  ;;  %v577_v15 = vmax.f32 %v460_v11, 0.0 }
  0xfb   :  { %v656_v16 = vpack.c.bf16 %v592_v12, %v592_v12  ;;  %v672_v17 = vpack.c.bf16 %v608_v13, %v608_v13 }
  0xfc   :  { %v625_v18 = vpack.c.bf16 %v561_v14, %v561_v14  ;;  %v641_v19 = vpack.c.bf16 %v577_v15, %v577_v15 }
  0xfd   :  { %721 = vst.msk [vmem:[%s1464_s3 + $0xac] sm:$0xf] %vm677_vm2, %v656_v16 }
  0xfe   :  { %737 = vst.msk [vmem:[%s1464_s3 + $0xec] sm:$0xf] %vm677_vm2, %v672_v17  ;;  %v499_v20 = vpop.f32.mrf.mxu2  ;;  %v539_v21 = vpop.f32.mrf.mxu3 }
  0xff   :  { %690 = vst.msk [vmem:[%s1464_s3 + $0x30] sm:$0xf] %vm677_vm2, %v625_v18  ;;  %v500_v22 = vadd.f32 %v1139_v8, %v499_v20  ;;  %v540_v23 = vadd.f32 %v1139_v8, %v539_v21  ;;  %v421_v24 = vpop.f32.mrf.mxu0  ;;  %v461_v25 = vpop.f32.mrf.mxu1 }
 0x100   :  { %706 = vst.msk [vmem:[%s1464_s3 + $0x70] sm:$0xf] %vm677_vm2, %v641_v19  ;;  %v422_v26 = vadd.f32 %v1139_v8, %v421_v24  ;;  %v462_v27 = vadd.f32 %v1139_v8, %v461_v25 }
 0x101   :  { %v593_v28 = vmax.f32 %v500_v22, 0.0  ;;  %v609_v29 = vmax.f32 %v540_v23, 0.0 }
 0x102   :  { %v562_v30 = vmax.f32 %v422_v26, 0.0  ;;  %v578_v31 = vmax.f32 %v462_v27, 0.0 }
 0x103   :  { %v657_v32 = vpack.c.bf16 %v593_v28, %v593_v28  ;;  %v673_v33 = vpack.c.bf16 %v609_v29, %v609_v29 }
 0x104   :  { %v626_v34 = vpack.c.bf16 %v562_v30, %v562_v30  ;;  %v642_v35 = vpack.c.bf16 %v578_v31, %v578_v31 }
 0x105   :  { %722 = vst.msk [vmem:[%s1464_s3 + $0xb0] sm:$0xf] %vm677_vm2, %v657_v32 }
 0x106   :  { %738 = vst.msk [vmem:[%s1464_s3 + $0xf0] sm:$0xf] %vm677_vm2, %v673_v33  ;;  %v501_v36 = vpop.f32.mrf.mxu2  ;;  %v541_v37 = vpop.f32.mrf.mxu3 }
 0x107   :  { %691 = vst.msk [vmem:[%s1464_s3 + $0x34] sm:$0xf] %vm677_vm2, %v626_v34  ;;  %v502_v38 = vadd.f32 %v1139_v8, %v501_v36  ;;  %v542_v39 = vadd.f32 %v1139_v8, %v541_v37  ;;  %v424_v40 = vpop.f32.mrf.mxu0  ;;  %v464_v41 = vpop.f32.mrf.mxu1 }
 0x108   :  { %707 = vst.msk [vmem:[%s1464_s3 + $0x74] sm:$0xf] %vm677_vm2, %v642_v35  ;;  %v425_v42 = vadd.f32 %v1139_v8, %v424_v40  ;;  %v465_v43 = vadd.f32 %v1139_v8, %v464_v41 }
 0x109   :  { %v594_v44 = vmax.f32 %v502_v38, 0.0  ;;  %v610_v45 = vmax.f32 %v542_v39, 0.0 }
 0x10a   :  { %v563_v46 = vmax.f32 %v425_v42, 0.0  ;;  %v579_v47 = vmax.f32 %v465_v43, 0.0 }
 0x10b   :  { %v658_v48 = vpack.c.bf16 %v594_v44, %v594_v44  ;;  %v674_v49 = vpack.c.bf16 %v610_v45, %v610_v45 }
 0x10c   :  { %v627_v50 = vpack.c.bf16 %v563_v46, %v563_v46  ;;  %v643_v51 = vpack.c.bf16 %v579_v47, %v579_v47 }
 0x10d   :  { %723 = vst.msk [vmem:[%s1464_s3 + $0xb4] sm:$0xf] %vm677_vm2, %v658_v48 }
 0x10e   :  { %739 = vst.msk [vmem:[%s1464_s3 + $0xf4] sm:$0xf] %vm677_vm2, %v674_v49  ;;  %v504_v52 = vpop.f32.mrf.mxu2  ;;  %v544_v53 = vpop.f32.mrf.mxu3 }
 0x10f   :  { %692 = vst.msk [vmem:[%s1464_s3 + $0x38] sm:$0xf] %vm677_vm2, %v627_v50  ;;  %v505_v54 = vadd.f32 %v1139_v8, %v504_v52  ;;  %v545_v55 = vadd.f32 %v1139_v8, %v544_v53  ;;  %v426_v56 = vpop.f32.mrf.mxu0  ;;  %v466_v57 = vpop.f32.mrf.mxu1 }
 0x110   :  { %708 = vst.msk [vmem:[%s1464_s3 + $0x78] sm:$0xf] %vm677_vm2, %v643_v51  ;;  %v427_v58 = vadd.f32 %v1139_v8, %v426_v56  ;;  %v467_v59 = vadd.f32 %v1139_v8, %v466_v57 }
 0x111   :  { %v595_v60 = vmax.f32 %v505_v54, 0.0  ;;  %v611_v61 = vmax.f32 %v545_v55, 0.0 }
 0x112   :  { %v564_v62 = vmax.f32 %v427_v58, 0.0  ;;  %v580_v63 = vmax.f32 %v467_v59, 0.0 }
 0x113   :  { %v659_v0 = vpack.c.bf16 %v595_v60, %v595_v60  ;;  %v675_v1 = vpack.c.bf16 %v611_v61, %v611_v61 }
 0x114   :  { %v628_v2 = vpack.c.bf16 %v564_v62, %v564_v62  ;;  %v644_v3 = vpack.c.bf16 %v580_v63, %v580_v63 }
 0x115   :  { %724 = vst.msk [vmem:[%s1464_s3 + $0xb8] sm:$0xf] %vm677_vm2, %v659_v0 }
 0x116   :  { %740 = vst.msk [vmem:[%s1464_s3 + $0xf8] sm:$0xf] %vm677_vm2, %v675_v1  ;;  %v506_v4 = vpop.f32.mrf.mxu2  ;;  %v546_v5 = vpop.f32.mrf.mxu3 }
 0x117   :  { %693 = vst.msk [vmem:[%s1464_s3 + $0x3c] sm:$0xf] %vm677_vm2, %v628_v2  ;;  %v507_v6 = vadd.f32 %v1139_v8, %v506_v4  ;;  %v547_v7 = vadd.f32 %v1139_v8, %v546_v5 }
 0x118   :  { %709 = vst.msk [vmem:[%s1464_s3 + $0x7c] sm:$0xf] %vm677_vm2, %v644_v3 }
 0x119   :  { %v596_v9 = vmax.f32 %v507_v6, 0.0  ;;  %v612_v10 = vmax.f32 %v547_v7, 0.0 }
 0x11b   :  { %v660_v11 = vpack.c.bf16 %v596_v9, %v596_v9  ;;  %v676_v12 = vpack.c.bf16 %v612_v10, %v612_v10 }
 0x11d   :  { %725 = vst.msk [vmem:[%s1464_s3 + $0xbc] sm:$0xf] %vm677_vm2, %v660_v11 }
 0x11e   :  { %741 = vst.msk [vmem:[%s1464_s3 + $0xfc] sm:$0xf] %vm677_vm2, %v676_v12 }

// kernel: resnet_ae_forward.72
= control target key start
LH: loop header
LB: loop body
LE: loop exit
PB: predicated region body
PF: predicated region fallthrough
CT: control target
= control target key end

     0   :  { %s118_s0 = inlined_call_operand.vmem [shape: bf16[8,512], index: 0, kind: input, shape index: {}]   ;;  %s119_s1 = inlined_call_operand.vmem [shape: f32[1,512], index: 1, kind: input, shape index: {}]   ;;  %s120_s2 = inlined_call_operand.vmem [shape: f32[1,512], index: 2, kind: input, shape index: {}]   ;;  %s121_s3 = inlined_call_operand.vmem [shape: bf16[8,512], index: 3, kind: input, shape index: {}]   ;;  %s122_s4 = inlined_call_operand.vmem [shape: bf16[8,512], index: 4, kind: output, shape index: {}]  }
   0x1   :  { %v17_v0 = vld [vmem:[%s118_s0] sm:$0xff]  ;;  %v18_v8 = vld [vmem:[%s118_s0 + $0x8] sm:$0xff] }
   0x2   :  { %v23_v1 = vld [vmem:[%s119_s1] sm:$0xf]  ;;  %v19_v3 = vunpack.c.l.bf16 %v17_v0  ;;  %v20_v4 = vunpack.c.h.bf16 %v17_v0  ;;  %v21_v15 = vunpack.c.l.bf16 %v18_v8  ;;  %v22_v16 = vunpack.c.h.bf16 %v18_v8  ;;  %v52_v17 = vld [vmem:[%s121_s3 + $0x8] sm:$0xff] }
   0x3   :  { %v37_v2 = vld [vmem:[%s120_s2] sm:$0xf]  ;;  %v25_v5 = vperm.slane %v23_v1, 0  ;;  %v26_v6 = vperm.slane %v23_v1, 1  ;;  %v27_v18 = vperm.slane %v23_v1, 2  ;;  %v28_v19 = vperm.slane %v23_v1, 3 }
   0x4   :  { %v51_v7 = vld [vmem:[%s121_s3] sm:$0xff]  ;;  %v39_v9 = vperm.slane %v37_v2, 0  ;;  %v40_v10 = vperm.slane %v37_v2, 1  ;;  %v41_v20 = vperm.slane %v37_v2, 2  ;;  %v42_v21 = vperm.slane %v37_v2, 3 }
   0x5   :  { %v53_v11 = vunpack.c.l.bf16 %v51_v7  ;;  %v54_v12 = vunpack.c.h.bf16 %v51_v7  ;;  %v33_v13 = vmul.f32 %v25_v5, %v19_v3  ;;  %v34_v14 = vmul.f32 %v26_v6, %v20_v4 }
   0x6   :  { %v35_v24 = vmul.f32 %v27_v18, %v21_v15  ;;  %v36_v25 = vmul.f32 %v28_v19, %v22_v16  ;;  %v55_v26 = vunpack.c.l.bf16 %v52_v17  ;;  %v56_v27 = vunpack.c.h.bf16 %v52_v17 }
   0x7   :  { %v47_v22 = vadd.f32 %v39_v9, %v33_v13  ;;  %v48_v23 = vadd.f32 %v40_v10, %v34_v14 }
   0x8   :  { %v49_v30 = vadd.f32 %v41_v20, %v35_v24  ;;  %v50_v31 = vadd.f32 %v42_v21, %v36_v25 }
   0x9   :  { %v57_v28 = vadd.f32 %v53_v11, %v47_v22  ;;  %v58_v29 = vadd.f32 %v54_v12, %v48_v23 }
   0xa   :  { %v59_v33 = vadd.f32 %v55_v26, %v49_v30  ;;  %v60_v34 = vadd.f32 %v56_v27, %v50_v31 }
   0xb   :  { %v61_v32 = vpack.c.bf16 %v58_v29, %v57_v28 }
   0xc   :  { %v62_v35 = vpack.c.bf16 %v60_v34, %v59_v33 }
   0xd   :  { %63 = vst [vmem:[%s122_s4] sm:$0xff] %v61_v32 }
   0xe   :  { %64 = vst [vmem:[%s122_s4 + $0x8] sm:$0xff] %v62_v35 }

// kernel: resnet_ae_forward.71
= control target key start
LH: loop header
LB: loop body
LE: loop exit
PB: predicated region body
PF: predicated region fallthrough
CT: control target
= control target key end

     0   :  { %vm372_vm0 = vcmask 1043456   ;;  %vm275_vm1 = vcmask 588800   ;;  %vm609_vm2 = vcmask 60416   ;;  %vm674_vm3 = vcmask 64512   ;;  %s2189_s1 = inlined_call_operand.vmem [shape: bf16[72,8], index: 1, kind: input, shape index: {}]   ;;  %s2190_s0 = inlined_call_operand.vmem [shape: bf16[512,72], index: 0, kind: input, shape index: {}]   ;;  %s2191_s2 = inlined_call_operand.vmem [shape: bf16[512,8], index: 2, kind: output, shape index: {0}]   ;;  %s2192_s3 = inlined_call_operand.vmem [shape: f32[1,1,8], index: 3, kind: output, shape index: {1}]   ;;  %s2193_s4 = inlined_call_operand.vmem [shape: f32[1,1,8], index: 4, kind: output, shape index: {2}]  }
   0x1   :  { %v87_v0 = vld [vmem:[%s2189_s1 + $0x20] sm:$0xf]  ;;  %v1231_v4 = vld [vmem:[%s2189_s1 + $0x18] sm:$0xff]  ;;  %v1230_v5 = vld [vmem:[%s2189_s1 + $0x10] sm:$0xff]  ;;  %vm808_vm4 = vcmask 57344  }
   0x2   :  { %v265_v1 = vunpack.c.l.b16 %v87_v0  ;;  %v1229_v6 = vld [vmem:[%s2189_s1 + $0x8] sm:$0xff]  ;;  %v1228_v7 = vld [vmem:[%s2189_s1] sm:$0xff]  ;;  %v1198_v13 = vld [vmem:[%s2190_s0 + $0x10] sm:$0xff] }
   0x3   :  { %v1196_v8 = vld [vmem:[%s2190_s0] sm:$0xff]  ;;  %v1197_v10 = vld [vmem:[%s2190_s0 + $0x8] sm:$0xff]  ;;  %v1206_v14 = vld [vmem:[%s2190_s0 + $0x50] sm:$0xff] }
   0x4   :  { %v270_v2 = vpack.c.b16 %v265_v1, %v265_v1  ;;  %v1204_v9 = vld [vmem:[%s2190_s0 + $0x40] sm:$0xff]  ;;  %v1205_v11 = vld [vmem:[%s2190_s0 + $0x48] sm:$0xff]  ;;  %v1199_v16 = vld [vmem:[%s2190_s0 + $0x18] sm:$0xff] }
   0x5   :  { %v1212_v12 = vld [vmem:[%s2190_s0 + $0x80] sm:$0xff]  ;;  %v1213_v15 = vld [vmem:[%s2190_s0 + $0x88] sm:$0xff]  ;;  %v1207_v17 = vld [vmem:[%s2190_s0 + $0x58] sm:$0xff] }
   0x6   :  { %v374_v3 = vsel %vm372_vm0, %v270_v2, 0  ;;  %v1214_v18 = vld [vmem:[%s2190_s0 + $0x90] sm:$0xff]  ;;  %v1220_v19 = vld [vmem:[%s2190_s0 + $0xc0] sm:$0xff]  ;;  %v1215_v22 = vld [vmem:[%s2190_s0 + $0x98] sm:$0xff] }
   0x7   :  { %379 = vmatpush.bf16.msra.mxu0 %v374_v3  ;;  %1232 = vmatpush.bf16.msra.mxu1 %v374_v3  ;;  %v1200_v20 = vld [vmem:[%s2190_s0 + $0x20] sm:$0xff]  ;;  %v1221_v23 = vld [vmem:[%s2190_s0 + $0xc8] sm:$0xff]  ;;  %v1222_v27 = vld [vmem:[%s2190_s0 + $0xd0] sm:$0xff] }
   0x8   :  { %1233 = vmatpush.bf16.msra.mxu2 %v374_v3  ;;  %1234 = vmatpush.bf16.msra.mxu3 %v374_v3  ;;  %v1208_v21 = vld [vmem:[%s2190_s0 + $0x60] sm:$0xff]  ;;  %v1201_v24 = vld [vmem:[%s2190_s0 + $0x28] sm:$0xff]  ;;  %v1202_v28 = vld [vmem:[%s2190_s0 + $0x30] sm:$0xff] }
   0x9   :  { %v1209_v25 = vld [vmem:[%s2190_s0 + $0x68] sm:$0xff]  ;;  %v1216_v26 = vld [vmem:[%s2190_s0 + $0xa0] sm:$0xff]  ;;  %v1210_v29 = vld [vmem:[%s2190_s0 + $0x70] sm:$0xff] }
   0xa   :  { %v1217_v30 = vld [vmem:[%s2190_s0 + $0xa8] sm:$0xff]  ;;  %v1223_v31 = vld [vmem:[%s2190_s0 + $0xd8] sm:$0xff]  ;;  %v1218_v34 = vld [vmem:[%s2190_s0 + $0xb0] sm:$0xff] }
   0xb   :  { %380 = vmatpush.bf16.msra.mxu0 %v1231_v4  ;;  %1235 = vmatpush.bf16.msra.mxu1 %v1231_v4  ;;  %v1203_v32 = vld [vmem:[%s2190_s0 + $0x38] sm:$0xff]  ;;  %v1224_v35 = vld [vmem:[%s2190_s0 + $0xe0] sm:$0xff]  ;;  %v1225_v41 = vld [vmem:[%s2190_s0 + $0xe8] sm:$0xff] }
   0xc   :  { %1236 = vmatpush.bf16.msra.mxu2 %v1231_v4  ;;  %1237 = vmatpush.bf16.msra.mxu3 %v1231_v4  ;;  %v1211_v33 = vld [vmem:[%s2190_s0 + $0x78] sm:$0xff]  ;;  %v1226_v62 = vld [vmem:[%s2190_s0 + $0xf0] sm:$0xff] }
   0xd   :  { %v1219_v40 = vld [vmem:[%s2190_s0 + $0xb8] sm:$0xff] }
   0xf   :  { %381 = vmatpush.bf16.msra.mxu0 %v1230_v5  ;;  %1238 = vmatpush.bf16.msra.mxu1 %v1230_v5 }
  0x10   :  { %1239 = vmatpush.bf16.msra.mxu2 %v1230_v5  ;;  %1240 = vmatpush.bf16.msra.mxu3 %v1230_v5 }
  0x13   :  { %382 = vmatpush.bf16.msra.mxu0 %v1229_v6  ;;  %1241 = vmatpush.bf16.msra.mxu1 %v1229_v6 }
  0x14   :  { %1242 = vmatpush.bf16.msra.mxu2 %v1229_v6  ;;  %1243 = vmatpush.bf16.msra.mxu3 %v1229_v6 }
  0x17   :  { %383 = vmatpush.bf16.msra.mxu0 %v1228_v7  ;;  %1244 = vmatpush.bf16.msra.mxu1 %v1228_v7 }
  0x18   :  { %1245 = vmatpush.bf16.msra.mxu2 %v1228_v7  ;;  %1246 = vmatpush.bf16.msra.mxu3 %v1228_v7 }
  0x1a   :  { %1164 = vmatmul.msk.bf16.vlgmr.msra.gmra.mxu0 %vm275_vm1, %v1196_v8  ;;  %1172 = vmatmul.msk.bf16.vlgmr.msra.gmra.mxu1 %vm275_vm1, %v1204_v9 }
  0x1b   :  { %1180 = vmatmul.msk.bf16.vlgmr.msra.gmra.mxu2 %vm275_vm1, %v1212_v12  ;;  %1188 = vmatmul.msk.bf16.vlgmr.msra.gmra.mxu3 %vm275_vm1, %v1220_v19 }
  0x2a   :  { %1165 = vmatmul.msk.bf16.gmra.mxu0 %vm275_vm1, %v1197_v10  ;;  %1173 = vmatmul.msk.bf16.gmra.mxu1 %vm275_vm1, %v1205_v11 }
  0x2b   :  { %1181 = vmatmul.msk.bf16.gmra.mxu2 %vm275_vm1, %v1213_v15  ;;  %1189 = vmatmul.msk.bf16.gmra.mxu3 %vm275_vm1, %v1221_v23 }
  0x3a   :  { %1166 = vmatmul.msk.bf16.gmra.mxu0 %vm275_vm1, %v1198_v13  ;;  %1174 = vmatmul.msk.bf16.gmra.mxu1 %vm275_vm1, %v1206_v14 }
  0x3b   :  { %1182 = vmatmul.msk.bf16.gmra.mxu2 %vm275_vm1, %v1214_v18  ;;  %1190 = vmatmul.msk.bf16.gmra.mxu3 %vm275_vm1, %v1222_v27 }
  0x4a   :  { %1167 = vmatmul.msk.bf16.gmra.mxu0 %vm275_vm1, %v1199_v16  ;;  %1175 = vmatmul.msk.bf16.gmra.mxu1 %vm275_vm1, %v1207_v17 }
  0x4b   :  { %1183 = vmatmul.msk.bf16.gmra.mxu2 %vm275_vm1, %v1215_v22  ;;  %1191 = vmatmul.msk.bf16.gmra.mxu3 %vm275_vm1, %v1223_v31 }
  0x5a   :  { %1168 = vmatmul.msk.bf16.gmra.mxu0 %vm275_vm1, %v1200_v20  ;;  %1176 = vmatmul.msk.bf16.gmra.mxu1 %vm275_vm1, %v1208_v21  ;;  %v1227_v21 = vld [vmem:[%s2190_s0 + $0xf8] sm:$0xff] }
  0x5b   :  { %1184 = vmatmul.msk.bf16.gmra.mxu2 %vm275_vm1, %v1216_v26  ;;  %1192 = vmatmul.msk.bf16.gmra.mxu3 %vm275_vm1, %v1224_v35 }
  0x6a   :  { %1169 = vmatmul.msk.bf16.gmra.mxu0 %vm275_vm1, %v1201_v24  ;;  %1177 = vmatmul.msk.bf16.gmra.mxu1 %vm275_vm1, %v1209_v25 }
  0x6b   :  { %1185 = vmatmul.msk.bf16.gmra.mxu2 %vm275_vm1, %v1217_v30  ;;  %1193 = vmatmul.msk.bf16.gmra.mxu3 %vm275_vm1, %v1225_v41 }
  0x7a   :  { %1170 = vmatmul.msk.bf16.gmra.mxu0 %vm275_vm1, %v1202_v28  ;;  %1178 = vmatmul.msk.bf16.gmra.mxu1 %vm275_vm1, %v1210_v29 }
  0x7b   :  { %1186 = vmatmul.msk.bf16.gmra.mxu2 %vm275_vm1, %v1218_v34  ;;  %1194 = vmatmul.msk.bf16.gmra.mxu3 %vm275_vm1, %v1226_v62 }
  0x8a   :  { %1171 = vmatmul.msk.bf16.gmra.mxu0 %vm275_vm1, %v1203_v32  ;;  %1179 = vmatmul.msk.bf16.gmra.mxu1 %vm275_vm1, %v1211_v33 }
  0x8b   :  { %1187 = vmatmul.msk.bf16.gmra.mxu2 %vm275_vm1, %v1219_v40  ;;  %1195 = vmatmul.msk.bf16.gmra.mxu3 %vm275_vm1, %v1227_v21 }
  0x97   :  { %v385_v36 = vpop.f32.mrf.mxu0  ;;  %v1399_v37 = vpop.f32.mrf.mxu1 }
  0x98   :  { %v545_v38 = vpack.c.bf16 %v385_v36, %v385_v36  ;;  %v561_v39 = vpack.c.bf16 %v1399_v37, %v1399_v37  ;;  %v810_v42 = vmul.f32 %v385_v36, %v385_v36  ;;  %v675_v43 = vsel %vm674_vm3, %v385_v36, 0.0 }
  0x9a   :  { %610 = vst.msk [vmem:[%s2191_s2] sm:$0xf] %vm609_vm2, %v545_v38  ;;  %v874_v51 = vsel %vm674_vm3, %v810_v42, 0.0 }
  0x9b   :  { %626 = vst.msk [vmem:[%s2191_s2 + $0x40] sm:$0xf] %vm609_vm2, %v561_v39 }
  0x9e   :  { %v1458_v6 = vpop.f32.mrf.mxu2  ;;  %v1563_v41 = vpop.f32.mrf.mxu3 }
  0x9f   :  { %v387_v44 = vpop.f32.mrf.mxu0  ;;  %v1420_v45 = vpop.f32.mrf.mxu1  ;;  %v577_v10 = vpack.c.bf16 %v1458_v6, %v1458_v6 }
  0xa0   :  { %v546_v46 = vpack.c.bf16 %v387_v44, %v387_v44  ;;  %v676_v47 = vsel %vm674_vm3, %v387_v44, 0.0  ;;  %v811_v48 = vmul.f32 %v387_v44, %v387_v44  ;;  %v562_v49 = vpack.c.bf16 %v1420_v45, %v1420_v45 }
  0xa1   :  { %v677_v50 = vadd.f32 %v676_v47, %v675_v43  ;;  %642 = vst.msk [vmem:[%s2191_s2 + $0x80] sm:$0xf] %vm609_vm2, %v577_v10  ;;  %v593_v43 = vpack.c.bf16 %v1563_v41, %v1563_v41 }
  0xa2   :  { %611 = vst.msk [vmem:[%s2191_s2 + $0x4] sm:$0xf] %vm609_vm2, %v546_v46  ;;  %v875_v52 = vsel %vm674_vm3, %v811_v48, 0.0 }
  0xa3   :  { %v876_v53 = vadd.f32 %v875_v52, %v874_v51  ;;  %627 = vst.msk [vmem:[%s2191_s2 + $0x44] sm:$0xf] %vm609_vm2, %v562_v49 }
  0xa4   :  { %658 = vst.msk [vmem:[%s2191_s2 + $0xc0] sm:$0xf] %vm609_vm2, %v593_v43 }
  0xa6   :  { %v1480_v17 = vpop.f32.mrf.mxu2 }
  0xa7   :  { %v390_v54 = vpop.f32.mrf.mxu0  ;;  %v1435_v55 = vpop.f32.mrf.mxu1  ;;  %v578_v19 = vpack.c.bf16 %v1480_v17, %v1480_v17 }
  0xa8   :  { %v547_v56 = vpack.c.bf16 %v390_v54, %v390_v54  ;;  %v678_v57 = vsel %vm674_vm3, %v390_v54, 0.0  ;;  %v812_v58 = vmul.f32 %v390_v54, %v390_v54  ;;  %v563_v59 = vpack.c.bf16 %v1435_v55, %v1435_v55 }
  0xa9   :  { %v679_v60 = vadd.f32 %v678_v57, %v677_v50  ;;  %643 = vst.msk [vmem:[%s2191_s2 + $0x84] sm:$0xf] %vm609_vm2, %v578_v19  ;;  %v1595_v50 = vpop.f32.mrf.mxu3 }
  0xaa   :  { %612 = vst.msk [vmem:[%s2191_s2 + $0x8] sm:$0xf] %vm609_vm2, %v547_v56  ;;  %v877_v61 = vsel %vm674_vm3, %v812_v58, 0.0  ;;  %v594_v52 = vpack.c.bf16 %v1595_v50, %v1595_v50 }
  0xab   :  { %v878_v63 = vadd.f32 %v877_v61, %v876_v53  ;;  %628 = vst.msk [vmem:[%s2191_s2 + $0x48] sm:$0xf] %vm609_vm2, %v563_v59 }
  0xac   :  { %659 = vst.msk [vmem:[%s2191_s2 + $0xc4] sm:$0xf] %vm609_vm2, %v594_v52 }
  0xae   :  { %v1513_v27 = vpop.f32.mrf.mxu2 }
  0xaf   :  { %v392_v0 = vpop.f32.mrf.mxu0  ;;  %v1453_v1 = vpop.f32.mrf.mxu1  ;;  %v579_v28 = vpack.c.bf16 %v1513_v27, %v1513_v27 }
  0xb0   :  { %v548_v2 = vpack.c.bf16 %v392_v0, %v392_v0  ;;  %v680_v3 = vsel %vm674_vm3, %v392_v0, 0.0  ;;  %v813_v4 = vmul.f32 %v392_v0, %v392_v0  ;;  %v564_v5 = vpack.c.bf16 %v1453_v1, %v1453_v1 }
  0xb1   :  { %v681_v7 = vadd.f32 %v680_v3, %v679_v60  ;;  %644 = vst.msk [vmem:[%s2191_s2 + $0x88] sm:$0xf] %vm609_vm2, %v579_v28  ;;  %v1627_v59 = vpop.f32.mrf.mxu3 }
  0xb2   :  { %613 = vst.msk [vmem:[%s2191_s2 + $0xc] sm:$0xf] %vm609_vm2, %v548_v2  ;;  %v879_v8 = vsel %vm674_vm3, %v813_v4, 0.0  ;;  %v595_v61 = vpack.c.bf16 %v1627_v59, %v1627_v59 }
  0xb3   :  { %v880_v9 = vadd.f32 %v879_v8, %v878_v63  ;;  %629 = vst.msk [vmem:[%s2191_s2 + $0x4c] sm:$0xf] %vm609_vm2, %v564_v5 }
  0xb4   :  { %660 = vst.msk [vmem:[%s2191_s2 + $0xc8] sm:$0xf] %vm609_vm2, %v595_v61 }
  0xb6   :  { %v1537_v33 = vpop.f32.mrf.mxu2 }
  0xb7   :  { %v395_v11 = vpop.f32.mrf.mxu0  ;;  %v1475_v12 = vpop.f32.mrf.mxu1  ;;  %v580_v34 = vpack.c.bf16 %v1537_v33, %v1537_v33 }
  0xb8   :  { %v549_v13 = vpack.c.bf16 %v395_v11, %v395_v11  ;;  %v682_v14 = vsel %vm674_vm3, %v395_v11, 0.0  ;;  %v814_v15 = vmul.f32 %v395_v11, %v395_v11  ;;  %v565_v16 = vpack.c.bf16 %v1475_v12, %v1475_v12 }
  0xb9   :  { %v1482_v18 = vadd.f32 %v682_v14, %v681_v7  ;;  %645 = vst.msk [vmem:[%s2191_s2 + $0x8c] sm:$0xf] %vm609_vm2, %v580_v34  ;;  %v1659_v4 = vpop.f32.mrf.mxu3 }
  0xba   :  { %614 = vst.msk [vmem:[%s2191_s2 + $0x10] sm:$0xf] %vm609_vm2, %v549_v13  ;;  %v881_v20 = vsel %vm674_vm3, %v814_v15, 0.0  ;;  %v596_v7 = vpack.c.bf16 %v1659_v4, %v1659_v4 }
  0xbb   :  { %v1494_v22 = vadd.f32 %v881_v20, %v880_v9  ;;  %630 = vst.msk [vmem:[%s2191_s2 + $0x50] sm:$0xf] %vm609_vm2, %v565_v16 }
  0xbc   :  { %661 = vst.msk [vmem:[%s2191_s2 + $0xcc] sm:$0xf] %vm609_vm2, %v596_v7 }
  0xbe   :  { %v1561_v40 = vpop.f32.mrf.mxu2 }
  0xbf   :  { %v1505_v23 = vpop.f32.mrf.mxu0  ;;  %v1507_v24 = vpop.f32.mrf.mxu1  ;;  %v581_v42 = vpack.c.bf16 %v1561_v40, %v1561_v40 }
  0xc0   :  { %v550_v25 = vpack.c.bf16 %v1505_v23, %v1505_v23  ;;  %v566_v26 = vpack.c.bf16 %v1507_v24, %v1507_v24  ;;  %v815_v19 = vmul.f32 %v1505_v23, %v1505_v23 }
  0xc1   :  { %646 = vst.msk [vmem:[%s2191_s2 + $0x90] sm:$0xf] %vm609_vm2, %v581_v42  ;;  %v1687_v14 = vpop.f32.mrf.mxu3 }
  0xc2   :  { %615 = vst.msk [vmem:[%s2191_s2 + $0x14] sm:$0xf] %vm609_vm2, %v550_v25  ;;  %v597_v34 = vpack.c.bf16 %v1687_v14, %v1687_v14 }
  0xc3   :  { %631 = vst.msk [vmem:[%s2191_s2 + $0x54] sm:$0xf] %vm609_vm2, %v566_v26 }
  0xc4   :  { %662 = vst.msk [vmem:[%s2191_s2 + $0xd0] sm:$0xf] %vm609_vm2, %v597_v34 }
  0xc6   :  { %v1593_v49 = vpop.f32.mrf.mxu2 }
  0xc7   :  { %v1529_v29 = vpop.f32.mrf.mxu0  ;;  %v1531_v30 = vpop.f32.mrf.mxu1  ;;  %v582_v51 = vpack.c.bf16 %v1593_v49, %v1593_v49 }
  0xc8   :  { %v551_v31 = vpack.c.bf16 %v1529_v29, %v1529_v29  ;;  %v567_v32 = vpack.c.bf16 %v1531_v30, %v1531_v30 }
  0xc9   :  { %647 = vst.msk [vmem:[%s2191_s2 + $0x94] sm:$0xf] %vm609_vm2, %v582_v51  ;;  %v1705_v26 = vpop.f32.mrf.mxu3 }
  0xca   :  { %616 = vst.msk [vmem:[%s2191_s2 + $0x18] sm:$0xf] %vm609_vm2, %v551_v31  ;;  %v684_v31 = vsel %vm674_vm3, %v1505_v23, 0.0  ;;  %v883_v23 = vsel %vm674_vm3, %v815_v19, 0.0 }
  0xcb   :  { %632 = vst.msk [vmem:[%s2191_s2 + $0x58] sm:$0xf] %vm609_vm2, %v567_v32  ;;  %v816_v32 = vmul.f32 %v1529_v29, %v1529_v29  ;;  %v685_v43 = vadd.f32 %v684_v31, %v1482_v18  ;;  %v884_v18 = vadd.f32 %v883_v23, %v1494_v22 }
  0xce   :  { %v1625_v58 = vpop.f32.mrf.mxu2 }
  0xcf   :  { %v1553_v35 = vpop.f32.mrf.mxu0  ;;  %v1555_v36 = vpop.f32.mrf.mxu1  ;;  %v583_v60 = vpack.c.bf16 %v1625_v58, %v1625_v58 }
  0xd0   :  { %v552_v38 = vpack.c.bf16 %v1553_v35, %v1553_v35  ;;  %v568_v39 = vpack.c.bf16 %v1555_v36, %v1555_v36 }
  0xd1   :  { %648 = vst.msk [vmem:[%s2191_s2 + $0x98] sm:$0xf] %vm609_vm2, %v583_v60 }
  0xd2   :  { %617 = vst.msk [vmem:[%s2191_s2 + $0x1c] sm:$0xf] %vm609_vm2, %v552_v38  ;;  %v817_v38 = vmul.f32 %v1553_v35, %v1553_v35 }
  0xd3   :  { %633 = vst.msk [vmem:[%s2191_s2 + $0x5c] sm:$0xf] %vm609_vm2, %v568_v39  ;;  %v686_v39 = vsel %vm674_vm3, %v1529_v29, 0.0  ;;  %v885_v29 = vsel %vm674_vm3, %v816_v32, 0.0 }
  0xd4   :  { %v687_v52 = vadd.f32 %v686_v39, %v685_v43  ;;  %v886_v7 = vadd.f32 %v885_v29, %v884_v18 }
  0xd6   :  { %v1657_v3 = vpop.f32.mrf.mxu2 }
  0xd7   :  { %v1585_v44 = vpop.f32.mrf.mxu0  ;;  %v1587_v46 = vpop.f32.mrf.mxu1  ;;  %v584_v5 = vpack.c.bf16 %v1657_v3, %v1657_v3 }
  0xd8   :  { %v553_v47 = vpack.c.bf16 %v1585_v44, %v1585_v44  ;;  %v569_v48 = vpack.c.bf16 %v1587_v46, %v1587_v46  ;;  %v818_v51 = vmul.f32 %v1585_v44, %v1585_v44 }
  0xd9   :  { %649 = vst.msk [vmem:[%s2191_s2 + $0x9c] sm:$0xf] %vm609_vm2, %v584_v5  ;;  %v1766_v5 = vpop.f32.mrf.mxu3 }
  0xda   :  { %618 = vst.msk [vmem:[%s2191_s2 + $0x20] sm:$0xf] %vm609_vm2, %v553_v47  ;;  %v598_v47 = vpack.c.bf16 %v1705_v26, %v1705_v26 }
  0xdb   :  { %634 = vst.msk [vmem:[%s2191_s2 + $0x60] sm:$0xf] %vm609_vm2, %v569_v48  ;;  %v688_v48 = vsel %vm674_vm3, %v1553_v35, 0.0  ;;  %v690_v35 = vsel %vm674_vm3, %v1585_v44, 0.0 }
  0xdc   :  { %663 = vst.msk [vmem:[%s2191_s2 + $0xd4] sm:$0xf] %vm609_vm2, %v598_v47 }
  0xde   :  { %v1685_v13 = vpop.f32.mrf.mxu2 }
  0xdf   :  { %v1617_v53 = vpop.f32.mrf.mxu0  ;;  %v1619_v54 = vpop.f32.mrf.mxu1  ;;  %v585_v28 = vpack.c.bf16 %v1685_v13, %v1685_v13 }
  0xe0   :  { %v554_v56 = vpack.c.bf16 %v1617_v53, %v1617_v53  ;;  %v570_v57 = vpack.c.bf16 %v1619_v54, %v1619_v54  ;;  %v819_v61 = vmul.f32 %v1617_v53, %v1617_v53  ;;  %v692_v19 = vsel %vm674_vm3, %v1617_v53, 0.0 }
  0xe1   :  { %650 = vst.msk [vmem:[%s2191_s2 + $0xa0] sm:$0xf] %vm609_vm2, %v585_v28 }
  0xe2   :  { %619 = vst.msk [vmem:[%s2191_s2 + $0x24] sm:$0xf] %vm609_vm2, %v554_v56  ;;  %v887_v56 = vsel %vm674_vm3, %v817_v38, 0.0  ;;  %v891_v31 = vsel %vm674_vm3, %v819_v61, 0.0 }
  0xe3   :  { %635 = vst.msk [vmem:[%s2191_s2 + $0x64] sm:$0xf] %vm609_vm2, %v570_v57 }
  0xe6   :  { %v1703_v25 = vpop.f32.mrf.mxu2 }
  0xe7   :  { %v1649_v62 = vpop.f32.mrf.mxu0  ;;  %v1651_v63 = vpop.f32.mrf.mxu1  ;;  %v586_v42 = vpack.c.bf16 %v1703_v25, %v1703_v25 }
  0xe8   :  { %v555_v0 = vpack.c.bf16 %v1649_v62, %v1649_v62  ;;  %v571_v2 = vpack.c.bf16 %v1651_v63, %v1651_v63  ;;  %v820_v44 = vmul.f32 %v1649_v62, %v1649_v62  ;;  %v694_v53 = vsel %vm674_vm3, %v1649_v62, 0.0 }
  0xe9   :  { %651 = vst.msk [vmem:[%s2191_s2 + $0xa4] sm:$0xf] %vm609_vm2, %v586_v42 }
  0xea   :  { %620 = vst.msk [vmem:[%s2191_s2 + $0x28] sm:$0xf] %vm609_vm2, %v555_v0  ;;  %v893_v38 = vsel %vm674_vm3, %v820_v44, 0.0 }
  0xeb   :  { %636 = vst.msk [vmem:[%s2191_s2 + $0x68] sm:$0xf] %vm609_vm2, %v571_v2 }
  0xee   :  { %v1764_v2 = vpop.f32.mrf.mxu2 }
  0xef   :  { %v412_v8 = vpop.f32.mrf.mxu0  ;;  %v1681_v9 = vpop.f32.mrf.mxu1 }
  0xf0   :  { %v556_v10 = vpack.c.bf16 %v412_v8, %v412_v8  ;;  %v572_v11 = vpack.c.bf16 %v1681_v9, %v1681_v9  ;;  %v821_v28 = vmul.f32 %v412_v8, %v412_v8  ;;  %v696_v23 = vsel %vm674_vm3, %v412_v8, 0.0 }
  0xf2   :  { %621 = vst.msk [vmem:[%s2191_s2 + $0x2c] sm:$0xf] %vm609_vm2, %v556_v10  ;;  %v689_v10 = vadd.f32 %v688_v48, %v687_v52  ;;  %v895_v47 = vsel %vm674_vm3, %v821_v28, 0.0 }
  0xf3   :  { %637 = vst.msk [vmem:[%s2191_s2 + $0x6c] sm:$0xf] %vm609_vm2, %v572_v11  ;;  %v889_v11 = vsel %vm674_vm3, %v818_v51, 0.0 }
  0xf7   :  { %v415_v15 = vpop.f32.mrf.mxu0  ;;  %v1697_v16 = vpop.f32.mrf.mxu1 }
  0xf8   :  { %v557_v20 = vpack.c.bf16 %v415_v15, %v415_v15  ;;  %v573_v21 = vpack.c.bf16 %v1697_v16, %v1697_v16  ;;  %v822_v39 = vmul.f32 %v415_v15, %v415_v15  ;;  %v698_v51 = vsel %vm674_vm3, %v415_v15, 0.0 }
  0xfa   :  { %622 = vst.msk [vmem:[%s2191_s2 + $0x30] sm:$0xf] %vm609_vm2, %v557_v20  ;;  %v888_v20 = vadd.f32 %v887_v56, %v886_v7  ;;  %v1792_v56 = vpop.f32.mrf.mxu2 }
  0xfb   :  { %638 = vst.msk [vmem:[%s2191_s2 + $0x70] sm:$0xf] %vm609_vm2, %v573_v21  ;;  %v691_v21 = vadd.f32 %v690_v35, %v689_v10  ;;  %v1794_v35 = vpop.f32.mrf.mxu3  ;;  %v599_v10 = vpack.c.bf16 %v1766_v5, %v1766_v5 }
  0xfc   :  { %v890_v32 = vadd.f32 %v889_v11, %v888_v20  ;;  %v588_v20 = vpack.c.bf16 %v1792_v56, %v1792_v56 }
  0xfd   :  { %v693_v34 = vadd.f32 %v692_v19, %v691_v21  ;;  %664 = vst.msk [vmem:[%s2191_s2 + $0xd8] sm:$0xf] %vm609_vm2, %v599_v10  ;;  %v708_v10 = vsel %vm674_vm3, %v1420_v45, 0.0 }
  0xfe   :  { %v892_v42 = vadd.f32 %v891_v31, %v890_v32  ;;  %v600_v31 = vpack.c.bf16 %v1794_v35, %v1794_v35  ;;  %653 = vst.msk [vmem:[%s2191_s2 + $0xac] sm:$0xf] %vm609_vm2, %v588_v20  ;;  %v826_v32 = vmul.f32 %v1399_v37, %v1399_v37  ;;  %v829_v20 = vmul.f32 %v1453_v1, %v1453_v1 }
  0xff   :  { %v417_v57 = vpop.f32.mrf.mxu0  ;;  %v1752_v60 = vpop.f32.mrf.mxu1  ;;  %v695_v43 = vadd.f32 %v694_v53, %v693_v34 }
 0x100   :  { %v558_v0 = vpack.c.bf16 %v417_v57, %v417_v57  ;;  %v574_v22 = vpack.c.bf16 %v1752_v60, %v1752_v60  ;;  %v823_v18 = vmul.f32 %v417_v57, %v417_v57  ;;  %v894_v8 = vadd.f32 %v893_v38, %v892_v42  ;;  %665 = vst.msk [vmem:[%s2191_s2 + $0xdc] sm:$0xf] %vm609_vm2, %v600_v31 }
 0x101   :  { %v697_v61 = vadd.f32 %v696_v23, %v695_v43  ;;  %v700_v7 = vsel %vm674_vm3, %v417_v57, 0.0 }
 0x102   :  { %623 = vst.msk [vmem:[%s2191_s2 + $0x34] sm:$0xf] %vm609_vm2, %v558_v0  ;;  %v587_v0 = vpack.c.bf16 %v1764_v2, %v1764_v2  ;;  %v896_v11 = vadd.f32 %v895_v47, %v894_v8  ;;  %v899_v44 = vsel %vm674_vm3, %v823_v18, 0.0  ;;  %v706_v8 = vsel %vm674_vm3, %v1399_v37, 0.0 }
 0x103   :  { %639 = vst.msk [vmem:[%s2191_s2 + $0x74] sm:$0xf] %vm609_vm2, %v574_v22  ;;  %v897_v22 = vsel %vm674_vm3, %v822_v39, 0.0  ;;  %v699_v19 = vadd.f32 %v698_v51, %v697_v61  ;;  %v1840_v51 = vpop.f32.mrf.mxu2  ;;  %v1842_v18 = vpop.f32.mrf.mxu3  ;;  %v827_v61 = vmul.f32 %v1420_v45, %v1420_v45  ;;  %v905_v37 = vsel %vm674_vm3, %v826_v32, 0.0 }
 0x104   :  { %652 = vst.msk [vmem:[%s2191_s2 + $0xa8] sm:$0xf] %vm609_vm2, %v587_v0  ;;  %v898_v21 = vadd.f32 %v897_v22, %v896_v11  ;;  %v828_v22 = vmul.f32 %v1435_v55, %v1435_v55  ;;  %v830_v45 = vmul.f32 %v1475_v12, %v1475_v12  ;;  %v589_v32 = vpack.c.bf16 %v1840_v51, %v1840_v51 }
 0x105   :  { %v701_v28 = vadd.f32 %v700_v7, %v699_v19 }
 0x106   :  { %v900_v34 = vadd.f32 %v899_v44, %v898_v21  ;;  %v907_v44 = vsel %vm674_vm3, %v827_v61, 0.0  ;;  %v909_v21 = vsel %vm674_vm3, %v828_v22, 0.0  ;;  %654 = vst.msk [vmem:[%s2191_s2 + $0xb0] sm:$0xf] %vm609_vm2, %v589_v32  ;;  %v716_v61 = vsel %vm674_vm3, %v1507_v24, 0.0 }
 0x107   :  { %v420_v29 = vpop.f32.mrf.mxu0  ;;  %v1787_v48 = vpop.f32.mrf.mxu1 }
 0x108   :  { %v559_v52 = vpack.c.bf16 %v420_v29, %v420_v29  ;;  %v575_v62 = vpack.c.bf16 %v1787_v48, %v1787_v48  ;;  %v824_v15 = vmul.f32 %v420_v29, %v420_v29  ;;  %v702_v57 = vsel %vm674_vm3, %v420_v29, 0.0 }
 0x109   :  { %v703_v38 = vadd.f32 %v702_v57, %v701_v28  ;;  %v710_v57 = vsel %vm674_vm3, %v1435_v55, 0.0 }
 0x10a   :  { %624 = vst.msk [vmem:[%s2191_s2 + $0x38] sm:$0xf] %vm609_vm2, %v559_v52  ;;  %v901_v53 = vsel %vm674_vm3, %v824_v15, 0.0 }
 0x10b   :  { %640 = vst.msk [vmem:[%s2191_s2 + $0x78] sm:$0xf] %vm609_vm2, %v575_v62  ;;  %v902_v52 = vadd.f32 %v901_v53, %v900_v34  ;;  %v712_v53 = vsel %vm674_vm3, %v1453_v1, 0.0  ;;  %v601_v34 = vpack.c.bf16 %v1842_v18, %v1842_v18  ;;  %v1876_v55 = vpop.f32.mrf.mxu2  ;;  %v714_v1 = vsel %vm674_vm3, %v1475_v12, 0.0 }
 0x10d   :  { %666 = vst.msk [vmem:[%s2191_s2 + $0xe0] sm:$0xf] %vm609_vm2, %v601_v34 }
 0x10f   :  { %v422_v23 = vpop.f32.mrf.mxu0  ;;  %v1831_v39 = vpop.f32.mrf.mxu1 }
 0x110   :  { %v560_v42 = vpack.c.bf16 %v422_v23, %v422_v23  ;;  %v704_v43 = vsel %vm674_vm3, %v422_v23, 0.0  ;;  %v825_v47 = vmul.f32 %v422_v23, %v422_v23  ;;  %v576_v29 = vpack.c.bf16 %v1831_v39, %v1831_v39 }
 0x111   :  { %v705_v62 = vadd.f32 %v704_v43, %v703_v38  ;;  %v1878_v38 = vpop.f32.mrf.mxu3  ;;  %v911_v43 = vsel %vm674_vm3, %v829_v20, 0.0 }
 0x112   :  { %625 = vst.msk [vmem:[%s2191_s2 + $0x3c] sm:$0xf] %vm609_vm2, %v560_v42  ;;  %v903_v0 = vsel %vm674_vm3, %v825_v47, 0.0  ;;  %v831_v47 = vmul.f32 %v1507_v24, %v1507_v24  ;;  %v602_v12 = vpack.c.bf16 %v1878_v38, %v1878_v38  ;;  %v718_v24 = vsel %vm674_vm3, %v1531_v30, 0.0 }
 0x113   :  { %v707_v7 = vadd.f32 %v706_v8, %v705_v62  ;;  %v904_v15 = vadd.f32 %v903_v0, %v902_v52  ;;  %641 = vst.msk [vmem:[%s2191_s2 + $0x7c] sm:$0xf] %vm609_vm2, %v576_v29  ;;  %v590_v29 = vpack.c.bf16 %v1876_v55, %v1876_v55  ;;  %v913_v8 = vsel %vm674_vm3, %v830_v45, 0.0  ;;  %v1920_v20 = vpop.f32.mrf.mxu2 }
 0x114   :  { %v832_v0 = vmul.f32 %v1531_v30, %v1531_v30  ;;  %667 = vst.msk [vmem:[%s2191_s2 + $0xe4] sm:$0xf] %vm609_vm2, %v602_v12  ;;  %v835_v45 = vmul.f32 %v1619_v54, %v1619_v54 }
 0x115   :  { %v709_v11 = vadd.f32 %v708_v10, %v707_v7  ;;  %v906_v19 = vadd.f32 %v905_v37, %v904_v15  ;;  %655 = vst.msk [vmem:[%s2191_s2 + $0xb4] sm:$0xf] %vm609_vm2, %v590_v29  ;;  %v915_v15 = vsel %vm674_vm3, %v831_v47, 0.0  ;;  %v833_v37 = vmul.f32 %v1555_v36, %v1555_v36 }
 0x116   :  { %v923_v47 = vsel %vm674_vm3, %v835_v45, 0.0  ;;  %v837_v29 = vmul.f32 %v1681_v9, %v1681_v9  ;;  %v841_v45 = vmul.f32 %v1831_v39, %v1831_v39 }
 0x117   :  { %v711_v28 = vadd.f32 %v710_v57, %v709_v11  ;;  %v908_v31 = vadd.f32 %v907_v44, %v906_v19  ;;  %v917_v19 = vsel %vm674_vm3, %v832_v0, 0.0  ;;  %v720_v44 = vsel %vm674_vm3, %v1555_v36, 0.0 }
 0x118   :  { %v834_v57 = vmul.f32 %v1587_v46, %v1587_v46  ;;  %v919_v30 = vsel %vm674_vm3, %v833_v37, 0.0  ;;  %v836_v36 = vmul.f32 %v1651_v63, %v1651_v63  ;;  %v839_v37 = vmul.f32 %v1752_v60, %v1752_v60 }
 0x119   :  { %v713_v23 = vadd.f32 %v712_v53, %v711_v28  ;;  %v910_v42 = vadd.f32 %v909_v21, %v908_v31  ;;  %v1922_v21 = vpop.f32.mrf.mxu3  ;;  %v722_v53 = vsel %vm674_vm3, %v1587_v46, 0.0  ;;  %v726_v46 = vsel %vm674_vm3, %v1651_v63, 0.0 }
 0x11a   :  { %v603_v0 = vpack.c.bf16 %v1922_v21, %v1922_v21 }
 0x11b   :  { %v715_v52 = vadd.f32 %v714_v1, %v713_v23  ;;  %v912_v62 = vadd.f32 %v911_v43, %v910_v42  ;;  %v921_v23 = vsel %vm674_vm3, %v834_v57, 0.0  ;;  %v724_v42 = vsel %vm674_vm3, %v1619_v54, 0.0  ;;  %v1948_v63 = vpop.f32.mrf.mxu2 }
 0x11c   :  { %v838_v54 = vmul.f32 %v1697_v16, %v1697_v16  ;;  %668 = vst.msk [vmem:[%s2191_s2 + $0xe8] sm:$0xf] %vm609_vm2, %v603_v0  ;;  %v732_v57 = vsel %vm674_vm3, %v1752_v60, 0.0  ;;  %v734_v60 = vsel %vm674_vm3, %v1787_v48, 0.0 }
 0x11d   :  { %v717_v22 = vadd.f32 %v716_v61, %v715_v52  ;;  %v914_v7 = vadd.f32 %v913_v8, %v912_v62  ;;  %v925_v52 = vsel %vm674_vm3, %v836_v36, 0.0  ;;  %v728_v8 = vsel %vm674_vm3, %v1681_v9, 0.0 }
 0x11e   :  { %v591_v61 = vpack.c.bf16 %v1920_v20, %v1920_v20  ;;  %v730_v9 = vsel %vm674_vm3, %v1697_v16, 0.0 }
 0x11f   :  { %v916_v10 = vadd.f32 %v915_v15, %v914_v7  ;;  %v719_v11 = vadd.f32 %v718_v24, %v717_v22  ;;  %v927_v24 = vsel %vm674_vm3, %v837_v29, 0.0  ;;  %v935_v29 = vsel %vm674_vm3, %v841_v45, 0.0 }
 0x120   :  { %656 = vst.msk [vmem:[%s2191_s2 + $0xb8] sm:$0xf] %vm609_vm2, %v591_v61 }
 0x121   :  { %v721_v28 = vadd.f32 %v720_v44, %v719_v11  ;;  %v918_v31 = vadd.f32 %v917_v19, %v916_v10  ;;  %v1950_v22 = vpop.f32.mrf.mxu3  ;;  %v592_v10 = vpack.c.bf16 %v1948_v63, %v1948_v63  ;;  %v929_v44 = vsel %vm674_vm3, %v838_v54, 0.0 }
 0x122   :  { %v604_v16 = vpack.c.bf16 %v1950_v22, %v1950_v22 }
 0x123   :  { %v723_v32 = vadd.f32 %v722_v53, %v721_v28  ;;  %v920_v34 = vadd.f32 %v919_v30, %v918_v31  ;;  %v840_v28 = vmul.f32 %v1787_v48, %v1787_v48  ;;  %657 = vst.msk [vmem:[%s2191_s2 + $0xbc] sm:$0xf] %vm609_vm2, %v592_v10  ;;  %v931_v53 = vsel %vm674_vm3, %v839_v37, 0.0 }
 0x124   :  { %669 = vst.msk [vmem:[%s2191_s2 + $0xec] sm:$0xf] %vm609_vm2, %v604_v16  ;;  %v738_v48 = vsel %vm674_vm3, %v1458_v6, 0.0  ;;  %v846_v37 = vmul.f32 %v1561_v40, %v1561_v40 }
 0x125   :  { %v725_v43 = vadd.f32 %v724_v42, %v723_v32  ;;  %v922_v1 = vadd.f32 %v921_v23, %v920_v34  ;;  %v842_v34 = vmul.f32 %v1458_v6, %v1458_v6  ;;  %v933_v23 = vsel %vm674_vm3, %v840_v28, 0.0 }
 0x126   :  { %v736_v42 = vsel %vm674_vm3, %v1831_v39, 0.0  ;;  %v844_v39 = vmul.f32 %v1513_v27, %v1513_v27  ;;  %v742_v6 = vsel %vm674_vm3, %v1513_v27, 0.0 }
 0x127   :  { %v727_v62 = vadd.f32 %v726_v46, %v725_v43  ;;  %v924_v12 = vadd.f32 %v923_v47, %v922_v1  ;;  %v843_v46 = vmul.f32 %v1480_v17, %v1480_v17 }
 0x129   :  { %v729_v7 = vadd.f32 %v728_v8, %v727_v62  ;;  %v926_v15 = vadd.f32 %v925_v52, %v924_v12  ;;  %v1992_v43 = vpop.f32.mrf.mxu3  ;;  %v937_v12 = vsel %vm674_vm3, %v842_v34, 0.0  ;;  %v740_v8 = vsel %vm674_vm3, %v1480_v17, 0.0 }
 0x12a   :  { %v939_v0 = vsel %vm674_vm3, %v843_v46, 0.0  ;;  %v744_v17 = vsel %vm674_vm3, %v1537_v33, 0.0  ;;  %v605_v10 = vpack.c.bf16 %v1992_v43, %v1992_v43  ;;  %v849_v34 = vmul.f32 %v1657_v3, %v1657_v3 }
 0x12b   :  { %v731_v11 = vadd.f32 %v730_v9, %v729_v7  ;;  %v928_v19 = vadd.f32 %v927_v24, %v926_v15  ;;  %v845_v7 = vmul.f32 %v1537_v33, %v1537_v33  ;;  %v941_v9 = vsel %vm674_vm3, %v844_v39, 0.0 }
 0x12c   :  { %v847_v33 = vmul.f32 %v1593_v49, %v1593_v49  ;;  %670 = vst.msk [vmem:[%s2191_s2 + $0xf0] sm:$0xf] %vm609_vm2, %v605_v10 }
 0x12d   :  { %v930_v31 = vadd.f32 %v929_v44, %v928_v19  ;;  %v733_v30 = vadd.f32 %v732_v57, %v731_v11  ;;  %v943_v44 = vsel %vm674_vm3, %v845_v7, 0.0  ;;  %v746_v57 = vsel %vm674_vm3, %v1561_v40, 0.0 }
 0x12e   :  { %v748_v40 = vsel %vm674_vm3, %v1593_v49, 0.0  ;;  %v752_v49 = vsel %vm674_vm3, %v1657_v3, 0.0  ;;  %v756_v3 = vsel %vm674_vm3, %v1703_v25, 0.0  ;;  %v853_v7 = vmul.f32 %v1792_v56, %v1792_v56 }
 0x12f   :  { %v932_v36 = vadd.f32 %v931_v53, %v930_v31  ;;  %v735_v32 = vadd.f32 %v734_v60, %v733_v30  ;;  %v945_v30 = vsel %vm674_vm3, %v846_v37, 0.0  ;;  %v848_v53 = vmul.f32 %v1625_v58, %v1625_v58 }
 0x131   :  { %v934_v1 = vadd.f32 %v933_v23, %v932_v36  ;;  %v737_v47 = vadd.f32 %v736_v42, %v735_v32  ;;  %v2016_v11 = vpop.f32.mrf.mxu3  ;;  %v947_v36 = vsel %vm674_vm3, %v847_v33, 0.0  ;;  %v750_v32 = vsel %vm674_vm3, %v1625_v58, 0.0 }
 0x132   :  { %v606_v16 = vpack.c.bf16 %v2016_v11, %v2016_v11  ;;  %v754_v58 = vsel %vm674_vm3, %v1685_v13, 0.0 }
 0x133   :  { %v739_v52 = vadd.f32 %v738_v48, %v737_v47  ;;  %v936_v62 = vadd.f32 %v935_v29, %v934_v1  ;;  %v949_v1 = vsel %vm674_vm3, %v848_v53, 0.0  ;;  %v850_v47 = vmul.f32 %v1685_v13, %v1685_v13 }
 0x134   :  { %671 = vst.msk [vmem:[%s2191_s2 + $0xf4] sm:$0xf] %vm609_vm2, %v606_v16  ;;  %v758_v13 = vsel %vm674_vm3, %v1764_v2, 0.0  ;;  %v959_v16 = vsel %vm674_vm3, %v853_v7, 0.0 }
 0x135   :  { %v741_v54 = vadd.f32 %v740_v8, %v739_v52  ;;  %v938_v61 = vadd.f32 %v937_v12, %v936_v62  ;;  %v951_v52 = vsel %vm674_vm3, %v849_v34, 0.0  ;;  %v851_v62 = vmul.f32 %v1703_v25, %v1703_v25 }
 0x136   :  { %v953_v39 = vsel %vm674_vm3, %v850_v47, 0.0  ;;  %v760_v25 = vsel %vm674_vm3, %v1792_v56, 0.0  ;;  %v855_v56 = vmul.f32 %v1876_v55, %v1876_v55  ;;  %v858_v34 = vmul.f32 %v1563_v41, %v1563_v41 }
 0x137   :  { %v743_v15 = vadd.f32 %v742_v6, %v741_v54  ;;  %v940_v24 = vadd.f32 %v939_v0, %v938_v61  ;;  %v852_v54 = vmul.f32 %v1764_v2, %v1764_v2  ;;  %v955_v6 = vsel %vm674_vm3, %v851_v62, 0.0 }
 0x138   :  { %v963_v53 = vsel %vm674_vm3, %v855_v56, 0.0 }
 0x139   :  { %v745_v19 = vadd.f32 %v744_v17, %v743_v15  ;;  %v942_v27 = vadd.f32 %v941_v9, %v940_v24  ;;  %v2048_v48 = vpop.f32.mrf.mxu3  ;;  %v957_v9 = vsel %vm674_vm3, %v852_v54, 0.0  ;;  %v854_v17 = vmul.f32 %v1840_v51, %v1840_v51 }
 0x13a   :  { %v607_v37 = vpack.c.bf16 %v2048_v48, %v2048_v48 }
 0x13b   :  { %v747_v28 = vadd.f32 %v746_v57, %v745_v19  ;;  %v944_v31 = vadd.f32 %v943_v44, %v942_v27  ;;  %v762_v44 = vsel %vm674_vm3, %v1840_v51, 0.0  ;;  %v764_v51 = vsel %vm674_vm3, %v1876_v55, 0.0 }
 0x13c   :  { %672 = vst.msk [vmem:[%s2191_s2 + $0xf8] sm:$0xf] %vm609_vm2, %v607_v37 }
 0x13d   :  { %v749_v60 = vadd.f32 %v748_v40, %v747_v28  ;;  %v946_v45 = vadd.f32 %v945_v30, %v944_v31  ;;  %v961_v28 = vsel %vm674_vm3, %v854_v17, 0.0  ;;  %v856_v31 = vmul.f32 %v1920_v20, %v1920_v20 }
 0x13e   :  { %v864_v17 = vmul.f32 %v1766_v5, %v1766_v5 }
 0x13f   :  { %v948_v23 = vadd.f32 %v947_v36, %v946_v45  ;;  %v751_v42 = vadd.f32 %v750_v32, %v749_v60  ;;  %v766_v60 = vsel %vm674_vm3, %v1920_v20, 0.0  ;;  %v857_v45 = vmul.f32 %v1948_v63, %v1948_v63 }
 0x140   :  { %v965_v55 = vsel %vm674_vm3, %v856_v31, 0.0  ;;  %v859_v20 = vmul.f32 %v1595_v50, %v1595_v50  ;;  %v981_v56 = vsel %vm674_vm3, %v864_v17, 0.0  ;;  %v867_v31 = vmul.f32 %v1878_v38, %v1878_v38 }
 0x141   :  { %v753_v46 = vadd.f32 %v752_v49, %v751_v42  ;;  %v950_v29 = vadd.f32 %v949_v1, %v948_v23  ;;  %v2072_v10 = vpop.f32.mrf.mxu3  ;;  %v768_v23 = vsel %vm674_vm3, %v1948_v63, 0.0  ;;  %v770_v49 = vsel %vm674_vm3, %v1563_v41, 0.0 }
 0x142   :  { %v608_v27 = vpack.c.bf16 %v2072_v10, %v2072_v10  ;;  %v967_v47 = vsel %vm674_vm3, %v857_v45, 0.0  ;;  %v860_v63 = vmul.f32 %v1627_v59, %v1627_v59  ;;  %v774_v41 = vsel %vm674_vm3, %v1627_v59, 0.0 }
 0x143   :  { %v755_v12 = vadd.f32 %v754_v58, %v753_v46  ;;  %v952_v8 = vadd.f32 %v951_v52, %v950_v29  ;;  %v969_v52 = vsel %vm674_vm3, %v858_v34, 0.0  ;;  %v772_v58 = vsel %vm674_vm3, %v1595_v50, 0.0 }
 0x144   :  { %673 = vst.msk [vmem:[%s2191_s2 + $0xfc] sm:$0xf] %vm609_vm2, %v608_v27  ;;  %v776_v50 = vsel %vm674_vm3, %v1659_v4, 0.0  ;;  %v778_v59 = vsel %vm674_vm3, %v1687_v14, 0.0  ;;  %v865_v27 = vmul.f32 %v1794_v35, %v1794_v35  ;;  %v869_v34 = vmul.f32 %v1950_v22, %v1950_v22 }
 0x145   :  { %v757_v61 = vadd.f32 %v756_v3, %v755_v12  ;;  %v954_v0 = vadd.f32 %v953_v39, %v952_v8  ;;  %v971_v8 = vsel %vm674_vm3, %v859_v20, 0.0  ;;  %v861_v39 = vmul.f32 %v1659_v4, %v1659_v4 }
 0x146   :  { %v780_v4 = vsel %vm674_vm3, %v1705_v26, 0.0 }
 0x147   :  { %v759_v15 = vadd.f32 %v758_v13, %v757_v61  ;;  %v956_v24 = vadd.f32 %v955_v6, %v954_v0  ;;  %v973_v61 = vsel %vm674_vm3, %v860_v63, 0.0  ;;  %v862_v0 = vmul.f32 %v1687_v14, %v1687_v14 }
 0x148   :  { %v975_v7 = vsel %vm674_vm3, %v861_v39, 0.0  ;;  %v782_v14 = vsel %vm674_vm3, %v1766_v5, 0.0  ;;  %v786_v5 = vsel %vm674_vm3, %v1842_v18, 0.0  ;;  %v872_v63 = vmul.f32 %v2048_v48, %v2048_v48 }
 0x149   :  { %v761_v19 = vadd.f32 %v760_v25, %v759_v15  ;;  %v958_v2 = vadd.f32 %v957_v9, %v956_v24  ;;  %v863_v15 = vmul.f32 %v1705_v26, %v1705_v26  ;;  %v977_v25 = vsel %vm674_vm3, %v862_v0, 0.0 }
 0x14a   :  { %v784_v26 = vsel %vm674_vm3, %v1794_v35, 0.0  ;;  %v788_v35 = vsel %vm674_vm3, %v1878_v38, 0.0  ;;  %v792_v38 = vsel %vm674_vm3, %v1950_v22, 0.0  ;;  %v796_v22 = vsel %vm674_vm3, %v2016_v11, 0.0 }
 0x14b   :  { %v960_v57 = vadd.f32 %v959_v16, %v958_v2  ;;  %v763_v33 = vadd.f32 %v762_v44, %v761_v19  ;;  %v979_v2 = vsel %vm674_vm3, %v863_v15, 0.0 }
 0x14d   :  { %v962_v30 = vadd.f32 %v961_v28, %v960_v57  ;;  %v765_v40 = vadd.f32 %v764_v51, %v763_v33  ;;  %v866_v57 = vmul.f32 %v1842_v18, %v1842_v18  ;;  %v983_v51 = vsel %vm674_vm3, %v865_v27, 0.0 }
 0x14e   :  { %v790_v18 = vsel %vm674_vm3, %v1922_v21, 0.0 }
 0x14f   :  { %v964_v36 = vadd.f32 %v963_v53, %v962_v30  ;;  %v767_v32 = vadd.f32 %v766_v60, %v765_v40  ;;  %v985_v53 = vsel %vm674_vm3, %v866_v57, 0.0  ;;  %v868_v60 = vmul.f32 %v1922_v21, %v1922_v21 }
 0x150   :  { %v794_v21 = vsel %vm674_vm3, %v1992_v43, 0.0 }
 0x151   :  { %v966_v42 = vadd.f32 %v965_v55, %v964_v36  ;;  %v769_v1 = vadd.f32 %v768_v23, %v767_v32  ;;  %v987_v32 = vsel %vm674_vm3, %v867_v31, 0.0 }
 0x153   :  { %v771_v46 = vadd.f32 %v770_v49, %v769_v1  ;;  %v968_v29 = vadd.f32 %v967_v47, %v966_v42  ;;  %v989_v42 = vsel %vm674_vm3, %v868_v60, 0.0  ;;  %v870_v1 = vmul.f32 %v1992_v43, %v1992_v43 }
 0x154   :  { %v991_v47 = vsel %vm674_vm3, %v869_v34, 0.0  ;;  %v798_v43 = vsel %vm674_vm3, %v2048_v48, 0.0 }
 0x155   :  { %v773_v62 = vadd.f32 %v772_v58, %v771_v46  ;;  %v970_v12 = vadd.f32 %v969_v52, %v968_v29  ;;  %v871_v46 = vmul.f32 %v2016_v11, %v2016_v11  ;;  %v993_v58 = vsel %vm674_vm3, %v870_v1, 0.0 }
 0x156   :  { %v800_v11 = vsel %vm674_vm3, %v2072_v10, 0.0 }
 0x157   :  { %v775_v3 = vadd.f32 %v774_v41, %v773_v62  ;;  %v972_v54 = vadd.f32 %v971_v8, %v970_v12  ;;  %v995_v8 = vsel %vm674_vm3, %v871_v46, 0.0  ;;  %v873_v41 = vmul.f32 %v2072_v10, %v2072_v10 }
 0x159   :  { %v777_v6 = vadd.f32 %v776_v50, %v775_v3  ;;  %v974_v13 = vadd.f32 %v973_v61, %v972_v54  ;;  %v997_v54 = vsel %vm674_vm3, %v872_v63, 0.0  ;;  %v999_v0 = vsel %vm674_vm3, %v873_v41, 0.0 }
 0x15b   :  { %v779_v24 = vadd.f32 %v778_v59, %v777_v6  ;;  %v976_v9 = vadd.f32 %v975_v7, %v974_v13 }
 0x15d   :  { %v781_v37 = vadd.f32 %v780_v4, %v779_v24  ;;  %v978_v19 = vadd.f32 %v977_v25, %v976_v9 }
 0x15f   :  { %v980_v16 = vadd.f32 %v979_v2, %v978_v19  ;;  %v783_v44 = vadd.f32 %v782_v14, %v781_v37 }
 0x161   :  { %v785_v33 = vadd.f32 %v784_v26, %v783_v44  ;;  %v982_v28 = vadd.f32 %v981_v56, %v980_v16 }
 0x163   :  { %v787_v30 = vadd.f32 %v786_v5, %v785_v33  ;;  %v984_v40 = vadd.f32 %v983_v51, %v982_v28 }
 0x165   :  { %v789_v45 = vadd.f32 %v788_v35, %v787_v30  ;;  %v986_v36 = vadd.f32 %v985_v53, %v984_v40 }
 0x167   :  { %v791_v55 = vadd.f32 %v790_v18, %v789_v45  ;;  %v988_v23 = vadd.f32 %v987_v32, %v986_v36 }
 0x169   :  { %v793_v49 = vadd.f32 %v792_v38, %v791_v55  ;;  %v990_v20 = vadd.f32 %v989_v42, %v988_v23 }
 0x16b   :  { %v992_v29 = vadd.f32 %v991_v47, %v990_v20  ;;  %v795_v52 = vadd.f32 %v794_v21, %v793_v49 }
 0x16d   :  { %v994_v62 = vadd.f32 %v993_v58, %v992_v29  ;;  %v797_v12 = vadd.f32 %v796_v22, %v795_v52 }
 0x16f   :  { %v996_v39 = vadd.f32 %v995_v8, %v994_v62  ;;  %v799_v3 = vadd.f32 %v798_v43, %v797_v12 }
 0x171   :  { %v998_v61 = vadd.f32 %v997_v54, %v996_v39  ;;  %v801_v50 = vadd.f32 %v800_v11, %v799_v3 }
 0x173   :  { %v802_v6 = vrot.slane %v801_v50, 4  ;;  %v1000_v13 = vadd.f32 %v999_v0, %v998_v61 }
 0x175   :  { %v803_v7 = vadd.f32 %v802_v6, %v801_v50  ;;  %v1001_v59 = vrot.slane %v1000_v13, 4 }
 0x177   :  { %v804_v15 = vrot.slane %v803_v7, 2  ;;  %v1002_v48 = vadd.f32 %v1001_v59, %v1000_v13 }
 0x179   :  { %v805_v24 = vadd.f32 %v804_v15, %v803_v7  ;;  %v1003_v9 = vrot.slane %v1002_v48, 2 }
 0x17b   :  { %v806_v25 = vrot.slane %v805_v24, 1  ;;  %v1004_v4 = vadd.f32 %v1003_v9, %v1002_v48 }
 0x17d   :  { %v807_v17 = vadd.f32 %v806_v25, %v805_v24  ;;  %v1005_v37 = vrot.slane %v1004_v4, 1 }
 0x17f   :  { %809 = vst.msk [vmem:[%s2192_s3] sm:$0x1] %vm808_vm4, %v807_v17  ;;  %v1006_v10 = vadd.f32 %v1005_v37, %v1004_v4 }
 0x181   :  { %1007 = vst.msk [vmem:[%s2193_s4] sm:$0x1] %vm808_vm4, %v1006_v10 }

// kernel: tile.305
= control target key start
LH: loop header
LB: loop body
LE: loop exit
PB: predicated region body
PF: predicated region fallthrough
CT: control target
= control target key end

     0   :  { %s40_s0 = inlined_call_operand.vmem [shape: f32[16], index: 0, kind: input, shape index: {}]   ;;  %s41_s1 = inlined_call_operand.vmem [shape: f32[32,16], index: 1, kind: output, shape index: {}]  }
   0x1   :  { %v4_v0 = vld [vmem:[%s40_s0] ss:$0 sm:$0xff] }
   0x2   :  { %5 = vst [vmem:[%s41_s1] sm:$0xff] %v4_v0 }
   0x3   :  { %12 = vst [vmem:[%s41_s1 + $0x8] sm:$0xff] %v4_v0 }
   0x4   :  { %13 = vst [vmem:[%s41_s1 + $0x10] sm:$0xff] %v4_v0 }
   0x5   :  { %14 = vst [vmem:[%s41_s1 + $0x18] sm:$0xff] %v4_v0 }

// kernel: tile.306
= control target key start
LH: loop header
LB: loop body
LE: loop exit
PB: predicated region body
PF: predicated region fallthrough
CT: control target
= control target key end

     0   :  { %s88_s8 = smov 112   ;;  %s89_s11 = smov 80   ;;  %vm3_vm0 = vcmask 130048   ;;  %vm9_vm1 = vcmask 1048448   ;;  %vm15_vm2 = vcmask 917248   ;;  %vm21_vm3 = vcmask 786048   ;;  %s141_s0 = inlined_call_operand.vmem [shape: f32[32,16], index: 0, kind: input, shape index: {}]   ;;  %s142_s1 = inlined_call_operand.vmem [shape: f32[1,512], index: 1, kind: output, shape index: {}]  }
   0x1   :  { %v71_v0 = vld [vmem:[%s141_s0 + $0x7] ss:$8 sm:$0xf]   ;;  %v73_v1 = vld [vmem:[%s141_s0 + $0x5] ss:$8 sm:$0xf]  }
   0x2   :  { %7 = vrot.lane.b32.xlu0 %v71_v0, %s88_s8  ;;  %19 = vrot.lane.b32.xlu1 %v73_v1, %s89_s11  ;;  %v75_v2 = vld [vmem:[%s141_s0 + $0x3] ss:$8 sm:$0xf]   ;;  %s90_s14 = smov 48   ;;  %s91_s19 = smov 96   ;;  %vm27_vm4 = vcmask 654848  }
   0x3   :  { %31 = vrot.lane.b32.xlu2 %v75_v2, %s90_s14  ;;  %v72_v3 = vld [vmem:[%s141_s0 + $0x6] ss:$8 sm:$0xf]   ;;  %v74_v4 = vld [vmem:[%s141_s0 + $0x4] ss:$8 sm:$0xf]  }
   0x4   :  { %s92_s20 = smov 64   ;;  %v76_v5 = vld [vmem:[%s141_s0 + $0x2] ss:$8 sm:$0xf]   ;;  %s93_s23 = smov 32   ;;  %vm33_vm5 = vcmask 523648  }
   0x5   :  { %v77_v6 = vld [vmem:[%s141_s0 + $0x1] ss:$8 sm:$0xf]   ;;  %s94_s26 = smov 16   ;;  %vm39_vm6 = vcmask 392448   ;;  %vm45_vm7 = vcmask 261248  }
   0x6   :  { %v2_v7 = vld [vmem:[%s141_s0] ss:$8 sm:$0xf]  }
   0x7   :  { %4 = vst.msk [vmem:[#allocation0] ss:$8 sm:$0xf] %vm3_vm0, %v2_v7  }
   0xa   :  { %13 = vrot.lane.b32.xlu0 %v72_v3, %s91_s19  ;;  %25 = vrot.lane.b32.xlu1 %v74_v4, %s92_s20 }
   0xb   :  { %37 = vrot.lane.b32.xlu2 %v76_v5, %s93_s23 }
  0x12   :  { %43 = vrot.lane.b32.xlu0 %v77_v6, %s94_s26 }
  0x5d   :  { %v32_v8 = vpop.permute.xlu2 %31  }
  0x65   :  { %v38_v9 = vpop.permute.xlu2 %37  }
  0x74   :  { %v8_v10 = vpop.permute.xlu0 %7   ;;  %v20_v11 = vpop.permute.xlu1 %19  }
  0x75   :  { %10 = vst.msk [vmem:[#allocation0] ss:$8 sm:$0xf] %vm9_vm1, %v8_v10  }
  0x7c   :  { %v14_v12 = vpop.permute.xlu0 %13   ;;  %v26_v13 = vpop.permute.xlu1 %25  }
  0x7d   :  { %16 = vst.msk [vmem:[#allocation0] ss:$8 sm:$0xf] %vm15_vm2, %v14_v12  }
  0x7e   :  { %22 = vst.msk [vmem:[#allocation0] ss:$8 sm:$0xf] %vm21_vm3, %v20_v11  }
  0x7f   :  { %28 = vst.msk [vmem:[#allocation0] ss:$8 sm:$0xf] %vm27_vm4, %v26_v13  }
  0x80   :  { %34 = vst.msk [vmem:[#allocation0] ss:$8 sm:$0xf] %vm33_vm5, %v32_v8  }
  0x81   :  { %40 = vst.msk [vmem:[#allocation0] ss:$8 sm:$0xf] %vm39_vm6, %v38_v9  }
  0x84   :  { %v44_v14 = vpop.permute.xlu0 %43  }
  0x85   :  { %46 = vst.msk [vmem:[#allocation0] ss:$8 sm:$0xf] %vm45_vm7, %v44_v14  }
  0x8c   :  { %v49_v15 = vld [vmem:[#allocation0] sm:$0x1]  ;;  %v54_v16 = vld [vmem:[#allocation0 + $0x8] sm:$0x1]  ;;  %v60_v17 = vld [vmem:[#allocation0 + $0x10] sm:$0x1] }
  0x8d   :  { %52 = vst [vmem:[%s142_s1] sm:$0x1] %v49_v15  ;;  %v66_v18 = vld [vmem:[#allocation0 + $0x18] sm:$0x1] }
  0x8e   :  { %78 = vst [vmem:[%s142_s1 + $0x1] sm:$0x1] %v54_v16 }
  0x8f   :  { %79 = vst [vmem:[%s142_s1 + $0x2] sm:$0x1] %v60_v17 }
  0x90   :  { %80 = vst [vmem:[%s142_s1 + $0x3] sm:$0x1] %v66_v18 }

// kernel: resnet_ae_forward.75
= control target key start
LH: loop header
LB: loop body
LE: loop exit
PB: predicated region body
PF: predicated region fallthrough
CT: control target
= control target key end

     0   :  { %vm87_vm0 = vcmask 261120   ;;  %vm177_vm1 = vcmask 125952   ;;  %vm194_vm2 = vcmask 130048   ;;  %vm232_vm3 = vcmask 122880   ;;  %s564_s1 = inlined_call_operand.vmem [shape: bf16[32,16], index: 1, kind: input, shape index: {}]   ;;  %s565_s0 = inlined_call_operand.vmem [shape: bf16[128,32], index: 0, kind: input, shape index: {}]   ;;  %s566_s2 = inlined_call_operand.vmem [shape: bf16[128,16], index: 2, kind: output, shape index: {0}]   ;;  %s567_s3 = inlined_call_operand.vmem [shape: f32[1,1,16], index: 3, kind: output, shape index: {1}]   ;;  %s568_s4 = inlined_call_operand.vmem [shape: f32[1,1,16], index: 4, kind: output, shape index: {2}]  }
   0x1   :  { %v357_v0 = vld [vmem:[%s564_s1 + $0x8] sm:$0xff]  ;;  %v356_v1 = vld [vmem:[%s564_s1] sm:$0xff]  ;;  %v350_v3 = vld [vmem:[%s565_s0 + $0x10] sm:$0xff] }
   0x2   :  { %118 = vmatpush.bf16.msra.mxu0 %v357_v0  ;;  %358 = vmatpush.bf16.msra.mxu1 %v357_v0  ;;  %v348_v2 = vld [vmem:[%s565_s0] sm:$0xff]  ;;  %v354_v5 = vld [vmem:[%s565_s0 + $0x30] sm:$0xff]  ;;  %v349_v6 = vld [vmem:[%s565_s0 + $0x8] sm:$0xff] }
   0x3   :  { %359 = vmatpush.bf16.msra.mxu2 %v357_v0  ;;  %360 = vmatpush.bf16.msra.mxu3 %v357_v0  ;;  %v352_v4 = vld [vmem:[%s565_s0 + $0x20] sm:$0xff]  ;;  %v351_v7 = vld [vmem:[%s565_s0 + $0x18] sm:$0xff]  ;;  %v353_v8 = vld [vmem:[%s565_s0 + $0x28] sm:$0xff] }
   0x4   :  { %v355_v9 = vld [vmem:[%s565_s0 + $0x38] sm:$0xff] }
   0x6   :  { %119 = vmatpush.bf16.msra.mxu0 %v356_v1  ;;  %361 = vmatpush.bf16.msra.mxu1 %v356_v1 }
   0x7   :  { %362 = vmatpush.bf16.msra.mxu2 %v356_v1  ;;  %363 = vmatpush.bf16.msra.mxu3 %v356_v1 }
   0x9   :  { %340 = vmatmul.msk.bf16.vlgmr.msra.gmra.mxu0 %vm87_vm0, %v348_v2  ;;  %342 = vmatmul.msk.bf16.vlgmr.msra.gmra.mxu1 %vm87_vm0, %v350_v3 }
   0xa   :  { %344 = vmatmul.msk.bf16.vlgmr.msra.gmra.mxu2 %vm87_vm0, %v352_v4  ;;  %346 = vmatmul.msk.bf16.vlgmr.msra.gmra.mxu3 %vm87_vm0, %v354_v5 }
  0x19   :  { %341 = vmatmul.msk.bf16.gmra.mxu0 %vm87_vm0, %v349_v6  ;;  %343 = vmatmul.msk.bf16.gmra.mxu1 %vm87_vm0, %v351_v7 }
  0x1a   :  { %345 = vmatmul.msk.bf16.gmra.mxu2 %vm87_vm0, %v353_v8  ;;  %347 = vmatmul.msk.bf16.gmra.mxu3 %vm87_vm0, %v355_v9 }
  0x86   :  { %v121_v10 = vpop.f32.mrf.mxu0  ;;  %v131_v11 = vpop.f32.mrf.mxu1 }
  0x87   :  { %v161_v12 = vpack.c.bf16 %v121_v10, %v121_v10  ;;  %v165_v13 = vpack.c.bf16 %v131_v11, %v131_v11  ;;  %v234_v31 = vmul.f32 %v121_v10, %v121_v10  ;;  %v195_v34 = vsel %vm194_vm2, %v121_v10, 0.0 }
  0x88   :  { %v238_v39 = vmul.f32 %v131_v11, %v131_v11  ;;  %v202_v55 = vsel %vm194_vm2, %v131_v11, 0.0 }
  0x89   :  { %178 = vst.msk [vmem:[%s566_s2] sm:$0xf] %vm177_vm1, %v161_v12  ;;  %v250_v38 = vsel %vm194_vm2, %v234_v31, 0.0 }
  0x8a   :  { %182 = vst.msk [vmem:[%s566_s2 + $0x10] sm:$0xf] %vm177_vm1, %v165_v13  ;;  %v257_v60 = vsel %vm194_vm2, %v238_v39, 0.0 }
  0x8d   :  { %v435_v14 = vpop.f32.mrf.mxu2  ;;  %v437_v15 = vpop.f32.mrf.mxu3 }
  0x8e   :  { %v123_v16 = vpop.f32.mrf.mxu0  ;;  %v133_v17 = vpop.f32.mrf.mxu1  ;;  %v169_v18 = vpack.c.bf16 %v435_v14, %v435_v14  ;;  %v173_v21 = vpack.c.bf16 %v437_v15, %v437_v15  ;;  %v242_v9 = vmul.f32 %v435_v14, %v435_v14 }
  0x8f   :  { %v162_v19 = vpack.c.bf16 %v123_v16, %v123_v16  ;;  %v166_v20 = vpack.c.bf16 %v133_v17, %v133_v17  ;;  %v235_v27 = vmul.f32 %v123_v16, %v123_v16  ;;  %v196_v32 = vsel %vm194_vm2, %v123_v16, 0.0 }
  0x90   :  { %186 = vst.msk [vmem:[%s566_s2 + $0x20] sm:$0xf] %vm177_vm1, %v169_v18  ;;  %v197_v37 = vadd.f32 %v196_v32, %v195_v34  ;;  %v239_v56 = vmul.f32 %v133_v17, %v133_v17  ;;  %v204_v61 = vsel %vm194_vm2, %v133_v17, 0.0  ;;  %v210_v17 = vsel %vm194_vm2, %v435_v14, 0.0 }
  0x91   :  { %179 = vst.msk [vmem:[%s566_s2 + $0x4] sm:$0xf] %vm177_vm1, %v162_v19  ;;  %v251_v35 = vsel %vm194_vm2, %v235_v27, 0.0 }
  0x92   :  { %183 = vst.msk [vmem:[%s566_s2 + $0x14] sm:$0xf] %vm177_vm1, %v166_v20  ;;  %v252_v43 = vadd.f32 %v251_v35, %v250_v38  ;;  %v259_v1 = vsel %vm194_vm2, %v239_v56, 0.0 }
  0x93   :  { %190 = vst.msk [vmem:[%s566_s2 + $0x30] sm:$0xf] %vm177_vm1, %v173_v21 }
  0x95   :  { %v459_v22 = vpop.f32.mrf.mxu2  ;;  %v461_v23 = vpop.f32.mrf.mxu3 }
  0x96   :  { %v126_v24 = vpop.f32.mrf.mxu0  ;;  %v136_v25 = vpop.f32.mrf.mxu1  ;;  %v170_v26 = vpack.c.bf16 %v459_v22, %v459_v22  ;;  %v174_v30 = vpack.c.bf16 %v461_v23, %v461_v23  ;;  %v243_v18 = vmul.f32 %v459_v22, %v459_v22  ;;  %v247_v38 = vmul.f32 %v461_v23, %v461_v23 }
  0x97   :  { %v163_v28 = vpack.c.bf16 %v126_v24, %v126_v24  ;;  %v167_v29 = vpack.c.bf16 %v136_v25, %v136_v25  ;;  %v236_v33 = vmul.f32 %v126_v24, %v126_v24  ;;  %v198_v36 = vsel %vm194_vm2, %v126_v24, 0.0 }
  0x98   :  { %187 = vst.msk [vmem:[%s566_s2 + $0x24] sm:$0xf] %vm177_vm1, %v170_v26  ;;  %v199_v44 = vadd.f32 %v198_v36, %v197_v37  ;;  %v240_v62 = vmul.f32 %v136_v25, %v136_v25  ;;  %v206_v2 = vsel %vm194_vm2, %v136_v25, 0.0  ;;  %v265_v24 = vsel %vm194_vm2, %v242_v9, 0.0 }
  0x99   :  { %180 = vst.msk [vmem:[%s566_s2 + $0x8] sm:$0xf] %vm177_vm1, %v163_v28  ;;  %v253_v40 = vsel %vm194_vm2, %v236_v33, 0.0  ;;  %v212_v25 = vsel %vm194_vm2, %v459_v22, 0.0  ;;  %v267_v28 = vsel %vm194_vm2, %v243_v18, 0.0  ;;  %v246_v33 = vmul.f32 %v437_v15, %v437_v15 }
  0x9a   :  { %184 = vst.msk [vmem:[%s566_s2 + $0x18] sm:$0xf] %vm177_vm1, %v167_v29  ;;  %v254_v53 = vadd.f32 %v253_v40, %v252_v43  ;;  %v261_v10 = vsel %vm194_vm2, %v240_v62, 0.0  ;;  %v218_v22 = vsel %vm194_vm2, %v437_v15, 0.0 }
  0x9b   :  { %191 = vst.msk [vmem:[%s566_s2 + $0x34] sm:$0xf] %vm177_vm1, %v174_v30  ;;  %v273_v43 = vsel %vm194_vm2, %v246_v33, 0.0 }
  0x9d   :  { %v146_v41 = vpop.f32.mrf.mxu2  ;;  %v489_v42 = vpop.f32.mrf.mxu3 }
  0x9e   :  { %v128_v45 = vpop.f32.mrf.mxu0  ;;  %v138_v46 = vpop.f32.mrf.mxu1  ;;  %v171_v47 = vpack.c.bf16 %v146_v41, %v146_v41  ;;  %v175_v48 = vpack.c.bf16 %v489_v42, %v489_v42  ;;  %v244_v26 = vmul.f32 %v146_v41, %v146_v41  ;;  %v214_v29 = vsel %vm194_vm2, %v146_v41, 0.0 }
  0x9f   :  { %v164_v49 = vpack.c.bf16 %v128_v45, %v128_v45  ;;  %v200_v50 = vsel %vm194_vm2, %v128_v45, 0.0  ;;  %v237_v51 = vmul.f32 %v128_v45, %v128_v45  ;;  %v168_v52 = vpack.c.bf16 %v138_v46, %v138_v46 }
  0xa0   :  { %v201_v54 = vadd.f32 %v200_v50, %v199_v44  ;;  %188 = vst.msk [vmem:[%s566_s2 + $0x28] sm:$0xf] %vm177_vm1, %v171_v47  ;;  %v241_v3 = vmul.f32 %v138_v46, %v138_v46  ;;  %v208_v11 = vsel %vm194_vm2, %v138_v46, 0.0  ;;  %v269_v34 = vsel %vm194_vm2, %v244_v26, 0.0 }
  0xa1   :  { %181 = vst.msk [vmem:[%s566_s2 + $0xc] sm:$0xf] %vm177_vm1, %v164_v49  ;;  %v255_v57 = vsel %vm194_vm2, %v237_v51, 0.0  ;;  %v220_v44 = vsel %vm194_vm2, %v461_v23, 0.0  ;;  %v248_v45 = vmul.f32 %v489_v42, %v489_v42  ;;  %v222_v15 = vsel %vm194_vm2, %v489_v42, 0.0 }
  0xa2   :  { %v203_v58 = vadd.f32 %v202_v55, %v201_v54  ;;  %v256_v59 = vadd.f32 %v255_v57, %v254_v53  ;;  %185 = vst.msk [vmem:[%s566_s2 + $0x1c] sm:$0xf] %vm177_vm1, %v168_v52  ;;  %v263_v19 = vsel %vm194_vm2, %v241_v3, 0.0 }
  0xa3   :  { %192 = vst.msk [vmem:[%s566_s2 + $0x38] sm:$0xf] %vm177_vm1, %v175_v48  ;;  %v275_v48 = vsel %vm194_vm2, %v247_v38, 0.0  ;;  %v277_v52 = vsel %vm194_vm2, %v248_v45, 0.0 }
  0xa4   :  { %v258_v63 = vadd.f32 %v257_v60, %v256_v59  ;;  %v205_v0 = vadd.f32 %v204_v61, %v203_v58 }
  0xa5   :  { %v148_v4 = vpop.f32.mrf.mxu2  ;;  %v158_v5 = vpop.f32.mrf.mxu3 }
  0xa6   :  { %v207_v6 = vadd.f32 %v206_v2, %v205_v0  ;;  %v260_v7 = vadd.f32 %v259_v1, %v258_v63  ;;  %v172_v8 = vpack.c.bf16 %v148_v4, %v148_v4  ;;  %v176_v12 = vpack.c.bf16 %v158_v5, %v158_v5 }
  0xa7   :  { %v245_v30 = vmul.f32 %v148_v4, %v148_v4  ;;  %v216_v35 = vsel %vm194_vm2, %v148_v4, 0.0  ;;  %v249_v49 = vmul.f32 %v158_v5, %v158_v5  ;;  %v224_v53 = vsel %vm194_vm2, %v158_v5, 0.0 }
  0xa8   :  { %v209_v13 = vadd.f32 %v208_v11, %v207_v6  ;;  %v262_v16 = vadd.f32 %v261_v10, %v260_v7  ;;  %189 = vst.msk [vmem:[%s566_s2 + $0x2c] sm:$0xf] %vm177_vm1, %v172_v8 }
  0xa9   :  { %193 = vst.msk [vmem:[%s566_s2 + $0x3c] sm:$0xf] %vm177_vm1, %v176_v12  ;;  %v271_v39 = vsel %vm194_vm2, %v245_v30, 0.0  ;;  %v279_v23 = vsel %vm194_vm2, %v249_v49, 0.0 }
  0xaa   :  { %v211_v20 = vadd.f32 %v210_v17, %v209_v13  ;;  %v264_v21 = vadd.f32 %v263_v19, %v262_v16 }
  0xac   :  { %v266_v27 = vadd.f32 %v265_v24, %v264_v21  ;;  %v213_v14 = vadd.f32 %v212_v25, %v211_v20 }
  0xae   :  { %v215_v31 = vadd.f32 %v214_v29, %v213_v14  ;;  %v268_v32 = vadd.f32 %v267_v28, %v266_v27 }
  0xb0   :  { %v270_v36 = vadd.f32 %v269_v34, %v268_v32  ;;  %v217_v37 = vadd.f32 %v216_v35, %v215_v31 }
  0xb2   :  { %v219_v40 = vadd.f32 %v218_v22, %v217_v37  ;;  %v272_v41 = vadd.f32 %v271_v39, %v270_v36 }
  0xb4   :  { %v274_v46 = vadd.f32 %v273_v43, %v272_v41  ;;  %v221_v47 = vadd.f32 %v220_v44, %v219_v40 }
  0xb6   :  { %v223_v50 = vadd.f32 %v222_v15, %v221_v47  ;;  %v276_v51 = vadd.f32 %v275_v48, %v274_v46 }
  0xb8   :  { %v278_v54 = vadd.f32 %v277_v52, %v276_v51  ;;  %v225_v55 = vadd.f32 %v224_v53, %v223_v50 }
  0xba   :  { %v226_v56 = vrot.slane %v225_v55, 4  ;;  %v280_v57 = vadd.f32 %v279_v23, %v278_v54 }
  0xbc   :  { %v227_v58 = vadd.f32 %v226_v56, %v225_v55  ;;  %v281_v59 = vrot.slane %v280_v57, 4 }
  0xbe   :  { %v228_v60 = vrot.slane %v227_v58, 2  ;;  %v282_v61 = vadd.f32 %v281_v59, %v280_v57 }
  0xc0   :  { %v229_v62 = vadd.f32 %v228_v60, %v227_v58  ;;  %v283_v63 = vrot.slane %v282_v61, 2 }
  0xc2   :  { %v230_v42 = vrot.slane %v229_v62, 1  ;;  %v284_v0 = vadd.f32 %v283_v63, %v282_v61 }
  0xc4   :  { %v231_v1 = vadd.f32 %v230_v42, %v229_v62  ;;  %v285_v2 = vrot.slane %v284_v0, 1 }
  0xc6   :  { %233 = vst.msk [vmem:[%s567_s3] sm:$0x1] %vm232_vm3, %v231_v1  ;;  %v286_v3 = vadd.f32 %v285_v2, %v284_v0 }
  0xc8   :  { %287 = vst.msk [vmem:[%s568_s4] sm:$0x1] %vm232_vm3, %v286_v3 }

// kernel: resnet_ae_forward.76
= control target key start
LH: loop header
LB: loop body
LE: loop exit
PB: predicated region body
PF: predicated region fallthrough
CT: control target
= control target key end

     0   :  { %vm25_vm0 = vcmask 1043456   ;;  %vm68_vm1 = vcmask 1041408   ;;  %vm72_vm2 = vcmask 1045508   ;;  %s120_s0 = inlined_call_operand.vmem [shape: bf16[4,512], index: 0, kind: input, shape index: {}]   ;;  %s121_s1 = inlined_call_operand.vmem [shape: f32[1,512], index: 1, kind: input, shape index: {}]   ;;  %s122_s2 = inlined_call_operand.vmem [shape: f32[1,512], index: 2, kind: input, shape index: {}]   ;;  %s123_s3 = inlined_call_operand.vmem [shape: bf16[4,512], index: 3, kind: output, shape index: {}]  }
   0x1   :  { %v14_v0 = vld [vmem:[%s120_s0] sm:$0xff] }
   0x2   :  { %v17_v1 = vld [vmem:[%s121_s1] sm:$0xf]  ;;  %v15_v3 = vunpack.c.l.bf16 %v14_v0  ;;  %v16_v11 = vunpack.c.h.bf16 %v14_v0 }
   0x3   :  { %v32_v2 = vld [vmem:[%s122_s2] sm:$0xf]  ;;  %v19_v4 = vperm.slane %v17_v1, 0  ;;  %v20_v5 = vperm.slane %v17_v1, 1  ;;  %v21_v8 = vperm.slane %v17_v1, 2  ;;  %v22_v9 = vperm.slane %v17_v1, 3 }
   0x4   :  { %v34_v6 = vperm.slane %v32_v2, 0  ;;  %v35_v7 = vperm.slane %v32_v2, 1  ;;  %v36_v12 = vperm.slane %v32_v2, 2  ;;  %v37_v13 = vperm.slane %v32_v2, 3 }
   0x5   :  { %v23_v10 = vrot.slane %v20_v5, 4  ;;  %v24_v15 = vrot.slane %v22_v9, 4 }
   0x6   :  { %v38_v14 = vrot.slane %v35_v7, 4  ;;  %v39_v17 = vrot.slane %v37_v13, 4 }
   0x7   :  { %v26_v16 = vsel %vm25_vm0, %v19_v4, %v23_v10  ;;  %v27_v20 = vsel %vm25_vm0, %v21_v8, %v24_v15 }
   0x8   :  { %v30_v18 = vmul.f32 %v26_v16, %v15_v3  ;;  %v40_v19 = vsel %vm25_vm0, %v34_v6, %v38_v14  ;;  %v31_v21 = vmul.f32 %v27_v20, %v16_v11  ;;  %v41_v22 = vsel %vm25_vm0, %v36_v12, %v39_v17 }
   0xa   :  { %v44_v23 = vadd.f32 %v40_v19, %v30_v18  ;;  %v45_v24 = vadd.f32 %v41_v22, %v31_v21 }
   0xc   :  { %v46_v25 = vmax.f32 %v44_v23, 0.0  ;;  %v47_v26 = vmax.f32 %v45_v24, 0.0 }
   0xe   :  { %50 = vst [vmem:[#allocation1] ss:$2 sm:$0xff] %v46_v25 }
   0xf   :  { %52 = vst [vmem:[#allocation1 + $0x10] ss:$2 sm:$0xff] %v47_v26 }
  0x15   :  { %v53_v27 = vld.sshfl [vmem:[#allocation1] sm:$0xff pattern:$0x75316420]  ;;  %v54_v28 = vld.sshfl [vmem:[#allocation1 + $0x8] sm:$0xff pattern:$0x75316420] }
  0x16   :  { %v55_v29 = vld.sshfl [vmem:[#allocation1 + $0x10] sm:$0xff pattern:$0x75316420]  ;;  %v56_v30 = vld.sshfl [vmem:[#allocation1 + $0x18] sm:$0xff pattern:$0x75316420]  ;;  %v61_v31 = vpack.c.bf16 %v54_v28, %v53_v27 }
  0x17   :  { %v62_v32 = vpack.c.bf16 %v56_v30, %v55_v29 }
  0x18   :  { %v65_v33 = vrot.slane %v61_v31, 2 }
  0x19   :  { %v66_v34 = vrot.slane %v62_v32, 4  ;;  %v67_v35 = vrot.slane %v62_v32, 6 }
  0x1a   :  { %v71_v36 = vsel %vm68_vm1, %v61_v31, %v65_v33 }
  0x1b   :  { %v75_v37 = vsel %vm72_vm2, %v66_v34, %v67_v35 }
  0x1c   :  { %v76_v38 = vsel %vm25_vm0, %v71_v36, %v75_v37 }
  0x1d   :  { %78 = vst [vmem:[%s123_s3] sm:$0xff] %v76_v38 }

// kernel: resnet_ae_forward.77
= control target key start
LH: loop header
LB: loop body
LE: loop exit
PB: predicated region body
PF: predicated region fallthrough
CT: control target
= control target key end

     0   :  { %vm187_vm0 = vcmask 130048   ;;  %vm342_vm1 = vcmask 125952   ;;  %s646_s1 = inlined_call_operand.vmem [shape: bf16[144,16], index: 1, kind: input, shape index: {}]   ;;  %s647_s0 = inlined_call_operand.vmem [shape: bf16[128,144], index: 0, kind: input, shape index: {}]   ;;  %s648_s2 = inlined_call_operand.vmem [shape: f32[1,16], index: 2, kind: input, shape index: {}]   ;;  %s649_s3 = inlined_call_operand.vmem [shape: bf16[128,16], index: 3, kind: output, shape index: {}]  }
   0x1   :  { %v414_v0 = vld [vmem:[%s646_s1 + $0x38] sm:$0xff]  ;;  %v415_v1 = vld [vmem:[%s646_s1 + $0x40] sm:$0xff]  ;;  %v16_v3 = vld [vmem:[%s647_s0 + $0x8] sm:$0xff] }
   0x2   :  { %v15_v2 = vld [vmem:[%s647_s0] sm:$0xff]  ;;  %212 = vmatpush.bf16.msra.mxu0 %v414_v0  ;;  %416 = vmatpush.bf16.msra.mxu2 %v414_v0  ;;  %v413_v4 = vld [vmem:[%s646_s1 + $0x30] sm:$0xff]  ;;  %v34_v6 = vunpack.c.h.bf16 %v16_v3  ;;  %v412_v11 = vld [vmem:[%s646_s1 + $0x28] sm:$0xff]  ;;  %v33_v31 = vunpack.c.l.bf16 %v16_v3 }
   0x3   :  { %v32_v5 = vunpack.c.h.bf16 %v15_v2  ;;  %268 = vmatpush.bf16.msra.mxu1 %v415_v1  ;;  %424 = vmatpush.bf16.msra.mxu3 %v415_v1  ;;  %v464_v9 = vld [vmem:[%s647_s0 + $0x50] sm:$0xff]  ;;  %v472_v12 = vld [vmem:[%s647_s0 + $0x58] sm:$0xff]  ;;  %v411_v17 = vld [vmem:[%s646_s1 + $0x20] sm:$0xff]  ;;  %v31_v30 = vunpack.c.l.bf16 %v15_v2 }
   0x4   :  { %v66_v8 = vmax.f32 %v34_v6, 0.0  ;;  %v52_v13 = vunpack.c.h.bf16 %v464_v9  ;;  %v479_v14 = vld [vmem:[%s647_s0 + $0x10] sm:$0xff]  ;;  %v484_v15 = vld [vmem:[%s647_s0 + $0x18] sm:$0xff]  ;;  %v54_v16 = vunpack.c.h.bf16 %v472_v12  ;;  %v502_v27 = vld [vmem:[%s647_s0 + $0x40] sm:$0xff]  ;;  %v65_v42 = vmax.f32 %v33_v31, 0.0 }
   0x5   :  { %v64_v7 = vmax.f32 %v32_v5, 0.0  ;;  %v36_v20 = vunpack.c.h.bf16 %v479_v14  ;;  %v38_v21 = vunpack.c.h.bf16 %v484_v15  ;;  %v410_v23 = vld [vmem:[%s646_s1 + $0x18] sm:$0xff]  ;;  %v409_v26 = vld [vmem:[%s646_s1 + $0x10] sm:$0xff]  ;;  %v507_v28 = vld [vmem:[%s647_s0 + $0x48] sm:$0xff]  ;;  %v47_v32 = vunpack.c.l.bf16 %v502_v27 }
   0x6   :  { %213 = vmatpush.bf16.msra.mxu0 %v413_v4  ;;  %417 = vmatpush.bf16.msra.mxu2 %v413_v4  ;;  %v84_v18 = vmax.f32 %v52_v13, 0.0  ;;  %v86_v19 = vmax.f32 %v54_v16, 0.0  ;;  %v49_v33 = vunpack.c.l.bf16 %v507_v28  ;;  %v514_v34 = vld [vmem:[%s647_s0 + $0x60] sm:$0xff]  ;;  %v519_v35 = vld [vmem:[%s647_s0 + $0x68] sm:$0xff]  ;;  %v63_v41 = vmax.f32 %v31_v30, 0.0  ;;  %v29_v60 = vld [vmem:[%s647_s0 + $0x70] sm:$0xff] }
   0x7   :  { %v96_v10 = vpack.c.bf16 %v66_v8, %v64_v7  ;;  %v68_v24 = vmax.f32 %v36_v20, 0.0  ;;  %v70_v25 = vmax.f32 %v38_v21, 0.0  ;;  %v408_v36 = vld [vmem:[%s646_s1 + $0x8] sm:$0xff]  ;;  %v56_v37 = vunpack.c.h.bf16 %v514_v34  ;;  %v19_v45 = vld [vmem:[%s647_s0 + $0x20] sm:$0xff]  ;;  %v30_v61 = vld [vmem:[%s647_s0 + $0x78] sm:$0xff] }
   0x8   :  { %v106_v22 = vpack.c.bf16 %v86_v19, %v84_v18  ;;  %v58_v38 = vunpack.c.h.bf16 %v519_v35  ;;  %v79_v43 = vmax.f32 %v47_v32, 0.0  ;;  %v81_v44 = vmax.f32 %v49_v33, 0.0  ;;  %v20_v46 = vld [vmem:[%s647_s0 + $0x28] sm:$0xff]  ;;  %v407_v47 = vld [vmem:[%s646_s1] sm:$0xff]  ;;  %v21_v6 = vld [vmem:[%s647_s0 + $0x30] sm:$0xff] }
   0x9   :  { %399 = vmatmul.msk.bf16.vlgmr.msra.gmra.mxu1 %vm187_vm0, %v96_v10  ;;  %v98_v29 = vpack.c.bf16 %v70_v25, %v68_v24  ;;  %v88_v39 = vmax.f32 %v56_v37, 0.0  ;;  %v40_v49 = vunpack.c.h.bf16 %v19_v45  ;;  %v42_v50 = vunpack.c.h.bf16 %v20_v46  ;;  %v22_v7 = vld [vmem:[%s647_s0 + $0x38] sm:$0xff] }
   0xa   :  { %214 = vmatpush.bf16.msra.mxu0 %v412_v11  ;;  %418 = vmatpush.bf16.msra.mxu2 %v412_v11  ;;  %v90_v40 = vmax.f32 %v58_v38, 0.0  ;;  %v95_v51 = vpack.c.bf16 %v65_v42, %v63_v41  ;;  %v103_v52 = vpack.c.bf16 %v81_v44, %v79_v43  ;;  %v35_v56 = vunpack.c.l.bf16 %v479_v14  ;;  %v564_v44 = vld [vmem:[%s648_s2] ss:$0 sm:$0xff] }
   0xb   :  { %404 = vmatmul.msk.bf16.vlgmr.msra.gmra.mxu3 %vm187_vm0, %v106_v22  ;;  %v72_v53 = vmax.f32 %v40_v49, 0.0  ;;  %v74_v54 = vmax.f32 %v42_v50, 0.0  ;;  %v37_v57 = vunpack.c.l.bf16 %v484_v15  ;;  %v51_v58 = vunpack.c.l.bf16 %v464_v9 }
   0xc   :  { %v108_v48 = vpack.c.bf16 %v90_v40, %v88_v39  ;;  %v53_v59 = vunpack.c.l.bf16 %v472_v12  ;;  %v60_v62 = vunpack.c.h.bf16 %v29_v60  ;;  %v62_v63 = vunpack.c.h.bf16 %v30_v61 }
   0xd   :  { %v100_v55 = vpack.c.bf16 %v74_v54, %v72_v53  ;;  %v67_v2 = vmax.f32 %v35_v56, 0.0  ;;  %v69_v3 = vmax.f32 %v37_v57, 0.0  ;;  %v83_v4 = vmax.f32 %v51_v58, 0.0 }
   0xe   :  { %215 = vmatpush.bf16.msra.mxu0 %v411_v17  ;;  %419 = vmatpush.bf16.msra.mxu2 %v411_v17  ;;  %v92_v0 = vmax.f32 %v60_v62, 0.0  ;;  %v94_v1 = vmax.f32 %v62_v63, 0.0  ;;  %v85_v5 = vmax.f32 %v53_v59, 0.0  ;;  %v44_v9 = vunpack.c.h.bf16 %v21_v6 }
   0xf   :  { %v46_v10 = vunpack.c.h.bf16 %v22_v7  ;;  %v97_v11 = vpack.c.bf16 %v69_v3, %v67_v2  ;;  %v39_v16 = vunpack.c.l.bf16 %v19_v45  ;;  %v41_v17 = vunpack.c.l.bf16 %v20_v46 }
  0x10   :  { %v110_v8 = vpack.c.bf16 %v94_v1, %v92_v0  ;;  %v105_v12 = vpack.c.bf16 %v85_v5, %v83_v4  ;;  %v76_v13 = vmax.f32 %v44_v9, 0.0  ;;  %v55_v18 = vunpack.c.l.bf16 %v514_v34 }
  0x11   :  { %v78_v14 = vmax.f32 %v46_v10, 0.0  ;;  %v57_v19 = vunpack.c.l.bf16 %v519_v35  ;;  %v71_v20 = vmax.f32 %v39_v16, 0.0  ;;  %v73_v21 = vmax.f32 %v41_v17, 0.0 }
  0x12   :  { %216 = vmatpush.bf16.msra.mxu0 %v410_v23  ;;  %420 = vmatpush.bf16.msra.mxu2 %v410_v23  ;;  %v87_v22 = vmax.f32 %v55_v18, 0.0  ;;  %v48_v24 = vunpack.c.h.bf16 %v502_v27  ;;  %v50_v25 = vunpack.c.h.bf16 %v507_v28  ;;  %v43_v33 = vunpack.c.l.bf16 %v21_v6 }
  0x13   :  { %v102_v15 = vpack.c.bf16 %v78_v14, %v76_v13  ;;  %v89_v23 = vmax.f32 %v57_v19, 0.0  ;;  %v45_v34 = vunpack.c.l.bf16 %v22_v7  ;;  %v59_v35 = vunpack.c.l.bf16 %v29_v60 }
  0x14   :  { %v80_v30 = vmax.f32 %v48_v24, 0.0  ;;  %v82_v31 = vmax.f32 %v50_v25, 0.0  ;;  %v75_v37 = vmax.f32 %v43_v33, 0.0 }
  0x15   :  { %v77_v38 = vmax.f32 %v45_v34, 0.0  ;;  %v91_v39 = vmax.f32 %v59_v35, 0.0 }
  0x16   :  { %217 = vmatpush.bf16.msra.mxu0 %v409_v26  ;;  %421 = vmatpush.bf16.msra.mxu2 %v409_v26  ;;  %v99_v26 = vpack.c.bf16 %v73_v21, %v71_v20  ;;  %v104_v32 = vpack.c.bf16 %v82_v31, %v80_v30 }
  0x17   :  { %v101_v27 = vpack.c.bf16 %v77_v38, %v75_v37 }
  0x19   :  { %400 = vmatmul.msk.bf16.gmra.mxu1 %vm187_vm0, %v98_v29  ;;  %v107_v29 = vpack.c.bf16 %v89_v23, %v87_v22 }
  0x1a   :  { %218 = vmatpush.bf16.msra.mxu0 %v408_v36  ;;  %422 = vmatpush.bf16.msra.mxu2 %v408_v36  ;;  %v61_v36 = vunpack.c.l.bf16 %v30_v61 }
  0x1b   :  { %405 = vmatmul.msk.bf16.gmra.mxu3 %vm187_vm0, %v108_v48 }
  0x1c   :  { %v93_v40 = vmax.f32 %v61_v36, 0.0 }
  0x1e   :  { %219 = vmatpush.bf16.msra.mxu0 %v407_v47  ;;  %423 = vmatpush.bf16.msra.mxu2 %v407_v47  ;;  %v109_v41 = vpack.c.bf16 %v93_v40, %v91_v39 }
  0x21   :  { %220 = vmatmul.bf16.vlgmr.msra.gmra.mxu0 %v95_v51  ;;  %240 = vmatmul.bf16.vlgmr.msra.gmra.mxu2 %v103_v52 }
  0x29   :  { %401 = vmatmul.msk.bf16.gmra.mxu1 %vm187_vm0, %v100_v55 }
  0x2b   :  { %406 = vmatmul.msk.bf16.gmra.mxu3 %vm187_vm0, %v110_v8 }
  0x31   :  { %225 = vmatmul.bf16.gmra.mxu0 %v97_v11  ;;  %245 = vmatmul.bf16.gmra.mxu2 %v105_v12 }
  0x39   :  { %402 = vmatmul.msk.bf16.gmra.mxu1 %vm187_vm0, %v102_v15 }
  0x41   :  { %230 = vmatmul.bf16.gmra.mxu0 %v99_v26  ;;  %250 = vmatmul.bf16.gmra.mxu2 %v107_v29 }
  0x49   :  { %403 = vmatmul.msk.bf16.gmra.mxu1 %vm187_vm0, %v104_v32 }
  0x51   :  { %235 = vmatmul.bf16.gmra.mxu0 %v101_v27  ;;  %255 = vmatmul.bf16.gmra.mxu2 %v109_v41 }
  0x86   :  { %v270_v28 = vpop.f32.mrf.mxu1 }
  0x8e   :  { %v272_v42 = vpop.f32.mrf.mxu1  ;;  %v295_v58 = vpop.f32.mrf.mxu3 }
  0x96   :  { %v275_v43 = vpop.f32.mrf.mxu1  ;;  %v297_v6 = vpop.f32.mrf.mxu3 }
  0x9e   :  { %v277_v45 = vpop.f32.mrf.mxu1  ;;  %v221_v46 = vpop.f32.mrf.mxu0 }
  0x9f   :  { %v222_v47 = vadd.f32 %v564_v44, %v221_v46  ;;  %v300_v20 = vpop.f32.mrf.mxu3 }
  0xa1   :  { %v271_v48 = vadd.f32 %v270_v28, %v222_v47 }
  0xa3   :  { %v310_v49 = vmax.f32 %v271_v48, 0.0 }
  0xa4   :  { %v241_v50 = vpop.f32.mrf.mxu2 }
  0xa5   :  { %v326_v51 = vpack.c.bf16 %v310_v49, %v310_v49  ;;  %v242_v25 = vadd.f32 %v564_v44, %v241_v50 }
  0xa6   :  { %v280_v52 = vpop.f32.mrf.mxu1  ;;  %v223_v53 = vpop.f32.mrf.mxu0 }
  0xa7   :  { %343 = vst.msk [vmem:[%s649_s3] sm:$0xf] %vm342_vm1, %v326_v51  ;;  %v224_v54 = vadd.f32 %v564_v44, %v223_v53  ;;  %v302_v40 = vpop.f32.mrf.mxu3 }
  0xa9   :  { %v273_v55 = vadd.f32 %v272_v42, %v224_v54 }
  0xab   :  { %v311_v56 = vmax.f32 %v273_v55, 0.0 }
  0xac   :  { %v243_v57 = vpop.f32.mrf.mxu2 }
  0xad   :  { %v327_v59 = vpack.c.bf16 %v311_v56, %v311_v56  ;;  %v244_v28 = vadd.f32 %v564_v44, %v243_v57 }
  0xae   :  { %v282_v60 = vpop.f32.mrf.mxu1  ;;  %v226_v61 = vpop.f32.mrf.mxu0 }
  0xaf   :  { %344 = vst.msk [vmem:[%s649_s3 + $0x4] sm:$0xf] %vm342_vm1, %v327_v59  ;;  %v227_v62 = vadd.f32 %v564_v44, %v226_v61  ;;  %v305_v57 = vpop.f32.mrf.mxu3 }
  0xb1   :  { %v276_v63 = vadd.f32 %v275_v43, %v227_v62 }
  0xb3   :  { %v312_v0 = vmax.f32 %v276_v63, 0.0 }
  0xb4   :  { %v246_v1 = vpop.f32.mrf.mxu2 }
  0xb5   :  { %v328_v2 = vpack.c.bf16 %v312_v0, %v312_v0  ;;  %v247_v4 = vadd.f32 %v564_v44, %v246_v1 }
  0xb6   :  { %v285_v3 = vpop.f32.mrf.mxu1  ;;  %v228_v5 = vpop.f32.mrf.mxu0 }
  0xb7   :  { %345 = vst.msk [vmem:[%s649_s3 + $0x8] sm:$0xf] %vm342_vm1, %v328_v2  ;;  %v296_v7 = vadd.f32 %v295_v58, %v247_v4  ;;  %v229_v8 = vadd.f32 %v564_v44, %v228_v5 }
  0xb9   :  { %v320_v9 = vmax.f32 %v296_v7, 0.0  ;;  %v278_v10 = vadd.f32 %v277_v45, %v229_v8  ;;  %v307_v7 = vpop.f32.mrf.mxu3 }
  0xbb   :  { %v336_v11 = vpack.c.bf16 %v320_v9, %v320_v9  ;;  %v313_v12 = vmax.f32 %v278_v10, 0.0 }
  0xbc   :  { %v248_v13 = vpop.f32.mrf.mxu2 }
  0xbd   :  { %353 = vst.msk [vmem:[%s649_s3 + $0x28] sm:$0xf] %vm342_vm1, %v336_v11  ;;  %v329_v14 = vpack.c.bf16 %v313_v12, %v313_v12  ;;  %v249_v16 = vadd.f32 %v564_v44, %v248_v13 }
  0xbe   :  { %v287_v15 = vpop.f32.mrf.mxu1  ;;  %v231_v17 = vpop.f32.mrf.mxu0 }
  0xbf   :  { %346 = vst.msk [vmem:[%s649_s3 + $0xc] sm:$0xf] %vm342_vm1, %v329_v14  ;;  %v298_v18 = vadd.f32 %v297_v6, %v249_v16  ;;  %v232_v19 = vadd.f32 %v564_v44, %v231_v17 }
  0xc1   :  { %v321_v21 = vmax.f32 %v298_v18, 0.0  ;;  %v281_v22 = vadd.f32 %v280_v52, %v232_v19 }
  0xc3   :  { %v337_v23 = vpack.c.bf16 %v321_v21, %v321_v21  ;;  %v314_v24 = vmax.f32 %v281_v22, 0.0 }
  0xc4   :  { %v251_v26 = vpop.f32.mrf.mxu2 }
  0xc5   :  { %354 = vst.msk [vmem:[%s649_s3 + $0x2c] sm:$0xf] %vm342_vm1, %v337_v23  ;;  %v330_v29 = vpack.c.bf16 %v314_v24, %v314_v24  ;;  %v252_v31 = vadd.f32 %v564_v44, %v251_v26 }
  0xc6   :  { %v290_v30 = vpop.f32.mrf.mxu1  ;;  %v233_v33 = vpop.f32.mrf.mxu0 }
  0xc7   :  { %v291_v32 = vadd.f32 %v290_v30, %v242_v25  ;;  %347 = vst.msk [vmem:[%s649_s3 + $0x10] sm:$0xf] %vm342_vm1, %v330_v29  ;;  %v301_v34 = vadd.f32 %v300_v20, %v252_v31  ;;  %v234_v35 = vadd.f32 %v564_v44, %v233_v33 }
  0xc9   :  { %v318_v36 = vmax.f32 %v291_v32, 0.0  ;;  %v322_v37 = vmax.f32 %v301_v34, 0.0  ;;  %v283_v38 = vadd.f32 %v282_v60, %v234_v35 }
  0xcb   :  { %v334_v39 = vpack.c.bf16 %v318_v36, %v318_v36  ;;  %v338_v27 = vpack.c.bf16 %v322_v37, %v322_v37  ;;  %v315_v41 = vmax.f32 %v283_v38, 0.0 }
  0xcc   :  { %v253_v42 = vpop.f32.mrf.mxu2 }
  0xcd   :  { %351 = vst.msk [vmem:[%s649_s3 + $0x20] sm:$0xf] %vm342_vm1, %v334_v39  ;;  %v331_v43 = vpack.c.bf16 %v315_v41, %v315_v41  ;;  %v254_v46 = vadd.f32 %v564_v44, %v253_v42 }
  0xce   :  { %355 = vst.msk [vmem:[%s649_s3 + $0x30] sm:$0xf] %vm342_vm1, %v338_v27  ;;  %v292_v45 = vpop.f32.mrf.mxu1  ;;  %v236_v48 = vpop.f32.mrf.mxu0 }
  0xcf   :  { %v293_v47 = vadd.f32 %v292_v45, %v244_v28  ;;  %348 = vst.msk [vmem:[%s649_s3 + $0x14] sm:$0xf] %vm342_vm1, %v331_v43  ;;  %v303_v49 = vadd.f32 %v302_v40, %v254_v46  ;;  %v237_v50 = vadd.f32 %v564_v44, %v236_v48 }
  0xd1   :  { %v319_v51 = vmax.f32 %v293_v47, 0.0  ;;  %v323_v52 = vmax.f32 %v303_v49, 0.0  ;;  %v286_v53 = vadd.f32 %v285_v3, %v237_v50 }
  0xd3   :  { %v335_v54 = vpack.c.bf16 %v319_v51, %v319_v51  ;;  %v339_v55 = vpack.c.bf16 %v323_v52, %v323_v52  ;;  %v316_v56 = vmax.f32 %v286_v53, 0.0 }
  0xd4   :  { %v256_v58 = vpop.f32.mrf.mxu2 }
  0xd5   :  { %352 = vst.msk [vmem:[%s649_s3 + $0x24] sm:$0xf] %vm342_vm1, %v335_v54  ;;  %v332_v59 = vpack.c.bf16 %v316_v56, %v316_v56  ;;  %v257_v60 = vadd.f32 %v564_v44, %v256_v58 }
  0xd6   :  { %356 = vst.msk [vmem:[%s649_s3 + $0x34] sm:$0xf] %vm342_vm1, %v339_v55  ;;  %v238_v61 = vpop.f32.mrf.mxu0 }
  0xd7   :  { %349 = vst.msk [vmem:[%s649_s3 + $0x18] sm:$0xf] %vm342_vm1, %v332_v59  ;;  %v306_v62 = vadd.f32 %v305_v57, %v257_v60  ;;  %v239_v63 = vadd.f32 %v564_v44, %v238_v61 }
  0xd9   :  { %v324_v0 = vmax.f32 %v306_v62, 0.0  ;;  %v288_v1 = vadd.f32 %v287_v15, %v239_v63 }
  0xdb   :  { %v340_v2 = vpack.c.bf16 %v324_v0, %v324_v0  ;;  %v317_v3 = vmax.f32 %v288_v1, 0.0 }
  0xdc   :  { %v258_v4 = vpop.f32.mrf.mxu2 }
  0xdd   :  { %357 = vst.msk [vmem:[%s649_s3 + $0x38] sm:$0xf] %vm342_vm1, %v340_v2  ;;  %v333_v5 = vpack.c.bf16 %v317_v3, %v317_v3  ;;  %v259_v6 = vadd.f32 %v564_v44, %v258_v4 }
  0xdf   :  { %350 = vst.msk [vmem:[%s649_s3 + $0x1c] sm:$0xf] %vm342_vm1, %v333_v5  ;;  %v308_v8 = vadd.f32 %v307_v7, %v259_v6 }
  0xe1   :  { %v325_v9 = vmax.f32 %v308_v8, 0.0 }
  0xe3   :  { %v341_v10 = vpack.c.bf16 %v325_v9, %v325_v9 }
  0xe5   :  { %358 = vst.msk [vmem:[%s649_s3 + $0x3c] sm:$0xf] %vm342_vm1, %v341_v10 }

// kernel: resnet_ae_forward.79
= control target key start
LH: loop header
LB: loop body
LE: loop exit
PB: predicated region body
PF: predicated region fallthrough
CT: control target
= control target key end

     0   :  { %vm28_vm0 = vcmask 1043456   ;;  %vm74_vm1 = vcmask 1041408   ;;  %vm78_vm2 = vcmask 1045508   ;;  %s134_s0 = inlined_call_operand.vmem [shape: bf16[4,512], index: 0, kind: input, shape index: {}]   ;;  %s135_s1 = inlined_call_operand.vmem [shape: f32[1,512], index: 1, kind: input, shape index: {}]   ;;  %s136_s2 = inlined_call_operand.vmem [shape: f32[1,512], index: 2, kind: input, shape index: {}]   ;;  %s137_s3 = inlined_call_operand.vmem [shape: bf16[4,512], index: 3, kind: input, shape index: {}]   ;;  %s138_s4 = inlined_call_operand.vmem [shape: bf16[4,512], index: 4, kind: output, shape index: {}]  }
   0x1   :  { %v17_v0 = vld [vmem:[%s134_s0] sm:$0xff] }
   0x2   :  { %v20_v1 = vld [vmem:[%s135_s1] sm:$0xf]  ;;  %v18_v5 = vunpack.c.l.bf16 %v17_v0  ;;  %v19_v15 = vunpack.c.h.bf16 %v17_v0 }
   0x3   :  { %v35_v2 = vld [vmem:[%s136_s2] sm:$0xf]  ;;  %v22_v3 = vperm.slane %v20_v1, 0  ;;  %v23_v4 = vperm.slane %v20_v1, 1  ;;  %v24_v8 = vperm.slane %v20_v1, 2  ;;  %v25_v11 = vperm.slane %v20_v1, 3 }
   0x4   :  { %v37_v6 = vperm.slane %v35_v2, 0  ;;  %v38_v7 = vperm.slane %v35_v2, 1  ;;  %v49_v10 = vld [vmem:[%s137_s3] sm:$0xff]  ;;  %v39_v12 = vperm.slane %v35_v2, 2  ;;  %v40_v13 = vperm.slane %v35_v2, 3 }
   0x5   :  { %v26_v9 = vrot.slane %v23_v4, 4  ;;  %v27_v17 = vrot.slane %v25_v11, 4  ;;  %v50_v21 = vunpack.c.l.bf16 %v49_v10  ;;  %v51_v26 = vunpack.c.h.bf16 %v49_v10 }
   0x6   :  { %v41_v14 = vrot.slane %v38_v7, 4  ;;  %v42_v18 = vrot.slane %v40_v13, 4 }
   0x7   :  { %v29_v16 = vsel %vm28_vm0, %v22_v3, %v26_v9  ;;  %v30_v22 = vsel %vm28_vm0, %v24_v8, %v27_v17 }
   0x8   :  { %v33_v19 = vmul.f32 %v29_v16, %v18_v5  ;;  %v43_v20 = vsel %vm28_vm0, %v37_v6, %v41_v14  ;;  %v44_v23 = vsel %vm28_vm0, %v39_v12, %v42_v18  ;;  %v34_v25 = vmul.f32 %v30_v22, %v19_v15 }
   0xa   :  { %v47_v24 = vadd.f32 %v43_v20, %v33_v19  ;;  %v48_v28 = vadd.f32 %v44_v23, %v34_v25 }
   0xc   :  { %v52_v27 = vadd.f32 %v50_v21, %v47_v24  ;;  %v53_v29 = vadd.f32 %v51_v26, %v48_v28 }
   0xe   :  { %56 = vst [vmem:[#allocation1] ss:$2 sm:$0xff] %v52_v27 }
   0xf   :  { %58 = vst [vmem:[#allocation1 + $0x10] ss:$2 sm:$0xff] %v53_v29 }
  0x15   :  { %v59_v30 = vld.sshfl [vmem:[#allocation1] sm:$0xff pattern:$0x75316420]  ;;  %v60_v31 = vld.sshfl [vmem:[#allocation1 + $0x8] sm:$0xff pattern:$0x75316420] }
  0x16   :  { %v67_v32 = vpack.c.bf16 %v60_v31, %v59_v30  ;;  %v61_v33 = vld.sshfl [vmem:[#allocation1 + $0x10] sm:$0xff pattern:$0x75316420]  ;;  %v62_v34 = vld.sshfl [vmem:[#allocation1 + $0x18] sm:$0xff pattern:$0x75316420] }
  0x17   :  { %v68_v35 = vpack.c.bf16 %v62_v34, %v61_v33 }
  0x18   :  { %v71_v36 = vrot.slane %v67_v32, 2 }
  0x19   :  { %v72_v37 = vrot.slane %v68_v35, 4  ;;  %v73_v38 = vrot.slane %v68_v35, 6 }
  0x1a   :  { %v77_v39 = vsel %vm74_vm1, %v67_v32, %v71_v36 }
  0x1b   :  { %v81_v40 = vsel %vm78_vm2, %v72_v37, %v73_v38 }
  0x1c   :  { %v82_v41 = vsel %vm28_vm0, %v77_v39, %v81_v40 }
  0x1d   :  { %84 = vst [vmem:[%s138_s4] sm:$0xff] %v82_v41 }

// kernel: resnet_ae_forward.78
= control target key start
LH: loop header
LB: loop body
LE: loop exit
PB: predicated region body
PF: predicated region fallthrough
CT: control target
= control target key end

     0   :  { %vm175_vm0 = vcmask 130048   ;;  %vm314_vm1 = vcmask 125952   ;;  %vm368_vm2 = vcmask 122880   ;;  %s874_s1 = inlined_call_operand.vmem [shape: bf16[144,16], index: 1, kind: input, shape index: {}]   ;;  %s875_s0 = inlined_call_operand.vmem [shape: bf16[128,144], index: 0, kind: input, shape index: {}]   ;;  %s876_s2 = inlined_call_operand.vmem [shape: bf16[128,16], index: 2, kind: output, shape index: {0}]   ;;  %s877_s3 = inlined_call_operand.vmem [shape: f32[1,1,16], index: 3, kind: output, shape index: {1}]   ;;  %s878_s4 = inlined_call_operand.vmem [shape: f32[1,1,16], index: 4, kind: output, shape index: {2}]  }
   0x1   :  { %v567_v0 = vld [vmem:[%s874_s1 + $0x38] sm:$0xff]  ;;  %v568_v1 = vld [vmem:[%s874_s1 + $0x40] sm:$0xff]  ;;  %v440_v3 = vld [vmem:[%s875_s0 + $0x8] sm:$0xf0] }
   0x2   :  { %v544_v2 = vld [vmem:[%s875_s0 + $0x4] sm:$0xf]  ;;  %200 = vmatpush.bf16.msra.mxu0 %v567_v0  ;;  %256 = vmatpush.bf16.msra.mxu1 %v568_v1  ;;  %v566_v5 = vld [vmem:[%s874_s1 + $0x30] sm:$0xff]  ;;  %v565_v6 = vld [vmem:[%s874_s1 + $0x28] sm:$0xff] }
   0x3   :  { %v443_v4 = vor.u32 %v544_v2, %v440_v3  ;;  %569 = vmatpush.bf16.msra.mxu2 %v567_v0  ;;  %577 = vmatpush.bf16.msra.mxu3 %v568_v1  ;;  %v564_v7 = vld [vmem:[%s874_s1 + $0x20] sm:$0xff]  ;;  %v563_v8 = vld [vmem:[%s874_s1 + $0x18] sm:$0xff]  ;;  %v546_v9 = vld [vmem:[%s875_s0 + $0x14] sm:$0xf] }
   0x4   :  { %v448_v10 = vld [vmem:[%s875_s0 + $0x18] sm:$0xf0]  ;;  %v554_v11 = vld [vmem:[%s875_s0 + $0x54] sm:$0xf]  ;;  %v561_v16 = vld [vmem:[%s874_s1 + $0x8] sm:$0xff] }
   0x5   :  { %536 = vmatmul.msk.bf16.vlgmr.msra.gmra.mxu1 %vm175_vm0, %v443_v4  ;;  %v451_v12 = vor.u32 %v546_v9, %v448_v10  ;;  %v480_v13 = vld [vmem:[%s875_s0 + $0x58] sm:$0xf0]  ;;  %v562_v14 = vld [vmem:[%s874_s1 + $0x10] sm:$0xff]  ;;  %v560_v17 = vld [vmem:[%s874_s1] sm:$0xff] }
   0x6   :  { %201 = vmatpush.bf16.msra.mxu0 %v566_v5  ;;  %v483_v15 = vor.u32 %v554_v11, %v480_v13  ;;  %v438_v18 = vld [vmem:[%s875_s0] sm:$0xf]  ;;  %v545_v19 = vld [vmem:[%s875_s0 + $0x4] sm:$0xf0]  ;;  %v548_v24 = vld [vmem:[%s875_s0 + $0x24] sm:$0xf] }
   0x7   :  { %570 = vmatpush.bf16.msra.mxu2 %v566_v5  ;;  %v470_v20 = vld [vmem:[%s875_s0 + $0x40] sm:$0xf]  ;;  %v553_v21 = vld [vmem:[%s875_s0 + $0x44] sm:$0xf0]  ;;  %v439_v22 = vor.u32 %v545_v19, %v438_v18  ;;  %v456_v25 = vld [vmem:[%s875_s0 + $0x28] sm:$0xf0] }
   0x8   :  { %541 = vmatmul.msk.bf16.vlgmr.msra.gmra.mxu3 %vm175_vm0, %v483_v15  ;;  %v471_v23 = vor.u32 %v553_v21, %v470_v20  ;;  %v556_v26 = vld [vmem:[%s875_s0 + $0x64] sm:$0xf]  ;;  %v459_v27 = vor.u32 %v548_v24, %v456_v25  ;;  %v488_v28 = vld [vmem:[%s875_s0 + $0x68] sm:$0xf0]  ;;  %v446_v30 = vld [vmem:[%s875_s0 + $0x10] sm:$0xf] }
   0x9   :  { %v491_v29 = vor.u32 %v556_v26, %v488_v28  ;;  %v547_v31 = vld [vmem:[%s875_s0 + $0x14] sm:$0xf0]  ;;  %v478_v32 = vld [vmem:[%s875_s0 + $0x50] sm:$0xf]  ;;  %v550_v36 = vld [vmem:[%s875_s0 + $0x34] sm:$0xf] }
   0xa   :  { %202 = vmatpush.bf16.msra.mxu0 %v565_v6  ;;  %v555_v33 = vld [vmem:[%s875_s0 + $0x54] sm:$0xf0]  ;;  %v447_v34 = vor.u32 %v547_v31, %v446_v30  ;;  %v464_v37 = vld [vmem:[%s875_s0 + $0x38] sm:$0xf0]  ;;  %v558_v38 = vld [vmem:[%s875_s0 + $0x74] sm:$0xf] }
   0xb   :  { %571 = vmatpush.bf16.msra.mxu2 %v565_v6  ;;  %v479_v35 = vor.u32 %v555_v33, %v478_v32  ;;  %v467_v39 = vor.u32 %v550_v36, %v464_v37  ;;  %v496_v40 = vld [vmem:[%s875_s0 + $0x78] sm:$0xf0]  ;;  %v454_v42 = vld [vmem:[%s875_s0 + $0x20] sm:$0xf]  ;;  %v549_v43 = vld [vmem:[%s875_s0 + $0x24] sm:$0xf0] }
   0xc   :  { %v499_v41 = vor.u32 %v558_v38, %v496_v40  ;;  %v486_v44 = vld [vmem:[%s875_s0 + $0x60] sm:$0xf]  ;;  %v557_v45 = vld [vmem:[%s875_s0 + $0x64] sm:$0xf0]  ;;  %v455_v46 = vor.u32 %v549_v43, %v454_v42  ;;  %v552_v48 = vld [vmem:[%s875_s0 + $0x44] sm:$0xf] }
   0xd   :  { %v487_v47 = vor.u32 %v557_v45, %v486_v44  ;;  %v472_v49 = vld [vmem:[%s875_s0 + $0x48] sm:$0xf0]  ;;  %v462_v51 = vld [vmem:[%s875_s0 + $0x30] sm:$0xf]  ;;  %v551_v52 = vld [vmem:[%s875_s0 + $0x34] sm:$0xf0] }
   0xe   :  { %203 = vmatpush.bf16.msra.mxu0 %v564_v7  ;;  %v475_v50 = vor.u32 %v552_v48, %v472_v49  ;;  %v494_v53 = vld [vmem:[%s875_s0 + $0x70] sm:$0xf]  ;;  %v559_v54 = vld [vmem:[%s875_s0 + $0x74] sm:$0xf0]  ;;  %v463_v55 = vor.u32 %v551_v52, %v462_v51 }
   0xf   :  { %572 = vmatpush.bf16.msra.mxu2 %v564_v7  ;;  %v495_v56 = vor.u32 %v559_v54, %v494_v53 }
  0x12   :  { %204 = vmatpush.bf16.msra.mxu0 %v563_v8 }
  0x13   :  { %573 = vmatpush.bf16.msra.mxu2 %v563_v8 }
  0x15   :  { %537 = vmatmul.msk.bf16.gmra.mxu1 %vm175_vm0, %v451_v12 }
  0x16   :  { %205 = vmatpush.bf16.msra.mxu0 %v562_v14 }
  0x17   :  { %574 = vmatpush.bf16.msra.mxu2 %v562_v14 }
  0x18   :  { %542 = vmatmul.msk.bf16.gmra.mxu3 %vm175_vm0, %v491_v29 }
  0x1a   :  { %206 = vmatpush.bf16.msra.mxu0 %v561_v16 }
  0x1b   :  { %575 = vmatpush.bf16.msra.mxu2 %v561_v16 }
  0x1e   :  { %207 = vmatpush.bf16.msra.mxu0 %v560_v17 }
  0x1f   :  { %576 = vmatpush.bf16.msra.mxu2 %v560_v17 }
  0x21   :  { %208 = vmatmul.bf16.vlgmr.msra.gmra.mxu0 %v439_v22 }
  0x22   :  { %228 = vmatmul.bf16.vlgmr.msra.gmra.mxu2 %v471_v23 }
  0x25   :  { %538 = vmatmul.msk.bf16.gmra.mxu1 %vm175_vm0, %v459_v27 }
  0x28   :  { %543 = vmatmul.msk.bf16.gmra.mxu3 %vm175_vm0, %v499_v41 }
  0x31   :  { %213 = vmatmul.bf16.gmra.mxu0 %v447_v34 }
  0x32   :  { %233 = vmatmul.bf16.gmra.mxu2 %v479_v35 }
  0x35   :  { %539 = vmatmul.msk.bf16.gmra.mxu1 %vm175_vm0, %v467_v39 }
  0x41   :  { %218 = vmatmul.bf16.gmra.mxu0 %v455_v46 }
  0x42   :  { %238 = vmatmul.bf16.gmra.mxu2 %v487_v47 }
  0x45   :  { %540 = vmatmul.msk.bf16.gmra.mxu1 %vm175_vm0, %v475_v50 }
  0x51   :  { %223 = vmatmul.bf16.gmra.mxu0 %v463_v55 }
  0x52   :  { %243 = vmatmul.bf16.gmra.mxu2 %v495_v56 }
  0x82   :  { %v258_v57 = vpop.f32.mrf.mxu1 }
  0x8a   :  { %v260_v58 = vpop.f32.mrf.mxu1 }
  0x8b   :  { %v283_v5 = vpop.f32.mrf.mxu3 }
  0x92   :  { %v263_v59 = vpop.f32.mrf.mxu1 }
  0x93   :  { %v285_v12 = vpop.f32.mrf.mxu3 }
  0x9a   :  { %v265_v60 = vpop.f32.mrf.mxu1 }
  0x9b   :  { %v288_v21 = vpop.f32.mrf.mxu3 }
  0x9e   :  { %v209_v61 = vpop.f32.mrf.mxu0 }
  0x9f   :  { %v259_v62 = vadd.f32 %v258_v57, %v209_v61 }
  0xa1   :  { %v298_v63 = vpack.c.bf16 %v259_v62, %v259_v62  ;;  %v370_v38 = vmul.f32 %v259_v62, %v259_v62  ;;  %v331_v43 = vsel %vm175_vm0, %v259_v62, 0.0 }
  0xa2   :  { %v268_v0 = vpop.f32.mrf.mxu1 }
  0xa3   :  { %315 = vst.msk [vmem:[%s876_s2] sm:$0xf] %vm314_vm1, %v298_v63  ;;  %v290_v34 = vpop.f32.mrf.mxu3  ;;  %v386_v49 = vsel %vm175_vm0, %v370_v38, 0.0 }
  0xa5   :  { %v229_v1 = vpop.f32.mrf.mxu2 }
  0xa6   :  { %v211_v2 = vpop.f32.mrf.mxu0 }
  0xa7   :  { %v261_v3 = vadd.f32 %v260_v58, %v211_v2 }
  0xa9   :  { %v299_v4 = vpack.c.bf16 %v261_v3, %v261_v3  ;;  %v371_v36 = vmul.f32 %v261_v3, %v261_v3  ;;  %v332_v40 = vsel %vm175_vm0, %v261_v3, 0.0 }
  0xaa   :  { %v270_v6 = vpop.f32.mrf.mxu1  ;;  %v333_v50 = vadd.f32 %v332_v40, %v331_v43 }
  0xab   :  { %316 = vst.msk [vmem:[%s876_s2 + $0x4] sm:$0xf] %vm314_vm1, %v299_v4  ;;  %v387_v44 = vsel %vm175_vm0, %v371_v36, 0.0 }
  0xac   :  { %v388_v57 = vadd.f32 %v387_v44, %v386_v49 }
  0xad   :  { %v231_v7 = vpop.f32.mrf.mxu2 }
  0xae   :  { %v214_v8 = vpop.f32.mrf.mxu0 }
  0xaf   :  { %v264_v9 = vadd.f32 %v263_v59, %v214_v8 }
  0xb1   :  { %v300_v10 = vpack.c.bf16 %v264_v9, %v264_v9  ;;  %v372_v41 = vmul.f32 %v264_v9, %v264_v9  ;;  %v334_v45 = vsel %vm175_vm0, %v264_v9, 0.0 }
  0xb2   :  { %v273_v11 = vpop.f32.mrf.mxu1  ;;  %v335_v58 = vadd.f32 %v334_v45, %v333_v50 }
  0xb3   :  { %317 = vst.msk [vmem:[%s876_s2 + $0x8] sm:$0xf] %vm314_vm1, %v300_v10  ;;  %v389_v53 = vsel %vm175_vm0, %v372_v41, 0.0 }
  0xb5   :  { %v234_v13 = vpop.f32.mrf.mxu2 }
  0xb6   :  { %v216_v14 = vpop.f32.mrf.mxu0  ;;  %v746_v15 = vadd.f32 %v283_v5, %v234_v13 }
  0xb7   :  { %v266_v16 = vadd.f32 %v265_v60, %v216_v14 }
  0xb8   :  { %v308_v17 = vpack.c.bf16 %v746_v15, %v746_v15  ;;  %v380_v36 = vmul.f32 %v746_v15, %v746_v15  ;;  %v350_v43 = vsel %vm175_vm0, %v746_v15, 0.0 }
  0xb9   :  { %v301_v18 = vpack.c.bf16 %v266_v16, %v266_v16  ;;  %v373_v46 = vmul.f32 %v266_v16, %v266_v16  ;;  %v336_v54 = vsel %vm175_vm0, %v266_v16, 0.0 }
  0xba   :  { %325 = vst.msk [vmem:[%s876_s2 + $0x28] sm:$0xf] %vm314_vm1, %v308_v17  ;;  %v754_v19 = vpop.f32.mrf.mxu1  ;;  %v337_v2 = vadd.f32 %v336_v54, %v335_v58  ;;  %v405_v49 = vsel %vm175_vm0, %v380_v36, 0.0 }
  0xbb   :  { %318 = vst.msk [vmem:[%s876_s2 + $0xc] sm:$0xf] %vm314_vm1, %v301_v18  ;;  %v391_v60 = vsel %vm175_vm0, %v373_v46, 0.0 }
  0xbd   :  { %v236_v20 = vpop.f32.mrf.mxu2 }
  0xbe   :  { %v219_v22 = vpop.f32.mrf.mxu0  ;;  %v760_v23 = vadd.f32 %v285_v12, %v236_v20 }
  0xbf   :  { %v269_v24 = vadd.f32 %v268_v0, %v219_v22  ;;  %v293_v0 = vpop.f32.mrf.mxu3 }
  0xc0   :  { %v309_v25 = vpack.c.bf16 %v760_v23, %v760_v23  ;;  %v381_v44 = vmul.f32 %v760_v23, %v760_v23 }
  0xc1   :  { %v302_v26 = vpack.c.bf16 %v269_v24, %v269_v24  ;;  %v374_v55 = vmul.f32 %v269_v24, %v269_v24  ;;  %v338_v61 = vsel %vm175_vm0, %v269_v24, 0.0 }
  0xc2   :  { %326 = vst.msk [vmem:[%s876_s2 + $0x2c] sm:$0xf] %vm314_vm1, %v309_v25  ;;  %v278_v27 = vpop.f32.mrf.mxu1  ;;  %v407_v15 = vsel %vm175_vm0, %v381_v44, 0.0 }
  0xc3   :  { %319 = vst.msk [vmem:[%s876_s2 + $0x10] sm:$0xf] %vm314_vm1, %v302_v26  ;;  %v772_v28 = vadd.f32 %v278_v27, %v229_v1  ;;  %v390_v1 = vadd.f32 %v389_v53, %v388_v57  ;;  %v393_v3 = vsel %vm175_vm0, %v374_v55, 0.0 }
  0xc5   :  { %v306_v29 = vpack.c.bf16 %v772_v28, %v772_v28  ;;  %v239_v30 = vpop.f32.mrf.mxu2  ;;  %v378_v22 = vmul.f32 %v772_v28, %v772_v28 }
  0xc6   :  { %v221_v31 = vpop.f32.mrf.mxu0  ;;  %v776_v32 = vadd.f32 %v288_v21, %v239_v30 }
  0xc7   :  { %323 = vst.msk [vmem:[%s876_s2 + $0x20] sm:$0xf] %vm314_vm1, %v306_v29  ;;  %v271_v33 = vadd.f32 %v270_v6, %v221_v31  ;;  %v392_v6 = vadd.f32 %v391_v60, %v390_v1 }
  0xc8   :  { %v310_v35 = vpack.c.bf16 %v776_v32, %v776_v32  ;;  %v382_v50 = vmul.f32 %v776_v32, %v776_v32  ;;  %v354_v54 = vsel %vm175_vm0, %v776_v32, 0.0 }
  0xc9   :  { %v303_v37 = vpack.c.bf16 %v271_v33, %v271_v33  ;;  %v375_v62 = vmul.f32 %v271_v33, %v271_v33  ;;  %v340_v4 = vsel %vm175_vm0, %v271_v33, 0.0  ;;  %v295_v33 = vpop.f32.mrf.mxu3 }
  0xca   :  { %327 = vst.msk [vmem:[%s876_s2 + $0x30] sm:$0xf] %vm314_vm1, %v310_v35  ;;  %v280_v39 = vpop.f32.mrf.mxu1  ;;  %v409_v57 = vsel %vm175_vm0, %v382_v50, 0.0 }
  0xcb   :  { %320 = vst.msk [vmem:[%s876_s2 + $0x14] sm:$0xf] %vm314_vm1, %v303_v37  ;;  %v281_v42 = vadd.f32 %v280_v39, %v231_v7  ;;  %v339_v7 = vadd.f32 %v338_v61, %v337_v2  ;;  %v395_v8 = vsel %vm175_vm0, %v375_v62, 0.0  ;;  %v401_v37 = vsel %vm175_vm0, %v378_v22, 0.0 }
  0xcd   :  { %v307_v47 = vpack.c.bf16 %v281_v42, %v281_v42  ;;  %v241_v48 = vpop.f32.mrf.mxu2  ;;  %v341_v12 = vadd.f32 %v340_v4, %v339_v7  ;;  %v379_v30 = vmul.f32 %v281_v42, %v281_v42  ;;  %v348_v38 = vsel %vm175_vm0, %v281_v42, 0.0 }
  0xce   :  { %v224_v51 = vpop.f32.mrf.mxu0  ;;  %v797_v52 = vadd.f32 %v290_v34, %v241_v48  ;;  %v352_v42 = vsel %vm175_vm0, %v760_v23, 0.0 }
  0xcf   :  { %324 = vst.msk [vmem:[%s876_s2 + $0x24] sm:$0xf] %vm314_vm1, %v307_v47  ;;  %v274_v56 = vadd.f32 %v273_v11, %v224_v51  ;;  %v394_v11 = vadd.f32 %v393_v3, %v392_v6  ;;  %v403_v45 = vsel %vm175_vm0, %v379_v30, 0.0 }
  0xd0   :  { %v311_v59 = vpack.c.bf16 %v797_v52, %v797_v52  ;;  %v383_v55 = vmul.f32 %v797_v52, %v797_v52  ;;  %v356_v58 = vsel %vm175_vm0, %v797_v52, 0.0 }
  0xd1   :  { %v304_v63 = vpack.c.bf16 %v274_v56, %v274_v56  ;;  %v376_v5 = vmul.f32 %v274_v56, %v274_v56  ;;  %v342_v9 = vsel %vm175_vm0, %v274_v56, 0.0  ;;  %v396_v18 = vadd.f32 %v395_v8, %v394_v11 }
  0xd2   :  { %328 = vst.msk [vmem:[%s876_s2 + $0x34] sm:$0xf] %vm314_vm1, %v311_v59  ;;  %v343_v20 = vadd.f32 %v342_v9, %v341_v12  ;;  %v411_v62 = vsel %vm175_vm0, %v383_v55, 0.0 }
  0xd3   :  { %321 = vst.msk [vmem:[%s876_s2 + $0x18] sm:$0xf] %vm314_vm1, %v304_v63  ;;  %v397_v16 = vsel %vm175_vm0, %v376_v5, 0.0 }
  0xd4   :  { %v398_v27 = vadd.f32 %v397_v16, %v396_v18 }
  0xd5   :  { %v244_v10 = vpop.f32.mrf.mxu2 }
  0xd6   :  { %v226_v13 = vpop.f32.mrf.mxu0  ;;  %v294_v14 = vadd.f32 %v293_v0, %v244_v10 }
  0xd7   :  { %v276_v17 = vadd.f32 %v754_v19, %v226_v13  ;;  %v346_v19 = vsel %vm175_vm0, %v772_v28, 0.0 }
  0xd8   :  { %v312_v21 = vpack.c.bf16 %v294_v14, %v294_v14  ;;  %v384_v59 = vmul.f32 %v294_v14, %v294_v14  ;;  %v358_v63 = vsel %vm175_vm0, %v294_v14, 0.0 }
  0xd9   :  { %v305_v24 = vpack.c.bf16 %v276_v17, %v276_v17  ;;  %v344_v25 = vsel %vm175_vm0, %v276_v17, 0.0  ;;  %v377_v26 = vmul.f32 %v276_v17, %v276_v17 }
  0xda   :  { %v345_v29 = vadd.f32 %v344_v25, %v343_v20  ;;  %329 = vst.msk [vmem:[%s876_s2 + $0x38] sm:$0xf] %vm314_vm1, %v312_v21  ;;  %v413_v2 = vsel %vm175_vm0, %v384_v59, 0.0 }
  0xdb   :  { %322 = vst.msk [vmem:[%s876_s2 + $0x1c] sm:$0xf] %vm314_vm1, %v305_v24  ;;  %v399_v31 = vsel %vm175_vm0, %v377_v26, 0.0 }
  0xdc   :  { %v347_v34 = vadd.f32 %v346_v19, %v345_v29  ;;  %v400_v35 = vadd.f32 %v399_v31, %v398_v27 }
  0xdd   :  { %v246_v39 = vpop.f32.mrf.mxu2 }
  0xde   :  { %v349_v28 = vadd.f32 %v348_v38, %v347_v34  ;;  %v402_v40 = vadd.f32 %v401_v37, %v400_v35  ;;  %v296_v41 = vadd.f32 %v295_v33, %v246_v39 }
  0xe0   :  { %v351_v46 = vadd.f32 %v350_v43, %v349_v28  ;;  %v404_v47 = vadd.f32 %v403_v45, %v402_v40  ;;  %v313_v48 = vpack.c.bf16 %v296_v41, %v296_v41  ;;  %v385_v0 = vmul.f32 %v296_v41, %v296_v41 }
  0xe1   :  { %v360_v3 = vsel %vm175_vm0, %v296_v41, 0.0 }
  0xe2   :  { %v406_v51 = vadd.f32 %v405_v49, %v404_v47  ;;  %v353_v53 = vadd.f32 %v352_v42, %v351_v46  ;;  %330 = vst.msk [vmem:[%s876_s2 + $0x3c] sm:$0xf] %vm314_vm1, %v313_v48  ;;  %v415_v6 = vsel %vm175_vm0, %v385_v0, 0.0 }
  0xe4   :  { %v355_v56 = vadd.f32 %v354_v54, %v353_v53  ;;  %v408_v23 = vadd.f32 %v407_v15, %v406_v51 }
  0xe6   :  { %v357_v60 = vadd.f32 %v356_v58, %v355_v56  ;;  %v410_v61 = vadd.f32 %v409_v57, %v408_v23 }
  0xe8   :  { %v359_v1 = vadd.f32 %v358_v63, %v357_v60  ;;  %v412_v32 = vadd.f32 %v411_v62, %v410_v61 }
  0xea   :  { %v414_v4 = vadd.f32 %v413_v2, %v412_v32  ;;  %v361_v5 = vadd.f32 %v360_v3, %v359_v1 }
  0xec   :  { %v362_v7 = vrot.slane %v361_v5, 4  ;;  %v416_v52 = vadd.f32 %v415_v6, %v414_v4 }
  0xee   :  { %v363_v8 = vadd.f32 %v362_v7, %v361_v5  ;;  %v417_v9 = vrot.slane %v416_v52, 4 }
  0xf0   :  { %v364_v10 = vrot.slane %v363_v8, 2  ;;  %v418_v11 = vadd.f32 %v417_v9, %v416_v52 }
  0xf2   :  { %v365_v12 = vadd.f32 %v364_v10, %v363_v8  ;;  %v419_v13 = vrot.slane %v418_v11, 2 }
  0xf4   :  { %v366_v14 = vrot.slane %v365_v12, 1  ;;  %v420_v16 = vadd.f32 %v419_v13, %v418_v11 }
  0xf6   :  { %v367_v17 = vadd.f32 %v366_v14, %v365_v12  ;;  %v421_v18 = vrot.slane %v420_v16, 1 }
  0xf8   :  { %369 = vst.msk [vmem:[%s877_s3] sm:$0x1] %vm368_vm2, %v367_v17  ;;  %v422_v20 = vadd.f32 %v421_v18, %v420_v16 }
  0xfa   :  { %423 = vst.msk [vmem:[%s878_s4] sm:$0x1] %vm368_vm2, %v422_v20 }

// kernel: tile.325
= control target key start
LH: loop header
LB: loop body
LE: loop exit
PB: predicated region body
PF: predicated region fallthrough
CT: control target
= control target key end

     0   :  { %s28_s0 = inlined_call_operand.vmem [shape: f32[32], index: 0, kind: input, shape index: {}]   ;;  %s29_s1 = inlined_call_operand.vmem [shape: f32[16,32], index: 1, kind: output, shape index: {}]  }
   0x1   :  { %v4_v0 = vld [vmem:[%s28_s0] ss:$0 sm:$0xff] }
   0x2   :  { %5 = vst [vmem:[%s29_s1] sm:$0xff] %v4_v0 }
   0x3   :  { %8 = vst [vmem:[%s29_s1 + $0x8] sm:$0xff] %v4_v0 }

// kernel: tile.326
= control target key start
LH: loop header
LB: loop body
LE: loop exit
PB: predicated region body
PF: predicated region fallthrough
CT: control target
= control target key end

     0   :  { %s56_s8 = smov 96   ;;  %s57_s11 = smov 32   ;;  %vm3_vm0 = vcmask 261120   ;;  %vm9_vm1 = vcmask 1048320   ;;  %vm15_vm2 = vcmask 785920   ;;  %vm21_vm3 = vcmask 523520   ;;  %s93_s0 = inlined_call_operand.vmem [shape: f32[16,32], index: 0, kind: input, shape index: {}]   ;;  %s94_s1 = inlined_call_operand.vmem [shape: f32[1,512], index: 1, kind: output, shape index: {}]  }
   0x1   :  { %v47_v0 = vld [vmem:[%s93_s0 + $0x3] ss:$4 sm:$0xf]   ;;  %v49_v1 = vld [vmem:[%s93_s0 + $0x1] ss:$4 sm:$0xf]  }
   0x2   :  { %7 = vrot.lane.b32.xlu0 %v47_v0, %s56_s8  ;;  %19 = vrot.lane.b32.xlu1 %v49_v1, %s57_s11  ;;  %v48_v2 = vld [vmem:[%s93_s0 + $0x2] ss:$4 sm:$0xf]   ;;  %s58_s14 = smov 64  }
   0x3   :  { %v2_v3 = vld [vmem:[%s93_s0] ss:$4 sm:$0xf]  }
   0x4   :  { %4 = vst.msk [vmem:[#allocation0] ss:$8 sm:$0xf] %vm3_vm0, %v2_v3  }
   0xa   :  { %13 = vrot.lane.b32.xlu0 %v48_v2, %s58_s14 }
  0x74   :  { %v8_v4 = vpop.permute.xlu0 %7   ;;  %v20_v5 = vpop.permute.xlu1 %19  }
  0x75   :  { %10 = vst.msk [vmem:[#allocation0] ss:$8 sm:$0xf] %vm9_vm1, %v8_v4  }
  0x7c   :  { %v14_v6 = vpop.permute.xlu0 %13  }
  0x7d   :  { %16 = vst.msk [vmem:[#allocation0] ss:$8 sm:$0xf] %vm15_vm2, %v14_v6  }
  0x7e   :  { %22 = vst.msk [vmem:[#allocation0] ss:$8 sm:$0xf] %vm21_vm3, %v20_v5  }
  0x85   :  { %v25_v7 = vld [vmem:[#allocation0] sm:$0x1]  ;;  %v30_v8 = vld [vmem:[#allocation0 + $0x8] sm:$0x1]  ;;  %v36_v9 = vld [vmem:[#allocation0 + $0x10] sm:$0x1] }
  0x86   :  { %28 = vst [vmem:[%s94_s1] sm:$0x1] %v25_v7  ;;  %v42_v10 = vld [vmem:[#allocation0 + $0x18] sm:$0x1] }
  0x87   :  { %50 = vst [vmem:[%s94_s1 + $0x1] sm:$0x1] %v30_v8 }
  0x88   :  { %51 = vst [vmem:[%s94_s1 + $0x2] sm:$0x1] %v36_v9 }
  0x89   :  { %52 = vst [vmem:[%s94_s1 + $0x3] sm:$0x1] %v42_v10 }

// kernel: resnet_ae_forward.81
= control target key start
LH: loop header
LB: loop body
LE: loop exit
PB: predicated region body
PF: predicated region fallthrough
CT: control target
= control target key end

     0   :  { %vm25_vm0 = vcmask 1041408   ;;  %vm27_vm1 = vcmask 1045508   ;;  %vm29_vm2 = vcmask 1043456   ;;  %vm65_vm3 = vcmask 1040384   ;;  %s117_s0 = inlined_call_operand.vmem [shape: bf16[2,512], index: 0, kind: input, shape index: {}]   ;;  %s118_s1 = inlined_call_operand.vmem [shape: f32[1,512], index: 1, kind: input, shape index: {}]   ;;  %s119_s2 = inlined_call_operand.vmem [shape: f32[1,512], index: 2, kind: input, shape index: {}]   ;;  %s120_s3 = inlined_call_operand.vmem [shape: bf16[2,512], index: 3, kind: output, shape index: {}]  }
   0x1   :  { %v16_v0 = vld [vmem:[%s118_s1] sm:$0xf]  ;;  %vm69_vm4 = vcmask 1042434  }
   0x2   :  { %v33_v1 = vld [vmem:[%s119_s2] sm:$0xf]  ;;  %v18_v3 = vperm.slane %v16_v0, 0  ;;  %v19_v4 = vperm.slane %v16_v0, 1  ;;  %v20_v5 = vperm.slane %v16_v0, 2  ;;  %v21_v6 = vperm.slane %v16_v0, 3 }
   0x3   :  { %v14_v2 = vld [vmem:[%s117_s0] sm:$0xf]  ;;  %v35_v7 = vperm.slane %v33_v1, 0  ;;  %v36_v8 = vperm.slane %v33_v1, 1  ;;  %v37_v9 = vperm.slane %v33_v1, 2  ;;  %v38_v12 = vperm.slane %v33_v1, 3 }
   0x4   :  { %v22_v10 = vrot.slane %v19_v4, 6  ;;  %v23_v11 = vrot.slane %v20_v5, 4  ;;  %v15_v13 = vunpack.c.l.bf16 %v14_v2  ;;  %v24_v14 = vrot.slane %v21_v6, 2 }
   0x5   :  { %v39_v15 = vrot.slane %v36_v8, 6  ;;  %v40_v16 = vrot.slane %v37_v9, 4  ;;  %v41_v18 = vrot.slane %v38_v12, 2 }
   0x6   :  { %v26_v17 = vsel %vm25_vm0, %v18_v3, %v22_v10  ;;  %v28_v19 = vsel %vm27_vm1, %v23_v11, %v24_v14 }
   0x7   :  { %v42_v20 = vsel %vm25_vm0, %v35_v7, %v39_v15  ;;  %v30_v21 = vsel %vm29_vm2, %v26_v17, %v28_v19  ;;  %v43_v22 = vsel %vm27_vm1, %v40_v16, %v41_v18 }
   0x8   :  { %v32_v23 = vmul.f32 %v30_v21, %v15_v13  ;;  %v44_v24 = vsel %vm29_vm2, %v42_v20, %v43_v22 }
   0xa   :  { %v46_v25 = vadd.f32 %v44_v24, %v32_v23 }
   0xc   :  { %v47_v26 = vmax.f32 %v46_v25, 0.0 }
   0xe   :  { %49 = vst [vmem:[#allocation1] ss:$4 sm:$0xff] %v47_v26 }
  0x15   :  { %v50_v27 = vld.sshfl [vmem:[#allocation1] sm:$0xff pattern:$0x73625140]  ;;  %v51_v28 = vld.sshfl [vmem:[#allocation1 + $0x8] sm:$0xff pattern:$0x73625140] }
  0x16   :  { %v52_v29 = vld.sshfl [vmem:[#allocation1 + $0x10] sm:$0xff pattern:$0x73625140]  ;;  %v53_v30 = vld.sshfl [vmem:[#allocation1 + $0x18] sm:$0xff pattern:$0x73625140]  ;;  %v58_v31 = vpack.c.bf16 %v51_v28, %v50_v27 }
  0x17   :  { %v59_v32 = vpack.c.bf16 %v53_v30, %v52_v29 }
  0x18   :  { %v62_v33 = vrot.slane %v58_v31, 3 }
  0x19   :  { %v63_v34 = vrot.slane %v59_v32, 6  ;;  %v64_v35 = vrot.slane %v59_v32, 1 }
  0x1a   :  { %v68_v36 = vsel %vm65_vm3, %v58_v31, %v62_v33 }
  0x1b   :  { %v72_v37 = vsel %vm69_vm4, %v63_v34, %v64_v35 }
  0x1c   :  { %v73_v38 = vsel %vm25_vm0, %v68_v36, %v72_v37 }
  0x1d   :  { %75 = vst [vmem:[%s120_s3] sm:$0xf] %v73_v38 }

// kernel: resnet_ae_forward.80
= control target key start
LH: loop header
LB: loop body
LE: loop exit
PB: predicated region body
PF: predicated region fallthrough
CT: control target
= control target key end

     0   :  { %vm61_vm0 = vcmask 523264   ;;  %vm91_vm1 = vcmask 257024   ;;  %vm96_vm2 = vcmask 261120   ;;  %vm110_vm3 = vcmask 253952   ;;  %s251_s1 = inlined_call_operand.vmem [shape: bf16[64,32], index: 1, kind: input, shape index: {}]   ;;  %s252_s0 = inlined_call_operand.vmem [shape: bf16[32,64], index: 0, kind: input, shape index: {}]   ;;  %s253_s2 = inlined_call_operand.vmem [shape: bf16[32,32], index: 2, kind: output, shape index: {0}]   ;;  %s254_s3 = inlined_call_operand.vmem [shape: f32[1,1,32], index: 3, kind: output, shape index: {1}]   ;;  %s255_s4 = inlined_call_operand.vmem [shape: f32[1,1,32], index: 4, kind: output, shape index: {2}]  }
   0x1   :  { %v173_v0 = vld [vmem:[%s251_s1 + $0x18] sm:$0xff]  ;;  %v172_v1 = vld [vmem:[%s251_s1 + $0x10] sm:$0xff]  ;;  %v171_v2 = vld [vmem:[%s251_s1 + $0x8] sm:$0xff] }
   0x2   :  { %72 = vmatpush.bf16.msra.mxu0 %v173_v0  ;;  %174 = vmatpush.bf16.msra.mxu1 %v173_v0  ;;  %v170_v3 = vld [vmem:[%s251_s1] sm:$0xff]  ;;  %v169_v5 = vld [vmem:[%s252_s0 + $0x8] sm:$0xff] }
   0x3   :  { %v168_v4 = vld [vmem:[%s252_s0] sm:$0xff] }
   0x6   :  { %73 = vmatpush.bf16.msra.mxu0 %v172_v1  ;;  %175 = vmatpush.bf16.msra.mxu1 %v172_v1 }
   0xa   :  { %74 = vmatpush.bf16.msra.mxu0 %v171_v2  ;;  %176 = vmatpush.bf16.msra.mxu1 %v171_v2 }
   0xe   :  { %75 = vmatpush.bf16.msra.mxu0 %v170_v3  ;;  %177 = vmatpush.bf16.msra.mxu1 %v170_v3 }
  0x11   :  { %166 = vmatmul.msk.bf16.vlgmr.msra.gmra.mxu0 %vm61_vm0, %v168_v4  ;;  %167 = vmatmul.msk.bf16.vlgmr.msra.gmra.mxu1 %vm61_vm0, %v169_v5 }
  0x8e   :  { %v77_v6 = vpop.f32.mrf.mxu0  ;;  %v82_v7 = vpop.f32.mrf.mxu1 }
  0x8f   :  { %v87_v8 = vpack.c.bf16 %v77_v6, %v77_v6  ;;  %v89_v9 = vpack.c.bf16 %v82_v7, %v82_v7  ;;  %v112_v10 = vmul.f32 %v77_v6, %v77_v6  ;;  %v97_v11 = vsel %vm96_vm2, %v77_v6, 0.0 }
  0x90   :  { %v114_v12 = vmul.f32 %v82_v7, %v82_v7  ;;  %v100_v21 = vsel %vm96_vm2, %v82_v7, 0.0 }
  0x91   :  { %92 = vst.msk [vmem:[%s253_s2] sm:$0xf] %vm91_vm1, %v87_v8  ;;  %v116_v20 = vsel %vm96_vm2, %v112_v10, 0.0 }
  0x92   :  { %94 = vst.msk [vmem:[%s253_s2 + $0x8] sm:$0xf] %vm91_vm1, %v89_v9  ;;  %v119_v26 = vsel %vm96_vm2, %v114_v12, 0.0 }
  0x96   :  { %v79_v13 = vpop.f32.mrf.mxu0  ;;  %v84_v14 = vpop.f32.mrf.mxu1 }
  0x97   :  { %v88_v15 = vpack.c.bf16 %v79_v13, %v79_v13  ;;  %v98_v16 = vsel %vm96_vm2, %v79_v13, 0.0  ;;  %v113_v17 = vmul.f32 %v79_v13, %v79_v13  ;;  %v90_v18 = vpack.c.bf16 %v84_v14, %v84_v14 }
  0x98   :  { %v99_v19 = vadd.f32 %v98_v16, %v97_v11  ;;  %v115_v23 = vmul.f32 %v84_v14, %v84_v14  ;;  %v102_v27 = vsel %vm96_vm2, %v84_v14, 0.0 }
  0x99   :  { %93 = vst.msk [vmem:[%s253_s2 + $0x4] sm:$0xf] %vm91_vm1, %v88_v15  ;;  %v117_v22 = vsel %vm96_vm2, %v113_v17, 0.0 }
  0x9a   :  { %v118_v24 = vadd.f32 %v117_v22, %v116_v20  ;;  %95 = vst.msk [vmem:[%s253_s2 + $0xc] sm:$0xf] %vm91_vm1, %v90_v18  ;;  %v101_v25 = vadd.f32 %v100_v21, %v99_v19  ;;  %v121_v30 = vsel %vm96_vm2, %v115_v23, 0.0 }
  0x9c   :  { %v103_v28 = vadd.f32 %v102_v27, %v101_v25  ;;  %v120_v29 = vadd.f32 %v119_v26, %v118_v24 }
  0x9e   :  { %v104_v31 = vrot.slane %v103_v28, 4  ;;  %v122_v32 = vadd.f32 %v121_v30, %v120_v29 }
  0xa0   :  { %v105_v33 = vadd.f32 %v104_v31, %v103_v28  ;;  %v123_v34 = vrot.slane %v122_v32, 4 }
  0xa2   :  { %v106_v35 = vrot.slane %v105_v33, 2  ;;  %v124_v36 = vadd.f32 %v123_v34, %v122_v32 }
  0xa4   :  { %v107_v37 = vadd.f32 %v106_v35, %v105_v33  ;;  %v125_v38 = vrot.slane %v124_v36, 2 }
  0xa6   :  { %v108_v39 = vrot.slane %v107_v37, 1  ;;  %v126_v40 = vadd.f32 %v125_v38, %v124_v36 }
  0xa8   :  { %v109_v41 = vadd.f32 %v108_v39, %v107_v37  ;;  %v127_v42 = vrot.slane %v126_v40, 1 }
  0xaa   :  { %111 = vst.msk [vmem:[%s254_s3] sm:$0x1] %vm110_vm3, %v109_v41  ;;  %v128_v43 = vadd.f32 %v127_v42, %v126_v40 }
  0xac   :  { %129 = vst.msk [vmem:[%s255_s4] sm:$0x1] %vm110_vm3, %v128_v43 }

// kernel: resnet_ae_forward.83
= control target key start
LH: loop header
LB: loop body
LE: loop exit
PB: predicated region body
PF: predicated region fallthrough
CT: control target
= control target key end

     0   :  { %vm31_vm0 = vcmask 1041408   ;;  %vm33_vm1 = vcmask 1045508   ;;  %vm35_vm2 = vcmask 1043456   ;;  %vm77_vm3 = vcmask 1040384   ;;  %s147_s0 = inlined_call_operand.vmem [shape: bf16[2,512], index: 0, kind: input, shape index: {}]   ;;  %s148_s1 = inlined_call_operand.vmem [shape: f32[1,512], index: 1, kind: input, shape index: {}]   ;;  %s149_s2 = inlined_call_operand.vmem [shape: f32[1,512], index: 2, kind: input, shape index: {}]   ;;  %s150_s3 = inlined_call_operand.vmem [shape: bf16[2,512], index: 3, kind: input, shape index: {}]   ;;  %s151_s4 = inlined_call_operand.vmem [shape: bf16[2,512], index: 4, kind: input, shape index: {}]   ;;  %s152_s5 = inlined_call_operand.vmem [shape: bf16[2,512], index: 5, kind: output, shape index: {}]  }
   0x1   :  { %v22_v0 = vld [vmem:[%s148_s1] sm:$0xf]  ;;  %vm81_vm4 = vcmask 1042434  }
   0x2   :  { %v39_v1 = vld [vmem:[%s149_s2] sm:$0xf]  ;;  %v24_v3 = vperm.slane %v22_v0, 0  ;;  %v25_v4 = vperm.slane %v22_v0, 1  ;;  %v26_v5 = vperm.slane %v22_v0, 2  ;;  %v27_v6 = vperm.slane %v22_v0, 3 }
   0x3   :  { %v20_v2 = vld [vmem:[%s147_s0] sm:$0xf]  ;;  %v41_v7 = vperm.slane %v39_v1, 0  ;;  %v42_v8 = vperm.slane %v39_v1, 1  ;;  %v43_v9 = vperm.slane %v39_v1, 2  ;;  %v44_v12 = vperm.slane %v39_v1, 3 }
   0x4   :  { %v28_v10 = vrot.slane %v25_v4, 6  ;;  %v29_v11 = vrot.slane %v26_v5, 4  ;;  %v21_v13 = vunpack.c.l.bf16 %v20_v2  ;;  %v30_v14 = vrot.slane %v27_v6, 2  ;;  %v54_v23 = vld [vmem:[%s150_s3] sm:$0xf] }
   0x5   :  { %v45_v15 = vrot.slane %v42_v8, 6  ;;  %v46_v16 = vrot.slane %v43_v9, 4  ;;  %v47_v18 = vrot.slane %v44_v12, 2  ;;  %v57_v26 = vld [vmem:[%s151_s4] sm:$0xf]  ;;  %v55_v28 = vunpack.c.l.bf16 %v54_v23 }
   0x6   :  { %v32_v17 = vsel %vm31_vm0, %v24_v3, %v28_v10  ;;  %v34_v19 = vsel %vm33_vm1, %v29_v11, %v30_v14  ;;  %v58_v30 = vunpack.c.l.bf16 %v57_v26 }
   0x7   :  { %v48_v20 = vsel %vm31_vm0, %v41_v7, %v45_v15  ;;  %v36_v21 = vsel %vm35_vm2, %v32_v17, %v34_v19  ;;  %v49_v22 = vsel %vm33_vm1, %v46_v16, %v47_v18 }
   0x8   :  { %v38_v24 = vmul.f32 %v36_v21, %v21_v13  ;;  %v50_v25 = vsel %vm35_vm2, %v48_v20, %v49_v22 }
   0xa   :  { %v52_v27 = vadd.f32 %v50_v25, %v38_v24 }
   0xc   :  { %v53_v29 = vmax.f32 %v52_v27, 0.0 }
   0xe   :  { %v56_v31 = vadd.f32 %v55_v28, %v53_v29 }
  0x10   :  { %v59_v32 = vadd.f32 %v58_v30, %v56_v31 }
  0x12   :  { %61 = vst [vmem:[#allocation1] ss:$4 sm:$0xff] %v59_v32 }
  0x19   :  { %v62_v33 = vld.sshfl [vmem:[#allocation1] sm:$0xff pattern:$0x73625140]  ;;  %v63_v34 = vld.sshfl [vmem:[#allocation1 + $0x8] sm:$0xff pattern:$0x73625140] }
  0x1a   :  { %v64_v35 = vld.sshfl [vmem:[#allocation1 + $0x10] sm:$0xff pattern:$0x73625140]  ;;  %v65_v36 = vld.sshfl [vmem:[#allocation1 + $0x18] sm:$0xff pattern:$0x73625140]  ;;  %v70_v37 = vpack.c.bf16 %v63_v34, %v62_v33 }
  0x1b   :  { %v71_v38 = vpack.c.bf16 %v65_v36, %v64_v35 }
  0x1c   :  { %v74_v39 = vrot.slane %v70_v37, 3 }
  0x1d   :  { %v75_v40 = vrot.slane %v71_v38, 6  ;;  %v76_v41 = vrot.slane %v71_v38, 1 }
  0x1e   :  { %v80_v42 = vsel %vm77_vm3, %v70_v37, %v74_v39 }
  0x1f   :  { %v84_v43 = vsel %vm81_vm4, %v75_v40, %v76_v41 }
  0x20   :  { %v85_v44 = vsel %vm31_vm0, %v80_v42, %v84_v43 }
  0x21   :  { %87 = vst [vmem:[%s152_s5] sm:$0xf] %v85_v44 }

// kernel: resnet_ae_forward.73
= control target key start
LH: loop header
LB: loop body
LE: loop exit
PB: predicated region body
PF: predicated region fallthrough
CT: control target
= control target key end

     0   :  { %vm117_vm0 = vcmask 257024   ;;  %vm122_vm1 = vcmask 261120   ;;  %vm136_vm2 = vcmask 253952   ;;  %s311_s1 = inlined_call_operand.vmem [shape: bf16[128,32], index: 1, kind: input, shape index: {}]   ;;  %s312_s0 = inlined_call_operand.vmem [shape: bf16[32,128], index: 0, kind: input, shape index: {}]   ;;  %s313_s2 = inlined_call_operand.vmem [shape: bf16[32,32], index: 2, kind: output, shape index: {0}]   ;;  %s314_s3 = inlined_call_operand.vmem [shape: f32[1,1,32], index: 3, kind: output, shape index: {1}]   ;;  %s315_s4 = inlined_call_operand.vmem [shape: f32[1,1,32], index: 4, kind: output, shape index: {2}]  }
   0x1   :  { %v217_v0 = vld [vmem:[%s311_s1 + $0x38] sm:$0xff]  ;;  %v216_v1 = vld [vmem:[%s311_s1 + $0x30] sm:$0xff]  ;;  %v215_v2 = vld [vmem:[%s311_s1 + $0x28] sm:$0xff] }
   0x2   :  { %94 = vmatpush.bf16.msra.mxu0 %v217_v0  ;;  %218 = vmatpush.bf16.msra.mxu1 %v217_v0  ;;  %v214_v3 = vld [vmem:[%s311_s1 + $0x20] sm:$0xff]  ;;  %v213_v4 = vld [vmem:[%s311_s1 + $0x18] sm:$0xff]  ;;  %v212_v5 = vld [vmem:[%s311_s1 + $0x10] sm:$0xff] }
   0x3   :  { %v211_v6 = vld [vmem:[%s311_s1 + $0x8] sm:$0xff]  ;;  %v210_v7 = vld [vmem:[%s311_s1] sm:$0xff] }
   0x4   :  { %v208_v8 = vld [vmem:[%s312_s0] sm:$0xff]  ;;  %v209_v9 = vld [vmem:[%s312_s0 + $0x8] sm:$0xff] }
   0x6   :  { %95 = vmatpush.bf16.msra.mxu0 %v216_v1  ;;  %219 = vmatpush.bf16.msra.mxu1 %v216_v1 }
   0xa   :  { %96 = vmatpush.bf16.msra.mxu0 %v215_v2  ;;  %220 = vmatpush.bf16.msra.mxu1 %v215_v2 }
   0xe   :  { %97 = vmatpush.bf16.msra.mxu0 %v214_v3  ;;  %221 = vmatpush.bf16.msra.mxu1 %v214_v3 }
  0x12   :  { %98 = vmatpush.bf16.msra.mxu0 %v213_v4  ;;  %222 = vmatpush.bf16.msra.mxu1 %v213_v4 }
  0x16   :  { %99 = vmatpush.bf16.msra.mxu0 %v212_v5  ;;  %223 = vmatpush.bf16.msra.mxu1 %v212_v5 }
  0x1a   :  { %100 = vmatpush.bf16.msra.mxu0 %v211_v6  ;;  %224 = vmatpush.bf16.msra.mxu1 %v211_v6 }
  0x1e   :  { %101 = vmatpush.bf16.msra.mxu0 %v210_v7  ;;  %225 = vmatpush.bf16.msra.mxu1 %v210_v7 }
  0x21   :  { %102 = vmatmul.bf16.vlgmr.msra.gmra.mxu0 %v208_v8  ;;  %107 = vmatmul.bf16.vlgmr.msra.gmra.mxu1 %v209_v9 }
  0x9e   :  { %v103_v10 = vpop.f32.mrf.mxu0  ;;  %v108_v11 = vpop.f32.mrf.mxu1 }
  0x9f   :  { %v113_v12 = vpack.c.bf16 %v103_v10, %v103_v10  ;;  %v115_v13 = vpack.c.bf16 %v108_v11, %v108_v11  ;;  %v138_v14 = vmul.f32 %v103_v10, %v103_v10  ;;  %v123_v15 = vsel %vm122_vm1, %v103_v10, 0.0 }
  0xa0   :  { %v140_v16 = vmul.f32 %v108_v11, %v108_v11  ;;  %v126_v25 = vsel %vm122_vm1, %v108_v11, 0.0 }
  0xa1   :  { %118 = vst.msk [vmem:[%s313_s2] sm:$0xf] %vm117_vm0, %v113_v12  ;;  %v142_v24 = vsel %vm122_vm1, %v138_v14, 0.0 }
  0xa2   :  { %120 = vst.msk [vmem:[%s313_s2 + $0x8] sm:$0xf] %vm117_vm0, %v115_v13  ;;  %v145_v30 = vsel %vm122_vm1, %v140_v16, 0.0 }
  0xa6   :  { %v105_v17 = vpop.f32.mrf.mxu0  ;;  %v110_v18 = vpop.f32.mrf.mxu1 }
  0xa7   :  { %v114_v19 = vpack.c.bf16 %v105_v17, %v105_v17  ;;  %v124_v20 = vsel %vm122_vm1, %v105_v17, 0.0  ;;  %v139_v21 = vmul.f32 %v105_v17, %v105_v17  ;;  %v116_v22 = vpack.c.bf16 %v110_v18, %v110_v18 }
  0xa8   :  { %v125_v23 = vadd.f32 %v124_v20, %v123_v15  ;;  %v141_v27 = vmul.f32 %v110_v18, %v110_v18  ;;  %v128_v31 = vsel %vm122_vm1, %v110_v18, 0.0 }
  0xa9   :  { %119 = vst.msk [vmem:[%s313_s2 + $0x4] sm:$0xf] %vm117_vm0, %v114_v19  ;;  %v143_v26 = vsel %vm122_vm1, %v139_v21, 0.0 }
  0xaa   :  { %v144_v28 = vadd.f32 %v143_v26, %v142_v24  ;;  %121 = vst.msk [vmem:[%s313_s2 + $0xc] sm:$0xf] %vm117_vm0, %v116_v22  ;;  %v127_v29 = vadd.f32 %v126_v25, %v125_v23  ;;  %v147_v34 = vsel %vm122_vm1, %v141_v27, 0.0 }
  0xac   :  { %v129_v32 = vadd.f32 %v128_v31, %v127_v29  ;;  %v146_v33 = vadd.f32 %v145_v30, %v144_v28 }
  0xae   :  { %v130_v35 = vrot.slane %v129_v32, 4  ;;  %v148_v36 = vadd.f32 %v147_v34, %v146_v33 }
  0xb0   :  { %v131_v37 = vadd.f32 %v130_v35, %v129_v32  ;;  %v149_v38 = vrot.slane %v148_v36, 4 }
  0xb2   :  { %v132_v39 = vrot.slane %v131_v37, 2  ;;  %v150_v40 = vadd.f32 %v149_v38, %v148_v36 }
  0xb4   :  { %v133_v41 = vadd.f32 %v132_v39, %v131_v37  ;;  %v151_v42 = vrot.slane %v150_v40, 2 }
  0xb6   :  { %v134_v43 = vrot.slane %v133_v41, 1  ;;  %v152_v44 = vadd.f32 %v151_v42, %v150_v40 }
  0xb8   :  { %v135_v45 = vadd.f32 %v134_v43, %v133_v41  ;;  %v153_v46 = vrot.slane %v152_v44, 1 }
  0xba   :  { %137 = vst.msk [vmem:[%s314_s3] sm:$0x1] %vm136_vm2, %v135_v45  ;;  %v154_v47 = vadd.f32 %v153_v46, %v152_v44 }
  0xbc   :  { %155 = vst.msk [vmem:[%s315_s4] sm:$0x1] %vm136_vm2, %v154_v47 }

// kernel: resnet_ae_forward.84
= control target key start
LH: loop header
LB: loop body
LE: loop exit
PB: predicated region body
PF: predicated region fallthrough
CT: control target
= control target key end

     0   :  { %vm201_vm0 = vcmask 261120   ;;  %vm269_vm1 = vcmask 125952   ;;  %s540_s1 = inlined_call_operand.vmem [shape: bf16[288,16], index: 1, kind: input, shape index: {}]   ;;  %s541_s0 = inlined_call_operand.vmem [shape: bf16[32,288], index: 0, kind: input, shape index: {}]   ;;  %s542_s2 = inlined_call_operand.vmem [shape: f32[1,16], index: 2, kind: input, shape index: {}]   ;;  %s543_s3 = inlined_call_operand.vmem [shape: bf16[32,16], index: 3, kind: output, shape index: {}]  }
   0x1   :  { %v389_v0 = vld [vmem:[%s540_s1 + $0x38] sm:$0xff]  ;;  %v388_v2 = vld [vmem:[%s540_s1 + $0x30] sm:$0xff]  ;;  %v399_v3 = vld [vmem:[%s540_s1 + $0x88] sm:$0xff] }
   0x2   :  { %v397_v1 = vld [vmem:[%s540_s1 + $0x78] sm:$0xff]  ;;  %208 = vmatpush.bf16.msra.mxu0 %v389_v0  ;;  %400 = vmatpush.bf16.msra.mxu3 %v389_v0  ;;  %v396_v4 = vld [vmem:[%s540_s1 + $0x70] sm:$0xff]  ;;  %v398_v5 = vld [vmem:[%s540_s1 + $0x80] sm:$0xff] }
   0x3   :  { %227 = vmatpush.bf16.msra.mxu1 %v397_v1  ;;  %252 = vmatpush.bf16.msra.mxu2 %v399_v3  ;;  %v288_v6 = vld [vmem:[%s541_s0 + $0x8] sm:$0xf]  ;;  %v378_v7 = vld [vmem:[%s541_s0 + $0x10] sm:$0xf0]  ;;  %v386_v11 = vld [vmem:[%s540_s1 + $0x20] sm:$0xff] }
   0x4   :  { %v387_v8 = vld [vmem:[%s540_s1 + $0x28] sm:$0xff]  ;;  %v289_v10 = vor.u32 %v378_v7, %v288_v6  ;;  %v394_v12 = vld [vmem:[%s540_s1 + $0x60] sm:$0xff]  ;;  %v385_v13 = vld [vmem:[%s540_s1 + $0x18] sm:$0xff] }
   0x5   :  { %v395_v9 = vld [vmem:[%s540_s1 + $0x68] sm:$0xff]  ;;  %v393_v14 = vld [vmem:[%s540_s1 + $0x58] sm:$0xff]  ;;  %v384_v15 = vld [vmem:[%s540_s1 + $0x10] sm:$0xff] }
   0x6   :  { %209 = vmatpush.bf16.msra.mxu0 %v388_v2  ;;  %401 = vmatpush.bf16.msra.mxu3 %v388_v2  ;;  %v392_v16 = vld [vmem:[%s540_s1 + $0x50] sm:$0xff]  ;;  %v300_v17 = vld [vmem:[%s541_s0 + $0x20] sm:$0xf]  ;;  %v381_v18 = vld [vmem:[%s541_s0 + $0x28] sm:$0xf0] }
   0x7   :  { %228 = vmatpush.bf16.msra.mxu1 %v396_v4  ;;  %253 = vmatpush.bf16.msra.mxu2 %v398_v5  ;;  %v383_v19 = vld [vmem:[%s540_s1 + $0x8] sm:$0xff]  ;;  %v301_v21 = vor.u32 %v381_v18, %v300_v17  ;;  %v382_v22 = vld [vmem:[%s540_s1] sm:$0xff]  ;;  %v292_v25 = vld [vmem:[%s541_s0 + $0x18] sm:$0xf] }
   0x8   :  { %v391_v20 = vld [vmem:[%s540_s1 + $0x48] sm:$0xff]  ;;  %v280_v23 = vld [vmem:[%s541_s0] sm:$0xf]  ;;  %v380_v26 = vld [vmem:[%s541_s0 + $0x20] sm:$0xf0] }
   0x9   :  { %v377_v24 = vld [vmem:[%s541_s0 + $0x8] sm:$0xf0]  ;;  %v390_v27 = vld [vmem:[%s540_s1 + $0x40] sm:$0xff]  ;;  %v282_v29 = vld [vmem:[%s541_s0 + $0xc] sm:$0xf0]  ;;  %v293_v31 = vor.u32 %v380_v26, %v292_v25 }
   0xa   :  { %210 = vmatpush.bf16.msra.mxu0 %v387_v8  ;;  %402 = vmatpush.bf16.msra.mxu3 %v387_v8  ;;  %v376_v28 = vld [vmem:[%s541_s0 + $0x4] sm:$0xf]  ;;  %v281_v30 = vor.u32 %v377_v24, %v280_v23  ;;  %v379_v33 = vld [vmem:[%s541_s0 + $0x1c] sm:$0xf]  ;;  %v294_v34 = vld [vmem:[%s541_s0 + $0x24] sm:$0xf0] }
   0xb   :  { %229 = vmatpush.bf16.msra.mxu1 %v395_v9  ;;  %374 = vmatmul.msk.bf16.vlgmr.msra.gmra.mxu2 %vm201_vm0, %v289_v10  ;;  %v285_v32 = vor.u32 %v376_v28, %v282_v29  ;;  %v297_v35 = vor.u32 %v379_v33, %v294_v34  ;;  %v408_v37 = vld [vmem:[%s542_s2] ss:$0 sm:$0xff] }
   0xe   :  { %211 = vmatpush.bf16.msra.mxu0 %v386_v11  ;;  %403 = vmatpush.bf16.msra.mxu3 %v386_v11 }
   0xf   :  { %230 = vmatpush.bf16.msra.mxu1 %v394_v12 }
  0x12   :  { %212 = vmatpush.bf16.msra.mxu0 %v385_v13  ;;  %404 = vmatpush.bf16.msra.mxu3 %v385_v13 }
  0x13   :  { %231 = vmatpush.bf16.msra.mxu1 %v393_v14 }
  0x16   :  { %213 = vmatpush.bf16.msra.mxu0 %v384_v15  ;;  %405 = vmatpush.bf16.msra.mxu3 %v384_v15 }
  0x17   :  { %232 = vmatpush.bf16.msra.mxu1 %v392_v16 }
  0x1a   :  { %214 = vmatpush.bf16.msra.mxu0 %v383_v19  ;;  %406 = vmatpush.bf16.msra.mxu3 %v383_v19 }
  0x1b   :  { %233 = vmatpush.bf16.msra.mxu1 %v391_v20  ;;  %375 = vmatmul.msk.bf16.gmra.mxu2 %vm201_vm0, %v301_v21 }
  0x1e   :  { %215 = vmatpush.bf16.msra.mxu0 %v382_v22  ;;  %407 = vmatpush.bf16.msra.mxu3 %v382_v22 }
  0x1f   :  { %234 = vmatpush.bf16.msra.mxu1 %v390_v27 }
  0x21   :  { %216 = vmatmul.bf16.vlgmr.msra.gmra.mxu0 %v281_v30  ;;  %221 = vmatmul.bf16.vlgmr.msra.gmra.mxu3 %v293_v31 }
  0x22   :  { %235 = vmatmul.bf16.vlgmr.msra.gmra.mxu1 %v285_v32 }
  0x32   :  { %240 = vmatmul.bf16.gmra.mxu1 %v297_v35 }
  0x8e   :  { %v255_v36 = vpop.f32.mrf.mxu2 }
  0x96   :  { %v257_v44 = vpop.f32.mrf.mxu2 }
  0x9e   :  { %v217_v38 = vpop.f32.mrf.mxu0  ;;  %v260_v53 = vpop.f32.mrf.mxu2 }
  0x9f   :  { %v218_v39 = vadd.f32 %v408_v37, %v217_v38  ;;  %v236_v40 = vpop.f32.mrf.mxu1 }
  0xa1   :  { %v237_v41 = vadd.f32 %v236_v40, %v218_v39 }
  0xa3   :  { %v256_v42 = vadd.f32 %v255_v36, %v237_v41 }
  0xa4   :  { %v222_v48 = vpop.f32.mrf.mxu3 }
  0xa5   :  { %v265_v43 = vpack.c.bf16 %v256_v42, %v256_v42  ;;  %v223_v51 = vadd.f32 %v408_v37, %v222_v48 }
  0xa6   :  { %v219_v45 = vpop.f32.mrf.mxu0  ;;  %v262_v62 = vpop.f32.mrf.mxu2 }
  0xa7   :  { %270 = vst.msk [vmem:[%s543_s3] sm:$0xf] %vm269_vm1, %v265_v43  ;;  %v220_v46 = vadd.f32 %v408_v37, %v219_v45  ;;  %v238_v47 = vpop.f32.mrf.mxu1 }
  0xa9   :  { %v239_v49 = vadd.f32 %v238_v47, %v220_v46 }
  0xab   :  { %v258_v50 = vadd.f32 %v257_v44, %v239_v49 }
  0xac   :  { %v224_v57 = vpop.f32.mrf.mxu3 }
  0xad   :  { %v266_v52 = vpack.c.bf16 %v258_v50, %v258_v50  ;;  %v225_v59 = vadd.f32 %v408_v37, %v224_v57 }
  0xaf   :  { %271 = vst.msk [vmem:[%s543_s3 + $0x4] sm:$0xf] %vm269_vm1, %v266_v52  ;;  %v241_v54 = vpop.f32.mrf.mxu1 }
  0xb0   :  { %v242_v55 = vadd.f32 %v241_v54, %v223_v51 }
  0xb2   :  { %v261_v56 = vadd.f32 %v260_v53, %v242_v55 }
  0xb4   :  { %v267_v58 = vpack.c.bf16 %v261_v56, %v261_v56 }
  0xb6   :  { %272 = vst.msk [vmem:[%s543_s3 + $0x8] sm:$0xf] %vm269_vm1, %v267_v58 }
  0xb7   :  { %v243_v60 = vpop.f32.mrf.mxu1 }
  0xb8   :  { %v244_v61 = vadd.f32 %v243_v60, %v225_v59 }
  0xba   :  { %v263_v63 = vadd.f32 %v262_v62, %v244_v61 }
  0xbc   :  { %v268_v0 = vpack.c.bf16 %v263_v63, %v263_v63 }
  0xbe   :  { %273 = vst.msk [vmem:[%s543_s3 + $0xc] sm:$0xf] %vm269_vm1, %v268_v0 }

// kernel: resnet_ae_forward.102
= control target key start
LH: loop header
LB: loop body
LE: loop exit
PB: predicated region body
PF: predicated region fallthrough
CT: control target
= control target key end

     0   :  { %vm391_vm0 = vcmask 1045504   ;;  %vm294_vm1 = vcmask 883712   ;;  %vm628_vm2 = vcmask 60416   ;;  %vm693_vm3 = vcmask 64512   ;;  %s2238_s1 = inlined_call_operand.vmem [shape: bf16[108,8], index: 1, kind: input, shape index: {}]   ;;  %s2239_s0 = inlined_call_operand.vmem [shape: bf16[512,108], index: 0, kind: input, shape index: {}]   ;;  %s2240_s2 = inlined_call_operand.vmem [shape: bf16[512,8], index: 2, kind: output, shape index: {0}]   ;;  %s2241_s3 = inlined_call_operand.vmem [shape: f32[1,1,8], index: 3, kind: output, shape index: {1}]   ;;  %s2242_s4 = inlined_call_operand.vmem [shape: f32[1,1,8], index: 4, kind: output, shape index: {2}]  }
   0x1   :  { %v1193_v0 = vld [vmem:[%s2238_s1 + $0x30] sm:$0xf]  ;;  %v1265_v1 = vld [vmem:[%s2238_s1 + $0x30] sm:$0x30]  ;;  %v1264_v4 = vld [vmem:[%s2238_s1 + $0x28] sm:$0xff]  ;;  %vm827_vm4 = vcmask 57344  }
   0x2   :  { %v1194_v2 = vor.u32 %v1265_v1, %v1193_v0  ;;  %v1263_v5 = vld [vmem:[%s2238_s1 + $0x20] sm:$0xff]  ;;  %v1262_v6 = vld [vmem:[%s2238_s1 + $0x18] sm:$0xff]  ;;  %v1261_v7 = vld [vmem:[%s2238_s1 + $0x10] sm:$0xff] }
   0x3   :  { %v1260_v8 = vld [vmem:[%s2238_s1 + $0x8] sm:$0xff]  ;;  %v1259_v9 = vld [vmem:[%s2238_s1] sm:$0xff]  ;;  %v1229_v15 = vld [vmem:[%s2239_s0 + $0x10] sm:$0xff] }
   0x4   :  { %v393_v3 = vsel %vm391_vm0, %v1194_v2, 0  ;;  %v1227_v10 = vld [vmem:[%s2239_s0] sm:$0xff]  ;;  %v1228_v12 = vld [vmem:[%s2239_s0 + $0x8] sm:$0xff]  ;;  %v1237_v16 = vld [vmem:[%s2239_s0 + $0x50] sm:$0xff] }
   0x5   :  { %396 = vmatpush.bf16.msra.mxu0 %v393_v3  ;;  %1266 = vmatpush.bf16.msra.mxu1 %v393_v3  ;;  %v1235_v11 = vld [vmem:[%s2239_s0 + $0x40] sm:$0xff]  ;;  %v1236_v13 = vld [vmem:[%s2239_s0 + $0x48] sm:$0xff]  ;;  %v1230_v18 = vld [vmem:[%s2239_s0 + $0x18] sm:$0xff] }
   0x6   :  { %1267 = vmatpush.bf16.msra.mxu2 %v393_v3  ;;  %1268 = vmatpush.bf16.msra.mxu3 %v393_v3  ;;  %v1243_v14 = vld [vmem:[%s2239_s0 + $0x80] sm:$0xff]  ;;  %v1244_v17 = vld [vmem:[%s2239_s0 + $0x88] sm:$0xff]  ;;  %v1238_v19 = vld [vmem:[%s2239_s0 + $0x58] sm:$0xff] }
   0x7   :  { %v1245_v20 = vld [vmem:[%s2239_s0 + $0x90] sm:$0xff]  ;;  %v1251_v21 = vld [vmem:[%s2239_s0 + $0xc0] sm:$0xff]  ;;  %v1246_v24 = vld [vmem:[%s2239_s0 + $0x98] sm:$0xff] }
   0x8   :  { %v1231_v22 = vld [vmem:[%s2239_s0 + $0x20] sm:$0xff]  ;;  %v1252_v25 = vld [vmem:[%s2239_s0 + $0xc8] sm:$0xff]  ;;  %v1253_v29 = vld [vmem:[%s2239_s0 + $0xd0] sm:$0xff] }
   0x9   :  { %397 = vmatpush.bf16.msra.mxu0 %v1264_v4  ;;  %1269 = vmatpush.bf16.msra.mxu1 %v1264_v4  ;;  %v1239_v23 = vld [vmem:[%s2239_s0 + $0x60] sm:$0xff]  ;;  %v1232_v26 = vld [vmem:[%s2239_s0 + $0x28] sm:$0xff]  ;;  %v1233_v30 = vld [vmem:[%s2239_s0 + $0x30] sm:$0xff] }
   0xa   :  { %1270 = vmatpush.bf16.msra.mxu2 %v1264_v4  ;;  %1271 = vmatpush.bf16.msra.mxu3 %v1264_v4  ;;  %v1240_v27 = vld [vmem:[%s2239_s0 + $0x68] sm:$0xff]  ;;  %v1247_v28 = vld [vmem:[%s2239_s0 + $0xa0] sm:$0xff]  ;;  %v1241_v31 = vld [vmem:[%s2239_s0 + $0x70] sm:$0xff] }
   0xb   :  { %v1248_v32 = vld [vmem:[%s2239_s0 + $0xa8] sm:$0xff]  ;;  %v1254_v33 = vld [vmem:[%s2239_s0 + $0xd8] sm:$0xff]  ;;  %v1249_v36 = vld [vmem:[%s2239_s0 + $0xb0] sm:$0xff] }
   0xc   :  { %v1234_v34 = vld [vmem:[%s2239_s0 + $0x38] sm:$0xff]  ;;  %v1255_v37 = vld [vmem:[%s2239_s0 + $0xe0] sm:$0xff]  ;;  %v1256_v43 = vld [vmem:[%s2239_s0 + $0xe8] sm:$0xff] }
   0xd   :  { %398 = vmatpush.bf16.msra.mxu0 %v1263_v5  ;;  %1272 = vmatpush.bf16.msra.mxu1 %v1263_v5  ;;  %v1242_v35 = vld [vmem:[%s2239_s0 + $0x78] sm:$0xff]  ;;  %v1257_v0 = vld [vmem:[%s2239_s0 + $0xf0] sm:$0xff] }
   0xe   :  { %1273 = vmatpush.bf16.msra.mxu2 %v1263_v5  ;;  %1274 = vmatpush.bf16.msra.mxu3 %v1263_v5  ;;  %v1250_v42 = vld [vmem:[%s2239_s0 + $0xb8] sm:$0xff] }
  0x11   :  { %399 = vmatpush.bf16.msra.mxu0 %v1262_v6  ;;  %1275 = vmatpush.bf16.msra.mxu1 %v1262_v6 }
  0x12   :  { %1276 = vmatpush.bf16.msra.mxu2 %v1262_v6  ;;  %1277 = vmatpush.bf16.msra.mxu3 %v1262_v6 }
  0x15   :  { %400 = vmatpush.bf16.msra.mxu0 %v1261_v7  ;;  %1278 = vmatpush.bf16.msra.mxu1 %v1261_v7 }
  0x16   :  { %1279 = vmatpush.bf16.msra.mxu2 %v1261_v7  ;;  %1280 = vmatpush.bf16.msra.mxu3 %v1261_v7 }
  0x19   :  { %401 = vmatpush.bf16.msra.mxu0 %v1260_v8  ;;  %1281 = vmatpush.bf16.msra.mxu1 %v1260_v8 }
  0x1a   :  { %1282 = vmatpush.bf16.msra.mxu2 %v1260_v8  ;;  %1283 = vmatpush.bf16.msra.mxu3 %v1260_v8 }
  0x1d   :  { %402 = vmatpush.bf16.msra.mxu0 %v1259_v9  ;;  %1284 = vmatpush.bf16.msra.mxu1 %v1259_v9 }
  0x1e   :  { %1285 = vmatpush.bf16.msra.mxu2 %v1259_v9  ;;  %1286 = vmatpush.bf16.msra.mxu3 %v1259_v9 }
  0x20   :  { %1195 = vmatmul.msk.bf16.vlgmr.msra.gmra.mxu0 %vm294_vm1, %v1227_v10  ;;  %1203 = vmatmul.msk.bf16.vlgmr.msra.gmra.mxu1 %vm294_vm1, %v1235_v11 }
  0x21   :  { %1211 = vmatmul.msk.bf16.vlgmr.msra.gmra.mxu2 %vm294_vm1, %v1243_v14  ;;  %1219 = vmatmul.msk.bf16.vlgmr.msra.gmra.mxu3 %vm294_vm1, %v1251_v21 }
  0x30   :  { %1196 = vmatmul.msk.bf16.gmra.mxu0 %vm294_vm1, %v1228_v12  ;;  %1204 = vmatmul.msk.bf16.gmra.mxu1 %vm294_vm1, %v1236_v13 }
  0x31   :  { %1212 = vmatmul.msk.bf16.gmra.mxu2 %vm294_vm1, %v1244_v17  ;;  %1220 = vmatmul.msk.bf16.gmra.mxu3 %vm294_vm1, %v1252_v25 }
  0x40   :  { %1197 = vmatmul.msk.bf16.gmra.mxu0 %vm294_vm1, %v1229_v15  ;;  %1205 = vmatmul.msk.bf16.gmra.mxu1 %vm294_vm1, %v1237_v16 }
  0x41   :  { %1213 = vmatmul.msk.bf16.gmra.mxu2 %vm294_vm1, %v1245_v20  ;;  %1221 = vmatmul.msk.bf16.gmra.mxu3 %vm294_vm1, %v1253_v29 }
  0x50   :  { %1198 = vmatmul.msk.bf16.gmra.mxu0 %vm294_vm1, %v1230_v18  ;;  %1206 = vmatmul.msk.bf16.gmra.mxu1 %vm294_vm1, %v1238_v19 }
  0x51   :  { %1214 = vmatmul.msk.bf16.gmra.mxu2 %vm294_vm1, %v1246_v24  ;;  %1222 = vmatmul.msk.bf16.gmra.mxu3 %vm294_vm1, %v1254_v33 }
  0x60   :  { %1199 = vmatmul.msk.bf16.gmra.mxu0 %vm294_vm1, %v1231_v22  ;;  %1207 = vmatmul.msk.bf16.gmra.mxu1 %vm294_vm1, %v1239_v23  ;;  %v1258_v23 = vld [vmem:[%s2239_s0 + $0xf8] sm:$0xff] }
  0x61   :  { %1215 = vmatmul.msk.bf16.gmra.mxu2 %vm294_vm1, %v1247_v28  ;;  %1223 = vmatmul.msk.bf16.gmra.mxu3 %vm294_vm1, %v1255_v37 }
  0x70   :  { %1200 = vmatmul.msk.bf16.gmra.mxu0 %vm294_vm1, %v1232_v26  ;;  %1208 = vmatmul.msk.bf16.gmra.mxu1 %vm294_vm1, %v1240_v27 }
  0x71   :  { %1216 = vmatmul.msk.bf16.gmra.mxu2 %vm294_vm1, %v1248_v32  ;;  %1224 = vmatmul.msk.bf16.gmra.mxu3 %vm294_vm1, %v1256_v43 }
  0x80   :  { %1201 = vmatmul.msk.bf16.gmra.mxu0 %vm294_vm1, %v1233_v30  ;;  %1209 = vmatmul.msk.bf16.gmra.mxu1 %vm294_vm1, %v1241_v31 }
  0x81   :  { %1217 = vmatmul.msk.bf16.gmra.mxu2 %vm294_vm1, %v1249_v36  ;;  %1225 = vmatmul.msk.bf16.gmra.mxu3 %vm294_vm1, %v1257_v0 }
  0x90   :  { %1202 = vmatmul.msk.bf16.gmra.mxu0 %vm294_vm1, %v1234_v34  ;;  %1210 = vmatmul.msk.bf16.gmra.mxu1 %vm294_vm1, %v1242_v35 }
  0x91   :  { %1218 = vmatmul.msk.bf16.gmra.mxu2 %vm294_vm1, %v1250_v42  ;;  %1226 = vmatmul.msk.bf16.gmra.mxu3 %vm294_vm1, %v1258_v23 }
  0x9d   :  { %v404_v38 = vpop.f32.mrf.mxu0  ;;  %v1448_v39 = vpop.f32.mrf.mxu1 }
  0x9e   :  { %v564_v40 = vpack.c.bf16 %v404_v38, %v404_v38  ;;  %v580_v41 = vpack.c.bf16 %v1448_v39, %v1448_v39  ;;  %v829_v44 = vmul.f32 %v404_v38, %v404_v38  ;;  %v694_v45 = vsel %vm693_vm3, %v404_v38, 0.0 }
  0xa0   :  { %629 = vst.msk [vmem:[%s2240_s2] sm:$0xf] %vm628_vm2, %v564_v40  ;;  %v893_v53 = vsel %vm693_vm3, %v829_v44, 0.0 }
  0xa1   :  { %645 = vst.msk [vmem:[%s2240_s2 + $0x40] sm:$0xf] %vm628_vm2, %v580_v41 }
  0xa4   :  { %v1507_v8 = vpop.f32.mrf.mxu2  ;;  %v1612_v43 = vpop.f32.mrf.mxu3 }
  0xa5   :  { %v406_v46 = vpop.f32.mrf.mxu0  ;;  %v1469_v47 = vpop.f32.mrf.mxu1  ;;  %v596_v12 = vpack.c.bf16 %v1507_v8, %v1507_v8 }
  0xa6   :  { %v565_v48 = vpack.c.bf16 %v406_v46, %v406_v46  ;;  %v695_v49 = vsel %vm693_vm3, %v406_v46, 0.0  ;;  %v830_v50 = vmul.f32 %v406_v46, %v406_v46  ;;  %v581_v51 = vpack.c.bf16 %v1469_v47, %v1469_v47 }
  0xa7   :  { %v696_v52 = vadd.f32 %v695_v49, %v694_v45  ;;  %661 = vst.msk [vmem:[%s2240_s2 + $0x80] sm:$0xf] %vm628_vm2, %v596_v12  ;;  %v612_v45 = vpack.c.bf16 %v1612_v43, %v1612_v43 }
  0xa8   :  { %630 = vst.msk [vmem:[%s2240_s2 + $0x4] sm:$0xf] %vm628_vm2, %v565_v48  ;;  %v894_v54 = vsel %vm693_vm3, %v830_v50, 0.0 }
  0xa9   :  { %v895_v55 = vadd.f32 %v894_v54, %v893_v53  ;;  %646 = vst.msk [vmem:[%s2240_s2 + $0x44] sm:$0xf] %vm628_vm2, %v581_v51 }
  0xaa   :  { %677 = vst.msk [vmem:[%s2240_s2 + $0xc0] sm:$0xf] %vm628_vm2, %v612_v45 }
  0xac   :  { %v1529_v19 = vpop.f32.mrf.mxu2 }
  0xad   :  { %v409_v56 = vpop.f32.mrf.mxu0  ;;  %v1484_v57 = vpop.f32.mrf.mxu1  ;;  %v597_v21 = vpack.c.bf16 %v1529_v19, %v1529_v19 }
  0xae   :  { %v566_v58 = vpack.c.bf16 %v409_v56, %v409_v56  ;;  %v697_v59 = vsel %vm693_vm3, %v409_v56, 0.0  ;;  %v831_v60 = vmul.f32 %v409_v56, %v409_v56  ;;  %v582_v61 = vpack.c.bf16 %v1484_v57, %v1484_v57 }
  0xaf   :  { %v698_v62 = vadd.f32 %v697_v59, %v696_v52  ;;  %662 = vst.msk [vmem:[%s2240_s2 + $0x84] sm:$0xf] %vm628_vm2, %v597_v21  ;;  %v1644_v52 = vpop.f32.mrf.mxu3 }
  0xb0   :  { %631 = vst.msk [vmem:[%s2240_s2 + $0x8] sm:$0xf] %vm628_vm2, %v566_v58  ;;  %v896_v63 = vsel %vm693_vm3, %v831_v60, 0.0  ;;  %v613_v54 = vpack.c.bf16 %v1644_v52, %v1644_v52 }
  0xb1   :  { %v897_v1 = vadd.f32 %v896_v63, %v895_v55  ;;  %647 = vst.msk [vmem:[%s2240_s2 + $0x48] sm:$0xf] %vm628_vm2, %v582_v61 }
  0xb2   :  { %678 = vst.msk [vmem:[%s2240_s2 + $0xc4] sm:$0xf] %vm628_vm2, %v613_v54 }
  0xb4   :  { %v1562_v29 = vpop.f32.mrf.mxu2 }
  0xb5   :  { %v411_v2 = vpop.f32.mrf.mxu0  ;;  %v1502_v3 = vpop.f32.mrf.mxu1  ;;  %v598_v30 = vpack.c.bf16 %v1562_v29, %v1562_v29 }
  0xb6   :  { %v567_v4 = vpack.c.bf16 %v411_v2, %v411_v2  ;;  %v699_v5 = vsel %vm693_vm3, %v411_v2, 0.0  ;;  %v832_v6 = vmul.f32 %v411_v2, %v411_v2  ;;  %v583_v7 = vpack.c.bf16 %v1502_v3, %v1502_v3 }
  0xb7   :  { %v700_v9 = vadd.f32 %v699_v5, %v698_v62  ;;  %663 = vst.msk [vmem:[%s2240_s2 + $0x88] sm:$0xf] %vm628_vm2, %v598_v30  ;;  %v1676_v61 = vpop.f32.mrf.mxu3 }
  0xb8   :  { %632 = vst.msk [vmem:[%s2240_s2 + $0xc] sm:$0xf] %vm628_vm2, %v567_v4  ;;  %v898_v10 = vsel %vm693_vm3, %v832_v6, 0.0  ;;  %v614_v63 = vpack.c.bf16 %v1676_v61, %v1676_v61 }
  0xb9   :  { %v899_v11 = vadd.f32 %v898_v10, %v897_v1  ;;  %648 = vst.msk [vmem:[%s2240_s2 + $0x4c] sm:$0xf] %vm628_vm2, %v583_v7 }
  0xba   :  { %679 = vst.msk [vmem:[%s2240_s2 + $0xc8] sm:$0xf] %vm628_vm2, %v614_v63 }
  0xbc   :  { %v1586_v35 = vpop.f32.mrf.mxu2 }
  0xbd   :  { %v414_v13 = vpop.f32.mrf.mxu0  ;;  %v1524_v14 = vpop.f32.mrf.mxu1  ;;  %v599_v36 = vpack.c.bf16 %v1586_v35, %v1586_v35 }
  0xbe   :  { %v568_v15 = vpack.c.bf16 %v414_v13, %v414_v13  ;;  %v701_v16 = vsel %vm693_vm3, %v414_v13, 0.0  ;;  %v833_v17 = vmul.f32 %v414_v13, %v414_v13  ;;  %v584_v18 = vpack.c.bf16 %v1524_v14, %v1524_v14 }
  0xbf   :  { %v1531_v20 = vadd.f32 %v701_v16, %v700_v9  ;;  %664 = vst.msk [vmem:[%s2240_s2 + $0x8c] sm:$0xf] %vm628_vm2, %v599_v36  ;;  %v1708_v6 = vpop.f32.mrf.mxu3 }
  0xc0   :  { %633 = vst.msk [vmem:[%s2240_s2 + $0x10] sm:$0xf] %vm628_vm2, %v568_v15  ;;  %v900_v22 = vsel %vm693_vm3, %v833_v17, 0.0  ;;  %v615_v9 = vpack.c.bf16 %v1708_v6, %v1708_v6 }
  0xc1   :  { %v1543_v24 = vadd.f32 %v900_v22, %v899_v11  ;;  %649 = vst.msk [vmem:[%s2240_s2 + $0x50] sm:$0xf] %vm628_vm2, %v584_v18 }
  0xc2   :  { %680 = vst.msk [vmem:[%s2240_s2 + $0xcc] sm:$0xf] %vm628_vm2, %v615_v9 }
  0xc4   :  { %v1610_v42 = vpop.f32.mrf.mxu2 }
  0xc5   :  { %v1554_v25 = vpop.f32.mrf.mxu0  ;;  %v1556_v26 = vpop.f32.mrf.mxu1  ;;  %v600_v44 = vpack.c.bf16 %v1610_v42, %v1610_v42 }
  0xc6   :  { %v569_v27 = vpack.c.bf16 %v1554_v25, %v1554_v25  ;;  %v585_v28 = vpack.c.bf16 %v1556_v26, %v1556_v26  ;;  %v834_v21 = vmul.f32 %v1554_v25, %v1554_v25 }
  0xc7   :  { %665 = vst.msk [vmem:[%s2240_s2 + $0x90] sm:$0xf] %vm628_vm2, %v600_v44  ;;  %v1736_v16 = vpop.f32.mrf.mxu3 }
  0xc8   :  { %634 = vst.msk [vmem:[%s2240_s2 + $0x14] sm:$0xf] %vm628_vm2, %v569_v27  ;;  %v616_v36 = vpack.c.bf16 %v1736_v16, %v1736_v16 }
  0xc9   :  { %650 = vst.msk [vmem:[%s2240_s2 + $0x54] sm:$0xf] %vm628_vm2, %v585_v28 }
  0xca   :  { %681 = vst.msk [vmem:[%s2240_s2 + $0xd0] sm:$0xf] %vm628_vm2, %v616_v36 }
  0xcc   :  { %v1642_v51 = vpop.f32.mrf.mxu2 }
  0xcd   :  { %v1578_v31 = vpop.f32.mrf.mxu0  ;;  %v1580_v32 = vpop.f32.mrf.mxu1  ;;  %v601_v53 = vpack.c.bf16 %v1642_v51, %v1642_v51 }
  0xce   :  { %v570_v33 = vpack.c.bf16 %v1578_v31, %v1578_v31  ;;  %v586_v34 = vpack.c.bf16 %v1580_v32, %v1580_v32 }
  0xcf   :  { %666 = vst.msk [vmem:[%s2240_s2 + $0x94] sm:$0xf] %vm628_vm2, %v601_v53  ;;  %v1754_v28 = vpop.f32.mrf.mxu3 }
  0xd0   :  { %635 = vst.msk [vmem:[%s2240_s2 + $0x18] sm:$0xf] %vm628_vm2, %v570_v33  ;;  %v703_v33 = vsel %vm693_vm3, %v1554_v25, 0.0  ;;  %v902_v25 = vsel %vm693_vm3, %v834_v21, 0.0 }
  0xd1   :  { %651 = vst.msk [vmem:[%s2240_s2 + $0x58] sm:$0xf] %vm628_vm2, %v586_v34  ;;  %v835_v34 = vmul.f32 %v1578_v31, %v1578_v31  ;;  %v704_v45 = vadd.f32 %v703_v33, %v1531_v20  ;;  %v903_v20 = vadd.f32 %v902_v25, %v1543_v24 }
  0xd4   :  { %v1674_v60 = vpop.f32.mrf.mxu2 }
  0xd5   :  { %v1602_v37 = vpop.f32.mrf.mxu0  ;;  %v1604_v38 = vpop.f32.mrf.mxu1  ;;  %v602_v62 = vpack.c.bf16 %v1674_v60, %v1674_v60 }
  0xd6   :  { %v571_v40 = vpack.c.bf16 %v1602_v37, %v1602_v37  ;;  %v587_v41 = vpack.c.bf16 %v1604_v38, %v1604_v38 }
  0xd7   :  { %667 = vst.msk [vmem:[%s2240_s2 + $0x98] sm:$0xf] %vm628_vm2, %v602_v62 }
  0xd8   :  { %636 = vst.msk [vmem:[%s2240_s2 + $0x1c] sm:$0xf] %vm628_vm2, %v571_v40  ;;  %v836_v40 = vmul.f32 %v1602_v37, %v1602_v37 }
  0xd9   :  { %652 = vst.msk [vmem:[%s2240_s2 + $0x5c] sm:$0xf] %vm628_vm2, %v587_v41  ;;  %v705_v41 = vsel %vm693_vm3, %v1578_v31, 0.0  ;;  %v904_v31 = vsel %vm693_vm3, %v835_v34, 0.0 }
  0xda   :  { %v706_v54 = vadd.f32 %v705_v41, %v704_v45  ;;  %v905_v9 = vadd.f32 %v904_v31, %v903_v20 }
  0xdc   :  { %v1706_v5 = vpop.f32.mrf.mxu2 }
  0xdd   :  { %v1634_v46 = vpop.f32.mrf.mxu0  ;;  %v1636_v48 = vpop.f32.mrf.mxu1  ;;  %v603_v7 = vpack.c.bf16 %v1706_v5, %v1706_v5 }
  0xde   :  { %v572_v49 = vpack.c.bf16 %v1634_v46, %v1634_v46  ;;  %v588_v50 = vpack.c.bf16 %v1636_v48, %v1636_v48  ;;  %v837_v53 = vmul.f32 %v1634_v46, %v1634_v46 }
  0xdf   :  { %668 = vst.msk [vmem:[%s2240_s2 + $0x9c] sm:$0xf] %vm628_vm2, %v603_v7  ;;  %v1815_v7 = vpop.f32.mrf.mxu3 }
  0xe0   :  { %637 = vst.msk [vmem:[%s2240_s2 + $0x20] sm:$0xf] %vm628_vm2, %v572_v49  ;;  %v617_v49 = vpack.c.bf16 %v1754_v28, %v1754_v28 }
  0xe1   :  { %653 = vst.msk [vmem:[%s2240_s2 + $0x60] sm:$0xf] %vm628_vm2, %v588_v50  ;;  %v707_v50 = vsel %vm693_vm3, %v1602_v37, 0.0  ;;  %v709_v37 = vsel %vm693_vm3, %v1634_v46, 0.0 }
  0xe2   :  { %682 = vst.msk [vmem:[%s2240_s2 + $0xd4] sm:$0xf] %vm628_vm2, %v617_v49 }
  0xe4   :  { %v1734_v15 = vpop.f32.mrf.mxu2 }
  0xe5   :  { %v1666_v55 = vpop.f32.mrf.mxu0  ;;  %v1668_v56 = vpop.f32.mrf.mxu1  ;;  %v604_v30 = vpack.c.bf16 %v1734_v15, %v1734_v15 }
  0xe6   :  { %v573_v58 = vpack.c.bf16 %v1666_v55, %v1666_v55  ;;  %v589_v59 = vpack.c.bf16 %v1668_v56, %v1668_v56  ;;  %v838_v63 = vmul.f32 %v1666_v55, %v1666_v55  ;;  %v711_v21 = vsel %vm693_vm3, %v1666_v55, 0.0 }
  0xe7   :  { %669 = vst.msk [vmem:[%s2240_s2 + $0xa0] sm:$0xf] %vm628_vm2, %v604_v30 }
  0xe8   :  { %638 = vst.msk [vmem:[%s2240_s2 + $0x24] sm:$0xf] %vm628_vm2, %v573_v58  ;;  %v906_v58 = vsel %vm693_vm3, %v836_v40, 0.0  ;;  %v910_v33 = vsel %vm693_vm3, %v838_v63, 0.0 }
  0xe9   :  { %654 = vst.msk [vmem:[%s2240_s2 + $0x64] sm:$0xf] %vm628_vm2, %v589_v59 }
  0xec   :  { %v1752_v27 = vpop.f32.mrf.mxu2 }
  0xed   :  { %v1698_v0 = vpop.f32.mrf.mxu0  ;;  %v1700_v1 = vpop.f32.mrf.mxu1  ;;  %v605_v44 = vpack.c.bf16 %v1752_v27, %v1752_v27 }
  0xee   :  { %v574_v2 = vpack.c.bf16 %v1698_v0, %v1698_v0  ;;  %v590_v4 = vpack.c.bf16 %v1700_v1, %v1700_v1  ;;  %v839_v46 = vmul.f32 %v1698_v0, %v1698_v0  ;;  %v713_v55 = vsel %vm693_vm3, %v1698_v0, 0.0 }
  0xef   :  { %670 = vst.msk [vmem:[%s2240_s2 + $0xa4] sm:$0xf] %vm628_vm2, %v605_v44 }
  0xf0   :  { %639 = vst.msk [vmem:[%s2240_s2 + $0x28] sm:$0xf] %vm628_vm2, %v574_v2  ;;  %v912_v40 = vsel %vm693_vm3, %v839_v46, 0.0 }
  0xf1   :  { %655 = vst.msk [vmem:[%s2240_s2 + $0x68] sm:$0xf] %vm628_vm2, %v590_v4 }
  0xf4   :  { %v1813_v4 = vpop.f32.mrf.mxu2 }
  0xf5   :  { %v431_v10 = vpop.f32.mrf.mxu0  ;;  %v1730_v11 = vpop.f32.mrf.mxu1 }
  0xf6   :  { %v575_v12 = vpack.c.bf16 %v431_v10, %v431_v10  ;;  %v591_v13 = vpack.c.bf16 %v1730_v11, %v1730_v11  ;;  %v840_v30 = vmul.f32 %v431_v10, %v431_v10  ;;  %v715_v25 = vsel %vm693_vm3, %v431_v10, 0.0 }
  0xf8   :  { %640 = vst.msk [vmem:[%s2240_s2 + $0x2c] sm:$0xf] %vm628_vm2, %v575_v12  ;;  %v708_v12 = vadd.f32 %v707_v50, %v706_v54  ;;  %v914_v49 = vsel %vm693_vm3, %v840_v30, 0.0 }
  0xf9   :  { %656 = vst.msk [vmem:[%s2240_s2 + $0x6c] sm:$0xf] %vm628_vm2, %v591_v13  ;;  %v908_v13 = vsel %vm693_vm3, %v837_v53, 0.0 }
  0xfd   :  { %v434_v17 = vpop.f32.mrf.mxu0  ;;  %v1746_v18 = vpop.f32.mrf.mxu1 }
  0xfe   :  { %v576_v22 = vpack.c.bf16 %v434_v17, %v434_v17  ;;  %v592_v23 = vpack.c.bf16 %v1746_v18, %v1746_v18  ;;  %v841_v41 = vmul.f32 %v434_v17, %v434_v17  ;;  %v717_v53 = vsel %vm693_vm3, %v434_v17, 0.0 }
 0x100   :  { %641 = vst.msk [vmem:[%s2240_s2 + $0x30] sm:$0xf] %vm628_vm2, %v576_v22  ;;  %v907_v22 = vadd.f32 %v906_v58, %v905_v9  ;;  %v1841_v58 = vpop.f32.mrf.mxu2 }
 0x101   :  { %657 = vst.msk [vmem:[%s2240_s2 + $0x70] sm:$0xf] %vm628_vm2, %v592_v23  ;;  %v710_v23 = vadd.f32 %v709_v37, %v708_v12  ;;  %v1843_v37 = vpop.f32.mrf.mxu3  ;;  %v618_v12 = vpack.c.bf16 %v1815_v7, %v1815_v7 }
 0x102   :  { %v909_v34 = vadd.f32 %v908_v13, %v907_v22  ;;  %v607_v22 = vpack.c.bf16 %v1841_v58, %v1841_v58 }
 0x103   :  { %v712_v36 = vadd.f32 %v711_v21, %v710_v23  ;;  %683 = vst.msk [vmem:[%s2240_s2 + $0xd8] sm:$0xf] %vm628_vm2, %v618_v12  ;;  %v727_v12 = vsel %vm693_vm3, %v1469_v47, 0.0 }
 0x104   :  { %v911_v44 = vadd.f32 %v910_v33, %v909_v34  ;;  %v619_v33 = vpack.c.bf16 %v1843_v37, %v1843_v37  ;;  %672 = vst.msk [vmem:[%s2240_s2 + $0xac] sm:$0xf] %vm628_vm2, %v607_v22  ;;  %v845_v34 = vmul.f32 %v1448_v39, %v1448_v39  ;;  %v848_v22 = vmul.f32 %v1502_v3, %v1502_v3 }
 0x105   :  { %v436_v59 = vpop.f32.mrf.mxu0  ;;  %v1801_v62 = vpop.f32.mrf.mxu1  ;;  %v714_v45 = vadd.f32 %v713_v55, %v712_v36 }
 0x106   :  { %v577_v2 = vpack.c.bf16 %v436_v59, %v436_v59  ;;  %v593_v24 = vpack.c.bf16 %v1801_v62, %v1801_v62  ;;  %v842_v20 = vmul.f32 %v436_v59, %v436_v59  ;;  %v913_v10 = vadd.f32 %v912_v40, %v911_v44  ;;  %684 = vst.msk [vmem:[%s2240_s2 + $0xdc] sm:$0xf] %vm628_vm2, %v619_v33 }
 0x107   :  { %v716_v63 = vadd.f32 %v715_v25, %v714_v45  ;;  %v719_v9 = vsel %vm693_vm3, %v436_v59, 0.0 }
 0x108   :  { %642 = vst.msk [vmem:[%s2240_s2 + $0x34] sm:$0xf] %vm628_vm2, %v577_v2  ;;  %v606_v2 = vpack.c.bf16 %v1813_v4, %v1813_v4  ;;  %v915_v13 = vadd.f32 %v914_v49, %v913_v10  ;;  %v918_v46 = vsel %vm693_vm3, %v842_v20, 0.0  ;;  %v725_v10 = vsel %vm693_vm3, %v1448_v39, 0.0 }
 0x109   :  { %658 = vst.msk [vmem:[%s2240_s2 + $0x74] sm:$0xf] %vm628_vm2, %v593_v24  ;;  %v916_v24 = vsel %vm693_vm3, %v841_v41, 0.0  ;;  %v718_v21 = vadd.f32 %v717_v53, %v716_v63  ;;  %v1889_v53 = vpop.f32.mrf.mxu2  ;;  %v1891_v20 = vpop.f32.mrf.mxu3  ;;  %v846_v63 = vmul.f32 %v1469_v47, %v1469_v47  ;;  %v924_v39 = vsel %vm693_vm3, %v845_v34, 0.0 }
 0x10a   :  { %671 = vst.msk [vmem:[%s2240_s2 + $0xa8] sm:$0xf] %vm628_vm2, %v606_v2  ;;  %v917_v23 = vadd.f32 %v916_v24, %v915_v13  ;;  %v847_v24 = vmul.f32 %v1484_v57, %v1484_v57  ;;  %v849_v47 = vmul.f32 %v1524_v14, %v1524_v14  ;;  %v608_v34 = vpack.c.bf16 %v1889_v53, %v1889_v53 }
 0x10b   :  { %v720_v30 = vadd.f32 %v719_v9, %v718_v21 }
 0x10c   :  { %v919_v36 = vadd.f32 %v918_v46, %v917_v23  ;;  %v926_v46 = vsel %vm693_vm3, %v846_v63, 0.0  ;;  %v928_v23 = vsel %vm693_vm3, %v847_v24, 0.0  ;;  %673 = vst.msk [vmem:[%s2240_s2 + $0xb0] sm:$0xf] %vm628_vm2, %v608_v34  ;;  %v735_v63 = vsel %vm693_vm3, %v1556_v26, 0.0 }
 0x10d   :  { %v439_v31 = vpop.f32.mrf.mxu0  ;;  %v1836_v50 = vpop.f32.mrf.mxu1 }
 0x10e   :  { %v578_v54 = vpack.c.bf16 %v439_v31, %v439_v31  ;;  %v594_v0 = vpack.c.bf16 %v1836_v50, %v1836_v50  ;;  %v843_v17 = vmul.f32 %v439_v31, %v439_v31  ;;  %v721_v59 = vsel %vm693_vm3, %v439_v31, 0.0 }
 0x10f   :  { %v722_v40 = vadd.f32 %v721_v59, %v720_v30  ;;  %v729_v59 = vsel %vm693_vm3, %v1484_v57, 0.0 }
 0x110   :  { %643 = vst.msk [vmem:[%s2240_s2 + $0x38] sm:$0xf] %vm628_vm2, %v578_v54  ;;  %v920_v55 = vsel %vm693_vm3, %v843_v17, 0.0 }
 0x111   :  { %659 = vst.msk [vmem:[%s2240_s2 + $0x78] sm:$0xf] %vm628_vm2, %v594_v0  ;;  %v921_v54 = vadd.f32 %v920_v55, %v919_v36  ;;  %v731_v55 = vsel %vm693_vm3, %v1502_v3, 0.0  ;;  %v620_v36 = vpack.c.bf16 %v1891_v20, %v1891_v20  ;;  %v1925_v57 = vpop.f32.mrf.mxu2  ;;  %v733_v3 = vsel %vm693_vm3, %v1524_v14, 0.0 }
 0x113   :  { %685 = vst.msk [vmem:[%s2240_s2 + $0xe0] sm:$0xf] %vm628_vm2, %v620_v36 }
 0x115   :  { %v441_v25 = vpop.f32.mrf.mxu0  ;;  %v1880_v41 = vpop.f32.mrf.mxu1 }
 0x116   :  { %v579_v44 = vpack.c.bf16 %v441_v25, %v441_v25  ;;  %v723_v45 = vsel %vm693_vm3, %v441_v25, 0.0  ;;  %v844_v49 = vmul.f32 %v441_v25, %v441_v25  ;;  %v595_v31 = vpack.c.bf16 %v1880_v41, %v1880_v41 }
 0x117   :  { %v724_v0 = vadd.f32 %v723_v45, %v722_v40  ;;  %v1927_v40 = vpop.f32.mrf.mxu3  ;;  %v930_v45 = vsel %vm693_vm3, %v848_v22, 0.0 }
 0x118   :  { %644 = vst.msk [vmem:[%s2240_s2 + $0x3c] sm:$0xf] %vm628_vm2, %v579_v44  ;;  %v922_v2 = vsel %vm693_vm3, %v844_v49, 0.0  ;;  %v850_v49 = vmul.f32 %v1556_v26, %v1556_v26  ;;  %v621_v14 = vpack.c.bf16 %v1927_v40, %v1927_v40  ;;  %v737_v26 = vsel %vm693_vm3, %v1580_v32, 0.0 }
 0x119   :  { %v726_v9 = vadd.f32 %v725_v10, %v724_v0  ;;  %v923_v17 = vadd.f32 %v922_v2, %v921_v54  ;;  %660 = vst.msk [vmem:[%s2240_s2 + $0x7c] sm:$0xf] %vm628_vm2, %v595_v31  ;;  %v609_v31 = vpack.c.bf16 %v1925_v57, %v1925_v57  ;;  %v932_v10 = vsel %vm693_vm3, %v849_v47, 0.0  ;;  %v1969_v22 = vpop.f32.mrf.mxu2 }
 0x11a   :  { %v851_v2 = vmul.f32 %v1580_v32, %v1580_v32  ;;  %686 = vst.msk [vmem:[%s2240_s2 + $0xe4] sm:$0xf] %vm628_vm2, %v621_v14  ;;  %v854_v47 = vmul.f32 %v1668_v56, %v1668_v56 }
 0x11b   :  { %v728_v13 = vadd.f32 %v727_v12, %v726_v9  ;;  %v925_v21 = vadd.f32 %v924_v39, %v923_v17  ;;  %674 = vst.msk [vmem:[%s2240_s2 + $0xb4] sm:$0xf] %vm628_vm2, %v609_v31  ;;  %v934_v17 = vsel %vm693_vm3, %v850_v49, 0.0  ;;  %v852_v39 = vmul.f32 %v1604_v38, %v1604_v38 }
 0x11c   :  { %v942_v49 = vsel %vm693_vm3, %v854_v47, 0.0  ;;  %v856_v31 = vmul.f32 %v1730_v11, %v1730_v11  ;;  %v860_v47 = vmul.f32 %v1880_v41, %v1880_v41 }
 0x11d   :  { %v730_v30 = vadd.f32 %v729_v59, %v728_v13  ;;  %v927_v33 = vadd.f32 %v926_v46, %v925_v21  ;;  %v936_v21 = vsel %vm693_vm3, %v851_v2, 0.0  ;;  %v739_v46 = vsel %vm693_vm3, %v1604_v38, 0.0 }
 0x11e   :  { %v853_v59 = vmul.f32 %v1636_v48, %v1636_v48  ;;  %v938_v32 = vsel %vm693_vm3, %v852_v39, 0.0  ;;  %v855_v38 = vmul.f32 %v1700_v1, %v1700_v1  ;;  %v858_v39 = vmul.f32 %v1801_v62, %v1801_v62 }
 0x11f   :  { %v732_v25 = vadd.f32 %v731_v55, %v730_v30  ;;  %v929_v44 = vadd.f32 %v928_v23, %v927_v33  ;;  %v1971_v23 = vpop.f32.mrf.mxu3  ;;  %v741_v55 = vsel %vm693_vm3, %v1636_v48, 0.0  ;;  %v745_v48 = vsel %vm693_vm3, %v1700_v1, 0.0 }
 0x120   :  { %v622_v2 = vpack.c.bf16 %v1971_v23, %v1971_v23 }
 0x121   :  { %v734_v54 = vadd.f32 %v733_v3, %v732_v25  ;;  %v931_v0 = vadd.f32 %v930_v45, %v929_v44  ;;  %v940_v25 = vsel %vm693_vm3, %v853_v59, 0.0  ;;  %v743_v44 = vsel %vm693_vm3, %v1668_v56, 0.0  ;;  %v1997_v1 = vpop.f32.mrf.mxu2 }
 0x122   :  { %v857_v56 = vmul.f32 %v1746_v18, %v1746_v18  ;;  %687 = vst.msk [vmem:[%s2240_s2 + $0xe8] sm:$0xf] %vm628_vm2, %v622_v2  ;;  %v751_v59 = vsel %vm693_vm3, %v1801_v62, 0.0  ;;  %v753_v62 = vsel %vm693_vm3, %v1836_v50, 0.0 }
 0x123   :  { %v736_v24 = vadd.f32 %v735_v63, %v734_v54  ;;  %v933_v9 = vadd.f32 %v932_v10, %v931_v0  ;;  %v944_v54 = vsel %vm693_vm3, %v855_v38, 0.0  ;;  %v747_v10 = vsel %vm693_vm3, %v1730_v11, 0.0 }
 0x124   :  { %v610_v63 = vpack.c.bf16 %v1969_v22, %v1969_v22  ;;  %v749_v11 = vsel %vm693_vm3, %v1746_v18, 0.0 }
 0x125   :  { %v935_v12 = vadd.f32 %v934_v17, %v933_v9  ;;  %v738_v13 = vadd.f32 %v737_v26, %v736_v24  ;;  %v946_v26 = vsel %vm693_vm3, %v856_v31, 0.0  ;;  %v954_v31 = vsel %vm693_vm3, %v860_v47, 0.0 }
 0x126   :  { %675 = vst.msk [vmem:[%s2240_s2 + $0xb8] sm:$0xf] %vm628_vm2, %v610_v63 }
 0x127   :  { %v740_v30 = vadd.f32 %v739_v46, %v738_v13  ;;  %v937_v33 = vadd.f32 %v936_v21, %v935_v12  ;;  %v1999_v24 = vpop.f32.mrf.mxu3  ;;  %v611_v12 = vpack.c.bf16 %v1997_v1, %v1997_v1  ;;  %v948_v46 = vsel %vm693_vm3, %v857_v56, 0.0 }
 0x128   :  { %v623_v18 = vpack.c.bf16 %v1999_v24, %v1999_v24 }
 0x129   :  { %v742_v34 = vadd.f32 %v741_v55, %v740_v30  ;;  %v939_v36 = vadd.f32 %v938_v32, %v937_v33  ;;  %v859_v30 = vmul.f32 %v1836_v50, %v1836_v50  ;;  %676 = vst.msk [vmem:[%s2240_s2 + $0xbc] sm:$0xf] %vm628_vm2, %v611_v12  ;;  %v950_v55 = vsel %vm693_vm3, %v858_v39, 0.0 }
 0x12a   :  { %688 = vst.msk [vmem:[%s2240_s2 + $0xec] sm:$0xf] %vm628_vm2, %v623_v18  ;;  %v757_v50 = vsel %vm693_vm3, %v1507_v8, 0.0  ;;  %v865_v39 = vmul.f32 %v1610_v42, %v1610_v42 }
 0x12b   :  { %v744_v45 = vadd.f32 %v743_v44, %v742_v34  ;;  %v941_v3 = vadd.f32 %v940_v25, %v939_v36  ;;  %v861_v36 = vmul.f32 %v1507_v8, %v1507_v8  ;;  %v952_v25 = vsel %vm693_vm3, %v859_v30, 0.0 }
 0x12c   :  { %v755_v44 = vsel %vm693_vm3, %v1880_v41, 0.0  ;;  %v863_v41 = vmul.f32 %v1562_v29, %v1562_v29  ;;  %v761_v8 = vsel %vm693_vm3, %v1562_v29, 0.0 }
 0x12d   :  { %v746_v0 = vadd.f32 %v745_v48, %v744_v45  ;;  %v943_v14 = vadd.f32 %v942_v49, %v941_v3  ;;  %v862_v48 = vmul.f32 %v1529_v19, %v1529_v19 }
 0x12f   :  { %v748_v9 = vadd.f32 %v747_v10, %v746_v0  ;;  %v945_v17 = vadd.f32 %v944_v54, %v943_v14  ;;  %v2041_v45 = vpop.f32.mrf.mxu3  ;;  %v956_v14 = vsel %vm693_vm3, %v861_v36, 0.0  ;;  %v759_v10 = vsel %vm693_vm3, %v1529_v19, 0.0 }
 0x130   :  { %v958_v2 = vsel %vm693_vm3, %v862_v48, 0.0  ;;  %v763_v19 = vsel %vm693_vm3, %v1586_v35, 0.0  ;;  %v624_v12 = vpack.c.bf16 %v2041_v45, %v2041_v45  ;;  %v868_v36 = vmul.f32 %v1706_v5, %v1706_v5 }
 0x131   :  { %v750_v13 = vadd.f32 %v749_v11, %v748_v9  ;;  %v947_v21 = vadd.f32 %v946_v26, %v945_v17  ;;  %v864_v9 = vmul.f32 %v1586_v35, %v1586_v35  ;;  %v960_v11 = vsel %vm693_vm3, %v863_v41, 0.0 }
 0x132   :  { %v866_v35 = vmul.f32 %v1642_v51, %v1642_v51  ;;  %689 = vst.msk [vmem:[%s2240_s2 + $0xf0] sm:$0xf] %vm628_vm2, %v624_v12 }
 0x133   :  { %v949_v33 = vadd.f32 %v948_v46, %v947_v21  ;;  %v752_v32 = vadd.f32 %v751_v59, %v750_v13  ;;  %v962_v46 = vsel %vm693_vm3, %v864_v9, 0.0  ;;  %v765_v59 = vsel %vm693_vm3, %v1610_v42, 0.0 }
 0x134   :  { %v767_v42 = vsel %vm693_vm3, %v1642_v51, 0.0  ;;  %v771_v51 = vsel %vm693_vm3, %v1706_v5, 0.0  ;;  %v775_v5 = vsel %vm693_vm3, %v1752_v27, 0.0  ;;  %v872_v9 = vmul.f32 %v1841_v58, %v1841_v58 }
 0x135   :  { %v951_v38 = vadd.f32 %v950_v55, %v949_v33  ;;  %v754_v34 = vadd.f32 %v753_v62, %v752_v32  ;;  %v964_v32 = vsel %vm693_vm3, %v865_v39, 0.0  ;;  %v867_v55 = vmul.f32 %v1674_v60, %v1674_v60 }
 0x137   :  { %v953_v3 = vadd.f32 %v952_v25, %v951_v38  ;;  %v756_v49 = vadd.f32 %v755_v44, %v754_v34  ;;  %v2065_v13 = vpop.f32.mrf.mxu3  ;;  %v966_v38 = vsel %vm693_vm3, %v866_v35, 0.0  ;;  %v769_v34 = vsel %vm693_vm3, %v1674_v60, 0.0 }
 0x138   :  { %v625_v18 = vpack.c.bf16 %v2065_v13, %v2065_v13  ;;  %v773_v60 = vsel %vm693_vm3, %v1734_v15, 0.0 }
 0x139   :  { %v758_v54 = vadd.f32 %v757_v50, %v756_v49  ;;  %v955_v0 = vadd.f32 %v954_v31, %v953_v3  ;;  %v968_v3 = vsel %vm693_vm3, %v867_v55, 0.0  ;;  %v869_v49 = vmul.f32 %v1734_v15, %v1734_v15 }
 0x13a   :  { %690 = vst.msk [vmem:[%s2240_s2 + $0xf4] sm:$0xf] %vm628_vm2, %v625_v18  ;;  %v777_v15 = vsel %vm693_vm3, %v1813_v4, 0.0  ;;  %v978_v18 = vsel %vm693_vm3, %v872_v9, 0.0 }
 0x13b   :  { %v760_v56 = vadd.f32 %v759_v10, %v758_v54  ;;  %v957_v63 = vadd.f32 %v956_v14, %v955_v0  ;;  %v970_v54 = vsel %vm693_vm3, %v868_v36, 0.0  ;;  %v870_v0 = vmul.f32 %v1752_v27, %v1752_v27 }
 0x13c   :  { %v972_v41 = vsel %vm693_vm3, %v869_v49, 0.0  ;;  %v779_v27 = vsel %vm693_vm3, %v1841_v58, 0.0  ;;  %v874_v58 = vmul.f32 %v1925_v57, %v1925_v57  ;;  %v877_v36 = vmul.f32 %v1612_v43, %v1612_v43 }
 0x13d   :  { %v762_v17 = vadd.f32 %v761_v8, %v760_v56  ;;  %v959_v26 = vadd.f32 %v958_v2, %v957_v63  ;;  %v871_v56 = vmul.f32 %v1813_v4, %v1813_v4  ;;  %v974_v8 = vsel %vm693_vm3, %v870_v0, 0.0 }
 0x13e   :  { %v982_v55 = vsel %vm693_vm3, %v874_v58, 0.0 }
 0x13f   :  { %v764_v21 = vadd.f32 %v763_v19, %v762_v17  ;;  %v961_v29 = vadd.f32 %v960_v11, %v959_v26  ;;  %v2097_v50 = vpop.f32.mrf.mxu3  ;;  %v976_v11 = vsel %vm693_vm3, %v871_v56, 0.0  ;;  %v873_v19 = vmul.f32 %v1889_v53, %v1889_v53 }
 0x140   :  { %v626_v39 = vpack.c.bf16 %v2097_v50, %v2097_v50 }
 0x141   :  { %v766_v30 = vadd.f32 %v765_v59, %v764_v21  ;;  %v963_v33 = vadd.f32 %v962_v46, %v961_v29  ;;  %v781_v46 = vsel %vm693_vm3, %v1889_v53, 0.0  ;;  %v783_v53 = vsel %vm693_vm3, %v1925_v57, 0.0 }
 0x142   :  { %691 = vst.msk [vmem:[%s2240_s2 + $0xf8] sm:$0xf] %vm628_vm2, %v626_v39 }
 0x143   :  { %v768_v62 = vadd.f32 %v767_v42, %v766_v30  ;;  %v965_v47 = vadd.f32 %v964_v32, %v963_v33  ;;  %v980_v30 = vsel %vm693_vm3, %v873_v19, 0.0  ;;  %v875_v33 = vmul.f32 %v1969_v22, %v1969_v22 }
 0x144   :  { %v883_v19 = vmul.f32 %v1815_v7, %v1815_v7 }
 0x145   :  { %v967_v25 = vadd.f32 %v966_v38, %v965_v47  ;;  %v770_v44 = vadd.f32 %v769_v34, %v768_v62  ;;  %v785_v62 = vsel %vm693_vm3, %v1969_v22, 0.0  ;;  %v876_v47 = vmul.f32 %v1997_v1, %v1997_v1 }
 0x146   :  { %v984_v57 = vsel %vm693_vm3, %v875_v33, 0.0  ;;  %v878_v22 = vmul.f32 %v1644_v52, %v1644_v52  ;;  %v1000_v58 = vsel %vm693_vm3, %v883_v19, 0.0  ;;  %v886_v33 = vmul.f32 %v1927_v40, %v1927_v40 }
 0x147   :  { %v772_v48 = vadd.f32 %v771_v51, %v770_v44  ;;  %v969_v31 = vadd.f32 %v968_v3, %v967_v25  ;;  %v2121_v12 = vpop.f32.mrf.mxu3  ;;  %v787_v25 = vsel %vm693_vm3, %v1997_v1, 0.0  ;;  %v789_v51 = vsel %vm693_vm3, %v1612_v43, 0.0 }
 0x148   :  { %v627_v29 = vpack.c.bf16 %v2121_v12, %v2121_v12  ;;  %v986_v49 = vsel %vm693_vm3, %v876_v47, 0.0  ;;  %v879_v1 = vmul.f32 %v1676_v61, %v1676_v61  ;;  %v793_v43 = vsel %vm693_vm3, %v1676_v61, 0.0 }
 0x149   :  { %v774_v14 = vadd.f32 %v773_v60, %v772_v48  ;;  %v971_v10 = vadd.f32 %v970_v54, %v969_v31  ;;  %v988_v54 = vsel %vm693_vm3, %v877_v36, 0.0  ;;  %v791_v60 = vsel %vm693_vm3, %v1644_v52, 0.0 }
 0x14a   :  { %692 = vst.msk [vmem:[%s2240_s2 + $0xfc] sm:$0xf] %vm628_vm2, %v627_v29  ;;  %v795_v52 = vsel %vm693_vm3, %v1708_v6, 0.0  ;;  %v797_v61 = vsel %vm693_vm3, %v1736_v16, 0.0  ;;  %v884_v29 = vmul.f32 %v1843_v37, %v1843_v37  ;;  %v888_v36 = vmul.f32 %v1999_v24, %v1999_v24 }
 0x14b   :  { %v776_v63 = vadd.f32 %v775_v5, %v774_v14  ;;  %v973_v2 = vadd.f32 %v972_v41, %v971_v10  ;;  %v990_v10 = vsel %vm693_vm3, %v878_v22, 0.0  ;;  %v880_v41 = vmul.f32 %v1708_v6, %v1708_v6 }
 0x14c   :  { %v799_v6 = vsel %vm693_vm3, %v1754_v28, 0.0 }
 0x14d   :  { %v778_v17 = vadd.f32 %v777_v15, %v776_v63  ;;  %v975_v26 = vadd.f32 %v974_v8, %v973_v2  ;;  %v992_v63 = vsel %vm693_vm3, %v879_v1, 0.0  ;;  %v881_v2 = vmul.f32 %v1736_v16, %v1736_v16 }
 0x14e   :  { %v994_v9 = vsel %vm693_vm3, %v880_v41, 0.0  ;;  %v801_v16 = vsel %vm693_vm3, %v1815_v7, 0.0  ;;  %v805_v7 = vsel %vm693_vm3, %v1891_v20, 0.0  ;;  %v891_v1 = vmul.f32 %v2097_v50, %v2097_v50 }
 0x14f   :  { %v780_v21 = vadd.f32 %v779_v27, %v778_v17  ;;  %v977_v4 = vadd.f32 %v976_v11, %v975_v26  ;;  %v882_v17 = vmul.f32 %v1754_v28, %v1754_v28  ;;  %v996_v27 = vsel %vm693_vm3, %v881_v2, 0.0 }
 0x150   :  { %v803_v28 = vsel %vm693_vm3, %v1843_v37, 0.0  ;;  %v807_v37 = vsel %vm693_vm3, %v1927_v40, 0.0  ;;  %v811_v40 = vsel %vm693_vm3, %v1999_v24, 0.0  ;;  %v815_v24 = vsel %vm693_vm3, %v2065_v13, 0.0 }
 0x151   :  { %v979_v59 = vadd.f32 %v978_v18, %v977_v4  ;;  %v782_v35 = vadd.f32 %v781_v46, %v780_v21  ;;  %v998_v4 = vsel %vm693_vm3, %v882_v17, 0.0 }
 0x153   :  { %v981_v32 = vadd.f32 %v980_v30, %v979_v59  ;;  %v784_v42 = vadd.f32 %v783_v53, %v782_v35  ;;  %v885_v59 = vmul.f32 %v1891_v20, %v1891_v20  ;;  %v1002_v53 = vsel %vm693_vm3, %v884_v29, 0.0 }
 0x154   :  { %v809_v20 = vsel %vm693_vm3, %v1971_v23, 0.0 }
 0x155   :  { %v983_v38 = vadd.f32 %v982_v55, %v981_v32  ;;  %v786_v34 = vadd.f32 %v785_v62, %v784_v42  ;;  %v1004_v55 = vsel %vm693_vm3, %v885_v59, 0.0  ;;  %v887_v62 = vmul.f32 %v1971_v23, %v1971_v23 }
 0x156   :  { %v813_v23 = vsel %vm693_vm3, %v2041_v45, 0.0 }
 0x157   :  { %v985_v44 = vadd.f32 %v984_v57, %v983_v38  ;;  %v788_v3 = vadd.f32 %v787_v25, %v786_v34  ;;  %v1006_v34 = vsel %vm693_vm3, %v886_v33, 0.0 }
 0x159   :  { %v790_v48 = vadd.f32 %v789_v51, %v788_v3  ;;  %v987_v31 = vadd.f32 %v986_v49, %v985_v44  ;;  %v1008_v44 = vsel %vm693_vm3, %v887_v62, 0.0  ;;  %v889_v3 = vmul.f32 %v2041_v45, %v2041_v45 }
 0x15a   :  { %v1010_v49 = vsel %vm693_vm3, %v888_v36, 0.0  ;;  %v817_v45 = vsel %vm693_vm3, %v2097_v50, 0.0 }
 0x15b   :  { %v792_v0 = vadd.f32 %v791_v60, %v790_v48  ;;  %v989_v14 = vadd.f32 %v988_v54, %v987_v31  ;;  %v890_v48 = vmul.f32 %v2065_v13, %v2065_v13  ;;  %v1012_v60 = vsel %vm693_vm3, %v889_v3, 0.0 }
 0x15c   :  { %v819_v13 = vsel %vm693_vm3, %v2121_v12, 0.0 }
 0x15d   :  { %v794_v5 = vadd.f32 %v793_v43, %v792_v0  ;;  %v991_v56 = vadd.f32 %v990_v10, %v989_v14  ;;  %v1014_v10 = vsel %vm693_vm3, %v890_v48, 0.0  ;;  %v892_v43 = vmul.f32 %v2121_v12, %v2121_v12 }
 0x15f   :  { %v796_v8 = vadd.f32 %v795_v52, %v794_v5  ;;  %v993_v15 = vadd.f32 %v992_v63, %v991_v56  ;;  %v1016_v56 = vsel %vm693_vm3, %v891_v1, 0.0  ;;  %v1018_v2 = vsel %vm693_vm3, %v892_v43, 0.0 }
 0x161   :  { %v798_v26 = vadd.f32 %v797_v61, %v796_v8  ;;  %v995_v11 = vadd.f32 %v994_v9, %v993_v15 }
 0x163   :  { %v800_v39 = vadd.f32 %v799_v6, %v798_v26  ;;  %v997_v21 = vadd.f32 %v996_v27, %v995_v11 }
 0x165   :  { %v999_v18 = vadd.f32 %v998_v4, %v997_v21  ;;  %v802_v46 = vadd.f32 %v801_v16, %v800_v39 }
 0x167   :  { %v804_v35 = vadd.f32 %v803_v28, %v802_v46  ;;  %v1001_v30 = vadd.f32 %v1000_v58, %v999_v18 }
 0x169   :  { %v806_v32 = vadd.f32 %v805_v7, %v804_v35  ;;  %v1003_v42 = vadd.f32 %v1002_v53, %v1001_v30 }
 0x16b   :  { %v808_v47 = vadd.f32 %v807_v37, %v806_v32  ;;  %v1005_v38 = vadd.f32 %v1004_v55, %v1003_v42 }
 0x16d   :  { %v810_v57 = vadd.f32 %v809_v20, %v808_v47  ;;  %v1007_v25 = vadd.f32 %v1006_v34, %v1005_v38 }
 0x16f   :  { %v812_v51 = vadd.f32 %v811_v40, %v810_v57  ;;  %v1009_v22 = vadd.f32 %v1008_v44, %v1007_v25 }
 0x171   :  { %v1011_v31 = vadd.f32 %v1010_v49, %v1009_v22  ;;  %v814_v54 = vadd.f32 %v813_v23, %v812_v51 }
 0x173   :  { %v1013_v0 = vadd.f32 %v1012_v60, %v1011_v31  ;;  %v816_v14 = vadd.f32 %v815_v24, %v814_v54 }
 0x175   :  { %v1015_v41 = vadd.f32 %v1014_v10, %v1013_v0  ;;  %v818_v5 = vadd.f32 %v817_v45, %v816_v14 }
 0x177   :  { %v1017_v63 = vadd.f32 %v1016_v56, %v1015_v41  ;;  %v820_v52 = vadd.f32 %v819_v13, %v818_v5 }
 0x179   :  { %v821_v8 = vrot.slane %v820_v52, 4  ;;  %v1019_v15 = vadd.f32 %v1018_v2, %v1017_v63 }
 0x17b   :  { %v822_v9 = vadd.f32 %v821_v8, %v820_v52  ;;  %v1020_v61 = vrot.slane %v1019_v15, 4 }
 0x17d   :  { %v823_v17 = vrot.slane %v822_v9, 2  ;;  %v1021_v50 = vadd.f32 %v1020_v61, %v1019_v15 }
 0x17f   :  { %v824_v26 = vadd.f32 %v823_v17, %v822_v9  ;;  %v1022_v11 = vrot.slane %v1021_v50, 2 }
 0x181   :  { %v825_v27 = vrot.slane %v824_v26, 1  ;;  %v1023_v6 = vadd.f32 %v1022_v11, %v1021_v50 }
 0x183   :  { %v826_v19 = vadd.f32 %v825_v27, %v824_v26  ;;  %v1024_v39 = vrot.slane %v1023_v6, 1 }
 0x185   :  { %828 = vst.msk [vmem:[%s2241_s3] sm:$0x1] %vm827_vm4, %v826_v19  ;;  %v1025_v12 = vadd.f32 %v1024_v39, %v1023_v6 }
 0x187   :  { %1026 = vst.msk [vmem:[%s2242_s4] sm:$0x1] %vm827_vm4, %v1025_v12 }

// kernel: resnet_ae_forward.119
= control target key start
LH: loop header
LB: loop body
LE: loop exit
PB: predicated region body
PF: predicated region fallthrough
CT: control target
= control target key end

     0   :  { %vm277_vm0 = vcmask 392192   ;;  %vm364_vm1 = vcmask 257024   ;;  %vm369_vm2 = vcmask 261120   ;;  %vm383_vm3 = vcmask 253952   ;;  %s778_s1 = inlined_call_operand.vmem [shape: bf16[432,32], index: 1, kind: input, shape index: {}]   ;;  %s779_s0 = inlined_call_operand.vmem [shape: bf16[32,432], index: 0, kind: input, shape index: {}]   ;;  %s780_s2 = inlined_call_operand.vmem [shape: bf16[32,32], index: 2, kind: output, shape index: {0}]   ;;  %s781_s3 = inlined_call_operand.vmem [shape: f32[1,1,32], index: 3, kind: output, shape index: {1}]   ;;  %s782_s4 = inlined_call_operand.vmem [shape: f32[1,1,32], index: 4, kind: output, shape index: {2}]  }
   0x1   :  { %v572_v0 = vld [vmem:[%s778_s1 + $0x38] sm:$0xff]  ;;  %v571_v3 = vld [vmem:[%s778_s1 + $0x30] sm:$0xff]  ;;  %v570_v7 = vld [vmem:[%s778_s1 + $0x28] sm:$0xff] }
   0x2   :  { %v580_v1 = vld [vmem:[%s778_s1 + $0x78] sm:$0xff]  ;;  %284 = vmatpush.bf16.msra.mxu0 %v572_v0  ;;  %v579_v4 = vld [vmem:[%s778_s1 + $0x70] sm:$0xff]  ;;  %v578_v8 = vld [vmem:[%s778_s1 + $0x68] sm:$0xff] }
   0x3   :  { %v588_v2 = vld [vmem:[%s778_s1 + $0xb8] sm:$0xff]  ;;  %303 = vmatpush.bf16.msra.mxu1 %v580_v1  ;;  %v587_v5 = vld [vmem:[%s778_s1 + $0xb0] sm:$0xff]  ;;  %v586_v9 = vld [vmem:[%s778_s1 + $0xa8] sm:$0xff] }
   0x4   :  { %322 = vmatpush.bf16.msra.mxu2 %v588_v2  ;;  %v591_v6 = vld [vmem:[%s778_s1 + $0xd0] sm:$0xff]  ;;  %v590_v10 = vld [vmem:[%s778_s1 + $0xc8] sm:$0xff]  ;;  %v569_v11 = vld [vmem:[%s778_s1 + $0x20] sm:$0xff] }
   0x5   :  { %346 = vmatpush.bf16.msra.mxu3 %v591_v6  ;;  %v577_v12 = vld [vmem:[%s778_s1 + $0x60] sm:$0xff]  ;;  %v558_v15 = vld [vmem:[%s779_s0 + $0xc] sm:$0xf]  ;;  %v427_v16 = vld [vmem:[%s779_s0 + $0x18] sm:$0xf0] }
   0x6   :  { %285 = vmatpush.bf16.msra.mxu0 %v571_v3  ;;  %v585_v13 = vld [vmem:[%s778_s1 + $0xa0] sm:$0xff]  ;;  %v568_v17 = vld [vmem:[%s778_s1 + $0x18] sm:$0xff]  ;;  %v430_v20 = vor.u32 %v558_v15, %v427_v16  ;;  %v567_v21 = vld [vmem:[%s778_s1 + $0x10] sm:$0xff] }
   0x7   :  { %304 = vmatpush.bf16.msra.mxu1 %v579_v4  ;;  %v589_v14 = vld [vmem:[%s778_s1 + $0xc0] sm:$0xff]  ;;  %v576_v18 = vld [vmem:[%s778_s1 + $0x58] sm:$0xff]  ;;  %v575_v22 = vld [vmem:[%s778_s1 + $0x50] sm:$0xff] }
   0x8   :  { %323 = vmatpush.bf16.msra.mxu2 %v587_v5  ;;  %v584_v19 = vld [vmem:[%s778_s1 + $0x98] sm:$0xff]  ;;  %v583_v23 = vld [vmem:[%s778_s1 + $0x90] sm:$0xff]  ;;  %v566_v24 = vld [vmem:[%s778_s1 + $0x8] sm:$0xff] }
   0x9   :  { %347 = vmatpush.bf16.msra.mxu3 %v590_v10  ;;  %v574_v25 = vld [vmem:[%s778_s1 + $0x48] sm:$0xff]  ;;  %v565_v27 = vld [vmem:[%s778_s1] sm:$0xff]  ;;  %v559_v30 = vld [vmem:[%s779_s0 + $0xc] sm:$0xf0] }
   0xa   :  { %286 = vmatpush.bf16.msra.mxu0 %v570_v7  ;;  %v582_v26 = vld [vmem:[%s778_s1 + $0x88] sm:$0xff]  ;;  %v573_v28 = vld [vmem:[%s778_s1 + $0x40] sm:$0xff]  ;;  %v419_v32 = vld [vmem:[%s779_s0 + $0x10] sm:$0xf0] }
   0xb   :  { %305 = vmatpush.bf16.msra.mxu1 %v578_v8  ;;  %v417_v29 = vld [vmem:[%s779_s0] sm:$0xf]  ;;  %v557_v31 = vld [vmem:[%s779_s0 + $0x4] sm:$0xf]  ;;  %v425_v34 = vld [vmem:[%s779_s0 + $0x8] sm:$0xf] }
   0xc   :  { %324 = vmatpush.bf16.msra.mxu2 %v586_v9  ;;  %v581_v33 = vld [vmem:[%s778_s1 + $0x80] sm:$0xff]  ;;  %v560_v35 = vld [vmem:[%s779_s0 + $0x14] sm:$0xf0]  ;;  %v562_v36 = vld [vmem:[%s779_s0 + $0x2c] sm:$0xf]  ;;  %v418_v38 = vor.u32 %v559_v30, %v417_v29  ;;  %v422_v39 = vor.u32 %v557_v31, %v419_v32 }
   0xd   :  { %348 = vmatpush.bf16.msra.mxu3 %v589_v14  ;;  %v443_v37 = vld [vmem:[%s779_s0 + $0x38] sm:$0xf0]  ;;  %v426_v40 = vor.u32 %v560_v35, %v425_v34  ;;  %v433_v42 = vld [vmem:[%s779_s0 + $0x20] sm:$0xf]  ;;  %v563_v43 = vld [vmem:[%s779_s0 + $0x2c] sm:$0xf0] }
   0xe   :  { %287 = vmatpush.bf16.msra.mxu0 %v569_v11  ;;  %v446_v41 = vor.u32 %v562_v36, %v443_v37  ;;  %v561_v44 = vld [vmem:[%s779_s0 + $0x24] sm:$0xf]  ;;  %v435_v45 = vld [vmem:[%s779_s0 + $0x30] sm:$0xf0]  ;;  %v441_v46 = vld [vmem:[%s779_s0 + $0x28] sm:$0xf]  ;;  %v434_v48 = vor.u32 %v563_v43, %v433_v42 }
   0xf   :  { %306 = vmatpush.bf16.msra.mxu1 %v577_v12  ;;  %v564_v47 = vld [vmem:[%s779_s0 + $0x34] sm:$0xf0]  ;;  %v438_v49 = vor.u32 %v561_v44, %v435_v45 }
  0x10   :  { %325 = vmatpush.bf16.msra.mxu2 %v585_v13  ;;  %555 = vmatmul.msk.bf16.vlgmr.msra.gmra.mxu3 %vm277_vm0, %v430_v20  ;;  %v442_v50 = vor.u32 %v564_v47, %v441_v46 }
  0x12   :  { %288 = vmatpush.bf16.msra.mxu0 %v568_v17 }
  0x13   :  { %307 = vmatpush.bf16.msra.mxu1 %v576_v18 }
  0x14   :  { %326 = vmatpush.bf16.msra.mxu2 %v584_v19 }
  0x16   :  { %289 = vmatpush.bf16.msra.mxu0 %v567_v21 }
  0x17   :  { %308 = vmatpush.bf16.msra.mxu1 %v575_v22 }
  0x18   :  { %327 = vmatpush.bf16.msra.mxu2 %v583_v23 }
  0x1a   :  { %290 = vmatpush.bf16.msra.mxu0 %v566_v24 }
  0x1b   :  { %309 = vmatpush.bf16.msra.mxu1 %v574_v25 }
  0x1c   :  { %328 = vmatpush.bf16.msra.mxu2 %v582_v26 }
  0x1e   :  { %291 = vmatpush.bf16.msra.mxu0 %v565_v27 }
  0x1f   :  { %310 = vmatpush.bf16.msra.mxu1 %v573_v28 }
  0x20   :  { %329 = vmatpush.bf16.msra.mxu2 %v581_v33  ;;  %556 = vmatmul.msk.bf16.gmra.mxu3 %vm277_vm0, %v446_v41 }
  0x21   :  { %292 = vmatmul.bf16.vlgmr.msra.gmra.mxu0 %v418_v38 }
  0x22   :  { %311 = vmatmul.bf16.vlgmr.msra.gmra.mxu1 %v422_v39 }
  0x23   :  { %330 = vmatmul.bf16.vlgmr.msra.gmra.mxu2 %v426_v40 }
  0x31   :  { %297 = vmatmul.bf16.gmra.mxu0 %v434_v48 }
  0x32   :  { %316 = vmatmul.bf16.gmra.mxu1 %v438_v49 }
  0x33   :  { %335 = vmatmul.bf16.gmra.mxu2 %v442_v50 }
  0x93   :  { %v350_v53 = vpop.f32.mrf.mxu3 }
  0x9b   :  { %v352_v61 = vpop.f32.mrf.mxu3 }
  0x9e   :  { %v293_v51 = vpop.f32.mrf.mxu0 }
  0x9f   :  { %v312_v52 = vpop.f32.mrf.mxu1 }
  0xa0   :  { %v313_v54 = vadd.f32 %v312_v52, %v293_v51 }
  0xa3   :  { %v355_v6 = vpop.f32.mrf.mxu3 }
  0xa6   :  { %v331_v55 = vpop.f32.mrf.mxu2  ;;  %v295_v57 = vpop.f32.mrf.mxu0 }
  0xa7   :  { %v332_v56 = vadd.f32 %v331_v55, %v313_v54  ;;  %v314_v58 = vpop.f32.mrf.mxu1 }
  0xa8   :  { %v315_v62 = vadd.f32 %v314_v58, %v295_v57 }
  0xa9   :  { %v351_v59 = vadd.f32 %v350_v53, %v332_v56 }
  0xab   :  { %v360_v60 = vpack.c.bf16 %v351_v59, %v351_v59  ;;  %v385_v14 = vmul.f32 %v351_v59, %v351_v59  ;;  %v370_v19 = vsel %vm369_vm2, %v351_v59, 0.0  ;;  %v357_v24 = vpop.f32.mrf.mxu3 }
  0xad   :  { %365 = vst.msk [vmem:[%s780_s2] sm:$0xf] %vm364_vm1, %v360_v60  ;;  %v389_v25 = vsel %vm369_vm2, %v385_v14, 0.0 }
  0xae   :  { %v333_v63 = vpop.f32.mrf.mxu2  ;;  %v298_v1 = vpop.f32.mrf.mxu0 }
  0xaf   :  { %v334_v0 = vadd.f32 %v333_v63, %v315_v62  ;;  %v317_v2 = vpop.f32.mrf.mxu1 }
  0xb0   :  { %v318_v5 = vadd.f32 %v317_v2, %v298_v1 }
  0xb1   :  { %v353_v3 = vadd.f32 %v352_v61, %v334_v0 }
  0xb3   :  { %v361_v4 = vpack.c.bf16 %v353_v3, %v353_v3  ;;  %v386_v12 = vmul.f32 %v353_v3, %v353_v3  ;;  %v371_v15 = vsel %vm369_vm2, %v353_v3, 0.0 }
  0xb4   :  { %v372_v23 = vadd.f32 %v371_v15, %v370_v19 }
  0xb5   :  { %366 = vst.msk [vmem:[%s780_s2 + $0x4] sm:$0xf] %vm364_vm1, %v361_v4  ;;  %v390_v20 = vsel %vm369_vm2, %v386_v12, 0.0 }
  0xb6   :  { %v336_v7 = vpop.f32.mrf.mxu2  ;;  %v300_v10 = vpop.f32.mrf.mxu0  ;;  %v391_v28 = vadd.f32 %v390_v20, %v389_v25 }
  0xb7   :  { %v337_v8 = vadd.f32 %v336_v7, %v318_v5  ;;  %v319_v11 = vpop.f32.mrf.mxu1 }
  0xb8   :  { %v320_v17 = vadd.f32 %v319_v11, %v300_v10 }
  0xb9   :  { %v356_v9 = vadd.f32 %v355_v6, %v337_v8 }
  0xbb   :  { %v362_v13 = vpack.c.bf16 %v356_v9, %v356_v9  ;;  %v387_v16 = vmul.f32 %v356_v9, %v356_v9  ;;  %v373_v21 = vsel %vm369_vm2, %v356_v9, 0.0 }
  0xbc   :  { %v374_v29 = vadd.f32 %v373_v21, %v372_v23 }
  0xbd   :  { %367 = vst.msk [vmem:[%s780_s2 + $0x8] sm:$0xf] %vm364_vm1, %v362_v13  ;;  %v392_v26 = vsel %vm369_vm2, %v387_v16, 0.0 }
  0xbe   :  { %v338_v18 = vpop.f32.mrf.mxu2  ;;  %v393_v33 = vadd.f32 %v392_v26, %v391_v28 }
  0xbf   :  { %v339_v22 = vadd.f32 %v338_v18, %v320_v17 }
  0xc1   :  { %v358_v27 = vadd.f32 %v357_v24, %v339_v22 }
  0xc3   :  { %v363_v30 = vpack.c.bf16 %v358_v27, %v358_v27  ;;  %v375_v31 = vsel %vm369_vm2, %v358_v27, 0.0  ;;  %v388_v32 = vmul.f32 %v358_v27, %v358_v27 }
  0xc4   :  { %v376_v34 = vadd.f32 %v375_v31, %v374_v29 }
  0xc5   :  { %368 = vst.msk [vmem:[%s780_s2 + $0xc] sm:$0xf] %vm364_vm1, %v363_v30  ;;  %v394_v35 = vsel %vm369_vm2, %v388_v32, 0.0 }
  0xc6   :  { %v377_v36 = vrot.slane %v376_v34, 4  ;;  %v395_v37 = vadd.f32 %v394_v35, %v393_v33 }
  0xc8   :  { %v378_v38 = vadd.f32 %v377_v36, %v376_v34  ;;  %v396_v39 = vrot.slane %v395_v37, 4 }
  0xca   :  { %v379_v40 = vrot.slane %v378_v38, 2  ;;  %v397_v41 = vadd.f32 %v396_v39, %v395_v37 }
  0xcc   :  { %v380_v42 = vadd.f32 %v379_v40, %v378_v38  ;;  %v398_v43 = vrot.slane %v397_v41, 2 }
  0xce   :  { %v381_v44 = vrot.slane %v380_v42, 1  ;;  %v399_v45 = vadd.f32 %v398_v43, %v397_v41 }
  0xd0   :  { %v382_v46 = vadd.f32 %v381_v44, %v380_v42  ;;  %v400_v47 = vrot.slane %v399_v45, 1 }
  0xd2   :  { %384 = vst.msk [vmem:[%s781_s3] sm:$0x1] %vm383_vm3, %v382_v46  ;;  %v401_v48 = vadd.f32 %v400_v47, %v399_v45 }
  0xd4   :  { %402 = vst.msk [vmem:[%s782_s4] sm:$0x1] %vm383_vm3, %v401_v48 }

// kernel: resnet_ae_forward.128
= control target key start
LH: loop header
LB: loop body
LE: loop exit
PB: predicated region body
PF: predicated region fallthrough
CT: control target
= control target key end

     0   :  { %vm45_vm0 = vcmask 261120   ;;  %s199_s1 = inlined_call_operand.vmem [shape: bf16[32,128], index: 1, kind: input, shape index: {}]   ;;  %s200_s0 = inlined_call_operand.vmem [shape: bf16[32,32], index: 0, kind: input, shape index: {}]   ;;  %s201_s2 = inlined_call_operand.vmem [shape: bf16[32,128], index: 2, kind: output, shape index: {0}]   ;;  %s202_s3 = inlined_call_operand.vmem [shape: f32[1,1,128], index: 3, kind: output, shape index: {1}]   ;;  %s203_s4 = inlined_call_operand.vmem [shape: f32[1,1,128], index: 4, kind: output, shape index: {2}]  }
   0x1   :  { %v136_v0 = vld [vmem:[%s199_s1 + $0x8] sm:$0xff]  ;;  %v135_v1 = vld [vmem:[%s199_s1] sm:$0xff] }
   0x2   :  { %58 = vmatpush.bf16.msra.mxu0 %v136_v0  ;;  %148 = vmatpush.bf16.msra.mxu1 %v136_v0  ;;  %v133_v2 = vld [vmem:[%s200_s0] sm:$0xff]  ;;  %v134_v3 = vld [vmem:[%s200_s0 + $0x8] sm:$0xff] }
   0x6   :  { %59 = vmatpush.bf16.msra.mxu0 %v135_v1  ;;  %149 = vmatpush.bf16.msra.mxu1 %v135_v1 }
   0x9   :  { %131 = vmatmul.msk.bf16.vlgmr.msra.gmra.mxu0 %vm45_vm0, %v133_v2  ;;  %132 = vmatmul.msk.bf16.vlgmr.msra.gmra.mxu1 %vm45_vm0, %v134_v3 }
  0x86   :  { %v61_v4 = vpop.f32.mrf.mxu0  ;;  %v66_v5 = vpop.f32.mrf.mxu1 }
  0x87   :  { %v89_v6 = vmul.f32 %v61_v4, %v61_v4  ;;  %v91_v13 = vmul.f32 %v66_v5, %v66_v5 }
  0x8e   :  { %v63_v7 = vpop.f32.mrf.mxu0  ;;  %v68_v8 = vpop.f32.mrf.mxu1 }
  0x8f   :  { %v140_v9 = vpack.c.bf16 %v63_v7, %v61_v4  ;;  %v79_v10 = vadd.f32 %v63_v7, %v61_v4  ;;  %v90_v11 = vmul.f32 %v63_v7, %v63_v7  ;;  %v145_v12 = vpack.c.bf16 %v68_v8, %v66_v5 }
  0x90   :  { %v92_v17 = vmul.f32 %v68_v8, %v68_v8 }
  0x91   :  { %141 = vst [vmem:[%s201_s2] sm:$0xff] %v140_v9   ;;  %v93_v14 = vadd.f32 %v90_v11, %v89_v6  ;;  %v80_v15 = vadd.f32 %v79_v10, %v66_v5 }
  0x92   :  { %147 = vst [vmem:[%s201_s2 + $0x8] sm:$0xff] %v145_v12  }
  0x93   :  { %v81_v16 = vadd.f32 %v80_v15, %v68_v8  ;;  %v94_v18 = vadd.f32 %v93_v14, %v91_v13 }
  0x95   :  { %v82_v19 = vrot.slane %v81_v16, 4  ;;  %v95_v20 = vadd.f32 %v94_v18, %v92_v17 }
  0x97   :  { %v83_v21 = vadd.f32 %v82_v19, %v81_v16  ;;  %v96_v22 = vrot.slane %v95_v20, 4 }
  0x99   :  { %v84_v23 = vrot.slane %v83_v21, 2  ;;  %v97_v24 = vadd.f32 %v96_v22, %v95_v20 }
  0x9b   :  { %v85_v25 = vadd.f32 %v84_v23, %v83_v21  ;;  %v98_v26 = vrot.slane %v97_v24, 2 }
  0x9d   :  { %v86_v27 = vrot.slane %v85_v25, 1  ;;  %v99_v28 = vadd.f32 %v98_v26, %v97_v24 }
  0x9f   :  { %v87_v29 = vadd.f32 %v86_v27, %v85_v25  ;;  %v100_v30 = vrot.slane %v99_v28, 1 }
  0xa1   :  { %88 = vst [vmem:[%s202_s3] sm:$0x1] %v87_v29  ;;  %v101_v31 = vadd.f32 %v100_v30, %v99_v28 }
  0xa3   :  { %102 = vst [vmem:[%s203_s4] sm:$0x1] %v101_v31 }

// kernel: tile.519
= control target key start
LH: loop header
LB: loop body
LE: loop exit
PB: predicated region body
PF: predicated region fallthrough
CT: control target
= control target key end

     0   :  { %s67_s10 = smov 112   ;;  %s68_s11 = smov 80   ;;  %vm3_vm0 = vcmask 130048   ;;  %vm9_vm1 = vcmask 1048448   ;;  %vm15_vm2 = vcmask 917248   ;;  %vm21_vm3 = vcmask 786048   ;;  %s111_s0 = inlined_call_operand.vmem [shape: f32[8,16], index: 0, kind: input, shape index: {}]   ;;  %s112_s1 = inlined_call_operand.vmem [shape: f32[128], index: 1, kind: output, shape index: {}]  }
   0x1   :  { %v53_v0 = vld [vmem:[%s111_s0 + $0x7] sm:$0x1]   ;;  %v55_v1 = vld [vmem:[%s111_s0 + $0x5] sm:$0x1]   ;;  %v57_v2 = vld [vmem:[%s111_s0 + $0x3] sm:$0x1]  }
   0x2   :  { %7 = vrot.lane.b32.xlu0 %v53_v0, %s67_s10  ;;  %19 = vrot.lane.b32.xlu1 %v55_v1, %s68_s11  ;;  %s69_s14 = smov 48   ;;  %v54_v3 = vld [vmem:[%s111_s0 + $0x6] sm:$0x1]   ;;  %v56_v4 = vld [vmem:[%s111_s0 + $0x4] sm:$0x1]   ;;  %s70_s21 = smov 96  }
   0x3   :  { %31 = vrot.lane.b32.xlu2 %v57_v2, %s69_s14  ;;  %v58_v5 = vld [vmem:[%s111_s0 + $0x2] sm:$0x1]   ;;  %s71_s22 = smov 64   ;;  %s72_s23 = smov 32   ;;  %v59_v6 = vld [vmem:[%s111_s0 + $0x1] sm:$0x1]  }
   0x4   :  { %s73_s26 = smov 16   ;;  %v2_v7 = vld [vmem:[%s111_s0] sm:$0x1]   ;;  %vm27_vm4 = vcmask 654848   ;;  %vm33_vm5 = vcmask 523648   ;;  %vm39_vm6 = vcmask 392448  }
   0x5   :  { %4 = vst.msk [vmem:[#allocation0] sm:$0x1] %vm3_vm0, %v2_v7   ;;  %vm45_vm7 = vcmask 261248  }
   0xa   :  { %13 = vrot.lane.b32.xlu0 %v54_v3, %s70_s21  ;;  %25 = vrot.lane.b32.xlu1 %v56_v4, %s71_s22 }
   0xb   :  { %37 = vrot.lane.b32.xlu2 %v58_v5, %s72_s23 }
  0x12   :  { %43 = vrot.lane.b32.xlu0 %v59_v6, %s73_s26 }
  0x5d   :  { %v32_v8 = vpop.permute.xlu2 %31  }
  0x65   :  { %v38_v9 = vpop.permute.xlu2 %37  }
  0x74   :  { %v8_v10 = vpop.permute.xlu0 %7   ;;  %v20_v11 = vpop.permute.xlu1 %19  }
  0x75   :  { %10 = vst.msk [vmem:[#allocation0] sm:$0x1] %vm9_vm1, %v8_v10  }
  0x7c   :  { %v14_v12 = vpop.permute.xlu0 %13   ;;  %v26_v13 = vpop.permute.xlu1 %25  }
  0x7d   :  { %16 = vst.msk [vmem:[#allocation0] sm:$0x1] %vm15_vm2, %v14_v12  }
  0x7e   :  { %22 = vst.msk [vmem:[#allocation0] sm:$0x1] %vm21_vm3, %v20_v11  }
  0x7f   :  { %28 = vst.msk [vmem:[#allocation0] sm:$0x1] %vm27_vm4, %v26_v13  }
  0x80   :  { %34 = vst.msk [vmem:[#allocation0] sm:$0x1] %vm33_vm5, %v32_v8  }
  0x81   :  { %40 = vst.msk [vmem:[#allocation0] sm:$0x1] %vm39_vm6, %v38_v9  }
  0x84   :  { %v44_v14 = vpop.permute.xlu0 %43  }
  0x85   :  { %46 = vst.msk [vmem:[#allocation0] sm:$0x1] %vm45_vm7, %v44_v14  }
  0x8c   :  { %v49_v15 = vld [vmem:[#allocation0] sm:$0x1] }
  0x8d   :  { %52 = vst [vmem:[%s112_s1] sm:$0x1] %v49_v15 }

// kernel: tile.520
= control target key start
LH: loop header
LB: loop body
LE: loop exit
PB: predicated region body
PF: predicated region fallthrough
CT: control target
= control target key end

     0   :  { %s22_s0 = inlined_call_operand.vmem [shape: f32[128], index: 0, kind: input, shape index: {}]   ;;  %s23_s1 = inlined_call_operand.vmem [shape: f32[4,128], index: 1, kind: output, shape index: {}]  }
   0x1   :  { %v4_v0 = vld [vmem:[%s22_s0] ss:$0 sm:$0xff] }
   0x2   :  { %5 = vst [vmem:[%s23_s1] sm:$0xf] %v4_v0 }

// kernel: tile.493
= control target key start
LH: loop header
LB: loop body
LE: loop exit
PB: predicated region body
PF: predicated region fallthrough
CT: control target
= control target key end

     0   :  { %s131_s10 = smov 60   ;;  %s132_s11 = smov 52   ;;  %vm3_vm0 = vcmask 31744   ;;  %vm9_vm1 = vcmask 523744   ;;  %vm15_vm2 = vcmask 490944   ;;  %vm21_vm3 = vcmask 458144   ;;  %s207_s0 = inlined_call_operand.vmem [shape: f32[16,4], index: 0, kind: input, shape index: {}]   ;;  %s208_s1 = inlined_call_operand.vmem [shape: f32[64], index: 1, kind: output, shape index: {}]  }
   0x1   :  { %v101_v0 = vld [vmem:[%s207_s0 + $0xf] sm:$0x1]   ;;  %v103_v1 = vld [vmem:[%s207_s0 + $0xd] sm:$0x1]   ;;  %v105_v2 = vld [vmem:[%s207_s0 + $0xb] sm:$0x1]  }
   0x2   :  { %7 = vrot.lane.b32.xlu0 %v101_v0, %s131_s10  ;;  %19 = vrot.lane.b32.xlu1 %v103_v1, %s132_s11  ;;  %s133_s14 = smov 44   ;;  %v102_v3 = vld [vmem:[%s207_s0 + $0xe] sm:$0x1]   ;;  %v104_v4 = vld [vmem:[%s207_s0 + $0xc] sm:$0x1]   ;;  %s134_s19 = smov 56  }
   0x3   :  { %31 = vrot.lane.b32.xlu2 %v105_v2, %s133_s14  ;;  %s135_s20 = smov 48   ;;  %v106_v5 = vld [vmem:[%s207_s0 + $0xa] sm:$0x1]   ;;  %s136_s23 = smov 40   ;;  %v107_v6 = vld [vmem:[%s207_s0 + $0x9] sm:$0x1]  }
   0x4   :  { %v108_v7 = vld [vmem:[%s207_s0 + $0x8] sm:$0x1]   ;;  %s137_s28 = smov 36   ;;  %s138_s29 = smov 32   ;;  %v109_v8 = vld [vmem:[%s207_s0 + $0x7] sm:$0x1]  }
   0x5   :  { %s139_s3 = smov 28   ;;  %v110_v9 = vld [vmem:[%s207_s0 + $0x6] sm:$0x1]   ;;  %v111_v10 = vld [vmem:[%s207_s0 + $0x5] sm:$0x1]   ;;  %s140_s8 = smov 24  }
   0x6   :  { %s141_s9 = smov 20   ;;  %v112_v11 = vld [vmem:[%s207_s0 + $0x4] sm:$0x1]   ;;  %s142_s12 = smov 16   ;;  %v113_v12 = vld [vmem:[%s207_s0 + $0x3] sm:$0x1]  }
   0x7   :  { %v114_v13 = vld [vmem:[%s207_s0 + $0x2] sm:$0x1]   ;;  %s143_s17 = smov 12   ;;  %s144_s18 = smov 8   ;;  %v115_v14 = vld [vmem:[%s207_s0 + $0x1] sm:$0x1]  }
   0x8   :  { %s145_s21 = smov 4   ;;  %v2_v15 = vld [vmem:[%s207_s0] sm:$0x1]   ;;  %vm27_vm4 = vcmask 425344   ;;  %vm33_vm5 = vcmask 392544   ;;  %vm39_vm6 = vcmask 359744  }
   0x9   :  { %4 = vst.msk [vmem:[#allocation0] sm:$0x1] %vm3_vm0, %v2_v15   ;;  %vm45_vm7 = vcmask 326944   ;;  %vm51_vm8 = vcmask 294144   ;;  %vm57_vm9 = vcmask 261344   ;;  %vm63_vm10 = vcmask 228544  }
   0xa   :  { %13 = vrot.lane.b32.xlu0 %v102_v3, %s134_s19  ;;  %25 = vrot.lane.b32.xlu1 %v104_v4, %s135_s20  ;;  %vm69_vm11 = vcmask 195744   ;;  %vm75_vm12 = vcmask 162944   ;;  %vm81_vm13 = vcmask 130144   ;;  %vm87_vm14 = vcmask 97344  }
   0xb   :  { %37 = vrot.lane.b32.xlu2 %v106_v5, %s136_s23  ;;  %vm93_vm15 = vcmask 64544  }
  0x12   :  { %43 = vrot.lane.b32.xlu0 %v107_v6, %s137_s28  ;;  %49 = vrot.lane.b32.xlu1 %v108_v7, %s138_s29 }
  0x13   :  { %55 = vrot.lane.b32.xlu2 %v109_v8, %s139_s3 }
  0x1a   :  { %61 = vrot.lane.b32.xlu0 %v110_v9, %s140_s8  ;;  %67 = vrot.lane.b32.xlu1 %v111_v10, %s141_s9 }
  0x1b   :  { %73 = vrot.lane.b32.xlu2 %v112_v11, %s142_s12 }
  0x22   :  { %79 = vrot.lane.b32.xlu0 %v113_v12, %s143_s17  ;;  %85 = vrot.lane.b32.xlu1 %v114_v13, %s144_s18 }
  0x23   :  { %91 = vrot.lane.b32.xlu2 %v115_v14, %s145_s21 }
  0x5d   :  { %v32_v16 = vpop.permute.xlu2 %31  }
  0x65   :  { %v38_v17 = vpop.permute.xlu2 %37  }
  0x6d   :  { %v56_v18 = vpop.permute.xlu2 %55  }
  0x74   :  { %v8_v19 = vpop.permute.xlu0 %7   ;;  %v20_v20 = vpop.permute.xlu1 %19  }
  0x75   :  { %10 = vst.msk [vmem:[#allocation0] sm:$0x1] %vm9_vm1, %v8_v19   ;;  %v74_v21 = vpop.permute.xlu2 %73  }
  0x7c   :  { %v14_v22 = vpop.permute.xlu0 %13   ;;  %v26_v23 = vpop.permute.xlu1 %25  }
  0x7d   :  { %16 = vst.msk [vmem:[#allocation0] sm:$0x1] %vm15_vm2, %v14_v22   ;;  %v92_v24 = vpop.permute.xlu2 %91  }
  0x7e   :  { %22 = vst.msk [vmem:[#allocation0] sm:$0x1] %vm21_vm3, %v20_v20  }
  0x7f   :  { %28 = vst.msk [vmem:[#allocation0] sm:$0x1] %vm27_vm4, %v26_v23  }
  0x80   :  { %34 = vst.msk [vmem:[#allocation0] sm:$0x1] %vm33_vm5, %v32_v16  }
  0x81   :  { %40 = vst.msk [vmem:[#allocation0] sm:$0x1] %vm39_vm6, %v38_v17  }
  0x84   :  { %v44_v25 = vpop.permute.xlu0 %43   ;;  %v50_v26 = vpop.permute.xlu1 %49  }
  0x85   :  { %46 = vst.msk [vmem:[#allocation0] sm:$0x1] %vm45_vm7, %v44_v25  }
  0x86   :  { %52 = vst.msk [vmem:[#allocation0] sm:$0x1] %vm51_vm8, %v50_v26  }
  0x87   :  { %58 = vst.msk [vmem:[#allocation0] sm:$0x1] %vm57_vm9, %v56_v18  }
  0x8c   :  { %v62_v27 = vpop.permute.xlu0 %61   ;;  %v68_v28 = vpop.permute.xlu1 %67  }
  0x8d   :  { %64 = vst.msk [vmem:[#allocation0] sm:$0x1] %vm63_vm10, %v62_v27  }
  0x8e   :  { %70 = vst.msk [vmem:[#allocation0] sm:$0x1] %vm69_vm11, %v68_v28  }
  0x8f   :  { %76 = vst.msk [vmem:[#allocation0] sm:$0x1] %vm75_vm12, %v74_v21  }
  0x94   :  { %v80_v29 = vpop.permute.xlu0 %79   ;;  %v86_v30 = vpop.permute.xlu1 %85  }
  0x95   :  { %82 = vst.msk [vmem:[#allocation0] sm:$0x1] %vm81_vm13, %v80_v29  }
  0x96   :  { %88 = vst.msk [vmem:[#allocation0] sm:$0x1] %vm87_vm14, %v86_v30  }
  0x97   :  { %94 = vst.msk [vmem:[#allocation0] sm:$0x1] %vm93_vm15, %v92_v24  }
  0x9e   :  { %v97_v31 = vld [vmem:[#allocation0] sm:$0x1] }
  0x9f   :  { %100 = vst [vmem:[%s208_s1] sm:$0x1] %v97_v31 }

// kernel: tile.494
= control target key start
LH: loop header
LB: loop body
LE: loop exit
PB: predicated region body
PF: predicated region fallthrough
CT: control target
= control target key end

     0   :  { %s22_s0 = inlined_call_operand.vmem [shape: f32[64], index: 0, kind: input, shape index: {}]   ;;  %s23_s1 = inlined_call_operand.vmem [shape: f32[8,64], index: 1, kind: output, shape index: {}]  }
   0x1   :  { %v4_v0 = vld [vmem:[%s22_s0] ss:$0 sm:$0xff] }
   0x2   :  { %5 = vst [vmem:[%s23_s1] sm:$0xff] %v4_v0 }

// kernel: tile.495
= control target key start
LH: loop header
LB: loop body
LE: loop exit
PB: predicated region body
PF: predicated region fallthrough
CT: control target
= control target key end

     0   :  { %vm3_vm0 = vcmask 523264   ;;  %s40_s8 = smov 64   ;;  %vm9_vm1 = vcmask 1048064   ;;  %s69_s0 = inlined_call_operand.vmem [shape: f32[8,64], index: 0, kind: input, shape index: {}]   ;;  %s70_s1 = inlined_call_operand.vmem [shape: f32[1,512], index: 1, kind: output, shape index: {}]  }
   0x1   :  { %v35_v0 = vld [vmem:[%s69_s0 + $0x1] ss:$2 sm:$0xf]   ;;  %v2_v1 = vld [vmem:[%s69_s0] ss:$2 sm:$0xf]  }
   0x2   :  { %7 = vrot.lane.b32.xlu0 %v35_v0, %s40_s8  ;;  %4 = vst.msk [vmem:[#allocation0] ss:$8 sm:$0xf] %vm3_vm0, %v2_v1  }
  0x74   :  { %v8_v2 = vpop.permute.xlu0 %7  }
  0x75   :  { %10 = vst.msk [vmem:[#allocation0] ss:$8 sm:$0xf] %vm9_vm1, %v8_v2  }
  0x7c   :  { %v13_v3 = vld [vmem:[#allocation0] sm:$0x1]  ;;  %v18_v4 = vld [vmem:[#allocation0 + $0x8] sm:$0x1]  ;;  %v24_v5 = vld [vmem:[#allocation0 + $0x10] sm:$0x1] }
  0x7d   :  { %16 = vst [vmem:[%s70_s1] sm:$0x1] %v13_v3  ;;  %v30_v6 = vld [vmem:[#allocation0 + $0x18] sm:$0x1] }
  0x7e   :  { %36 = vst [vmem:[%s70_s1 + $0x1] sm:$0x1] %v18_v4 }
  0x7f   :  { %37 = vst [vmem:[%s70_s1 + $0x2] sm:$0x1] %v24_v5 }
  0x80   :  { %38 = vst [vmem:[%s70_s1 + $0x3] sm:$0x1] %v30_v6 }

// kernel: resnet_ae_forward.121
= control target key start
LH: loop header
LB: loop body
LE: loop exit
PB: predicated region body
PF: predicated region fallthrough
CT: control target
= control target key end

     0   :  { %vm45_vm0 = vcmask 261120   ;;  %vm75_vm1 = vcmask 519168   ;;  %vm80_vm2 = vcmask 523264   ;;  %vm94_vm3 = vcmask 516096   ;;  %s217_s1 = inlined_call_operand.vmem [shape: bf16[32,64], index: 1, kind: input, shape index: {}]   ;;  %s218_s0 = inlined_call_operand.vmem [shape: bf16[32,32], index: 0, kind: input, shape index: {}]   ;;  %s219_s2 = inlined_call_operand.vmem [shape: bf16[32,64], index: 2, kind: output, shape index: {0}]   ;;  %s220_s3 = inlined_call_operand.vmem [shape: f32[1,1,64], index: 3, kind: output, shape index: {1}]   ;;  %s221_s4 = inlined_call_operand.vmem [shape: f32[1,1,64], index: 4, kind: output, shape index: {2}]  }
   0x1   :  { %v147_v0 = vld [vmem:[%s217_s1 + $0x8] sm:$0xff]  ;;  %v146_v1 = vld [vmem:[%s217_s1] sm:$0xff] }
   0x2   :  { %58 = vmatpush.bf16.msra.mxu0 %v147_v0  ;;  %148 = vmatpush.bf16.msra.mxu1 %v147_v0  ;;  %v144_v2 = vld [vmem:[%s218_s0] sm:$0xff]  ;;  %v145_v3 = vld [vmem:[%s218_s0 + $0x8] sm:$0xff] }
   0x6   :  { %59 = vmatpush.bf16.msra.mxu0 %v146_v1  ;;  %149 = vmatpush.bf16.msra.mxu1 %v146_v1 }
   0x9   :  { %142 = vmatmul.msk.bf16.vlgmr.msra.gmra.mxu0 %vm45_vm0, %v144_v2  ;;  %143 = vmatmul.msk.bf16.vlgmr.msra.gmra.mxu1 %vm45_vm0, %v145_v3 }
  0x86   :  { %v61_v4 = vpop.f32.mrf.mxu0  ;;  %v66_v5 = vpop.f32.mrf.mxu1 }
  0x87   :  { %v71_v6 = vpack.c.bf16 %v61_v4, %v61_v4  ;;  %v73_v7 = vpack.c.bf16 %v66_v5, %v66_v5  ;;  %v96_v8 = vmul.f32 %v61_v4, %v61_v4  ;;  %v81_v9 = vsel %vm80_vm2, %v61_v4, 0.0 }
  0x88   :  { %v98_v10 = vmul.f32 %v66_v5, %v66_v5  ;;  %v84_v19 = vsel %vm80_vm2, %v66_v5, 0.0 }
  0x89   :  { %76 = vst.msk [vmem:[%s219_s2] sm:$0xf] %vm75_vm1, %v71_v6  ;;  %v100_v18 = vsel %vm80_vm2, %v96_v8, 0.0 }
  0x8a   :  { %78 = vst.msk [vmem:[%s219_s2 + $0x8] sm:$0xf] %vm75_vm1, %v73_v7  ;;  %v103_v24 = vsel %vm80_vm2, %v98_v10, 0.0 }
  0x8e   :  { %v63_v11 = vpop.f32.mrf.mxu0  ;;  %v68_v12 = vpop.f32.mrf.mxu1 }
  0x8f   :  { %v72_v13 = vpack.c.bf16 %v63_v11, %v63_v11  ;;  %v82_v14 = vsel %vm80_vm2, %v63_v11, 0.0  ;;  %v97_v15 = vmul.f32 %v63_v11, %v63_v11  ;;  %v74_v16 = vpack.c.bf16 %v68_v12, %v68_v12 }
  0x90   :  { %v83_v17 = vadd.f32 %v82_v14, %v81_v9  ;;  %v99_v21 = vmul.f32 %v68_v12, %v68_v12  ;;  %v86_v25 = vsel %vm80_vm2, %v68_v12, 0.0 }
  0x91   :  { %77 = vst.msk [vmem:[%s219_s2 + $0x4] sm:$0xf] %vm75_vm1, %v72_v13  ;;  %v101_v20 = vsel %vm80_vm2, %v97_v15, 0.0 }
  0x92   :  { %v102_v22 = vadd.f32 %v101_v20, %v100_v18  ;;  %79 = vst.msk [vmem:[%s219_s2 + $0xc] sm:$0xf] %vm75_vm1, %v74_v16  ;;  %v85_v23 = vadd.f32 %v84_v19, %v83_v17  ;;  %v105_v28 = vsel %vm80_vm2, %v99_v21, 0.0 }
  0x94   :  { %v87_v26 = vadd.f32 %v86_v25, %v85_v23  ;;  %v104_v27 = vadd.f32 %v103_v24, %v102_v22 }
  0x96   :  { %v88_v29 = vrot.slane %v87_v26, 4  ;;  %v106_v30 = vadd.f32 %v105_v28, %v104_v27 }
  0x98   :  { %v89_v31 = vadd.f32 %v88_v29, %v87_v26  ;;  %v107_v32 = vrot.slane %v106_v30, 4 }
  0x9a   :  { %v90_v33 = vrot.slane %v89_v31, 2  ;;  %v108_v34 = vadd.f32 %v107_v32, %v106_v30 }
  0x9c   :  { %v91_v35 = vadd.f32 %v90_v33, %v89_v31  ;;  %v109_v36 = vrot.slane %v108_v34, 2 }
  0x9e   :  { %v92_v37 = vrot.slane %v91_v35, 1  ;;  %v110_v38 = vadd.f32 %v109_v36, %v108_v34 }
  0xa0   :  { %v93_v39 = vadd.f32 %v92_v37, %v91_v35  ;;  %v111_v40 = vrot.slane %v110_v38, 1 }
  0xa2   :  { %95 = vst.msk [vmem:[%s220_s3] sm:$0x1] %vm94_vm3, %v93_v39  ;;  %v112_v41 = vadd.f32 %v111_v40, %v110_v38 }
  0xa4   :  { %113 = vst.msk [vmem:[%s221_s4] sm:$0x1] %vm94_vm3, %v112_v41 }

// kernel: resnet_ae_forward.127
= control target key start
LH: loop header
LB: loop body
LE: loop exit
PB: predicated region body
PF: predicated region fallthrough
CT: control target
= control target key end

     0   :  { %vm31_vm0 = vcmask 1043456   ;;  %vm82_vm1 = vcmask 1041408   ;;  %vm86_vm2 = vcmask 1045508   ;;  %s150_s0 = inlined_call_operand.vmem [shape: bf16[4,512], index: 0, kind: input, shape index: {}]   ;;  %s151_s1 = inlined_call_operand.vmem [shape: f32[1,512], index: 1, kind: input, shape index: {}]   ;;  %s152_s2 = inlined_call_operand.vmem [shape: f32[1,512], index: 2, kind: input, shape index: {}]   ;;  %s153_s3 = inlined_call_operand.vmem [shape: bf16[4,512], index: 3, kind: input, shape index: {}]   ;;  %s154_s4 = inlined_call_operand.vmem [shape: bf16[4,512], index: 4, kind: input, shape index: {}]   ;;  %s155_s5 = inlined_call_operand.vmem [shape: bf16[4,512], index: 5, kind: output, shape index: {}]  }
   0x1   :  { %v20_v0 = vld [vmem:[%s150_s0] sm:$0xff] }
   0x2   :  { %v23_v1 = vld [vmem:[%s151_s1] sm:$0xf]  ;;  %v21_v5 = vunpack.c.l.bf16 %v20_v0  ;;  %v22_v14 = vunpack.c.h.bf16 %v20_v0 }
   0x3   :  { %v38_v2 = vld [vmem:[%s152_s2] sm:$0xf]  ;;  %v25_v3 = vperm.slane %v23_v1, 0  ;;  %v26_v4 = vperm.slane %v23_v1, 1  ;;  %v27_v10 = vperm.slane %v23_v1, 2  ;;  %v28_v11 = vperm.slane %v23_v1, 3 }
   0x4   :  { %v40_v6 = vperm.slane %v38_v2, 0  ;;  %v41_v7 = vperm.slane %v38_v2, 1  ;;  %v52_v9 = vld [vmem:[%s153_s3] sm:$0xff]  ;;  %v42_v15 = vperm.slane %v38_v2, 2  ;;  %v43_v16 = vperm.slane %v38_v2, 3 }
   0x5   :  { %v29_v8 = vrot.slane %v26_v4, 4  ;;  %v57_v13 = vld [vmem:[%s154_s4] sm:$0xff]  ;;  %v30_v18 = vrot.slane %v28_v11, 4  ;;  %v53_v21 = vunpack.c.l.bf16 %v52_v9  ;;  %v54_v28 = vunpack.c.h.bf16 %v52_v9 }
   0x6   :  { %v44_v12 = vrot.slane %v41_v7, 4  ;;  %v45_v22 = vrot.slane %v43_v16, 4  ;;  %v58_v23 = vunpack.c.l.bf16 %v57_v13  ;;  %v59_v31 = vunpack.c.h.bf16 %v57_v13 }
   0x7   :  { %v32_v17 = vsel %vm31_vm0, %v25_v3, %v29_v8  ;;  %v33_v24 = vsel %vm31_vm0, %v27_v10, %v30_v18 }
   0x8   :  { %v36_v19 = vmul.f32 %v32_v17, %v21_v5  ;;  %v46_v20 = vsel %vm31_vm0, %v40_v6, %v44_v12  ;;  %v37_v26 = vmul.f32 %v33_v24, %v22_v14  ;;  %v47_v27 = vsel %vm31_vm0, %v42_v15, %v45_v22 }
   0xa   :  { %v50_v25 = vadd.f32 %v46_v20, %v36_v19  ;;  %v51_v30 = vadd.f32 %v47_v27, %v37_v26 }
   0xc   :  { %v55_v29 = vadd.f32 %v53_v21, %v50_v25  ;;  %v56_v33 = vadd.f32 %v54_v28, %v51_v30 }
   0xe   :  { %v60_v32 = vadd.f32 %v58_v23, %v55_v29  ;;  %v61_v34 = vadd.f32 %v59_v31, %v56_v33 }
  0x10   :  { %64 = vst [vmem:[#allocation1] ss:$2 sm:$0xff] %v60_v32 }
  0x11   :  { %66 = vst [vmem:[#allocation1 + $0x10] ss:$2 sm:$0xff] %v61_v34 }
  0x17   :  { %v67_v35 = vld.sshfl [vmem:[#allocation1] sm:$0xff pattern:$0x75316420]  ;;  %v68_v36 = vld.sshfl [vmem:[#allocation1 + $0x8] sm:$0xff pattern:$0x75316420] }
  0x18   :  { %v75_v37 = vpack.c.bf16 %v68_v36, %v67_v35  ;;  %v69_v38 = vld.sshfl [vmem:[#allocation1 + $0x10] sm:$0xff pattern:$0x75316420]  ;;  %v70_v39 = vld.sshfl [vmem:[#allocation1 + $0x18] sm:$0xff pattern:$0x75316420] }
  0x19   :  { %v76_v40 = vpack.c.bf16 %v70_v39, %v69_v38 }
  0x1a   :  { %v79_v41 = vrot.slane %v75_v37, 2 }
  0x1b   :  { %v80_v42 = vrot.slane %v76_v40, 4  ;;  %v81_v43 = vrot.slane %v76_v40, 6 }
  0x1c   :  { %v85_v44 = vsel %vm82_vm1, %v75_v37, %v79_v41 }
  0x1d   :  { %v89_v45 = vsel %vm86_vm2, %v80_v42, %v81_v43 }
  0x1e   :  { %v90_v46 = vsel %vm31_vm0, %v85_v44, %v89_v45 }
  0x1f   :  { %92 = vst [vmem:[%s155_s5] sm:$0xff] %v90_v46 }

// kernel: tile.527
= control target key start
LH: loop header
LB: loop body
LE: loop exit
PB: predicated region body
PF: predicated region fallthrough
CT: control target
= control target key end

     0   :  { %s67_s10 = smov 28   ;;  %s68_s11 = smov 20   ;;  %vm3_vm0 = vcmask 31744   ;;  %vm9_vm1 = vcmask 261344   ;;  %vm15_vm2 = vcmask 228544   ;;  %vm21_vm3 = vcmask 195744   ;;  %s111_s0 = inlined_call_operand.vmem [shape: f32[8,4], index: 0, kind: input, shape index: {}]   ;;  %s112_s1 = inlined_call_operand.vmem [shape: f32[32], index: 1, kind: output, shape index: {}]  }
   0x1   :  { %v53_v0 = vld [vmem:[%s111_s0 + $0x7] sm:$0x1]   ;;  %v55_v1 = vld [vmem:[%s111_s0 + $0x5] sm:$0x1]   ;;  %v57_v2 = vld [vmem:[%s111_s0 + $0x3] sm:$0x1]  }
   0x2   :  { %7 = vrot.lane.b32.xlu0 %v53_v0, %s67_s10  ;;  %19 = vrot.lane.b32.xlu1 %v55_v1, %s68_s11  ;;  %s69_s14 = smov 12   ;;  %v54_v3 = vld [vmem:[%s111_s0 + $0x6] sm:$0x1]   ;;  %v56_v4 = vld [vmem:[%s111_s0 + $0x4] sm:$0x1]   ;;  %s70_s21 = smov 24  }
   0x3   :  { %31 = vrot.lane.b32.xlu2 %v57_v2, %s69_s14  ;;  %v58_v5 = vld [vmem:[%s111_s0 + $0x2] sm:$0x1]   ;;  %s71_s22 = smov 16   ;;  %s72_s23 = smov 8   ;;  %v59_v6 = vld [vmem:[%s111_s0 + $0x1] sm:$0x1]  }
   0x4   :  { %s73_s26 = smov 4   ;;  %v2_v7 = vld [vmem:[%s111_s0] sm:$0x1]   ;;  %vm27_vm4 = vcmask 162944   ;;  %vm33_vm5 = vcmask 130144   ;;  %vm39_vm6 = vcmask 97344  }
   0x5   :  { %4 = vst.msk [vmem:[#allocation0] sm:$0x1] %vm3_vm0, %v2_v7   ;;  %vm45_vm7 = vcmask 64544  }
   0xa   :  { %13 = vrot.lane.b32.xlu0 %v54_v3, %s70_s21  ;;  %25 = vrot.lane.b32.xlu1 %v56_v4, %s71_s22 }
   0xb   :  { %37 = vrot.lane.b32.xlu2 %v58_v5, %s72_s23 }
  0x12   :  { %43 = vrot.lane.b32.xlu0 %v59_v6, %s73_s26 }
  0x5d   :  { %v32_v8 = vpop.permute.xlu2 %31  }
  0x65   :  { %v38_v9 = vpop.permute.xlu2 %37  }
  0x74   :  { %v8_v10 = vpop.permute.xlu0 %7   ;;  %v20_v11 = vpop.permute.xlu1 %19  }
  0x75   :  { %10 = vst.msk [vmem:[#allocation0] sm:$0x1] %vm9_vm1, %v8_v10  }
  0x7c   :  { %v14_v12 = vpop.permute.xlu0 %13   ;;  %v26_v13 = vpop.permute.xlu1 %25  }
  0x7d   :  { %16 = vst.msk [vmem:[#allocation0] sm:$0x1] %vm15_vm2, %v14_v12  }
  0x7e   :  { %22 = vst.msk [vmem:[#allocation0] sm:$0x1] %vm21_vm3, %v20_v11  }
  0x7f   :  { %28 = vst.msk [vmem:[#allocation0] sm:$0x1] %vm27_vm4, %v26_v13  }
  0x80   :  { %34 = vst.msk [vmem:[#allocation0] sm:$0x1] %vm33_vm5, %v32_v8  }
  0x81   :  { %40 = vst.msk [vmem:[#allocation0] sm:$0x1] %vm39_vm6, %v38_v9  }
  0x84   :  { %v44_v14 = vpop.permute.xlu0 %43  }
  0x85   :  { %46 = vst.msk [vmem:[#allocation0] sm:$0x1] %vm45_vm7, %v44_v14  }
  0x8c   :  { %v49_v15 = vld [vmem:[#allocation0] sm:$0x1] }
  0x8d   :  { %52 = vst [vmem:[%s112_s1] sm:$0x1] %v49_v15 }

// kernel: resnet_ae_forward.130
= control target key start
LH: loop header
LB: loop body
LE: loop exit
PB: predicated region body
PF: predicated region fallthrough
CT: control target
= control target key end

     0   :  { %vm79_vm0 = vcmask 130048   ;;  %vm169_vm1 = vcmask 257024   ;;  %vm186_vm2 = vcmask 261120   ;;  %vm224_vm3 = vcmask 253952   ;;  %s545_s1 = inlined_call_operand.vmem [shape: bf16[16,32], index: 1, kind: input, shape index: {}]   ;;  %s546_s0 = inlined_call_operand.vmem [shape: bf16[128,16], index: 0, kind: input, shape index: {}]   ;;  %s547_s2 = inlined_call_operand.vmem [shape: bf16[128,32], index: 2, kind: output, shape index: {0}]   ;;  %s548_s3 = inlined_call_operand.vmem [shape: f32[1,1,32], index: 3, kind: output, shape index: {1}]   ;;  %s549_s4 = inlined_call_operand.vmem [shape: f32[1,1,32], index: 4, kind: output, shape index: {2}]  }
   0x1   :  { %v344_v0 = vld [vmem:[%s545_s1] sm:$0xff]  ;;  %v338_v2 = vld [vmem:[%s546_s0 + $0x10] sm:$0xff]  ;;  %v337_v5 = vld [vmem:[%s546_s0 + $0x8] sm:$0xff] }
   0x2   :  { %v336_v1 = vld [vmem:[%s546_s0] sm:$0xff]  ;;  %111 = vmatpush.bf16.msra.mxu0 %v344_v0  ;;  %345 = vmatpush.bf16.msra.mxu1 %v344_v0  ;;  %v342_v4 = vld [vmem:[%s546_s0 + $0x30] sm:$0xff]  ;;  %v339_v6 = vld [vmem:[%s546_s0 + $0x18] sm:$0xff] }
   0x3   :  { %v340_v3 = vld [vmem:[%s546_s0 + $0x20] sm:$0xff]  ;;  %346 = vmatpush.bf16.msra.mxu2 %v344_v0  ;;  %347 = vmatpush.bf16.msra.mxu3 %v344_v0  ;;  %v341_v7 = vld [vmem:[%s546_s0 + $0x28] sm:$0xff]  ;;  %v343_v8 = vld [vmem:[%s546_s0 + $0x38] sm:$0xff] }
   0x5   :  { %328 = vmatmul.msk.bf16.vlgmr.msra.gmra.mxu0 %vm79_vm0, %v336_v1  ;;  %330 = vmatmul.msk.bf16.vlgmr.msra.gmra.mxu1 %vm79_vm0, %v338_v2 }
   0x6   :  { %332 = vmatmul.msk.bf16.vlgmr.msra.gmra.mxu2 %vm79_vm0, %v340_v3  ;;  %334 = vmatmul.msk.bf16.vlgmr.msra.gmra.mxu3 %vm79_vm0, %v342_v4 }
  0x15   :  { %329 = vmatmul.msk.bf16.gmra.mxu0 %vm79_vm0, %v337_v5  ;;  %331 = vmatmul.msk.bf16.gmra.mxu1 %vm79_vm0, %v339_v6 }
  0x16   :  { %333 = vmatmul.msk.bf16.gmra.mxu2 %vm79_vm0, %v341_v7  ;;  %335 = vmatmul.msk.bf16.gmra.mxu3 %vm79_vm0, %v343_v8 }
  0x82   :  { %v113_v9 = vpop.f32.mrf.mxu0  ;;  %v123_v10 = vpop.f32.mrf.mxu1 }
  0x83   :  { %v153_v11 = vpack.c.bf16 %v113_v9, %v113_v9  ;;  %v157_v12 = vpack.c.bf16 %v123_v10, %v123_v10  ;;  %v226_v30 = vmul.f32 %v113_v9, %v113_v9  ;;  %v187_v33 = vsel %vm186_vm2, %v113_v9, 0.0 }
  0x84   :  { %v230_v38 = vmul.f32 %v123_v10, %v123_v10  ;;  %v194_v54 = vsel %vm186_vm2, %v123_v10, 0.0 }
  0x85   :  { %170 = vst.msk [vmem:[%s547_s2] sm:$0xf] %vm169_vm1, %v153_v11  ;;  %v242_v37 = vsel %vm186_vm2, %v226_v30, 0.0 }
  0x86   :  { %174 = vst.msk [vmem:[%s547_s2 + $0x10] sm:$0xf] %vm169_vm1, %v157_v12  ;;  %v249_v59 = vsel %vm186_vm2, %v230_v38, 0.0 }
  0x89   :  { %v416_v13 = vpop.f32.mrf.mxu2  ;;  %v418_v14 = vpop.f32.mrf.mxu3 }
  0x8a   :  { %v115_v15 = vpop.f32.mrf.mxu0  ;;  %v125_v16 = vpop.f32.mrf.mxu1  ;;  %v161_v17 = vpack.c.bf16 %v416_v13, %v416_v13  ;;  %v165_v20 = vpack.c.bf16 %v418_v14, %v418_v14  ;;  %v234_v8 = vmul.f32 %v416_v13, %v416_v13 }
  0x8b   :  { %v154_v18 = vpack.c.bf16 %v115_v15, %v115_v15  ;;  %v158_v19 = vpack.c.bf16 %v125_v16, %v125_v16  ;;  %v227_v26 = vmul.f32 %v115_v15, %v115_v15  ;;  %v188_v31 = vsel %vm186_vm2, %v115_v15, 0.0 }
  0x8c   :  { %178 = vst.msk [vmem:[%s547_s2 + $0x20] sm:$0xf] %vm169_vm1, %v161_v17  ;;  %v189_v36 = vadd.f32 %v188_v31, %v187_v33  ;;  %v231_v55 = vmul.f32 %v125_v16, %v125_v16  ;;  %v196_v60 = vsel %vm186_vm2, %v125_v16, 0.0  ;;  %v202_v16 = vsel %vm186_vm2, %v416_v13, 0.0 }
  0x8d   :  { %171 = vst.msk [vmem:[%s547_s2 + $0x4] sm:$0xf] %vm169_vm1, %v154_v18  ;;  %v243_v34 = vsel %vm186_vm2, %v227_v26, 0.0 }
  0x8e   :  { %175 = vst.msk [vmem:[%s547_s2 + $0x14] sm:$0xf] %vm169_vm1, %v158_v19  ;;  %v244_v42 = vadd.f32 %v243_v34, %v242_v37  ;;  %v251_v0 = vsel %vm186_vm2, %v231_v55, 0.0 }
  0x8f   :  { %182 = vst.msk [vmem:[%s547_s2 + $0x30] sm:$0xf] %vm169_vm1, %v165_v20 }
  0x91   :  { %v440_v21 = vpop.f32.mrf.mxu2  ;;  %v442_v22 = vpop.f32.mrf.mxu3 }
  0x92   :  { %v118_v23 = vpop.f32.mrf.mxu0  ;;  %v128_v24 = vpop.f32.mrf.mxu1  ;;  %v162_v25 = vpack.c.bf16 %v440_v21, %v440_v21  ;;  %v166_v29 = vpack.c.bf16 %v442_v22, %v442_v22  ;;  %v235_v17 = vmul.f32 %v440_v21, %v440_v21  ;;  %v239_v37 = vmul.f32 %v442_v22, %v442_v22 }
  0x93   :  { %v155_v27 = vpack.c.bf16 %v118_v23, %v118_v23  ;;  %v159_v28 = vpack.c.bf16 %v128_v24, %v128_v24  ;;  %v228_v32 = vmul.f32 %v118_v23, %v118_v23  ;;  %v190_v35 = vsel %vm186_vm2, %v118_v23, 0.0 }
  0x94   :  { %179 = vst.msk [vmem:[%s547_s2 + $0x24] sm:$0xf] %vm169_vm1, %v162_v25  ;;  %v191_v43 = vadd.f32 %v190_v35, %v189_v36  ;;  %v232_v61 = vmul.f32 %v128_v24, %v128_v24  ;;  %v198_v1 = vsel %vm186_vm2, %v128_v24, 0.0  ;;  %v257_v23 = vsel %vm186_vm2, %v234_v8, 0.0 }
  0x95   :  { %172 = vst.msk [vmem:[%s547_s2 + $0x8] sm:$0xf] %vm169_vm1, %v155_v27  ;;  %v245_v39 = vsel %vm186_vm2, %v228_v32, 0.0  ;;  %v204_v24 = vsel %vm186_vm2, %v440_v21, 0.0  ;;  %v259_v27 = vsel %vm186_vm2, %v235_v17, 0.0  ;;  %v238_v32 = vmul.f32 %v418_v14, %v418_v14 }
  0x96   :  { %176 = vst.msk [vmem:[%s547_s2 + $0x18] sm:$0xf] %vm169_vm1, %v159_v28  ;;  %v246_v52 = vadd.f32 %v245_v39, %v244_v42  ;;  %v253_v9 = vsel %vm186_vm2, %v232_v61, 0.0  ;;  %v210_v21 = vsel %vm186_vm2, %v418_v14, 0.0 }
  0x97   :  { %183 = vst.msk [vmem:[%s547_s2 + $0x34] sm:$0xf] %vm169_vm1, %v166_v29  ;;  %v265_v42 = vsel %vm186_vm2, %v238_v32, 0.0 }
  0x99   :  { %v138_v40 = vpop.f32.mrf.mxu2  ;;  %v470_v41 = vpop.f32.mrf.mxu3 }
  0x9a   :  { %v120_v44 = vpop.f32.mrf.mxu0  ;;  %v130_v45 = vpop.f32.mrf.mxu1  ;;  %v163_v46 = vpack.c.bf16 %v138_v40, %v138_v40  ;;  %v167_v47 = vpack.c.bf16 %v470_v41, %v470_v41  ;;  %v236_v25 = vmul.f32 %v138_v40, %v138_v40  ;;  %v206_v28 = vsel %vm186_vm2, %v138_v40, 0.0 }
  0x9b   :  { %v156_v48 = vpack.c.bf16 %v120_v44, %v120_v44  ;;  %v192_v49 = vsel %vm186_vm2, %v120_v44, 0.0  ;;  %v229_v50 = vmul.f32 %v120_v44, %v120_v44  ;;  %v160_v51 = vpack.c.bf16 %v130_v45, %v130_v45 }
  0x9c   :  { %v193_v53 = vadd.f32 %v192_v49, %v191_v43  ;;  %180 = vst.msk [vmem:[%s547_s2 + $0x28] sm:$0xf] %vm169_vm1, %v163_v46  ;;  %v233_v2 = vmul.f32 %v130_v45, %v130_v45  ;;  %v200_v10 = vsel %vm186_vm2, %v130_v45, 0.0  ;;  %v261_v33 = vsel %vm186_vm2, %v236_v25, 0.0 }
  0x9d   :  { %173 = vst.msk [vmem:[%s547_s2 + $0xc] sm:$0xf] %vm169_vm1, %v156_v48  ;;  %v247_v56 = vsel %vm186_vm2, %v229_v50, 0.0  ;;  %v212_v43 = vsel %vm186_vm2, %v442_v22, 0.0  ;;  %v240_v44 = vmul.f32 %v470_v41, %v470_v41  ;;  %v214_v14 = vsel %vm186_vm2, %v470_v41, 0.0 }
  0x9e   :  { %v195_v57 = vadd.f32 %v194_v54, %v193_v53  ;;  %v248_v58 = vadd.f32 %v247_v56, %v246_v52  ;;  %177 = vst.msk [vmem:[%s547_s2 + $0x1c] sm:$0xf] %vm169_vm1, %v160_v51  ;;  %v255_v18 = vsel %vm186_vm2, %v233_v2, 0.0 }
  0x9f   :  { %184 = vst.msk [vmem:[%s547_s2 + $0x38] sm:$0xf] %vm169_vm1, %v167_v47  ;;  %v267_v47 = vsel %vm186_vm2, %v239_v37, 0.0  ;;  %v269_v51 = vsel %vm186_vm2, %v240_v44, 0.0 }
  0xa0   :  { %v250_v62 = vadd.f32 %v249_v59, %v248_v58  ;;  %v197_v63 = vadd.f32 %v196_v60, %v195_v57 }
  0xa1   :  { %v140_v3 = vpop.f32.mrf.mxu2  ;;  %v150_v4 = vpop.f32.mrf.mxu3 }
  0xa2   :  { %v199_v5 = vadd.f32 %v198_v1, %v197_v63  ;;  %v252_v6 = vadd.f32 %v251_v0, %v250_v62  ;;  %v164_v7 = vpack.c.bf16 %v140_v3, %v140_v3  ;;  %v168_v11 = vpack.c.bf16 %v150_v4, %v150_v4 }
  0xa3   :  { %v237_v29 = vmul.f32 %v140_v3, %v140_v3  ;;  %v208_v34 = vsel %vm186_vm2, %v140_v3, 0.0  ;;  %v241_v48 = vmul.f32 %v150_v4, %v150_v4  ;;  %v216_v52 = vsel %vm186_vm2, %v150_v4, 0.0 }
  0xa4   :  { %v201_v12 = vadd.f32 %v200_v10, %v199_v5  ;;  %v254_v15 = vadd.f32 %v253_v9, %v252_v6  ;;  %181 = vst.msk [vmem:[%s547_s2 + $0x2c] sm:$0xf] %vm169_vm1, %v164_v7 }
  0xa5   :  { %185 = vst.msk [vmem:[%s547_s2 + $0x3c] sm:$0xf] %vm169_vm1, %v168_v11  ;;  %v263_v38 = vsel %vm186_vm2, %v237_v29, 0.0  ;;  %v271_v22 = vsel %vm186_vm2, %v241_v48, 0.0 }
  0xa6   :  { %v203_v19 = vadd.f32 %v202_v16, %v201_v12  ;;  %v256_v20 = vadd.f32 %v255_v18, %v254_v15 }
  0xa8   :  { %v258_v26 = vadd.f32 %v257_v23, %v256_v20  ;;  %v205_v13 = vadd.f32 %v204_v24, %v203_v19 }
  0xaa   :  { %v207_v30 = vadd.f32 %v206_v28, %v205_v13  ;;  %v260_v31 = vadd.f32 %v259_v27, %v258_v26 }
  0xac   :  { %v262_v35 = vadd.f32 %v261_v33, %v260_v31  ;;  %v209_v36 = vadd.f32 %v208_v34, %v207_v30 }
  0xae   :  { %v211_v39 = vadd.f32 %v210_v21, %v209_v36  ;;  %v264_v40 = vadd.f32 %v263_v38, %v262_v35 }
  0xb0   :  { %v266_v45 = vadd.f32 %v265_v42, %v264_v40  ;;  %v213_v46 = vadd.f32 %v212_v43, %v211_v39 }
  0xb2   :  { %v215_v49 = vadd.f32 %v214_v14, %v213_v46  ;;  %v268_v50 = vadd.f32 %v267_v47, %v266_v45 }
  0xb4   :  { %v270_v53 = vadd.f32 %v269_v51, %v268_v50  ;;  %v217_v54 = vadd.f32 %v216_v52, %v215_v49 }
  0xb6   :  { %v218_v55 = vrot.slane %v217_v54, 4  ;;  %v272_v56 = vadd.f32 %v271_v22, %v270_v53 }
  0xb8   :  { %v219_v57 = vadd.f32 %v218_v55, %v217_v54  ;;  %v273_v58 = vrot.slane %v272_v56, 4 }
  0xba   :  { %v220_v59 = vrot.slane %v219_v57, 2  ;;  %v274_v60 = vadd.f32 %v273_v58, %v272_v56 }
  0xbc   :  { %v221_v61 = vadd.f32 %v220_v59, %v219_v57  ;;  %v275_v62 = vrot.slane %v274_v60, 2 }
  0xbe   :  { %v222_v41 = vrot.slane %v221_v61, 1  ;;  %v276_v63 = vadd.f32 %v275_v62, %v274_v60 }
  0xc0   :  { %v223_v0 = vadd.f32 %v222_v41, %v221_v61  ;;  %v277_v1 = vrot.slane %v276_v63, 1 }
  0xc2   :  { %225 = vst.msk [vmem:[%s548_s3] sm:$0x1] %vm224_vm3, %v223_v0  ;;  %v278_v2 = vadd.f32 %v277_v1, %v276_v63 }
  0xc4   :  { %279 = vst.msk [vmem:[%s549_s4] sm:$0x1] %vm224_vm3, %v278_v2 }

// kernel: resnet_ae_forward.134
= control target key start
LH: loop header
LB: loop body
LE: loop exit
PB: predicated region body
PF: predicated region fallthrough
CT: control target
= control target key end

     0   :  { %s142_s0 = inlined_call_operand.vmem [shape: bf16[8,512], index: 0, kind: input, shape index: {}]   ;;  %s143_s1 = inlined_call_operand.vmem [shape: f32[1,512], index: 1, kind: input, shape index: {}]   ;;  %s144_s2 = inlined_call_operand.vmem [shape: f32[1,512], index: 2, kind: input, shape index: {}]   ;;  %s145_s3 = inlined_call_operand.vmem [shape: bf16[8,512], index: 3, kind: input, shape index: {}]   ;;  %s146_s4 = inlined_call_operand.vmem [shape: bf16[8,512], index: 4, kind: input, shape index: {}]   ;;  %s147_s5 = inlined_call_operand.vmem [shape: bf16[8,512], index: 5, kind: output, shape index: {}]  }
   0x1   :  { %v20_v0 = vld [vmem:[%s142_s0] sm:$0xff]  ;;  %v21_v9 = vld [vmem:[%s142_s0 + $0x8] sm:$0xff] }
   0x2   :  { %v26_v1 = vld [vmem:[%s143_s1] sm:$0xf]  ;;  %v22_v3 = vunpack.c.l.bf16 %v20_v0  ;;  %v23_v4 = vunpack.c.h.bf16 %v20_v0  ;;  %v55_v18 = vld [vmem:[%s145_s3 + $0x8] sm:$0xff]  ;;  %v24_v19 = vunpack.c.l.bf16 %v21_v9  ;;  %v25_v20 = vunpack.c.h.bf16 %v21_v9 }
   0x3   :  { %v40_v2 = vld [vmem:[%s144_s2] sm:$0xf]  ;;  %v28_v5 = vperm.slane %v26_v1, 0  ;;  %v29_v6 = vperm.slane %v26_v1, 1  ;;  %v30_v21 = vperm.slane %v26_v1, 2  ;;  %v31_v22 = vperm.slane %v26_v1, 3 }
   0x4   :  { %v54_v7 = vld [vmem:[%s145_s3] sm:$0xff]  ;;  %v42_v10 = vperm.slane %v40_v2, 0  ;;  %v43_v11 = vperm.slane %v40_v2, 1  ;;  %v44_v25 = vperm.slane %v40_v2, 2  ;;  %v45_v26 = vperm.slane %v40_v2, 3  ;;  %v65_v27 = vld [vmem:[%s146_s4 + $0x8] sm:$0xff] }
   0x5   :  { %v64_v8 = vld [vmem:[%s146_s4] sm:$0xff]  ;;  %v56_v12 = vunpack.c.l.bf16 %v54_v7  ;;  %v57_v13 = vunpack.c.h.bf16 %v54_v7  ;;  %v36_v14 = vmul.f32 %v28_v5, %v22_v3  ;;  %v37_v15 = vmul.f32 %v29_v6, %v23_v4 }
   0x6   :  { %v66_v16 = vunpack.c.l.bf16 %v64_v8  ;;  %v67_v17 = vunpack.c.h.bf16 %v64_v8  ;;  %v38_v28 = vmul.f32 %v30_v21, %v24_v19  ;;  %v39_v29 = vmul.f32 %v31_v22, %v25_v20 }
   0x7   :  { %v50_v23 = vadd.f32 %v42_v10, %v36_v14  ;;  %v51_v24 = vadd.f32 %v43_v11, %v37_v15  ;;  %v58_v30 = vunpack.c.l.bf16 %v55_v18  ;;  %v59_v31 = vunpack.c.h.bf16 %v55_v18 }
   0x8   :  { %v52_v34 = vadd.f32 %v44_v25, %v38_v28  ;;  %v53_v35 = vadd.f32 %v45_v26, %v39_v29  ;;  %v68_v36 = vunpack.c.l.bf16 %v65_v27  ;;  %v69_v37 = vunpack.c.h.bf16 %v65_v27 }
   0x9   :  { %v60_v32 = vadd.f32 %v56_v12, %v50_v23  ;;  %v61_v33 = vadd.f32 %v57_v13, %v51_v24 }
   0xa   :  { %v62_v40 = vadd.f32 %v58_v30, %v52_v34  ;;  %v63_v41 = vadd.f32 %v59_v31, %v53_v35 }
   0xb   :  { %v70_v38 = vadd.f32 %v66_v16, %v60_v32  ;;  %v71_v39 = vadd.f32 %v67_v17, %v61_v33 }
   0xc   :  { %v72_v43 = vadd.f32 %v68_v36, %v62_v40  ;;  %v73_v44 = vadd.f32 %v69_v37, %v63_v41 }
   0xd   :  { %v74_v42 = vpack.c.bf16 %v71_v39, %v70_v38 }
   0xe   :  { %v75_v45 = vpack.c.bf16 %v73_v44, %v72_v43 }
   0xf   :  { %76 = vst [vmem:[%s147_s5] sm:$0xff] %v74_v42 }
  0x10   :  { %77 = vst [vmem:[%s147_s5 + $0x8] sm:$0xff] %v75_v45 }

// kernel: resnet_ae_forward.135
= control target key start
LH: loop header
LB: loop body
LE: loop exit
PB: predicated region body
PF: predicated region fallthrough
CT: control target
= control target key end

     0   :  { %vm376_vm0 = vcmask 1043456   ;;  %vm279_vm1 = vcmask 588800   ;;  %vm613_vm2 = vcmask 93184   ;;  %s1398_s1 = inlined_call_operand.vmem [shape: bf16[72,12], index: 1, kind: input, shape index: {}]   ;;  %s1399_s2 = inlined_call_operand.vmem [shape: f32[1,12], index: 2, kind: input, shape index: {}]   ;;  %s1400_s0 = inlined_call_operand.vmem [shape: bf16[512,72], index: 0, kind: input, shape index: {}]   ;;  %s1401_s3 = inlined_call_operand.vmem [shape: bf16[512,12], index: 3, kind: output, shape index: {}]  }
   0x1   :  { %v87_v0 = vld [vmem:[%s1398_s1 + $0x20] sm:$0xf]  ;;  %v893_v4 = vld [vmem:[%s1398_s1 + $0x18] sm:$0xff]  ;;  %v892_v5 = vld [vmem:[%s1398_s1 + $0x10] sm:$0xff] }
   0x2   :  { %v269_v1 = vunpack.c.l.b16 %v87_v0  ;;  %v891_v6 = vld [vmem:[%s1398_s1 + $0x8] sm:$0xff]  ;;  %v890_v7 = vld [vmem:[%s1398_s1] sm:$0xff]  ;;  %v860_v16 = vld [vmem:[%s1400_s0 + $0x10] sm:$0xff] }
   0x3   :  { %v858_v8 = vld [vmem:[%s1400_s0] sm:$0xff]  ;;  %v859_v12 = vld [vmem:[%s1400_s0 + $0x8] sm:$0xff]  ;;  %v868_v17 = vld [vmem:[%s1400_s0 + $0x50] sm:$0xff] }
   0x4   :  { %v274_v2 = vpack.c.b16 %v269_v1, %v269_v1  ;;  %v866_v9 = vld [vmem:[%s1400_s0 + $0x40] sm:$0xff]  ;;  %v867_v13 = vld [vmem:[%s1400_s0 + $0x48] sm:$0xff]  ;;  %v876_v18 = vld [vmem:[%s1400_s0 + $0x90] sm:$0xff] }
   0x5   :  { %v874_v10 = vld [vmem:[%s1400_s0 + $0x80] sm:$0xff]  ;;  %v875_v14 = vld [vmem:[%s1400_s0 + $0x88] sm:$0xff]  ;;  %v884_v19 = vld [vmem:[%s1400_s0 + $0xd0] sm:$0xff] }
   0x6   :  { %v378_v3 = vsel %vm376_vm0, %v274_v2, 0  ;;  %v882_v11 = vld [vmem:[%s1400_s0 + $0xc0] sm:$0xff]  ;;  %v883_v15 = vld [vmem:[%s1400_s0 + $0xc8] sm:$0xff]  ;;  %v861_v20 = vld [vmem:[%s1400_s0 + $0x18] sm:$0xff] }
   0x7   :  { %383 = vmatpush.bf16.msra.mxu0 %v378_v3  ;;  %894 = vmatpush.bf16.msra.mxu1 %v378_v3  ;;  %v869_v21 = vld [vmem:[%s1400_s0 + $0x58] sm:$0xff]  ;;  %v862_v24 = vld [vmem:[%s1400_s0 + $0x20] sm:$0xff]  ;;  %v863_v28 = vld [vmem:[%s1400_s0 + $0x28] sm:$0xff] }
   0x8   :  { %895 = vmatpush.bf16.msra.mxu2 %v378_v3  ;;  %896 = vmatpush.bf16.msra.mxu3 %v378_v3  ;;  %v877_v22 = vld [vmem:[%s1400_s0 + $0x98] sm:$0xff]  ;;  %v870_v25 = vld [vmem:[%s1400_s0 + $0x60] sm:$0xff]  ;;  %v871_v29 = vld [vmem:[%s1400_s0 + $0x68] sm:$0xff] }
   0x9   :  { %v885_v23 = vld [vmem:[%s1400_s0 + $0xd8] sm:$0xff]  ;;  %v878_v26 = vld [vmem:[%s1400_s0 + $0xa0] sm:$0xff]  ;;  %v879_v30 = vld [vmem:[%s1400_s0 + $0xa8] sm:$0xff] }
   0xa   :  { %v886_v27 = vld [vmem:[%s1400_s0 + $0xe0] sm:$0xff]  ;;  %v887_v31 = vld [vmem:[%s1400_s0 + $0xe8] sm:$0xff]  ;;  %v864_v32 = vld [vmem:[%s1400_s0 + $0x30] sm:$0xff] }
   0xb   :  { %384 = vmatpush.bf16.msra.mxu0 %v893_v4  ;;  %897 = vmatpush.bf16.msra.mxu1 %v893_v4  ;;  %v872_v33 = vld [vmem:[%s1400_s0 + $0x70] sm:$0xff]  ;;  %v865_v36 = vld [vmem:[%s1400_s0 + $0x38] sm:$0xff]  ;;  %v1076_v40 = vld [vmem:[%s1399_s2] ss:$0 sm:$0xff] }
   0xc   :  { %898 = vmatpush.bf16.msra.mxu2 %v893_v4  ;;  %899 = vmatpush.bf16.msra.mxu3 %v893_v4  ;;  %v880_v34 = vld [vmem:[%s1400_s0 + $0xb0] sm:$0xff]  ;;  %v873_v37 = vld [vmem:[%s1400_s0 + $0x78] sm:$0xff] }
   0xd   :  { %v888_v35 = vld [vmem:[%s1400_s0 + $0xf0] sm:$0xff]  ;;  %v881_v38 = vld [vmem:[%s1400_s0 + $0xb8] sm:$0xff] }
   0xe   :  { %v889_v39 = vld [vmem:[%s1400_s0 + $0xf8] sm:$0xff] }
   0xf   :  { %385 = vmatpush.bf16.msra.mxu0 %v892_v5  ;;  %900 = vmatpush.bf16.msra.mxu1 %v892_v5 }
  0x10   :  { %901 = vmatpush.bf16.msra.mxu2 %v892_v5  ;;  %902 = vmatpush.bf16.msra.mxu3 %v892_v5 }
  0x13   :  { %386 = vmatpush.bf16.msra.mxu0 %v891_v6  ;;  %903 = vmatpush.bf16.msra.mxu1 %v891_v6 }
  0x14   :  { %904 = vmatpush.bf16.msra.mxu2 %v891_v6  ;;  %905 = vmatpush.bf16.msra.mxu3 %v891_v6 }
  0x17   :  { %387 = vmatpush.bf16.msra.mxu0 %v890_v7  ;;  %906 = vmatpush.bf16.msra.mxu1 %v890_v7 }
  0x18   :  { %907 = vmatpush.bf16.msra.mxu2 %v890_v7  ;;  %908 = vmatpush.bf16.msra.mxu3 %v890_v7 }
  0x1a   :  { %826 = vmatmul.msk.bf16.vlgmr.msra.gmra.mxu0 %vm279_vm1, %v858_v8  ;;  %834 = vmatmul.msk.bf16.vlgmr.msra.gmra.mxu1 %vm279_vm1, %v866_v9 }
  0x1b   :  { %842 = vmatmul.msk.bf16.vlgmr.msra.gmra.mxu2 %vm279_vm1, %v874_v10  ;;  %850 = vmatmul.msk.bf16.vlgmr.msra.gmra.mxu3 %vm279_vm1, %v882_v11 }
  0x2a   :  { %827 = vmatmul.msk.bf16.gmra.mxu0 %vm279_vm1, %v859_v12  ;;  %835 = vmatmul.msk.bf16.gmra.mxu1 %vm279_vm1, %v867_v13 }
  0x2b   :  { %843 = vmatmul.msk.bf16.gmra.mxu2 %vm279_vm1, %v875_v14  ;;  %851 = vmatmul.msk.bf16.gmra.mxu3 %vm279_vm1, %v883_v15 }
  0x3a   :  { %828 = vmatmul.msk.bf16.gmra.mxu0 %vm279_vm1, %v860_v16  ;;  %836 = vmatmul.msk.bf16.gmra.mxu1 %vm279_vm1, %v868_v17 }
  0x3b   :  { %844 = vmatmul.msk.bf16.gmra.mxu2 %vm279_vm1, %v876_v18  ;;  %852 = vmatmul.msk.bf16.gmra.mxu3 %vm279_vm1, %v884_v19 }
  0x4a   :  { %829 = vmatmul.msk.bf16.gmra.mxu0 %vm279_vm1, %v861_v20  ;;  %837 = vmatmul.msk.bf16.gmra.mxu1 %vm279_vm1, %v869_v21 }
  0x4b   :  { %845 = vmatmul.msk.bf16.gmra.mxu2 %vm279_vm1, %v877_v22  ;;  %853 = vmatmul.msk.bf16.gmra.mxu3 %vm279_vm1, %v885_v23 }
  0x5a   :  { %830 = vmatmul.msk.bf16.gmra.mxu0 %vm279_vm1, %v862_v24  ;;  %838 = vmatmul.msk.bf16.gmra.mxu1 %vm279_vm1, %v870_v25 }
  0x5b   :  { %846 = vmatmul.msk.bf16.gmra.mxu2 %vm279_vm1, %v878_v26  ;;  %854 = vmatmul.msk.bf16.gmra.mxu3 %vm279_vm1, %v886_v27 }
  0x6a   :  { %831 = vmatmul.msk.bf16.gmra.mxu0 %vm279_vm1, %v863_v28  ;;  %839 = vmatmul.msk.bf16.gmra.mxu1 %vm279_vm1, %v871_v29 }
  0x6b   :  { %847 = vmatmul.msk.bf16.gmra.mxu2 %vm279_vm1, %v879_v30  ;;  %855 = vmatmul.msk.bf16.gmra.mxu3 %vm279_vm1, %v887_v31 }
  0x7a   :  { %832 = vmatmul.msk.bf16.gmra.mxu0 %vm279_vm1, %v864_v32  ;;  %840 = vmatmul.msk.bf16.gmra.mxu1 %vm279_vm1, %v872_v33 }
  0x7b   :  { %848 = vmatmul.msk.bf16.gmra.mxu2 %vm279_vm1, %v880_v34  ;;  %856 = vmatmul.msk.bf16.gmra.mxu3 %vm279_vm1, %v888_v35 }
  0x8a   :  { %833 = vmatmul.msk.bf16.gmra.mxu0 %vm279_vm1, %v865_v36  ;;  %841 = vmatmul.msk.bf16.gmra.mxu1 %vm279_vm1, %v873_v37 }
  0x8b   :  { %849 = vmatmul.msk.bf16.gmra.mxu2 %vm279_vm1, %v881_v38  ;;  %857 = vmatmul.msk.bf16.gmra.mxu3 %vm279_vm1, %v889_v39 }
  0x97   :  { %v389_v41 = vpop.f32.mrf.mxu0  ;;  %v429_v42 = vpop.f32.mrf.mxu1 }
  0x98   :  { %v390_v43 = vadd.f32 %v1076_v40, %v389_v41  ;;  %v430_v44 = vadd.f32 %v1076_v40, %v429_v42 }
  0x9a   :  { %v549_v45 = vpack.c.bf16 %v390_v43, %v390_v43  ;;  %v565_v46 = vpack.c.bf16 %v430_v44, %v430_v44 }
  0x9c   :  { %614 = vst.msk [vmem:[%s1401_s3] sm:$0xf] %vm613_vm2, %v549_v45 }
  0x9d   :  { %630 = vst.msk [vmem:[%s1401_s3 + $0x40] sm:$0xf] %vm613_vm2, %v565_v46 }
  0x9e   :  { %v469_v47 = vpop.f32.mrf.mxu2  ;;  %v509_v48 = vpop.f32.mrf.mxu3 }
  0x9f   :  { %v470_v49 = vadd.f32 %v1076_v40, %v469_v47  ;;  %v510_v50 = vadd.f32 %v1076_v40, %v509_v48  ;;  %v391_v51 = vpop.f32.mrf.mxu0  ;;  %v431_v52 = vpop.f32.mrf.mxu1 }
  0xa0   :  { %v392_v53 = vadd.f32 %v1076_v40, %v391_v51  ;;  %v432_v54 = vadd.f32 %v1076_v40, %v431_v52 }
  0xa1   :  { %v581_v55 = vpack.c.bf16 %v470_v49, %v470_v49  ;;  %v597_v56 = vpack.c.bf16 %v510_v50, %v510_v50 }
  0xa2   :  { %v550_v57 = vpack.c.bf16 %v392_v53, %v392_v53  ;;  %v566_v58 = vpack.c.bf16 %v432_v54, %v432_v54 }
  0xa3   :  { %646 = vst.msk [vmem:[%s1401_s3 + $0x80] sm:$0xf] %vm613_vm2, %v581_v55 }
  0xa4   :  { %662 = vst.msk [vmem:[%s1401_s3 + $0xc0] sm:$0xf] %vm613_vm2, %v597_v56 }
  0xa5   :  { %615 = vst.msk [vmem:[%s1401_s3 + $0x4] sm:$0xf] %vm613_vm2, %v550_v57 }
  0xa6   :  { %631 = vst.msk [vmem:[%s1401_s3 + $0x44] sm:$0xf] %vm613_vm2, %v566_v58  ;;  %v471_v59 = vpop.f32.mrf.mxu2  ;;  %v511_v60 = vpop.f32.mrf.mxu3 }
  0xa7   :  { %v472_v61 = vadd.f32 %v1076_v40, %v471_v59  ;;  %v512_v62 = vadd.f32 %v1076_v40, %v511_v60  ;;  %v394_v63 = vpop.f32.mrf.mxu0  ;;  %v434_v0 = vpop.f32.mrf.mxu1 }
  0xa8   :  { %v395_v1 = vadd.f32 %v1076_v40, %v394_v63  ;;  %v435_v2 = vadd.f32 %v1076_v40, %v434_v0 }
  0xa9   :  { %v582_v3 = vpack.c.bf16 %v472_v61, %v472_v61  ;;  %v598_v4 = vpack.c.bf16 %v512_v62, %v512_v62 }
  0xaa   :  { %v551_v5 = vpack.c.bf16 %v395_v1, %v395_v1  ;;  %v567_v6 = vpack.c.bf16 %v435_v2, %v435_v2 }
  0xab   :  { %647 = vst.msk [vmem:[%s1401_s3 + $0x84] sm:$0xf] %vm613_vm2, %v582_v3 }
  0xac   :  { %663 = vst.msk [vmem:[%s1401_s3 + $0xc4] sm:$0xf] %vm613_vm2, %v598_v4 }
  0xad   :  { %616 = vst.msk [vmem:[%s1401_s3 + $0x8] sm:$0xf] %vm613_vm2, %v551_v5 }
  0xae   :  { %632 = vst.msk [vmem:[%s1401_s3 + $0x48] sm:$0xf] %vm613_vm2, %v567_v6  ;;  %v474_v7 = vpop.f32.mrf.mxu2  ;;  %v514_v8 = vpop.f32.mrf.mxu3 }
  0xaf   :  { %v475_v9 = vadd.f32 %v1076_v40, %v474_v7  ;;  %v515_v10 = vadd.f32 %v1076_v40, %v514_v8  ;;  %v396_v11 = vpop.f32.mrf.mxu0  ;;  %v436_v12 = vpop.f32.mrf.mxu1 }
  0xb0   :  { %v397_v13 = vadd.f32 %v1076_v40, %v396_v11  ;;  %v437_v14 = vadd.f32 %v1076_v40, %v436_v12 }
  0xb1   :  { %v583_v15 = vpack.c.bf16 %v475_v9, %v475_v9  ;;  %v599_v16 = vpack.c.bf16 %v515_v10, %v515_v10 }
  0xb2   :  { %v552_v17 = vpack.c.bf16 %v397_v13, %v397_v13  ;;  %v568_v18 = vpack.c.bf16 %v437_v14, %v437_v14 }
  0xb3   :  { %648 = vst.msk [vmem:[%s1401_s3 + $0x88] sm:$0xf] %vm613_vm2, %v583_v15 }
  0xb4   :  { %664 = vst.msk [vmem:[%s1401_s3 + $0xc8] sm:$0xf] %vm613_vm2, %v599_v16 }
  0xb5   :  { %617 = vst.msk [vmem:[%s1401_s3 + $0xc] sm:$0xf] %vm613_vm2, %v552_v17 }
  0xb6   :  { %633 = vst.msk [vmem:[%s1401_s3 + $0x4c] sm:$0xf] %vm613_vm2, %v568_v18  ;;  %v476_v19 = vpop.f32.mrf.mxu2  ;;  %v516_v20 = vpop.f32.mrf.mxu3 }
  0xb7   :  { %v477_v21 = vadd.f32 %v1076_v40, %v476_v19  ;;  %v517_v22 = vadd.f32 %v1076_v40, %v516_v20  ;;  %v399_v23 = vpop.f32.mrf.mxu0  ;;  %v439_v24 = vpop.f32.mrf.mxu1 }
  0xb8   :  { %v400_v25 = vadd.f32 %v1076_v40, %v399_v23  ;;  %v440_v26 = vadd.f32 %v1076_v40, %v439_v24 }
  0xb9   :  { %v584_v27 = vpack.c.bf16 %v477_v21, %v477_v21  ;;  %v600_v28 = vpack.c.bf16 %v517_v22, %v517_v22 }
  0xba   :  { %v553_v29 = vpack.c.bf16 %v400_v25, %v400_v25  ;;  %v569_v30 = vpack.c.bf16 %v440_v26, %v440_v26 }
  0xbb   :  { %649 = vst.msk [vmem:[%s1401_s3 + $0x8c] sm:$0xf] %vm613_vm2, %v584_v27 }
  0xbc   :  { %665 = vst.msk [vmem:[%s1401_s3 + $0xcc] sm:$0xf] %vm613_vm2, %v600_v28 }
  0xbd   :  { %618 = vst.msk [vmem:[%s1401_s3 + $0x10] sm:$0xf] %vm613_vm2, %v553_v29 }
  0xbe   :  { %634 = vst.msk [vmem:[%s1401_s3 + $0x50] sm:$0xf] %vm613_vm2, %v569_v30  ;;  %v479_v31 = vpop.f32.mrf.mxu2  ;;  %v519_v32 = vpop.f32.mrf.mxu3 }
  0xbf   :  { %v480_v33 = vadd.f32 %v1076_v40, %v479_v31  ;;  %v520_v34 = vadd.f32 %v1076_v40, %v519_v32  ;;  %v401_v35 = vpop.f32.mrf.mxu0  ;;  %v441_v36 = vpop.f32.mrf.mxu1 }
  0xc0   :  { %v402_v37 = vadd.f32 %v1076_v40, %v401_v35  ;;  %v442_v38 = vadd.f32 %v1076_v40, %v441_v36 }
  0xc1   :  { %v585_v39 = vpack.c.bf16 %v480_v33, %v480_v33  ;;  %v601_v41 = vpack.c.bf16 %v520_v34, %v520_v34 }
  0xc2   :  { %v554_v42 = vpack.c.bf16 %v402_v37, %v402_v37  ;;  %v570_v43 = vpack.c.bf16 %v442_v38, %v442_v38 }
  0xc3   :  { %650 = vst.msk [vmem:[%s1401_s3 + $0x90] sm:$0xf] %vm613_vm2, %v585_v39 }
  0xc4   :  { %666 = vst.msk [vmem:[%s1401_s3 + $0xd0] sm:$0xf] %vm613_vm2, %v601_v41 }
  0xc5   :  { %619 = vst.msk [vmem:[%s1401_s3 + $0x14] sm:$0xf] %vm613_vm2, %v554_v42 }
  0xc6   :  { %635 = vst.msk [vmem:[%s1401_s3 + $0x54] sm:$0xf] %vm613_vm2, %v570_v43  ;;  %v481_v44 = vpop.f32.mrf.mxu2  ;;  %v521_v45 = vpop.f32.mrf.mxu3 }
  0xc7   :  { %v482_v46 = vadd.f32 %v1076_v40, %v481_v44  ;;  %v522_v47 = vadd.f32 %v1076_v40, %v521_v45  ;;  %v404_v48 = vpop.f32.mrf.mxu0  ;;  %v444_v49 = vpop.f32.mrf.mxu1 }
  0xc8   :  { %v405_v50 = vadd.f32 %v1076_v40, %v404_v48  ;;  %v445_v51 = vadd.f32 %v1076_v40, %v444_v49 }
  0xc9   :  { %v586_v52 = vpack.c.bf16 %v482_v46, %v482_v46  ;;  %v602_v53 = vpack.c.bf16 %v522_v47, %v522_v47 }
  0xca   :  { %v555_v54 = vpack.c.bf16 %v405_v50, %v405_v50  ;;  %v571_v55 = vpack.c.bf16 %v445_v51, %v445_v51 }
  0xcb   :  { %651 = vst.msk [vmem:[%s1401_s3 + $0x94] sm:$0xf] %vm613_vm2, %v586_v52 }
  0xcc   :  { %667 = vst.msk [vmem:[%s1401_s3 + $0xd4] sm:$0xf] %vm613_vm2, %v602_v53 }
  0xcd   :  { %620 = vst.msk [vmem:[%s1401_s3 + $0x18] sm:$0xf] %vm613_vm2, %v555_v54 }
  0xce   :  { %636 = vst.msk [vmem:[%s1401_s3 + $0x58] sm:$0xf] %vm613_vm2, %v571_v55  ;;  %v484_v56 = vpop.f32.mrf.mxu2  ;;  %v524_v57 = vpop.f32.mrf.mxu3 }
  0xcf   :  { %v485_v58 = vadd.f32 %v1076_v40, %v484_v56  ;;  %v525_v59 = vadd.f32 %v1076_v40, %v524_v57  ;;  %v406_v60 = vpop.f32.mrf.mxu0  ;;  %v446_v61 = vpop.f32.mrf.mxu1 }
  0xd0   :  { %v407_v62 = vadd.f32 %v1076_v40, %v406_v60  ;;  %v447_v63 = vadd.f32 %v1076_v40, %v446_v61 }
  0xd1   :  { %v587_v0 = vpack.c.bf16 %v485_v58, %v485_v58  ;;  %v603_v1 = vpack.c.bf16 %v525_v59, %v525_v59 }
  0xd2   :  { %v556_v2 = vpack.c.bf16 %v407_v62, %v407_v62  ;;  %v572_v3 = vpack.c.bf16 %v447_v63, %v447_v63 }
  0xd3   :  { %652 = vst.msk [vmem:[%s1401_s3 + $0x98] sm:$0xf] %vm613_vm2, %v587_v0 }
  0xd4   :  { %668 = vst.msk [vmem:[%s1401_s3 + $0xd8] sm:$0xf] %vm613_vm2, %v603_v1 }
  0xd5   :  { %621 = vst.msk [vmem:[%s1401_s3 + $0x1c] sm:$0xf] %vm613_vm2, %v556_v2 }
  0xd6   :  { %637 = vst.msk [vmem:[%s1401_s3 + $0x5c] sm:$0xf] %vm613_vm2, %v572_v3  ;;  %v486_v4 = vpop.f32.mrf.mxu2  ;;  %v526_v5 = vpop.f32.mrf.mxu3 }
  0xd7   :  { %v487_v6 = vadd.f32 %v1076_v40, %v486_v4  ;;  %v527_v7 = vadd.f32 %v1076_v40, %v526_v5  ;;  %v409_v8 = vpop.f32.mrf.mxu0  ;;  %v449_v9 = vpop.f32.mrf.mxu1 }
  0xd8   :  { %v410_v10 = vadd.f32 %v1076_v40, %v409_v8  ;;  %v450_v11 = vadd.f32 %v1076_v40, %v449_v9 }
  0xd9   :  { %v588_v12 = vpack.c.bf16 %v487_v6, %v487_v6  ;;  %v604_v13 = vpack.c.bf16 %v527_v7, %v527_v7 }
  0xda   :  { %v557_v14 = vpack.c.bf16 %v410_v10, %v410_v10  ;;  %v573_v15 = vpack.c.bf16 %v450_v11, %v450_v11 }
  0xdb   :  { %653 = vst.msk [vmem:[%s1401_s3 + $0x9c] sm:$0xf] %vm613_vm2, %v588_v12 }
  0xdc   :  { %669 = vst.msk [vmem:[%s1401_s3 + $0xdc] sm:$0xf] %vm613_vm2, %v604_v13 }
  0xdd   :  { %622 = vst.msk [vmem:[%s1401_s3 + $0x20] sm:$0xf] %vm613_vm2, %v557_v14 }
  0xde   :  { %638 = vst.msk [vmem:[%s1401_s3 + $0x60] sm:$0xf] %vm613_vm2, %v573_v15  ;;  %v489_v16 = vpop.f32.mrf.mxu2  ;;  %v529_v17 = vpop.f32.mrf.mxu3 }
  0xdf   :  { %v490_v18 = vadd.f32 %v1076_v40, %v489_v16  ;;  %v530_v19 = vadd.f32 %v1076_v40, %v529_v17  ;;  %v411_v20 = vpop.f32.mrf.mxu0  ;;  %v451_v21 = vpop.f32.mrf.mxu1 }
  0xe0   :  { %v412_v22 = vadd.f32 %v1076_v40, %v411_v20  ;;  %v452_v23 = vadd.f32 %v1076_v40, %v451_v21 }
  0xe1   :  { %v589_v24 = vpack.c.bf16 %v490_v18, %v490_v18  ;;  %v605_v25 = vpack.c.bf16 %v530_v19, %v530_v19 }
  0xe2   :  { %v558_v26 = vpack.c.bf16 %v412_v22, %v412_v22  ;;  %v574_v27 = vpack.c.bf16 %v452_v23, %v452_v23 }
  0xe3   :  { %654 = vst.msk [vmem:[%s1401_s3 + $0xa0] sm:$0xf] %vm613_vm2, %v589_v24 }
  0xe4   :  { %670 = vst.msk [vmem:[%s1401_s3 + $0xe0] sm:$0xf] %vm613_vm2, %v605_v25 }
  0xe5   :  { %623 = vst.msk [vmem:[%s1401_s3 + $0x24] sm:$0xf] %vm613_vm2, %v558_v26 }
  0xe6   :  { %639 = vst.msk [vmem:[%s1401_s3 + $0x64] sm:$0xf] %vm613_vm2, %v574_v27  ;;  %v491_v28 = vpop.f32.mrf.mxu2  ;;  %v531_v29 = vpop.f32.mrf.mxu3 }
  0xe7   :  { %v492_v30 = vadd.f32 %v1076_v40, %v491_v28  ;;  %v532_v31 = vadd.f32 %v1076_v40, %v531_v29  ;;  %v414_v32 = vpop.f32.mrf.mxu0  ;;  %v454_v33 = vpop.f32.mrf.mxu1 }
  0xe8   :  { %v415_v34 = vadd.f32 %v1076_v40, %v414_v32  ;;  %v455_v35 = vadd.f32 %v1076_v40, %v454_v33 }
  0xe9   :  { %v590_v36 = vpack.c.bf16 %v492_v30, %v492_v30  ;;  %v606_v37 = vpack.c.bf16 %v532_v31, %v532_v31 }
  0xea   :  { %v559_v38 = vpack.c.bf16 %v415_v34, %v415_v34  ;;  %v575_v39 = vpack.c.bf16 %v455_v35, %v455_v35 }
  0xeb   :  { %655 = vst.msk [vmem:[%s1401_s3 + $0xa4] sm:$0xf] %vm613_vm2, %v590_v36 }
  0xec   :  { %671 = vst.msk [vmem:[%s1401_s3 + $0xe4] sm:$0xf] %vm613_vm2, %v606_v37 }
  0xed   :  { %624 = vst.msk [vmem:[%s1401_s3 + $0x28] sm:$0xf] %vm613_vm2, %v559_v38 }
  0xee   :  { %640 = vst.msk [vmem:[%s1401_s3 + $0x68] sm:$0xf] %vm613_vm2, %v575_v39  ;;  %v494_v41 = vpop.f32.mrf.mxu2  ;;  %v534_v42 = vpop.f32.mrf.mxu3 }
  0xef   :  { %v495_v43 = vadd.f32 %v1076_v40, %v494_v41  ;;  %v535_v44 = vadd.f32 %v1076_v40, %v534_v42  ;;  %v416_v45 = vpop.f32.mrf.mxu0  ;;  %v456_v46 = vpop.f32.mrf.mxu1 }
  0xf0   :  { %v417_v47 = vadd.f32 %v1076_v40, %v416_v45  ;;  %v457_v48 = vadd.f32 %v1076_v40, %v456_v46 }
  0xf1   :  { %v591_v49 = vpack.c.bf16 %v495_v43, %v495_v43  ;;  %v607_v50 = vpack.c.bf16 %v535_v44, %v535_v44 }
  0xf2   :  { %v560_v51 = vpack.c.bf16 %v417_v47, %v417_v47  ;;  %v576_v52 = vpack.c.bf16 %v457_v48, %v457_v48 }
  0xf3   :  { %656 = vst.msk [vmem:[%s1401_s3 + $0xa8] sm:$0xf] %vm613_vm2, %v591_v49 }
  0xf4   :  { %672 = vst.msk [vmem:[%s1401_s3 + $0xe8] sm:$0xf] %vm613_vm2, %v607_v50 }
  0xf5   :  { %625 = vst.msk [vmem:[%s1401_s3 + $0x2c] sm:$0xf] %vm613_vm2, %v560_v51 }
  0xf6   :  { %641 = vst.msk [vmem:[%s1401_s3 + $0x6c] sm:$0xf] %vm613_vm2, %v576_v52  ;;  %v496_v53 = vpop.f32.mrf.mxu2  ;;  %v536_v54 = vpop.f32.mrf.mxu3 }
  0xf7   :  { %v497_v55 = vadd.f32 %v1076_v40, %v496_v53  ;;  %v537_v56 = vadd.f32 %v1076_v40, %v536_v54  ;;  %v419_v57 = vpop.f32.mrf.mxu0  ;;  %v459_v58 = vpop.f32.mrf.mxu1 }
  0xf8   :  { %v420_v59 = vadd.f32 %v1076_v40, %v419_v57  ;;  %v460_v60 = vadd.f32 %v1076_v40, %v459_v58 }
  0xf9   :  { %v592_v61 = vpack.c.bf16 %v497_v55, %v497_v55  ;;  %v608_v62 = vpack.c.bf16 %v537_v56, %v537_v56 }
  0xfa   :  { %v561_v63 = vpack.c.bf16 %v420_v59, %v420_v59  ;;  %v577_v0 = vpack.c.bf16 %v460_v60, %v460_v60 }
  0xfb   :  { %657 = vst.msk [vmem:[%s1401_s3 + $0xac] sm:$0xf] %vm613_vm2, %v592_v61 }
  0xfc   :  { %673 = vst.msk [vmem:[%s1401_s3 + $0xec] sm:$0xf] %vm613_vm2, %v608_v62 }
  0xfd   :  { %626 = vst.msk [vmem:[%s1401_s3 + $0x30] sm:$0xf] %vm613_vm2, %v561_v63 }
  0xfe   :  { %642 = vst.msk [vmem:[%s1401_s3 + $0x70] sm:$0xf] %vm613_vm2, %v577_v0  ;;  %v499_v1 = vpop.f32.mrf.mxu2  ;;  %v539_v2 = vpop.f32.mrf.mxu3 }
  0xff   :  { %v500_v3 = vadd.f32 %v1076_v40, %v499_v1  ;;  %v540_v4 = vadd.f32 %v1076_v40, %v539_v2  ;;  %v421_v5 = vpop.f32.mrf.mxu0  ;;  %v461_v6 = vpop.f32.mrf.mxu1 }
 0x100   :  { %v422_v7 = vadd.f32 %v1076_v40, %v421_v5  ;;  %v462_v8 = vadd.f32 %v1076_v40, %v461_v6 }
 0x101   :  { %v593_v9 = vpack.c.bf16 %v500_v3, %v500_v3  ;;  %v609_v10 = vpack.c.bf16 %v540_v4, %v540_v4 }
 0x102   :  { %v562_v11 = vpack.c.bf16 %v422_v7, %v422_v7  ;;  %v578_v12 = vpack.c.bf16 %v462_v8, %v462_v8 }
 0x103   :  { %658 = vst.msk [vmem:[%s1401_s3 + $0xb0] sm:$0xf] %vm613_vm2, %v593_v9 }
 0x104   :  { %674 = vst.msk [vmem:[%s1401_s3 + $0xf0] sm:$0xf] %vm613_vm2, %v609_v10 }
 0x105   :  { %627 = vst.msk [vmem:[%s1401_s3 + $0x34] sm:$0xf] %vm613_vm2, %v562_v11 }
 0x106   :  { %643 = vst.msk [vmem:[%s1401_s3 + $0x74] sm:$0xf] %vm613_vm2, %v578_v12  ;;  %v501_v13 = vpop.f32.mrf.mxu2  ;;  %v541_v14 = vpop.f32.mrf.mxu3 }
 0x107   :  { %v502_v15 = vadd.f32 %v1076_v40, %v501_v13  ;;  %v542_v16 = vadd.f32 %v1076_v40, %v541_v14  ;;  %v424_v17 = vpop.f32.mrf.mxu0  ;;  %v464_v18 = vpop.f32.mrf.mxu1 }
 0x108   :  { %v425_v19 = vadd.f32 %v1076_v40, %v424_v17  ;;  %v465_v20 = vadd.f32 %v1076_v40, %v464_v18 }
 0x109   :  { %v594_v21 = vpack.c.bf16 %v502_v15, %v502_v15  ;;  %v610_v22 = vpack.c.bf16 %v542_v16, %v542_v16 }
 0x10a   :  { %v563_v23 = vpack.c.bf16 %v425_v19, %v425_v19  ;;  %v579_v24 = vpack.c.bf16 %v465_v20, %v465_v20 }
 0x10b   :  { %659 = vst.msk [vmem:[%s1401_s3 + $0xb4] sm:$0xf] %vm613_vm2, %v594_v21 }
 0x10c   :  { %675 = vst.msk [vmem:[%s1401_s3 + $0xf4] sm:$0xf] %vm613_vm2, %v610_v22 }
 0x10d   :  { %628 = vst.msk [vmem:[%s1401_s3 + $0x38] sm:$0xf] %vm613_vm2, %v563_v23 }
 0x10e   :  { %644 = vst.msk [vmem:[%s1401_s3 + $0x78] sm:$0xf] %vm613_vm2, %v579_v24  ;;  %v504_v25 = vpop.f32.mrf.mxu2  ;;  %v544_v26 = vpop.f32.mrf.mxu3 }
 0x10f   :  { %v505_v27 = vadd.f32 %v1076_v40, %v504_v25  ;;  %v545_v28 = vadd.f32 %v1076_v40, %v544_v26  ;;  %v426_v29 = vpop.f32.mrf.mxu0  ;;  %v466_v30 = vpop.f32.mrf.mxu1 }
 0x110   :  { %v427_v31 = vadd.f32 %v1076_v40, %v426_v29  ;;  %v467_v32 = vadd.f32 %v1076_v40, %v466_v30 }
 0x111   :  { %v595_v33 = vpack.c.bf16 %v505_v27, %v505_v27  ;;  %v611_v34 = vpack.c.bf16 %v545_v28, %v545_v28 }
 0x112   :  { %v564_v35 = vpack.c.bf16 %v427_v31, %v427_v31  ;;  %v580_v36 = vpack.c.bf16 %v467_v32, %v467_v32 }
 0x113   :  { %660 = vst.msk [vmem:[%s1401_s3 + $0xb8] sm:$0xf] %vm613_vm2, %v595_v33 }
 0x114   :  { %676 = vst.msk [vmem:[%s1401_s3 + $0xf8] sm:$0xf] %vm613_vm2, %v611_v34 }
 0x115   :  { %629 = vst.msk [vmem:[%s1401_s3 + $0x3c] sm:$0xf] %vm613_vm2, %v564_v35 }
 0x116   :  { %645 = vst.msk [vmem:[%s1401_s3 + $0x7c] sm:$0xf] %vm613_vm2, %v580_v36  ;;  %v506_v37 = vpop.f32.mrf.mxu2  ;;  %v546_v38 = vpop.f32.mrf.mxu3 }
 0x117   :  { %v507_v39 = vadd.f32 %v1076_v40, %v506_v37  ;;  %v547_v41 = vadd.f32 %v1076_v40, %v546_v38 }
 0x119   :  { %v596_v42 = vpack.c.bf16 %v507_v39, %v507_v39  ;;  %v612_v43 = vpack.c.bf16 %v547_v41, %v547_v41 }
 0x11b   :  { %661 = vst.msk [vmem:[%s1401_s3 + $0xbc] sm:$0xf] %vm613_vm2, %v596_v42 }
 0x11c   :  { %677 = vst.msk [vmem:[%s1401_s3 + $0xfc] sm:$0xf] %vm613_vm2, %v612_v43 }

</bundles_post_ra>
